<compile_context>
chip_gen: v7x
topology: tpu7x:2x2x1
jax: 0.10.0
libtpu: 0.0.40
codegen_flags: <defaults>
</compile_context>

<pallas_src>
import functools
import math

import jax
import jax.numpy as jnp
from jax import lax
from jax.experimental import pallas as pl
from jax.experimental.pallas import tpu as pltpu


_VMEM_LIMIT = 32 * 1024 * 1024          # explicit scoped-VMEM limit per kernel
_APPROX_SOFTMAX_RECIP = True            # EUP vrcp for softmax denominators
                                        # (tiny relative error vs. reference)


# ----------------------------- tiling helpers ------------------------------

def _tile(dim, targets=(256, 128)):
    """Largest target tile that evenly divides `dim`, else the full dim."""
    for t in targets:
        if dim > t and dim % t == 0:
            return t
    return dim


def _pick_head_block(H, hd):
    """Head-group size so the attention output block is lane-dense."""
    for hb in (8, 4, 2, 1):
        if H % hb == 0 and (hb * hd) % 128 == 0:
            return hb
    return H


def _cost(flops, bytes_accessed, transcendentals=0):
    return pl.CostEstimate(flops=int(flops),
                           transcendentals=int(transcendentals),
                           bytes_accessed=int(bytes_accessed))


# ----------------------------- Pallas kernels ------------------------------

def _rmsnorm_to_scratch(x_ref, nw_ref, xn_ref, eps):
    """RMSNorm of the (tm, D) block into bf16 scratch (full D resident)."""
    x = x_ref[...].astype(jnp.float32)
    ms = jnp.mean(x * x, axis=-1, keepdims=True)
    xn_ref[...] = ((x * lax.rsqrt(ms + eps)) * nw_ref[...]).astype(xn_ref.dtype)


def _norm_qkv_kernel(x_ref, nw_ref, wq_ref, wk_ref, wv_ref,
                     q_ref, k_ref, v_ref, xn_ref, *, eps):
    # norm is computed once per row tile (j == 0), reused across all N tiles
    @pl.when(pl.program_id(1) == 0)
    def _():
        _rmsnorm_to_scratch(x_ref, nw_ref, xn_ref, eps)
    xn = xn_ref[...]
    q_ref[...] = jnp.dot(xn, wq_ref[...],
                         preferred_element_type=jnp.float32).astype(q_ref.dtype)
    k_ref[...] = jnp.dot(xn, wk_ref[...],
                         preferred_element_type=jnp.float32).astype(k_ref.dtype)
    v_ref[...] = jnp.dot(xn, wv_ref[...],
                         preferred_element_type=jnp.float32).astype(v_ref.dtype)


def pallas_norm_qkv(x, norm_w, wq, wk, wv, eps):
    M, D = x.shape
    assert wq.shape == (D, D)  # RMSNorm needs the full D resident in one block
    N = D
    tm, tn = _tile(M), _tile(N)
    w_spec = pl.BlockSpec((D, tn), lambda i, j: (0, j))
    o_spec = pl.BlockSpec((tm, tn), lambda i, j: (i, j))
    out = jax.ShapeDtypeStruct((M, N), jnp.bfloat16)
    return pl.pallas_call(
        functools.partial(_norm_qkv_kernel, eps=eps),
        out_shape=(out, out, out),
        grid=(M // tm, N // tn),
        in_specs=[pl.BlockSpec((tm, D), lambda i, j: (i, 0)),
                  pl.BlockSpec((1, D), lambda i, j: (0, 0)),
                  w_spec, w_spec, w_spec],
        out_specs=(o_spec, o_spec, o_spec),
        scratch_shapes=[pltpu.VMEM((tm, D), jnp.bfloat16)],
        compiler_params=pltpu.CompilerParams(
            dimension_semantics=("parallel", "arbitrary"),
            vmem_limit_bytes=_VMEM_LIMIT),
        cost_estimate=_cost(6 * M * D * N,
                            4 * M * D + 6 * D * N + 6 * M * N,
                            transcendentals=M),
    )(x, norm_w.reshape(1, D), wq, wk, wv)


def _norm_swiglu_kernel(x_ref, nw_ref, w1_ref, w3_ref, o_ref, xn_ref, *, eps):
    @pl.when(pl.program_id(1) == 0)
    def _():
        _rmsnorm_to_scratch(x_ref, nw_ref, xn_ref, eps)
    xn = xn_ref[...]
    a = jnp.dot(xn, w1_ref[...], preferred_element_type=jnp.float32)
    b = jnp.dot(xn, w3_ref[...], preferred_element_type=jnp.float32)
    o_ref[...] = (a * jax.nn.sigmoid(a) * b).astype(o_ref.dtype)


def pallas_norm_swiglu(x, norm_w, w1, w3, eps):
    M, D = x.shape
    Hff = w1.shape[1]
    tm, tn = _tile(M), _tile(Hff)
    return pl.pallas_call(
        functools.partial(_norm_swiglu_kernel, eps=eps),
        out_shape=jax.ShapeDtypeStruct((M, Hff), jnp.bfloat16),
        grid=(M // tm, Hff // tn),
        in_specs=[pl.BlockSpec((tm, D), lambda i, j: (i, 0)),
                  pl.BlockSpec((1, D), lambda i, j: (0, 0)),
                  pl.BlockSpec((D, tn), lambda i, j: (0, j)),
                  pl.BlockSpec((D, tn), lambda i, j: (0, j))],
        out_specs=pl.BlockSpec((tm, tn), lambda i, j: (i, j)),
        scratch_shapes=[pltpu.VMEM((tm, D), jnp.bfloat16)],
        compiler_params=pltpu.CompilerParams(
            dimension_semantics=("parallel", "arbitrary"),
            vmem_limit_bytes=_VMEM_LIMIT),
        cost_estimate=_cost(4 * M * D * Hff + 3 * M * Hff,
                            4 * M * D + 4 * D * Hff + 2 * M * Hff,
                            transcendentals=M * Hff + M),
    )(x, norm_w.reshape(1, D), w1, w3)


def _norm_matmul_kernel(x_ref, nw_ref, w_ref, o_ref, xn_ref, *, eps):
    @pl.when(pl.program_id(1) == 0)
    def _():
        _rmsnorm_to_scratch(x_ref, nw_ref, xn_ref, eps)
    o_ref[...] = jnp.dot(xn_ref[...], w_ref[...],
                         preferred_element_type=jnp.float32).astype(o_ref.dtype)


def pallas_norm_matmul(x, norm_w, w, eps, out_dtype=jnp.float32):
    """RMSNorm(x) @ W (used for the lm head)."""
    M, D = x.shape
    N = w.shape[1]
    tm, tn = _tile(M), _tile(N)
    return pl.pallas_call(
        functools.partial(_norm_matmul_kernel, eps=eps),
        out_shape=jax.ShapeDtypeStruct((M, N), out_dtype),
        grid=(M // tm, N // tn),
        in_specs=[pl.BlockSpec((tm, D), lambda i, j: (i, 0)),
                  pl.BlockSpec((1, D), lambda i, j: (0, 0)),
                  pl.BlockSpec((D, tn), lambda i, j: (0, j))],
        out_specs=pl.BlockSpec((tm, tn), lambda i, j: (i, j)),
        scratch_shapes=[pltpu.VMEM((tm, D), jnp.bfloat16)],
        compiler_params=pltpu.CompilerParams(
            dimension_semantics=("parallel", "arbitrary"),
            vmem_limit_bytes=_VMEM_LIMIT),
        cost_estimate=_cost(2 * M * D * N,
                            4 * M * D + 2 * D * N + 4 * M * N,
                            transcendentals=M),
    )(x, norm_w.reshape(1, D), w)


def _matmul_residual_kernel(x_ref, w_ref, r_ref, o_ref, acc_ref):
    """K-tiled matmul, f32 VMEM accumulator, residual added at the last step."""
    @pl.when(pl.program_id(2) == 0)
    def _():
        acc_ref[...] = jnp.zeros_like(acc_ref)

    acc_ref[...] += jnp.dot(x_ref[...].astype(w_ref.dtype), w_ref[...],
                            preferred_element_type=jnp.float32)

    @pl.when(pl.program_id(2) == pl.num_programs(2) - 1)
    def _():
        o_ref[...] = (acc_ref[...] + r_ref[...].astype(jnp.float32)
                      ).astype(o_ref.dtype)


def pallas_matmul_residual(x, w, res):
    """res + x @ w   (wo / w2 projections).  Residual stream kept in f32."""
    M, K = x.shape
    K2, N = w.shape
    assert K == K2 and res.shape == (M, N)
    tm = _tile(M)
    tn = _tile(N, (512, 256, 128))
    tk = _tile(K, (512, 256, 128))
    return pl.pallas_call(
        _matmul_residual_kernel,
        out_shape=jax.ShapeDtypeStruct((M, N), jnp.float32),
        grid=(M // tm, N // tn, K // tk),
        in_specs=[pl.BlockSpec((tm, tk), lambda i, j, k: (i, k)),
                  pl.BlockSpec((tk, tn), lambda i, j, k: (k, j)),
                  pl.BlockSpec((tm, tn), lambda i, j, k: (i, j))],
        out_specs=pl.BlockSpec((tm, tn), lambda i, j, k: (i, j)),
        scratch_shapes=[pltpu.VMEM((tm, tn), jnp.float32)],
        compiler_params=pltpu.CompilerParams(
            dimension_semantics=("parallel", "parallel", "arbitrary"),
            vmem_limit_bytes=_VMEM_LIMIT),
        cost_estimate=_cost(2 * M * K * N,
                            2 * M * K + 2 * K * N + 8 * M * N),
    )(x, w, res)


def _prefix_kv_kernel(p_ref, wk_ref, wv_ref, pk_ref, pv_ref):
    """Per-layer prefix K/V projection (batched over layers via the grid)."""
    p = p_ref[0].astype(wk_ref.dtype)                      # (P, D) bf16
    pk_ref[0] = jnp.dot(p, wk_ref[0],
                        preferred_element_type=jnp.float32).astype(pk_ref.dtype)
    pv_ref[0] = jnp.dot(p, wv_ref[0],
                        preferred_element_type=jnp.float32).astype(pv_ref.dtype)


def pallas_prefix_kv(prefix, wk_all, wv_all):
    """prefix (L,P,D) @ wk/wv (L,D,D) -> (L,P,D) each; one call for all layers."""
    L, P, D = prefix.shape
    w_spec = pl.BlockSpec((1, D, D), lambda l: (l, 0, 0))
    o_spec = pl.BlockSpec((1, P, D), lambda l: (l, 0, 0))
    out = jax.ShapeDtypeStruct((L, P, D), jnp.bfloat16)
    return pl.pallas_call(
        _prefix_kv_kernel,
        out_shape=(out, out),
        grid=(L,),
        in_specs=[pl.BlockSpec((1, P, D), lambda l: (l, 0, 0)), w_spec, w_spec],
        out_specs=(o_spec, o_spec),
        compiler_params=pltpu.CompilerParams(
            dimension_semantics=("parallel",),
            vmem_limit_bytes=_VMEM_LIMIT),
        cost_estimate=_cost(4 * L * P * D * D,
                            4 * L * P * D + 4 * L * D * D + 4 * L * P * D),
    )(prefix, wk_all, wv_all)


def _flash_attn_kernel(q_ref, k_ref, v_ref, pk_ref, pv_ref, g_ref, o_ref,
                       m_sc, l_sc, acc_sc, *, scale):
    """Flash-style causal attention + prefix (adapter) attention, gated.

    Layout: q/k/v blocks are (1, t, hb, hd) in (B,S,H,hd) order; the output
    block is the lane-dense (1, tq, hb*hd) slab consumed by the wo matmul.
    """
    qi = pl.program_id(2)
    ki = pl.program_id(3)
    nk = pl.num_programs(3)
    tq = q_ref.shape[1]
    tk = k_ref.shape[1]

    @pl.when(ki == 0)
    def _():
        m_sc[...] = jnp.full(m_sc.shape, -jnp.inf, m_sc.dtype)
        l_sc[...] = jnp.zeros(l_sc.shape, l_sc.dtype)
        acc_sc[...] = jnp.zeros(acc_sc.shape, acc_sc.dtype)

    # skip KV tiles that lie entirely above the causal diagonal
    @pl.when(ki * tk <= qi * tq + (tq - 1))
    def _():
        q = jnp.transpose(q_ref[0], (1, 0, 2))             # (hb, tq, hd)
        k = jnp.transpose(k_ref[0], (1, 0, 2))             # (hb, tk, hd)
        v = jnp.transpose(v_ref[0], (1, 0, 2))

        s = jnp.einsum('hqd,hkd->hqk', q, k,
                       preferred_element_type=jnp.float32) * scale
        qpos = qi * tq + lax.broadcasted_iota(jnp.int32, (tq, tk), 0)
        kpos = ki * tk + lax.broadcasted_iota(jnp.int32, (tq, tk), 1)
        s = jnp.where((qpos >= kpos)[None, :, :], s, -jnp.inf)

        m_prev = m_sc[...]
        m_new = jnp.maximum(m_prev, s.max(axis=-1, keepdims=True))
        alpha = jnp.exp(m_prev - m_new)
        p = jnp.exp(s - m_new)
        l_sc[...] = alpha * l_sc[...] + p.sum(axis=-1, keepdims=True)
        acc_sc[...] = alpha * acc_sc[...] + jnp.einsum(
            'hqk,hkd->hqd', p.astype(v.dtype), v,
            preferred_element_type=jnp.float32)
        m_sc[...] = m_new

    @pl.when(ki == nk - 1)
    def _():
        q = jnp.transpose(q_ref[0], (1, 0, 2))             # (hb, tq, hd)
        pk = jnp.transpose(pk_ref[...], (1, 0, 2))         # (hb, P, hd)
        pv = jnp.transpose(pv_ref[...], (1, 0, 2))

        # prefix attention: no causal mask, no rotary on prefix keys
        sp = jnp.einsum('hqd,hpd->hqp', q, pk,
                        preferred_element_type=jnp.float32) * scale
        pp = jnp.exp(sp - sp.max(axis=-1, keepdims=True))
        inv_lp = pl.reciprocal(pp.sum(axis=-1, keepdims=True),
                               approx=_APPROX_SOFTMAX_RECIP)
        pdelta = jnp.einsum('hqp,hpd->hqd', pp.astype(pv.dtype), pv,
                            preferred_element_type=jnp.float32) * inv_lp

        inv_l = pl.reciprocal(l_sc[...], approx=_APPROX_SOFTMAX_RECIP)
        out = acc_sc[...] * inv_l + g_ref[...][:, None, :] * pdelta  # (hb,tq,hd)

        hb = out.shape[0]
        out_rows = jnp.concatenate([out[h] for h in range(hb)], axis=-1)
        o_ref[0] = out_rows.astype(o_ref.dtype)            # lane-dense (tq, hb*hd)


def pallas_flash_prefix_attention(q, k, v, pk, pv, gate, scale):
    """q/k/v: (B,S,H,hd); pk/pv: (P,H,hd) (shared across batch); gate: (H,hd)."""
    B, S, H, hd = q.shape
    P = pk.shape[0]
    hb = _pick_head_block(H, hd)
    G = H // hb
    tq = _tile(S, (256, 128))
    tk = _tile(S, (512, 256, 128))
    return pl.pallas_call(
        functools.partial(_flash_attn_kernel, scale=scale),
        out_shape=jax.ShapeDtypeStruct((B, S, H * hd), jnp.bfloat16),
        grid=(B, G, S // tq, S // tk),
        in_specs=[
            pl.BlockSpec((1, tq, hb, hd), lambda b, g, i, j: (b, i, g, 0)),
            pl.BlockSpec((1, tk, hb, hd), lambda b, g, i, j: (b, j, g, 0)),
            pl.BlockSpec((1, tk, hb, hd), lambda b, g, i, j: (b, j, g, 0)),
            pl.BlockSpec((P, hb, hd), lambda b, g, i, j: (0, g, 0)),
            pl.BlockSpec((P, hb, hd), lambda b, g, i, j: (0, g, 0)),
            pl.BlockSpec((hb, hd), lambda b, g, i, j: (g, 0)),
        ],
        out_specs=pl.BlockSpec((1, tq, hb * hd), lambda b, g, i, j: (b, i, g)),
        scratch_shapes=[pltpu.VMEM((hb, tq, 1), jnp.float32),
                        pltpu.VMEM((hb, tq, 1), jnp.float32),
                        pltpu.VMEM((hb, tq, hd), jnp.float32)],
        compiler_params=pltpu.CompilerParams(
            dimension_semantics=("parallel", "parallel", "parallel", "arbitrary"),
            vmem_limit_bytes=_VMEM_LIMIT),
        cost_estimate=_cost(4 * B * H * S * hd * (S + P),
                            2 * (3 * B * S * H * hd + 2 * P * H * hd
                                 + B * S * H * hd),
                            transcendentals=B * H * S * (S + P)),
    )(q, k, v, pk, pv, gate)


# ------------------------------- JAX glue ----------------------------------

def ffn_hidden_dim(dim, multiple_of):
    hidden = 4 * dim
    hidden = int(2 * hidden / 3)
    return multiple_of * ((hidden + multiple_of - 1) // multiple_of)


def precompute_rope(head_dim, end, theta=10000.0):
    freqs = 1.0 / (theta ** (
        jnp.arange(0, head_dim, 2, dtype=jnp.float32)[: head_dim // 2] / head_dim))
    t = jnp.arange(end, dtype=jnp.float32)
    ang = jnp.outer(t, freqs)
    return jnp.cos(ang), jnp.sin(ang)


def apply_rotary(x, cos, sin):
    """Interleaved even/odd rotary (matches view_as_complex semantics); f32 math."""
    x = x.astype(jnp.float32)
    xr = x[..., 0::2]
    xi = x[..., 1::2]
    c = cos[None, :, None, :]
    s = sin[None, :, None, :]
    out_r = xr * c - xi * s
    out_i = xr * s + xi * c
    return jnp.stack([out_r, out_i], axis=-1).reshape(x.shape)


def transformer_block_forward(h, lp, cos, sin, pk, pv, gate, cfg):
    B, S, D = h.shape
    H = cfg['n_heads']
    hd = D // H
    scale = 1.0 / math.sqrt(hd)
    eps = cfg['norm_eps']

    hf = h.reshape(B * S, D)

    # --- attention sub-block: h = h + wo(attn(attention_norm(h))) ---
    q, k, v = pallas_norm_qkv(hf, lp['attn_norm'],
                              lp['wq'], lp['wk'], lp['wv'], eps)   # bf16
    q = q.reshape(B, S, H, hd)
    k = k.reshape(B, S, H, hd)
    v = v.reshape(B, S, H, hd)
    q = apply_rotary(q, cos, sin).astype(jnp.bfloat16)
    k = apply_rotary(k, cos, sin).astype(jnp.bfloat16)

    attn = pallas_flash_prefix_attention(q, k, v, pk, pv, gate, scale)  # (B,S,D)
    h = pallas_matmul_residual(attn.reshape(B * S, D), lp['wo'], hf
                               ).reshape(B, S, D)

    # --- feed-forward sub-block: h = h + w2(silu(w1(n)) * w3(n)) ---
    hf2 = h.reshape(B * S, D)
    gated = pallas_norm_swiglu(hf2, lp['ffn_norm'], lp['w1'], lp['w3'], eps)
    h = pallas_matmul_residual(gated, lp['w2'], hf2).reshape(B, S, D)
    return h


def transformer_forward(params, tokens, cfg):
    B, S = tokens.shape
    D, V, L = cfg['dim'], cfg['vocab_size'], cfg['n_layers']
    H = cfg['n_heads']
    hd = D // H
    P = cfg['prefix_len']

    h = jnp.take(params['tok_emb'], tokens, axis=0)           # embedding (glue)
    cos_f, sin_f = precompute_rope(hd, cfg['max_seq_len'] * 2, cfg['theta'])
    cos, sin = cos_f[:S], sin_f[:S]

    # prefix K/V is token-independent and identical across the batch:
    # project once for ALL layers in one batched kernel call.
    pk_all, pv_all = pallas_prefix_kv(params['prefix'][:, 0],
                                      params['wk'], params['wv'])
    gates = jnp.tanh(params['prefix_gate']).astype(jnp.float32)  # (L, H)

    # prefix_layers defaults to n_layers -> every layer gets a prefix
    for li in range(L):
        lp = {name: params[name][li] for name in
              ('attn_norm', 'ffn_norm', 'wq', 'wk', 'wv', 'wo', 'w1', 'w3', 'w2')}
        pk = pk_all[li].reshape(P, H, hd)
        pv = pv_all[li].reshape(P, H, hd)
        gate = jnp.broadcast_to(gates[li][:, None], (H, hd))
        h = transformer_block_forward(h, lp, cos, sin, pk, pv, gate, cfg)

    # fused final RMSNorm + lm head
    logits = pallas_norm_matmul(h.reshape(B * S, D), params['norm_w'],
                                params['out_w'], cfg['norm_eps'],
                                out_dtype=jnp.float32)
    return logits.reshape(B, S, V)


# ------------------------------ parameters ---------------------------------

def make_config():
    # small but lane-dense: hd = 128, D = 512, Hff = 1408, V = 256
    return dict(dim=512, n_layers=2, n_heads=4, vocab_size=256,
                multiple_of=128, norm_eps=1e-5, prefix_len=8,
                max_seq_len=16, theta=10000.0)


def init_params(key, cfg):
    D, H = cfg['dim'], cfg['n_heads']
    V, L, P = cfg['vocab_size'], cfg['n_layers'], cfg['prefix_len']
    Hff = ffn_hidden_dim(D, cfg['multiple_of'])

    def linear(k, fan_in, fan_out, dtype=jnp.bfloat16):
        # kaiming_uniform(a=sqrt(5)) == U(-1/sqrt(fan_in), 1/sqrt(fan_in))
        bound = 1.0 / math.sqrt(fan_in)
        w = jax.random.uniform(k, (fan_in, fan_out), jnp.float32, -bound, bound)
        return w.astype(dtype)

    def stack_linear(k, fan_in, fan_out):
        ks = jax.random.split(k, L)
        return jnp.stack([linear(ks[i], fan_in, fan_out) for i in range(L)])

    keys = jax.random.split(key, 12)
    return dict(
        tok_emb=0.02 * jax.random.normal(keys[0], (V, D), jnp.float32),
        attn_norm=jnp.ones((L, D), jnp.float32),
        ffn_norm=jnp.ones((L, D), jnp.float32),
        wq=stack_linear(keys[1], D, D),
        wk=stack_linear(keys[2], D, D),
        wv=stack_linear(keys[3], D, D),
        wo=stack_linear(keys[4], D, D),
        w1=stack_linear(keys[5], D, Hff),
        w3=stack_linear(keys[6], D, Hff),
        w2=stack_linear(keys[7], Hff, D),
        norm_w=jnp.ones((D,), jnp.float32),
        out_w=linear(keys[8], D, V),
        prefix=jax.random.normal(keys[9], (L, 1, P, D), jnp.float32),
        # reference inits prefix_gate to zeros; use small values so the
        # prefix-attention path is numerically exercised.
        prefix_gate=0.1 * jax.random.normal(keys[10], (L, H), jnp.float32),
    )


if __name__ == "__main__":
    cfg = make_config()
    key = jax.random.PRNGKey(0)
    pkey, tkey = jax.random.split(key)
    params = init_params(pkey, cfg)

    B, S = 2, 8
    tokens = jax.random.randint(tkey, (B, S), 0, cfg['vocab_size'],
                                dtype=jnp.int32)

    fwd = jax.jit(functools.partial(transformer_forward, cfg=cfg))
    logits = fwd(params, tokens)
    jax.block_until_ready(logits)

    assert logits.shape == (B, S, cfg['vocab_size'])
    assert bool(jnp.all(jnp.isfinite(logits)))
    print("KERNEL_OK")
</pallas_src>

<mosaic_0001>
module attributes {stable_mosaic.version = 11 : i64} {
  func.func @_norm_qkv_kernel(%arg0: i32, %arg1: i32, %arg2: memref<16x512xf32, #tpu.memory_space<vmem>>, %arg3: memref<1x512xf32, #tpu.memory_space<vmem>>, %arg4: memref<512x256xbf16, #tpu.memory_space<vmem>>, %arg5: memref<512x256xbf16, #tpu.memory_space<vmem>>, %arg6: memref<512x256xbf16, #tpu.memory_space<vmem>>, %arg7: memref<16x256xbf16, #tpu.memory_space<vmem>>, %arg8: memref<16x256xbf16, #tpu.memory_space<vmem>>, %arg9: memref<16x256xbf16, #tpu.memory_space<vmem>>, %arg10: memref<16x512xbf16, #tpu.memory_space<vmem>>) attributes {dimension_semantics = [#tpu.dimension_semantics<parallel>, #tpu.dimension_semantics<arbitrary>], iteration_bounds = array<i64: 1, 2>, scalar_prefetch = 0 : i64, scratch_operands = 1 : i64, tpu.core_type = #tpu.core_type<tc>, window_params = [{transform_indices = @transform_0, window_bounds = array<i64: 16, 512>}, {pipeline_mode = #tpu.pipeline_mode<synchronous>, transform_indices = @transform_1, window_bounds = array<i64: 1, 512>}, {transform_indices = @transform_2, window_bounds = array<i64: 512, 256>}, {transform_indices = @transform_3, window_bounds = array<i64: 512, 256>}, {transform_indices = @transform_4, window_bounds = array<i64: 512, 256>}, {transform_indices = @transform_5, window_bounds = array<i64: 16, 256>}, {transform_indices = @transform_6, window_bounds = array<i64: 16, 256>}, {transform_indices = @transform_7, window_bounds = array<i64: 16, 256>}]} {
    %c0_i32 = arith.constant 0 : i32
    %0 = arith.cmpi eq, %arg1, %c0_i32 : i32
    %1 = arith.extui %0 : i1 to i32
    %c0_i32_0 = arith.constant 0 : i32
    %2 = arith.cmpi ne, %1, %c0_i32_0 : i32
    scf.if %2 {
      %c0_16 = arith.constant 0 : index
      %c0_17 = arith.constant 0 : index
      %16 = vector.load %arg2[%c0_16, %c0_17] : memref<16x512xf32, #tpu.memory_space<vmem>>, vector<16x512xf32>
      %17 = arith.mulf %16, %16 : vector<16x512xf32>
      %cst_18 = arith.constant dense<0.000000e+00> : vector<16xf32>
      %18 = vector.multi_reduction <add>, %17, %cst_18 [1] : vector<16x512xf32> to vector<16xf32>
      %19 = vector.shape_cast %18 : vector<16xf32> to vector<16x1xf32>
      %cst_19 = arith.constant 5.120000e+02 : f32
      %20 = vector.broadcast %cst_19 : f32 to vector<16x1xf32>
      %21 = arith.divf %19, %20 : vector<16x1xf32>
      %cst_20 = arith.constant 9.99999974E-6 : f32
      %22 = vector.broadcast %cst_20 : f32 to vector<16x1xf32>
      %23 = arith.addf %21, %22 : vector<16x1xf32>
      %24 = math.rsqrt %23 : vector<16x1xf32>
      %25 = vector.broadcast %24 : vector<16x1xf32> to vector<16x512xf32>
      %26 = arith.mulf %16, %25 : vector<16x512xf32>
      %c0_21 = arith.constant 0 : index
      %c0_22 = arith.constant 0 : index
      %27 = vector.load %arg3[%c0_21, %c0_22] : memref<1x512xf32, #tpu.memory_space<vmem>>, vector<1x512xf32>
      %28 = vector.broadcast %27 : vector<1x512xf32> to vector<16x512xf32>
      %29 = arith.mulf %26, %28 : vector<16x512xf32>
      %30 = arith.truncf %29 : vector<16x512xf32> to vector<16x512xbf16>
      %c0_23 = arith.constant 0 : index
      %c0_24 = arith.constant 0 : index
      %31 = vector.load %arg10[%c0_23, %c0_24] : memref<16x512xbf16, #tpu.memory_space<vmem>>, vector<16x512xbf16>
      tpu.vector_store %arg10[%c0_23, %c0_24], %30 {strides = array<i32>} : memref<16x512xbf16, #tpu.memory_space<vmem>>, vector<16x512xbf16>,
    } else {
    }
    %c0 = arith.constant 0 : index
    %c0_1 = arith.constant 0 : index
    %3 = vector.load %arg10[%c0, %c0_1] : memref<16x512xbf16, #tpu.memory_space<vmem>>, vector<16x512xbf16>
    %c0_2 = arith.constant 0 : index
    %c0_3 = arith.constant 0 : index
    %4 = vector.load %arg4[%c0_2, %c0_3] : memref<512x256xbf16, #tpu.memory_space<vmem>>, vector<512x256xbf16>
    %cst = arith.constant dense<0.000000e+00> : vector<16x256xf32>
    %5 = tpu.matmul %3, %4, %cst {dimension_numbers = #tpu.dot_dimension_numbers<[1], [0], [0], [1], [0, 0, 1, 1], [], []>} : vector<16x512xbf16>, vector<512x256xbf16>, vector<16x256xf32> -> vector<16x256xf32>
    %6 = arith.truncf %5 : vector<16x256xf32> to vector<16x256xbf16>
    %c0_4 = arith.constant 0 : index
    %c0_5 = arith.constant 0 : index
    %7 = vector.load %arg7[%c0_4, %c0_5] : memref<16x256xbf16, #tpu.memory_space<vmem>>, vector<16x256xbf16>
    tpu.vector_store %arg7[%c0_4, %c0_5], %6 {strides = array<i32>} : memref<16x256xbf16, #tpu.memory_space<vmem>>, vector<16x256xbf16>,
    %c0_6 = arith.constant 0 : index
    %c0_7 = arith.constant 0 : index
    %8 = vector.load %arg5[%c0_6, %c0_7] : memref<512x256xbf16, #tpu.memory_space<vmem>>, vector<512x256xbf16>
    %cst_8 = arith.constant dense<0.000000e+00> : vector<16x256xf32>
    %9 = tpu.matmul %3, %8, %cst_8 {dimension_numbers = #tpu.dot_dimension_numbers<[1], [0], [0], [1], [0, 0, 1, 1], [], []>} : vector<16x512xbf16>, vector<512x256xbf16>, vector<16x256xf32> -> vector<16x256xf32>
    %10 = arith.truncf %9 : vector<16x256xf32> to vector<16x256xbf16>
    %c0_9 = arith.constant 0 : index
    %c0_10 = arith.constant 0 : index
    %11 = vector.load %arg8[%c0_9, %c0_10] : memref<16x256xbf16, #tpu.memory_space<vmem>>, vector<16x256xbf16>
    tpu.vector_store %arg8[%c0_9, %c0_10], %10 {strides = array<i32>} : memref<16x256xbf16, #tpu.memory_space<vmem>>, vector<16x256xbf16>,
    %c0_11 = arith.constant 0 : index
    %c0_12 = arith.constant 0 : index
    %12 = vector.load %arg6[%c0_11, %c0_12] : memref<512x256xbf16, #tpu.memory_space<vmem>>, vector<512x256xbf16>
    %cst_13 = arith.constant dense<0.000000e+00> : vector<16x256xf32>
    %13 = tpu.matmul %3, %12, %cst_13 {dimension_numbers = #tpu.dot_dimension_numbers<[1], [0], [0], [1], [0, 0, 1, 1], [], []>} : vector<16x512xbf16>, vector<512x256xbf16>, vector<16x256xf32> -> vector<16x256xf32>
    %14 = arith.truncf %13 : vector<16x256xf32> to vector<16x256xbf16>
    %c0_14 = arith.constant 0 : index
    %c0_15 = arith.constant 0 : index
    %15 = vector.load %arg9[%c0_14, %c0_15] : memref<16x256xbf16, #tpu.memory_space<vmem>>, vector<16x256xbf16>
    tpu.vector_store %arg9[%c0_14, %c0_15], %14 {strides = array<i32>} : memref<16x256xbf16, #tpu.memory_space<vmem>>, vector<16x256xbf16>,
    return
  }
  func.func @transform_0(%arg0: i32, %arg1: i32) -> (i32, i32) {
    %c0_i32 = arith.constant 0 : i32
    %c0_i32_0 = arith.constant 0 : i32
    return %arg0, %c0_i32 : i32, i32
  }
  func.func @transform_1(%arg0: i32, %arg1: i32) -> (i32, i32) {
    %c0_i32 = arith.constant 0 : i32
    %c0_i32_0 = arith.constant 0 : i32
    %c0_i32_1 = arith.constant 0 : i32
    return %c0_i32, %c0_i32_0 : i32, i32
  }
  func.func @transform_2(%arg0: i32, %arg1: i32) -> (i32, i32) {
    %c0_i32 = arith.constant 0 : i32
    %c0_i32_0 = arith.constant 0 : i32
    return %c0_i32, %arg1 : i32, i32
  }
  func.func @transform_3(%arg0: i32, %arg1: i32) -> (i32, i32) {
    %c0_i32 = arith.constant 0 : i32
    %c0_i32_0 = arith.constant 0 : i32
    return %c0_i32, %arg1 : i32, i32
  }
  func.func @transform_4(%arg0: i32, %arg1: i32) -> (i32, i32) {
    %c0_i32 = arith.constant 0 : i32
    %c0_i32_0 = arith.constant 0 : i32
    return %c0_i32, %arg1 : i32, i32
  }
  func.func @transform_5(%arg0: i32, %arg1: i32) -> (i32, i32) {
    %c0_i32 = arith.constant 0 : i32
    return %arg0, %arg1 : i32, i32
  }
  func.func @transform_6(%arg0: i32, %arg1: i32) -> (i32, i32) {
    %c0_i32 = arith.constant 0 : i32
    return %arg0, %arg1 : i32, i32
  }
  func.func @transform_7(%arg0: i32, %arg1: i32) -> (i32, i32) {
    %c0_i32 = arith.constant 0 : i32
    return %arg0, %arg1 : i32, i32
  }
}

module attributes {stable_mosaic.version = 11 : i64} {
  func.func @_prefix_kv_kernel(%arg0: i32, %arg1: memref<1x8x512xf32, #tpu.memory_space<vmem>>, %arg2: memref<1x512x512xbf16, #tpu.memory_space<vmem>>, %arg3: memref<1x512x512xbf16, #tpu.memory_space<vmem>>, %arg4: memref<1x8x512xbf16, #tpu.memory_space<vmem>>, %arg5: memref<1x8x512xbf16, #tpu.memory_space<vmem>>) attributes {dimension_semantics = [#tpu.dimension_semantics<parallel>], iteration_bounds = array<i64: 2>, scalar_prefetch = 0 : i64, scratch_operands = 0 : i64, tpu.core_type = #tpu.core_type<tc>, window_params = [{transform_indices = @transform_0, window_bounds = array<i64: 1, 8, 512>}, {transform_indices = @transform_1, window_bounds = array<i64: 1, 512, 512>}, {transform_indices = @transform_2, window_bounds = array<i64: 1, 512, 512>}, {transform_indices = @transform_3, window_bounds = array<i64: 1, 8, 512>}, {transform_indices = @transform_4, window_bounds = array<i64: 1, 8, 512>}]} {
    %c0 = arith.constant 0 : index
    %c0_0 = arith.constant 0 : index
    %c0_1 = arith.constant 0 : index
    %0 = vector.load %arg1[%c0, %c0_0, %c0_1] : memref<1x8x512xf32, #tpu.memory_space<vmem>>, vector<1x8x512xf32>
    %1 = vector.shape_cast %0 : vector<1x8x512xf32> to vector<8x512xf32>
    %2 = arith.truncf %1 : vector<8x512xf32> to vector<8x512xbf16>
    %c0_2 = arith.constant 0 : index
    %c0_3 = arith.constant 0 : index
    %c0_4 = arith.constant 0 : index
    %3 = vector.load %arg2[%c0_2, %c0_3, %c0_4] : memref<1x512x512xbf16, #tpu.memory_space<vmem>>, vector<1x512x512xbf16>
    %4 = vector.shape_cast %3 : vector<1x512x512xbf16> to vector<512x512xbf16>
    %cst = arith.constant dense<0.000000e+00> : vector<8x512xf32>
    %5 = tpu.matmul %2, %4, %cst {dimension_numbers = #tpu.dot_dimension_numbers<[1], [0], [0], [1], [0, 0, 1, 1], [], []>} : vector<8x512xbf16>, vector<512x512xbf16>, vector<8x512xf32> -> vector<8x512xf32>
    %6 = arith.truncf %5 : vector<8x512xf32> to vector<8x512xbf16>
    %c0_5 = arith.constant 0 : index
    %c0_6 = arith.constant 0 : index
    %c0_7 = arith.constant 0 : index
    %7 = vector.load %arg4[%c0_5, %c0_6, %c0_7] : memref<1x8x512xbf16, #tpu.memory_space<vmem>>, vector<1x8x512xbf16>
    %8 = vector.shape_cast %7 : vector<1x8x512xbf16> to vector<8x512xbf16>
    %9 = vector.shape_cast %6 : vector<8x512xbf16> to vector<1x8x512xbf16>
    tpu.vector_store %arg4[%c0_5, %c0_6, %c0_7], %9 {strides = array<i32>} : memref<1x8x512xbf16, #tpu.memory_space<vmem>>, vector<1x8x512xbf16>,
    %c0_8 = arith.constant 0 : index
    %c0_9 = arith.constant 0 : index
    %c0_10 = arith.constant 0 : index
    %10 = vector.load %arg3[%c0_8, %c0_9, %c0_10] : memref<1x512x512xbf16, #tpu.memory_space<vmem>>, vector<1x512x512xbf16>
    %11 = vector.shape_cast %10 : vector<1x512x512xbf16> to vector<512x512xbf16>
    %cst_11 = arith.constant dense<0.000000e+00> : vector<8x512xf32>
    %12 = tpu.matmul %2, %11, %cst_11 {dimension_numbers = #tpu.dot_dimension_numbers<[1], [0], [0], [1], [0, 0, 1, 1], [], []>} : vector<8x512xbf16>, vector<512x512xbf16>, vector<8x512xf32> -> vector<8x512xf32>
    %13 = arith.truncf %12 : vector<8x512xf32> to vector<8x512xbf16>
    %c0_12 = arith.constant 0 : index
    %c0_13 = arith.constant 0 : index
    %c0_14 = arith.constant 0 : index
    %14 = vector.load %arg5[%c0_12, %c0_13, %c0_14] : memref<1x8x512xbf16, #tpu.memory_space<vmem>>, vector<1x8x512xbf16>
    %15 = vector.shape_cast %14 : vector<1x8x512xbf16> to vector<8x512xbf16>
    %16 = vector.shape_cast %13 : vector<8x512xbf16> to vector<1x8x512xbf16>
    tpu.vector_store %arg5[%c0_12, %c0_13, %c0_14], %16 {strides = array<i32>} : memref<1x8x512xbf16, #tpu.memory_space<vmem>>, vector<1x8x512xbf16>,
    return
  }
  func.func @transform_0(%arg0: i32) -> (i32, i32, i32) {
    %c0_i32 = arith.constant 0 : i32
    %c0_i32_0 = arith.constant 0 : i32
    %c0_i32_1 = arith.constant 0 : i32
    return %arg0, %c0_i32, %c0_i32_0 : i32, i32, i32
  }
  func.func @transform_1(%arg0: i32) -> (i32, i32, i32) {
    %c0_i32 = arith.constant 0 : i32
    %c0_i32_0 = arith.constant 0 : i32
    %c0_i32_1 = arith.constant 0 : i32
    return %arg0, %c0_i32, %c0_i32_0 : i32, i32, i32
  }
  func.func @transform_2(%arg0: i32) -> (i32, i32, i32) {
    %c0_i32 = arith.constant 0 : i32
    %c0_i32_0 = arith.constant 0 : i32
    %c0_i32_1 = arith.constant 0 : i32
    return %arg0, %c0_i32, %c0_i32_0 : i32, i32, i32
  }
  func.func @transform_3(%arg0: i32) -> (i32, i32, i32) {
    %c0_i32 = arith.constant 0 : i32
    %c0_i32_0 = arith.constant 0 : i32
    %c0_i32_1 = arith.constant 0 : i32
    return %arg0, %c0_i32, %c0_i32_0 : i32, i32, i32
  }
  func.func @transform_4(%arg0: i32) -> (i32, i32, i32) {
    %c0_i32 = arith.constant 0 : i32
    %c0_i32_0 = arith.constant 0 : i32
    %c0_i32_1 = arith.constant 0 : i32
    return %arg0, %c0_i32, %c0_i32_0 : i32, i32, i32
  }
}

module attributes {stable_mosaic.version = 11 : i64} {
  func.func @_flash_attn_kernel(%arg0: i32, %arg1: i32, %arg2: i32, %arg3: i32, %arg4: memref<1x8x4x128xbf16, #tpu.memory_space<vmem>>, %arg5: memref<1x8x4x128xbf16, #tpu.memory_space<vmem>>, %arg6: memref<1x8x4x128xbf16, #tpu.memory_space<vmem>>, %arg7: memref<8x4x128xbf16, #tpu.memory_space<vmem>>, %arg8: memref<8x4x128xbf16, #tpu.memory_space<vmem>>, %arg9: memref<4x128xf32, #tpu.memory_space<vmem>>, %arg10: memref<1x8x512xbf16, #tpu.memory_space<vmem>>, %arg11: memref<4x8x1xf32, #tpu.memory_space<vmem>>, %arg12: memref<4x8x1xf32, #tpu.memory_space<vmem>>, %arg13: memref<4x8x128xf32, #tpu.memory_space<vmem>>) attributes {dimension_semantics = [#tpu.dimension_semantics<parallel>, #tpu.dimension_semantics<parallel>, #tpu.dimension_semantics<parallel>, #tpu.dimension_semantics<arbitrary>], iteration_bounds = array<i64: 2, 1, 1, 1>, scalar_prefetch = 0 : i64, scratch_operands = 3 : i64, tpu.core_type = #tpu.core_type<tc>, window_params = [{transform_indices = @transform_0, window_bounds = array<i64: 1, 8, 4, 128>}, {transform_indices = @transform_1, window_bounds = array<i64: 1, 8, 4, 128>}, {transform_indices = @transform_2, window_bounds = array<i64: 1, 8, 4, 128>}, {transform_indices = @transform_3, window_bounds = array<i64: 8, 4, 128>}, {transform_indices = @transform_4, window_bounds = array<i64: 8, 4, 128>}, {transform_indices = @transform_5, window_bounds = array<i64: 4, 128>}, {transform_indices = @transform_6, window_bounds = array<i64: 1, 8, 512>}]} {
    %c0_i32 = arith.constant 0 : i32
    %0 = arith.cmpi eq, %arg3, %c0_i32 : i32
    %1 = arith.extui %0 : i1 to i32
    %c0_i32_0 = arith.constant 0 : i32
    %2 = arith.cmpi ne, %1, %c0_i32_0 : i32
    scf.if %2 {
      %cst = arith.constant 0xFF800000 : f32
      %12 = vector.broadcast %cst : f32 to vector<4x8x1xf32>
      %c0 = arith.constant 0 : index
      %c0_5 = arith.constant 0 : index
      %c0_6 = arith.constant 0 : index
      %13 = vector.load %arg11[%c0, %c0_5, %c0_6] : memref<4x8x1xf32, #tpu.memory_space<vmem>>, vector<4x8x1xf32>
      tpu.vector_store %arg11[%c0, %c0_5, %c0_6], %12 {strides = array<i32>} : memref<4x8x1xf32, #tpu.memory_space<vmem>>, vector<4x8x1xf32>,
      %cst_7 = arith.constant 0.000000e+00 : f32
      %14 = vector.broadcast %cst_7 : f32 to vector<4x8x1xf32>
      %c0_8 = arith.constant 0 : index
      %c0_9 = arith.constant 0 : index
      %c0_10 = arith.constant 0 : index
      %15 = vector.load %arg12[%c0_8, %c0_9, %c0_10] : memref<4x8x1xf32, #tpu.memory_space<vmem>>, vector<4x8x1xf32>
      tpu.vector_store %arg12[%c0_8, %c0_9, %c0_10], %14 {strides = array<i32>} : memref<4x8x1xf32, #tpu.memory_space<vmem>>, vector<4x8x1xf32>,
      %cst_11 = arith.constant 0.000000e+00 : f32
      %16 = vector.broadcast %cst_11 : f32 to vector<4x8x128xf32>
      %c0_12 = arith.constant 0 : index
      %c0_13 = arith.constant 0 : index
      %c0_14 = arith.constant 0 : index
      %17 = vector.load %arg13[%c0_12, %c0_13, %c0_14] : memref<4x8x128xf32, #tpu.memory_space<vmem>>, vector<4x8x128xf32>
      tpu.vector_store %arg13[%c0_12, %c0_13, %c0_14], %16 {strides = array<i32>} : memref<4x8x128xf32, #tpu.memory_space<vmem>>, vector<4x8x128xf32>,
    } else {
    }
    %c8_i32 = arith.constant 8 : i32
    %3 = arith.muli %arg3, %c8_i32 : i32
    %c8_i32_1 = arith.constant 8 : i32
    %4 = arith.muli %arg2, %c8_i32_1 : i32
    %c7_i32 = arith.constant 7 : i32
    %5 = arith.addi %4, %c7_i32 : i32
    %6 = arith.cmpi sle, %3, %5 : i32
    %7 = arith.extui %6 : i1 to i32
    %c0_i32_2 = arith.constant 0 : i32
    %8 = arith.cmpi ne, %7, %c0_i32_2 : i32
    scf.if %8 {
      %c0 = arith.constant 0 : index
      %c0_5 = arith.constant 0 : index
      %c0_6 = arith.constant 0 : index
      %c0_7 = arith.constant 0 : index
      %12 = vector.load %arg4[%c0, %c0_5, %c0_6, %c0_7] : memref<1x8x4x128xbf16, #tpu.memory_space<vmem>>, vector<1x8x4x128xbf16>
      %13 = vector.shape_cast %12 : vector<1x8x4x128xbf16> to vector<8x4x128xbf16>
      %14 = tpu.transpose %13, [1, 0, 2] : vector<8x4x128xbf16> -> vector<4x8x128xbf16>
      %c0_8 = arith.constant 0 : index
      %c0_9 = arith.constant 0 : index
      %c0_10 = arith.constant 0 : index
      %c0_11 = arith.constant 0 : index
      %15 = vector.load %arg5[%c0_8, %c0_9, %c0_10, %c0_11] : memref<1x8x4x128xbf16, #tpu.memory_space<vmem>>, vector<1x8x4x128xbf16>
      %16 = vector.shape_cast %15 : vector<1x8x4x128xbf16> to vector<8x4x128xbf16>
      %17 = tpu.transpose %16, [1, 0, 2] : vector<8x4x128xbf16> -> vector<4x8x128xbf16>
      %c0_12 = arith.constant 0 : index
      %c0_13 = arith.constant 0 : index
      %c0_14 = arith.constant 0 : index
      %c0_15 = arith.constant 0 : index
      %18 = vector.load %arg6[%c0_12, %c0_13, %c0_14, %c0_15] : memref<1x8x4x128xbf16, #tpu.memory_space<vmem>>, vector<1x8x4x128xbf16>
      %19 = vector.shape_cast %18 : vector<1x8x4x128xbf16> to vector<8x4x128xbf16>
      %20 = tpu.transpose %19, [1, 0, 2] : vector<8x4x128xbf16> -> vector<4x8x128xbf16>
      "tpu.trace_start"() <{level = 10 : i32, message = "hqd,hkd->hqk"}> : () -> ()
      %cst = arith.constant dense<0.000000e+00> : vector<4x8x8xf32>
      %21 = tpu.matmul %14, %17, %cst {dimension_numbers = #tpu.dot_dimension_numbers<[2], [2], [1], [1], [0, 0, 0, 1, 1, 1], [0], [0]>} : vector<4x8x128xbf16>, vector<4x8x128xbf16>, vector<4x8x8xf32> -> vector<4x8x8xf32>
      "tpu.trace_stop"() : () -> ()
      %cst_16 = arith.constant 0.0883883461 : f32
      %22 = vector.broadcast %cst_16 : f32 to vector<4x8x8xf32>
      %23 = arith.mulf %21, %22 : vector<4x8x8xf32>
      %c8_i32_17 = arith.constant 8 : i32
      %24 = arith.muli %arg2, %c8_i32_17 : i32
      %25 = tpu.iota {dimensions = array<i32: 0>} : vector<8x8xi32>
      %26 = vector.broadcast %24 : i32 to vector<8x8xi32>
      %27 = arith.addi %26, %25 : vector<8x8xi32>
      %c8_i32_18 = arith.constant 8 : i32
      %28 = arith.muli %arg3, %c8_i32_18 : i32
      %29 = tpu.iota {dimensions = array<i32: 1>} : vector<8x8xi32>
      %30 = vector.broadcast %28 : i32 to vector<8x8xi32>
      %31 = arith.addi %30, %29 : vector<8x8xi32>
      %32 = arith.cmpi sge, %27, %31 : vector<8x8xi32>
      %33 = vector.shape_cast %32 : vector<8x8xi1> to vector<1x8x8xi1>
      %cst_19 = arith.constant 0xFF800000 : f32
      %34 = vector.shape_cast %33 : vector<1x8x8xi1> to vector<1x8x8xi1>
      %35 = vector.broadcast %34 : vector<1x8x8xi1> to vector<4x8x8xi1>
      %36 = vector.broadcast %cst_19 : f32 to vector<4x8x8xf32>
      %37 = arith.select %35, %23, %36 : vector<4x8x8xi1>, vector<4x8x8xf32>
      %c0_20 = arith.constant 0 : index
      %c0_21 = arith.constant 0 : index
      %c0_22 = arith.constant 0 : index
      %38 = vector.load %arg11[%c0_20, %c0_21, %c0_22] : memref<4x8x1xf32, #tpu.memory_space<vmem>>, vector<4x8x1xf32>
      %cst_23 = arith.constant dense<0xFF800000> : vector<4x8xf32>
      %39 = vector.multi_reduction <maximumf>, %37, %cst_23 [2] : vector<4x8x8xf32> to vector<4x8xf32>
      %40 = vector.shape_cast %39 : vector<4x8xf32> to vector<4x8x1xf32>
      %41 = arith.maximumf %38, %40 : vector<4x8x1xf32>
      %42 = arith.subf %38, %41 : vector<4x8x1xf32>
      %43 = math.exp %42 : vector<4x8x1xf32>
      %44 = vector.broadcast %41 : vector<4x8x1xf32> to vector<4x8x8xf32>
      %45 = arith.subf %37, %44 : vector<4x8x8xf32>
      %46 = math.exp %45 : vector<4x8x8xf32>
      %c0_24 = arith.constant 0 : index
      %c0_25 = arith.constant 0 : index
      %c0_26 = arith.constant 0 : index
      %47 = vector.load %arg12[%c0_24, %c0_25, %c0_26] : memref<4x8x1xf32, #tpu.memory_space<vmem>>, vector<4x8x1xf32>
      %48 = arith.mulf %43, %47 : vector<4x8x1xf32>
      %cst_27 = arith.constant dense<0.000000e+00> : vector<4x8xf32>
      %49 = vector.multi_reduction <add>, %46, %cst_27 [2] : vector<4x8x8xf32> to vector<4x8xf32>
      %50 = vector.shape_cast %49 : vector<4x8xf32> to vector<4x8x1xf32>
      %51 = arith.addf %48, %50 : vector<4x8x1xf32>
      %c0_28 = arith.constant 0 : index
      %c0_29 = arith.constant 0 : index
      %c0_30 = arith.constant 0 : index
      %52 = vector.load %arg12[%c0_28, %c0_29, %c0_30] : memref<4x8x1xf32, #tpu.memory_space<vmem>>, vector<4x8x1xf32>
      tpu.vector_store %arg12[%c0_28, %c0_29, %c0_30], %51 {strides = array<i32>} : memref<4x8x1xf32, #tpu.memory_space<vmem>>, vector<4x8x1xf32>,
      %c0_31 = arith.constant 0 : index
      %c0_32 = arith.constant 0 : index
      %c0_33 = arith.constant 0 : index
      %53 = vector.load %arg13[%c0_31, %c0_32, %c0_33] : memref<4x8x128xf32, #tpu.memory_space<vmem>>, vector<4x8x128xf32>
      %54 = vector.broadcast %43 : vector<4x8x1xf32> to vector<4x8x128xf32>
      %55 = arith.mulf %54, %53 : vector<4x8x128xf32>
      %56 = arith.truncf %46 : vector<4x8x8xf32> to vector<4x8x8xbf16>
      "tpu.trace_start"() <{level = 10 : i32, message = "hqk,hkd->hqd"}> : () -> ()
      %cst_34 = arith.constant dense<0.000000e+00> : vector<4x8x128xf32>
      %57 = tpu.matmul %56, %20, %cst_34 {dimension_numbers = #tpu.dot_dimension_numbers<[2], [1], [1], [2], [0, 0, 0, 1, 1, 2], [0], [0]>} : vector<4x8x8xbf16>, vector<4x8x128xbf16>, vector<4x8x128xf32> -> vector<4x8x128xf32>
      "tpu.trace_stop"() : () -> ()
      %58 = arith.addf %55, %57 : vector<4x8x128xf32>
      %c0_35 = arith.constant 0 : index
      %c0_36 = arith.constant 0 : index
      %c0_37 = arith.constant 0 : index
      %59 = vector.load %arg13[%c0_35, %c0_36, %c0_37] : memref<4x8x128xf32, #tpu.memory_space<vmem>>, vector<4x8x128xf32>
      tpu.vector_store %arg13[%c0_35, %c0_36, %c0_37], %58 {strides = array<i32>} : memref<4x8x128xf32, #tpu.memory_space<vmem>>, vector<4x8x128xf32>,
      %c0_38 = arith.constant 0 : index
      %c0_39 = arith.constant 0 : index
      %c0_40 = arith.constant 0 : index
      %60 = vector.load %arg11[%c0_38, %c0_39, %c0_40] : memref<4x8x1xf32, #tpu.memory_space<vmem>>, vector<4x8x1xf32>
      tpu.vector_store %arg11[%c0_38, %c0_39, %c0_40], %41 {strides = array<i32>} : memref<4x8x1xf32, #tpu.memory_space<vmem>>, vector<4x8x1xf32>,
    } else {
    }
    %c0_i32_3 = arith.constant 0 : i32
    %9 = arith.cmpi eq, %arg3, %c0_i32_3 : i32
    %10 = arith.extui %9 : i1 to i32
    %c0_i32_4 = arith.constant 0 : i32
    %11 = arith.cmpi ne, %10, %c0_i32_4 : i32
    scf.if %11 {
      %c0 = arith.constant 0 : index
      %c0_5 = arith.constant 0 : index
      %c0_6 = arith.constant 0 : index
      %c0_7 = arith.constant 0 : index
      %12 = vector.load %arg4[%c0, %c0_5, %c0_6, %c0_7] : memref<1x8x4x128xbf16, #tpu.memory_space<vmem>>, vector<1x8x4x128xbf16>
      %13 = vector.shape_cast %12 : vector<1x8x4x128xbf16> to vector<8x4x128xbf16>
      %14 = tpu.transpose %13, [1, 0, 2] : vector<8x4x128xbf16> -> vector<4x8x128xbf16>
      %c0_8 = arith.constant 0 : index
      %c0_9 = arith.constant 0 : index
      %c0_10 = arith.constant 0 : index
      %15 = vector.load %arg7[%c0_8, %c0_9, %c0_10] : memref<8x4x128xbf16, #tpu.memory_space<vmem>>, vector<8x4x128xbf16>
      %16 = tpu.transpose %15, [1, 0, 2] : vector<8x4x128xbf16> -> vector<4x8x128xbf16>
      %c0_11 = arith.constant 0 : index
      %c0_12 = arith.constant 0 : index
      %c0_13 = arith.constant 0 : index
      %17 = vector.load %arg8[%c0_11, %c0_12, %c0_13] : memref<8x4x128xbf16, #tpu.memory_space<vmem>>, vector<8x4x128xbf16>
      %18 = tpu.transpose %17, [1, 0, 2] : vector<8x4x128xbf16> -> vector<4x8x128xbf16>
      "tpu.trace_start"() <{level = 10 : i32, message = "hqd,hpd->hqp"}> : () -> ()
      %cst = arith.constant dense<0.000000e+00> : vector<4x8x8xf32>
      %19 = tpu.matmul %14, %16, %cst {dimension_numbers = #tpu.dot_dimension_numbers<[2], [2], [1], [1], [0, 0, 0, 1, 1, 1], [0], [0]>} : vector<4x8x128xbf16>, vector<4x8x128xbf16>, vector<4x8x8xf32> -> vector<4x8x8xf32>
      "tpu.trace_stop"() : () -> ()
      %cst_14 = arith.constant 0.0883883461 : f32
      %20 = vector.broadcast %cst_14 : f32 to vector<4x8x8xf32>
      %21 = arith.mulf %19, %20 : vector<4x8x8xf32>
      %cst_15 = arith.constant dense<0xFF800000> : vector<4x8xf32>
      %22 = vector.multi_reduction <maximumf>, %21, %cst_15 [2] : vector<4x8x8xf32> to vector<4x8xf32>
      %23 = vector.shape_cast %22 : vector<4x8xf32> to vector<4x8x1xf32>
      %24 = vector.broadcast %23 : vector<4x8x1xf32> to vector<4x8x8xf32>
      %25 = arith.subf %21, %24 : vector<4x8x8xf32>
      %26 = math.exp %25 : vector<4x8x8xf32>
      %cst_16 = arith.constant dense<0.000000e+00> : vector<4x8xf32>
      %27 = vector.multi_reduction <add>, %26, %cst_16 [2] : vector<4x8x8xf32> to vector<4x8xf32>
      %28 = vector.shape_cast %27 : vector<4x8xf32> to vector<4x8x1xf32>
      %29 = tpu.reciprocal %28 {approx = true} : vector<4x8x1xf32> -> vector<4x8x1xf32>
      %30 = arith.truncf %26 : vector<4x8x8xf32> to vector<4x8x8xbf16>
      "tpu.trace_start"() <{level = 10 : i32, message = "hqp,hpd->hqd"}> : () -> ()
      %cst_17 = arith.constant dense<0.000000e+00> : vector<4x8x128xf32>
      %31 = tpu.matmul %30, %18, %cst_17 {dimension_numbers = #tpu.dot_dimension_numbers<[2], [1], [1], [2], [0, 0, 0, 1, 1, 2], [0], [0]>} : vector<4x8x8xbf16>, vector<4x8x128xbf16>, vector<4x8x128xf32> -> vector<4x8x128xf32>
      "tpu.trace_stop"() : () -> ()
      %32 = vector.broadcast %29 : vector<4x8x1xf32> to vector<4x8x128xf32>
      %33 = arith.mulf %31, %32 : vector<4x8x128xf32>
      %c0_18 = arith.constant 0 : index
      %c0_19 = arith.constant 0 : index
      %c0_20 = arith.constant 0 : index
      %34 = vector.load %arg12[%c0_18, %c0_19, %c0_20] : memref<4x8x1xf32, #tpu.memory_space<vmem>>, vector<4x8x1xf32>
      %35 = tpu.reciprocal %34 {approx = true} : vector<4x8x1xf32> -> vector<4x8x1xf32>
      %c0_21 = arith.constant 0 : index
      %c0_22 = arith.constant 0 : index
      %c0_23 = arith.constant 0 : index
      %36 = vector.load %arg13[%c0_21, %c0_22, %c0_23] : memref<4x8x128xf32, #tpu.memory_space<vmem>>, vector<4x8x128xf32>
      %37 = vector.broadcast %35 : vector<4x8x1xf32> to vector<4x8x128xf32>
      %38 = arith.mulf %36, %37 : vector<4x8x128xf32>
      %c0_24 = arith.constant 0 : index
      %c0_25 = arith.constant 0 : index
      %39 = vector.load %arg9[%c0_24, %c0_25] : memref<4x128xf32, #tpu.memory_space<vmem>>, vector<4x128xf32>
      %40 = vector.shape_cast %39 : vector<4x128xf32> to vector<4x1x128xf32>
      %41 = vector.broadcast %40 : vector<4x1x128xf32> to vector<4x8x128xf32>
      %42 = arith.mulf %41, %33 : vector<4x8x128xf32>
      %43 = arith.addf %38, %42 : vector<4x8x128xf32>
      %44 = vector.extract_strided_slice %43 {offsets = [0, 0, 0], sizes = [1, 8, 128], strides = [1, 1, 1]} : vector<4x8x128xf32> to vector<1x8x128xf32>
      %45 = vector.shape_cast %44 : vector<1x8x128xf32> to vector<8x128xf32>
      %46 = vector.extract_strided_slice %43 {offsets = [1, 0, 0], sizes = [1, 8, 128], strides = [1, 1, 1]} : vector<4x8x128xf32> to vector<1x8x128xf32>
      %47 = vector.shape_cast %46 : vector<1x8x128xf32> to vector<8x128xf32>
      %48 = vector.extract_strided_slice %43 {offsets = [2, 0, 0], sizes = [1, 8, 128], strides = [1, 1, 1]} : vector<4x8x128xf32> to vector<1x8x128xf32>
      %49 = vector.shape_cast %48 : vector<1x8x128xf32> to vector<8x128xf32>
      %50 = vector.extract_strided_slice %43 {offsets = [3, 0, 0], sizes = [1, 8, 128], strides = [1, 1, 1]} : vector<4x8x128xf32> to vector<1x8x128xf32>
      %51 = vector.shape_cast %50 : vector<1x8x128xf32> to vector<8x128xf32>
      %52 = tpu.concatenate %45, %47, %49, %51 in 1 : vector<8x128xf32>, vector<8x128xf32>, vector<8x128xf32>, vector<8x128xf32> -> vector<8x512xf32>
      %53 = arith.truncf %52 : vector<8x512xf32> to vector<8x512xbf16>
      %c0_26 = arith.constant 0 : index
      %c0_27 = arith.constant 0 : index
      %c0_28 = arith.constant 0 : index
      %54 = vector.load %arg10[%c0_26, %c0_27, %c0_28] : memref<1x8x512xbf16, #tpu.memory_space<vmem>>, vector<1x8x512xbf16>
      %55 = vector.shape_cast %54 : vector<1x8x512xbf16> to vector<8x512xbf16>
      %56 = vector.shape_cast %53 : vector<8x512xbf16> to vector<1x8x512xbf16>
      tpu.vector_store %arg10[%c0_26, %c0_27, %c0_28], %56 {strides = array<i32>} : memref<1x8x512xbf16, #tpu.memory_space<vmem>>, vector<1x8x512xbf16>,
    } else {
    }
    return
  }
  func.func @transform_0(%arg0: i32, %arg1: i32, %arg2: i32, %arg3: i32) -> (i32, i32, i32, i32) {
    %c0_i32 = arith.constant 0 : i32
    %c0_i32_0 = arith.constant 0 : i32
    return %arg0, %arg2, %arg1, %c0_i32 : i32, i32, i32, i32
  }
  func.func @transform_1(%arg0: i32, %arg1: i32, %arg2: i32, %arg3: i32) -> (i32, i32, i32, i32) {
    %c0_i32 = arith.constant 0 : i32
    %c0_i32_0 = arith.constant 0 : i32
    return %arg0, %arg3, %arg1, %c0_i32 : i32, i32, i32, i32
  }
  func.func @transform_2(%arg0: i32, %arg1: i32, %arg2: i32, %arg3: i32) -> (i32, i32, i32, i32) {
    %c0_i32 = arith.constant 0 : i32
    %c0_i32_0 = arith.constant 0 : i32
    return %arg0, %arg3, %arg1, %c0_i32 : i32, i32, i32, i32
  }
  func.func @transform_3(%arg0: i32, %arg1: i32, %arg2: i32, %arg3: i32) -> (i32, i32, i32) {
    %c0_i32 = arith.constant 0 : i32
    %c0_i32_0 = arith.constant 0 : i32
    %c0_i32_1 = arith.constant 0 : i32
    return %c0_i32, %arg1, %c0_i32_0 : i32, i32, i32
  }
  func.func @transform_4(%arg0: i32, %arg1: i32, %arg2: i32, %arg3: i32) -> (i32, i32, i32) {
    %c0_i32 = arith.constant 0 : i32
    %c0_i32_0 = arith.constant 0 : i32
    %c0_i32_1 = arith.constant 0 : i32
    return %c0_i32, %arg1, %c0_i32_0 : i32, i32, i32
  }
  func.func @transform_5(%arg0: i32, %arg1: i32, %arg2: i32, %arg3: i32) -> (i32, i32) {
    %c0_i32 = arith.constant 0 : i32
    %c0_i32_0 = arith.constant 0 : i32
    return %arg1, %c0_i32 : i32, i32
  }
  func.func @transform_6(%arg0: i32, %arg1: i32, %arg2: i32, %arg3: i32) -> (i32, i32, i32) {
    %c0_i32 = arith.constant 0 : i32
    return %arg0, %arg2, %arg1 : i32, i32, i32
  }
}

module attributes {stable_mosaic.version = 11 : i64} {
  func.func @_matmul_residual_kernel(%arg0: i32, %arg1: i32, %arg2: i32, %arg3: memref<16x256xbf16, #tpu.memory_space<vmem>>, %arg4: memref<256x256xbf16, #tpu.memory_space<vmem>>, %arg5: memref<16x256xf32, #tpu.memory_space<vmem>>, %arg6: memref<16x256xf32, #tpu.memory_space<vmem>>, %arg7: memref<16x256xf32, #tpu.memory_space<vmem>>) attributes {dimension_semantics = [#tpu.dimension_semantics<parallel>, #tpu.dimension_semantics<parallel>, #tpu.dimension_semantics<arbitrary>], iteration_bounds = array<i64: 1, 2, 2>, scalar_prefetch = 0 : i64, scratch_operands = 1 : i64, tpu.core_type = #tpu.core_type<tc>, window_params = [{transform_indices = @transform_0, window_bounds = array<i64: 16, 256>}, {transform_indices = @transform_1, window_bounds = array<i64: 256, 256>}, {transform_indices = @transform_2, window_bounds = array<i64: 16, 256>}, {transform_indices = @transform_3, window_bounds = array<i64: 16, 256>}]} {
    %c0_i32 = arith.constant 0 : i32
    %0 = arith.cmpi eq, %arg2, %c0_i32 : i32
    %1 = arith.extui %0 : i1 to i32
    %c0_i32_0 = arith.constant 0 : i32
    %2 = arith.cmpi ne, %1, %c0_i32_0 : i32
    scf.if %2 {
      %cst_9 = arith.constant 0.000000e+00 : f32
      %12 = vector.broadcast %cst_9 : f32 to vector<16x256xf32>
      %c0_10 = arith.constant 0 : index
      %c0_11 = arith.constant 0 : index
      %13 = vector.load %arg7[%c0_10, %c0_11] : memref<16x256xf32, #tpu.memory_space<vmem>>, vector<16x256xf32>
      tpu.vector_store %arg7[%c0_10, %c0_11], %12 {strides = array<i32>} : memref<16x256xf32, #tpu.memory_space<vmem>>, vector<16x256xf32>,
    } else {
    }
    %c0 = arith.constant 0 : index
    %c0_1 = arith.constant 0 : index
    %3 = vector.load %arg7[%c0, %c0_1] : memref<16x256xf32, #tpu.memory_space<vmem>>, vector<16x256xf32>
    %c0_2 = arith.constant 0 : index
    %c0_3 = arith.constant 0 : index
    %4 = vector.load %arg3[%c0_2, %c0_3] : memref<16x256xbf16, #tpu.memory_space<vmem>>, vector<16x256xbf16>
    %c0_4 = arith.constant 0 : index
    %c0_5 = arith.constant 0 : index
    %5 = vector.load %arg4[%c0_4, %c0_5] : memref<256x256xbf16, #tpu.memory_space<vmem>>, vector<256x256xbf16>
    %cst = arith.constant dense<0.000000e+00> : vector<16x256xf32>
    %6 = tpu.matmul %4, %5, %cst {dimension_numbers = #tpu.dot_dimension_numbers<[1], [0], [0], [1], [0, 0, 1, 1], [], []>} : vector<16x256xbf16>, vector<256x256xbf16>, vector<16x256xf32> -> vector<16x256xf32>
    %7 = arith.addf %3, %6 : vector<16x256xf32>
    %c0_6 = arith.constant 0 : index
    %c0_7 = arith.constant 0 : index
    %8 = vector.load %arg7[%c0_6, %c0_7] : memref<16x256xf32, #tpu.memory_space<vmem>>, vector<16x256xf32>
    tpu.vector_store %arg7[%c0_6, %c0_7], %7 {strides = array<i32>} : memref<16x256xf32, #tpu.memory_space<vmem>>, vector<16x256xf32>,
    %c1_i32 = arith.constant 1 : i32
    %9 = arith.cmpi eq, %arg2, %c1_i32 : i32
    %10 = arith.extui %9 : i1 to i32
    %c0_i32_8 = arith.constant 0 : i32
    %11 = arith.cmpi ne, %10, %c0_i32_8 : i32
    scf.if %11 {
      %c0_9 = arith.constant 0 : index
      %c0_10 = arith.constant 0 : index
      %12 = vector.load %arg7[%c0_9, %c0_10] : memref<16x256xf32, #tpu.memory_space<vmem>>, vector<16x256xf32>
      %c0_11 = arith.constant 0 : index
      %c0_12 = arith.constant 0 : index
      %13 = vector.load %arg5[%c0_11, %c0_12] : memref<16x256xf32, #tpu.memory_space<vmem>>, vector<16x256xf32>
      %14 = arith.addf %12, %13 : vector<16x256xf32>
      %c0_13 = arith.constant 0 : index
      %c0_14 = arith.constant 0 : index
      %15 = vector.load %arg6[%c0_13, %c0_14] : memref<16x256xf32, #tpu.memory_space<vmem>>, vector<16x256xf32>
      tpu.vector_store %arg6[%c0_13, %c0_14], %14 {strides = array<i32>} : memref<16x256xf32, #tpu.memory_space<vmem>>, vector<16x256xf32>,
    } else {
    }
    return
  }
  func.func @transform_0(%arg0: i32, %arg1: i32, %arg2: i32) -> (i32, i32) {
    %c0_i32 = arith.constant 0 : i32
    return %arg0, %arg2 : i32, i32
  }
  func.func @transform_1(%arg0: i32, %arg1: i32, %arg2: i32) -> (i32, i32) {
    %c0_i32 = arith.constant 0 : i32
    return %arg2, %arg1 : i32, i32
  }
  func.func @transform_2(%arg0: i32, %arg1: i32, %arg2: i32) -> (i32, i32) {
    %c0_i32 = arith.constant 0 : i32
    return %arg0, %arg1 : i32, i32
  }
  func.func @transform_3(%arg0: i32, %arg1: i32, %arg2: i32) -> (i32, i32) {
    %c0_i32 = arith.constant 0 : i32
    return %arg0, %arg1 : i32, i32
  }
}

module attributes {stable_mosaic.version = 11 : i64} {
  func.func @_norm_swiglu_kernel(%arg0: i32, %arg1: i32, %arg2: memref<16x512xf32, #tpu.memory_space<vmem>>, %arg3: memref<1x512xf32, #tpu.memory_space<vmem>>, %arg4: memref<512x128xbf16, #tpu.memory_space<vmem>>, %arg5: memref<512x128xbf16, #tpu.memory_space<vmem>>, %arg6: memref<16x128xbf16, #tpu.memory_space<vmem>>, %arg7: memref<16x512xbf16, #tpu.memory_space<vmem>>) attributes {dimension_semantics = [#tpu.dimension_semantics<parallel>, #tpu.dimension_semantics<arbitrary>], iteration_bounds = array<i64: 1, 11>, scalar_prefetch = 0 : i64, scratch_operands = 1 : i64, tpu.core_type = #tpu.core_type<tc>, window_params = [{transform_indices = @transform_0, window_bounds = array<i64: 16, 512>}, {pipeline_mode = #tpu.pipeline_mode<synchronous>, transform_indices = @transform_1, window_bounds = array<i64: 1, 512>}, {transform_indices = @transform_2, window_bounds = array<i64: 512, 128>}, {transform_indices = @transform_3, window_bounds = array<i64: 512, 128>}, {transform_indices = @transform_4, window_bounds = array<i64: 16, 128>}]} {
    %c0_i32 = arith.constant 0 : i32
    %0 = arith.cmpi eq, %arg1, %c0_i32 : i32
    %1 = arith.extui %0 : i1 to i32
    %c0_i32_0 = arith.constant 0 : i32
    %2 = arith.cmpi ne, %1, %c0_i32_0 : i32
    scf.if %2 {
      %c0_10 = arith.constant 0 : index
      %c0_11 = arith.constant 0 : index
      %17 = vector.load %arg2[%c0_10, %c0_11] : memref<16x512xf32, #tpu.memory_space<vmem>>, vector<16x512xf32>
      %18 = arith.mulf %17, %17 : vector<16x512xf32>
      %cst_12 = arith.constant dense<0.000000e+00> : vector<16xf32>
      %19 = vector.multi_reduction <add>, %18, %cst_12 [1] : vector<16x512xf32> to vector<16xf32>
      %20 = vector.shape_cast %19 : vector<16xf32> to vector<16x1xf32>
      %cst_13 = arith.constant 5.120000e+02 : f32
      %21 = vector.broadcast %cst_13 : f32 to vector<16x1xf32>
      %22 = arith.divf %20, %21 : vector<16x1xf32>
      %cst_14 = arith.constant 9.99999974E-6 : f32
      %23 = vector.broadcast %cst_14 : f32 to vector<16x1xf32>
      %24 = arith.addf %22, %23 : vector<16x1xf32>
      %25 = math.rsqrt %24 : vector<16x1xf32>
      %26 = vector.broadcast %25 : vector<16x1xf32> to vector<16x512xf32>
      %27 = arith.mulf %17, %26 : vector<16x512xf32>
      %c0_15 = arith.constant 0 : index
      %c0_16 = arith.constant 0 : index
      %28 = vector.load %arg3[%c0_15, %c0_16] : memref<1x512xf32, #tpu.memory_space<vmem>>, vector<1x512xf32>
      %29 = vector.broadcast %28 : vector<1x512xf32> to vector<16x512xf32>
      %30 = arith.mulf %27, %29 : vector<16x512xf32>
      %31 = arith.truncf %30 : vector<16x512xf32> to vector<16x512xbf16>
      %c0_17 = arith.constant 0 : index
      %c0_18 = arith.constant 0 : index
      %32 = vector.load %arg7[%c0_17, %c0_18] : memref<16x512xbf16, #tpu.memory_space<vmem>>, vector<16x512xbf16>
      tpu.vector_store %arg7[%c0_17, %c0_18], %31 {strides = array<i32>} : memref<16x512xbf16, #tpu.memory_space<vmem>>, vector<16x512xbf16>,
    } else {
    }
    %c0 = arith.constant 0 : index
    %c0_1 = arith.constant 0 : index
    %3 = vector.load %arg7[%c0, %c0_1] : memref<16x512xbf16, #tpu.memory_space<vmem>>, vector<16x512xbf16>
    %c0_2 = arith.constant 0 : index
    %c0_3 = arith.constant 0 : index
    %4 = vector.load %arg4[%c0_2, %c0_3] : memref<512x128xbf16, #tpu.memory_space<vmem>>, vector<512x128xbf16>
    %cst = arith.constant dense<0.000000e+00> : vector<16x128xf32>
    %5 = tpu.matmul %3, %4, %cst {dimension_numbers = #tpu.dot_dimension_numbers<[1], [0], [0], [1], [0, 0, 1, 1], [], []>} : vector<16x512xbf16>, vector<512x128xbf16>, vector<16x128xf32> -> vector<16x128xf32>
    %c0_4 = arith.constant 0 : index
    %c0_5 = arith.constant 0 : index
    %6 = vector.load %arg5[%c0_4, %c0_5] : memref<512x128xbf16, #tpu.memory_space<vmem>>, vector<512x128xbf16>
    %cst_6 = arith.constant dense<0.000000e+00> : vector<16x128xf32>
    %7 = tpu.matmul %3, %6, %cst_6 {dimension_numbers = #tpu.dot_dimension_numbers<[1], [0], [0], [1], [0, 0, 1, 1], [], []>} : vector<16x512xbf16>, vector<512x128xbf16>, vector<16x128xf32> -> vector<16x128xf32>
    %8 = arith.negf %5 : vector<16x128xf32>
    %9 = math.exp %8 : vector<16x128xf32>
    %cst_7 = arith.constant 1.000000e+00 : f32
    %10 = vector.broadcast %cst_7 : f32 to vector<16x128xf32>
    %11 = arith.addf %10, %9 : vector<16x128xf32>
    %12 = arith.divf %10, %11 : vector<16x128xf32>
    %13 = arith.mulf %5, %12 : vector<16x128xf32>
    %14 = arith.mulf %13, %7 : vector<16x128xf32>
    %15 = arith.truncf %14 : vector<16x128xf32> to vector<16x128xbf16>
    %c0_8 = arith.constant 0 : index
    %c0_9 = arith.constant 0 : index
    %16 = vector.load %arg6[%c0_8, %c0_9] : memref<16x128xbf16, #tpu.memory_space<vmem>>, vector<16x128xbf16>
    tpu.vector_store %arg6[%c0_8, %c0_9], %15 {strides = array<i32>} : memref<16x128xbf16, #tpu.memory_space<vmem>>, vector<16x128xbf16>,
    return
  }
  func.func @transform_0(%arg0: i32, %arg1: i32) -> (i32, i32) {
    %c0_i32 = arith.constant 0 : i32
    %c0_i32_0 = arith.constant 0 : i32
    return %arg0, %c0_i32 : i32, i32
  }
  func.func @transform_1(%arg0: i32, %arg1: i32) -> (i32, i32) {
    %c0_i32 = arith.constant 0 : i32
    %c0_i32_0 = arith.constant 0 : i32
    %c0_i32_1 = arith.constant 0 : i32
    return %c0_i32, %c0_i32_0 : i32, i32
  }
  func.func @transform_2(%arg0: i32, %arg1: i32) -> (i32, i32) {
    %c0_i32 = arith.constant 0 : i32
    %c0_i32_0 = arith.constant 0 : i32
    return %c0_i32, %arg1 : i32, i32
  }
  func.func @transform_3(%arg0: i32, %arg1: i32) -> (i32, i32) {
    %c0_i32 = arith.constant 0 : i32
    %c0_i32_0 = arith.constant 0 : i32
    return %c0_i32, %arg1 : i32, i32
  }
  func.func @transform_4(%arg0: i32, %arg1: i32) -> (i32, i32) {
    %c0_i32 = arith.constant 0 : i32
    return %arg0, %arg1 : i32, i32
  }
}

module attributes {stable_mosaic.version = 11 : i64} {
  func.func @_matmul_residual_kernel(%arg0: i32, %arg1: i32, %arg2: i32, %arg3: memref<16x128xbf16, #tpu.memory_space<vmem>>, %arg4: memref<128x256xbf16, #tpu.memory_space<vmem>>, %arg5: memref<16x256xf32, #tpu.memory_space<vmem>>, %arg6: memref<16x256xf32, #tpu.memory_space<vmem>>, %arg7: memref<16x256xf32, #tpu.memory_space<vmem>>) attributes {dimension_semantics = [#tpu.dimension_semantics<parallel>, #tpu.dimension_semantics<parallel>, #tpu.dimension_semantics<arbitrary>], iteration_bounds = array<i64: 1, 2, 11>, scalar_prefetch = 0 : i64, scratch_operands = 1 : i64, tpu.core_type = #tpu.core_type<tc>, window_params = [{transform_indices = @transform_0, window_bounds = array<i64: 16, 128>}, {transform_indices = @transform_1, window_bounds = array<i64: 128, 256>}, {transform_indices = @transform_2, window_bounds = array<i64: 16, 256>}, {transform_indices = @transform_3, window_bounds = array<i64: 16, 256>}]} {
    %c0_i32 = arith.constant 0 : i32
    %0 = arith.cmpi eq, %arg2, %c0_i32 : i32
    %1 = arith.extui %0 : i1 to i32
    %c0_i32_0 = arith.constant 0 : i32
    %2 = arith.cmpi ne, %1, %c0_i32_0 : i32
    scf.if %2 {
      %cst_9 = arith.constant 0.000000e+00 : f32
      %12 = vector.broadcast %cst_9 : f32 to vector<16x256xf32>
      %c0_10 = arith.constant 0 : index
      %c0_11 = arith.constant 0 : index
      %13 = vector.load %arg7[%c0_10, %c0_11] : memref<16x256xf32, #tpu.memory_space<vmem>>, vector<16x256xf32>
      tpu.vector_store %arg7[%c0_10, %c0_11], %12 {strides = array<i32>} : memref<16x256xf32, #tpu.memory_space<vmem>>, vector<16x256xf32>,
    } else {
    }
    %c0 = arith.constant 0 : index
    %c0_1 = arith.constant 0 : index
    %3 = vector.load %arg7[%c0, %c0_1] : memref<16x256xf32, #tpu.memory_space<vmem>>, vector<16x256xf32>
    %c0_2 = arith.constant 0 : index
    %c0_3 = arith.constant 0 : index
    %4 = vector.load %arg3[%c0_2, %c0_3] : memref<16x128xbf16, #tpu.memory_space<vmem>>, vector<16x128xbf16>
    %c0_4 = arith.constant 0 : index
    %c0_5 = arith.constant 0 : index
    %5 = vector.load %arg4[%c0_4, %c0_5] : memref<128x256xbf16, #tpu.memory_space<vmem>>, vector<128x256xbf16>
    %cst = arith.constant dense<0.000000e+00> : vector<16x256xf32>
    %6 = tpu.matmul %4, %5, %cst {dimension_numbers = #tpu.dot_dimension_numbers<[1], [0], [0], [1], [0, 0, 1, 1], [], []>} : vector<16x128xbf16>, vector<128x256xbf16>, vector<16x256xf32> -> vector<16x256xf32>
    %7 = arith.addf %3, %6 : vector<16x256xf32>
    %c0_6 = arith.constant 0 : index
    %c0_7 = arith.constant 0 : index
    %8 = vector.load %arg7[%c0_6, %c0_7] : memref<16x256xf32, #tpu.memory_space<vmem>>, vector<16x256xf32>
    tpu.vector_store %arg7[%c0_6, %c0_7], %7 {strides = array<i32>} : memref<16x256xf32, #tpu.memory_space<vmem>>, vector<16x256xf32>,
    %c10_i32 = arith.constant 10 : i32
    %9 = arith.cmpi eq, %arg2, %c10_i32 : i32
    %10 = arith.extui %9 : i1 to i32
    %c0_i32_8 = arith.constant 0 : i32
    %11 = arith.cmpi ne, %10, %c0_i32_8 : i32
    scf.if %11 {
      %c0_9 = arith.constant 0 : index
      %c0_10 = arith.constant 0 : index
      %12 = vector.load %arg7[%c0_9, %c0_10] : memref<16x256xf32, #tpu.memory_space<vmem>>, vector<16x256xf32>
      %c0_11 = arith.constant 0 : index
      %c0_12 = arith.constant 0 : index
      %13 = vector.load %arg5[%c0_11, %c0_12] : memref<16x256xf32, #tpu.memory_space<vmem>>, vector<16x256xf32>
      %14 = arith.addf %12, %13 : vector<16x256xf32>
      %c0_13 = arith.constant 0 : index
      %c0_14 = arith.constant 0 : index
      %15 = vector.load %arg6[%c0_13, %c0_14] : memref<16x256xf32, #tpu.memory_space<vmem>>, vector<16x256xf32>
      tpu.vector_store %arg6[%c0_13, %c0_14], %14 {strides = array<i32>} : memref<16x256xf32, #tpu.memory_space<vmem>>, vector<16x256xf32>,
    } else {
    }
    return
  }
  func.func @transform_0(%arg0: i32, %arg1: i32, %arg2: i32) -> (i32, i32) {
    %c0_i32 = arith.constant 0 : i32
    return %arg0, %arg2 : i32, i32
  }
  func.func @transform_1(%arg0: i32, %arg1: i32, %arg2: i32) -> (i32, i32) {
    %c0_i32 = arith.constant 0 : i32
    return %arg2, %arg1 : i32, i32
  }
  func.func @transform_2(%arg0: i32, %arg1: i32, %arg2: i32) -> (i32, i32) {
    %c0_i32 = arith.constant 0 : i32
    return %arg0, %arg1 : i32, i32
  }
  func.func @transform_3(%arg0: i32, %arg1: i32, %arg2: i32) -> (i32, i32) {
    %c0_i32 = arith.constant 0 : i32
    return %arg0, %arg1 : i32, i32
  }
}

module attributes {stable_mosaic.version = 11 : i64} {
  func.func @_norm_matmul_kernel(%arg0: i32, %arg1: i32, %arg2: memref<16x512xf32, #tpu.memory_space<vmem>>, %arg3: memref<1x512xf32, #tpu.memory_space<vmem>>, %arg4: memref<512x128xbf16, #tpu.memory_space<vmem>>, %arg5: memref<16x128xf32, #tpu.memory_space<vmem>>, %arg6: memref<16x512xbf16, #tpu.memory_space<vmem>>) attributes {dimension_semantics = [#tpu.dimension_semantics<parallel>, #tpu.dimension_semantics<arbitrary>], iteration_bounds = array<i64: 1, 2>, scalar_prefetch = 0 : i64, scratch_operands = 1 : i64, tpu.core_type = #tpu.core_type<tc>, window_params = [{transform_indices = @transform_0, window_bounds = array<i64: 16, 512>}, {pipeline_mode = #tpu.pipeline_mode<synchronous>, transform_indices = @transform_1, window_bounds = array<i64: 1, 512>}, {transform_indices = @transform_2, window_bounds = array<i64: 512, 128>}, {transform_indices = @transform_3, window_bounds = array<i64: 16, 128>}]} {
    %c0_i32 = arith.constant 0 : i32
    %0 = arith.cmpi eq, %arg1, %c0_i32 : i32
    %1 = arith.extui %0 : i1 to i32
    %c0_i32_0 = arith.constant 0 : i32
    %2 = arith.cmpi ne, %1, %c0_i32_0 : i32
    scf.if %2 {
      %c0_6 = arith.constant 0 : index
      %c0_7 = arith.constant 0 : index
      %7 = vector.load %arg2[%c0_6, %c0_7] : memref<16x512xf32, #tpu.memory_space<vmem>>, vector<16x512xf32>
      %8 = arith.mulf %7, %7 : vector<16x512xf32>
      %cst_8 = arith.constant dense<0.000000e+00> : vector<16xf32>
      %9 = vector.multi_reduction <add>, %8, %cst_8 [1] : vector<16x512xf32> to vector<16xf32>
      %10 = vector.shape_cast %9 : vector<16xf32> to vector<16x1xf32>
      %cst_9 = arith.constant 5.120000e+02 : f32
      %11 = vector.broadcast %cst_9 : f32 to vector<16x1xf32>
      %12 = arith.divf %10, %11 : vector<16x1xf32>
      %cst_10 = arith.constant 9.99999974E-6 : f32
      %13 = vector.broadcast %cst_10 : f32 to vector<16x1xf32>
      %14 = arith.addf %12, %13 : vector<16x1xf32>
      %15 = math.rsqrt %14 : vector<16x1xf32>
      %16 = vector.broadcast %15 : vector<16x1xf32> to vector<16x512xf32>
      %17 = arith.mulf %7, %16 : vector<16x512xf32>
      %c0_11 = arith.constant 0 : index
      %c0_12 = arith.constant 0 : index
      %18 = vector.load %arg3[%c0_11, %c0_12] : memref<1x512xf32, #tpu.memory_space<vmem>>, vector<1x512xf32>
      %19 = vector.broadcast %18 : vector<1x512xf32> to vector<16x512xf32>
      %20 = arith.mulf %17, %19 : vector<16x512xf32>
      %21 = arith.truncf %20 : vector<16x512xf32> to vector<16x512xbf16>
      %c0_13 = arith.constant 0 : index
      %c0_14 = arith.constant 0 : index
      %22 = vector.load %arg6[%c0_13, %c0_14] : memref<16x512xbf16, #tpu.memory_space<vmem>>, vector<16x512xbf16>
      tpu.vector_store %arg6[%c0_13, %c0_14], %21 {strides = array<i32>} : memref<16x512xbf16, #tpu.memory_space<vmem>>, vector<16x512xbf16>,
    } else {
    }
    %c0 = arith.constant 0 : index
    %c0_1 = arith.constant 0 : index
    %3 = vector.load %arg6[%c0, %c0_1] : memref<16x512xbf16, #tpu.memory_space<vmem>>, vector<16x512xbf16>
    %c0_2 = arith.constant 0 : index
    %c0_3 = arith.constant 0 : index
    %4 = vector.load %arg4[%c0_2, %c0_3] : memref<512x128xbf16, #tpu.memory_space<vmem>>, vector<512x128xbf16>
    %cst = arith.constant dense<0.000000e+00> : vector<16x128xf32>
    %5 = tpu.matmul %3, %4, %cst {dimension_numbers = #tpu.dot_dimension_numbers<[1], [0], [0], [1], [0, 0, 1, 1], [], []>} : vector<16x512xbf16>, vector<512x128xbf16>, vector<16x128xf32> -> vector<16x128xf32>
    %c0_4 = arith.constant 0 : index
    %c0_5 = arith.constant 0 : index
    %6 = vector.load %arg5[%c0_4, %c0_5] : memref<16x128xf32, #tpu.memory_space<vmem>>, vector<16x128xf32>
    tpu.vector_store %arg5[%c0_4, %c0_5], %5 {strides = array<i32>} : memref<16x128xf32, #tpu.memory_space<vmem>>, vector<16x128xf32>,
    return
  }
  func.func @transform_0(%arg0: i32, %arg1: i32) -> (i32, i32) {
    %c0_i32 = arith.constant 0 : i32
    %c0_i32_0 = arith.constant 0 : i32
    return %arg0, %c0_i32 : i32, i32
  }
  func.func @transform_1(%arg0: i32, %arg1: i32) -> (i32, i32) {
    %c0_i32 = arith.constant 0 : i32
    %c0_i32_0 = arith.constant 0 : i32
    %c0_i32_1 = arith.constant 0 : i32
    return %c0_i32, %c0_i32_0 : i32, i32
  }
  func.func @transform_2(%arg0: i32, %arg1: i32) -> (i32, i32) {
    %c0_i32 = arith.constant 0 : i32
    %c0_i32_0 = arith.constant 0 : i32
    return %c0_i32, %arg1 : i32, i32
  }
  func.func @transform_3(%arg0: i32, %arg1: i32) -> (i32, i32) {
    %c0_i32 = arith.constant 0 : i32
    return %arg0, %arg1 : i32, i32
  }
}

</mosaic_0001>

<bundles_post_ra>
// kernel: squeeze.29
= control target key start
LH: loop header
LB: loop body
LE: loop exit
PB: predicated region body
PF: predicated region fallthrough
CT: control target
= control target key end

     0   :  { %v170_v9 = vmov 0.0   ;;  %s211_s0 = inlined_call_operand.vmem [shape: bf16[1,8,512], index: 0, kind: input, shape index: {}]   ;;  %s212_s1 = inlined_call_operand.vmem [shape: bf16[8,4,128], index: 1, kind: output, shape index: {}]  }
   0x1   :  { %v168_v0 = vld [vmem:[%s211_s0 + $0x8] sm:$0xff]   ;;  %v165_v1 = vld [vmem:[%s211_s0] sm:$0xff]  }
   0x2   :  { %v162_v2 = vunpack.c.l.bf16 %v168_v0  ;;  %v163_v3 = vunpack.c.h.bf16 %v168_v0  ;;  %v166_v4 = vunpack.c.l.bf16 %v165_v1  ;;  %v167_v5 = vunpack.c.h.bf16 %v165_v1 }
   0x4   :  { %66 = vst [vmem:[#allocation0] ss:$8 sm:$0xf] %v166_v4   ;;  %67 = vst [vmem:[#allocation0] ss:$8 sm:$0xf0] %v166_v4  }
   0x5   :  { %71 = vst [vmem:[#allocation0 + $0x1] ss:$8 sm:$0xf] %v167_v5   ;;  %73 = vst [vmem:[#allocation0 + $0x1] ss:$8 sm:$0xf0] %v167_v5  }
   0x6   :  { %77 = vst [vmem:[#allocation0 + $0x2] ss:$8 sm:$0xf] %v162_v2   ;;  %79 = vst [vmem:[#allocation0 + $0x2] ss:$8 sm:$0xf0] %v162_v2  }
   0x7   :  { %83 = vst [vmem:[#allocation0 + $0x3] ss:$8 sm:$0xf] %v163_v3   ;;  %85 = vst [vmem:[#allocation0 + $0x3] ss:$8 sm:$0xf0] %v163_v3  }
   0xe   :  { %v90_v6 = vld [vmem:[#allocation0] sm:$0xf]  ;;  %v95_v7 = vld [vmem:[#allocation0 + $0x8] sm:$0xf]  ;;  %v101_v8 = vld [vmem:[#allocation0 + $0x10] sm:$0xf] }
   0xf   :  { %v91_v10 = vpack.c.bf16 %v170_v9, %v90_v6  ;;  %v96_v11 = vpack.c.bf16 %v170_v9, %v95_v7  ;;  %v102_v12 = vpack.c.bf16 %v170_v9, %v101_v8  ;;  %v108_v13 = vld [vmem:[#allocation0 + $0x18] sm:$0xf]  ;;  %v115_v14 = vld [vmem:[#allocation0 + $0x20] sm:$0xf]  ;;  %v122_v15 = vld [vmem:[#allocation0 + $0x28] sm:$0xf] }
  0x10   :  { %v109_v16 = vpack.c.bf16 %v170_v9, %v108_v13  ;;  %v116_v17 = vpack.c.bf16 %v170_v9, %v115_v14  ;;  %v123_v18 = vpack.c.bf16 %v170_v9, %v122_v15  ;;  %v129_v19 = vld [vmem:[#allocation0 + $0x30] sm:$0xf]  ;;  %v136_v20 = vld [vmem:[#allocation0 + $0x38] sm:$0xf] }
  0x11   :  { %93 = vst [vmem:[%s212_s1] sm:$0x3] %v91_v10  ;;  %153 = vst [vmem:[%s212_s1 + $0x2] sm:$0x3] %v96_v11  ;;  %v130_v21 = vpack.c.bf16 %v170_v9, %v129_v19  ;;  %v137_v22 = vpack.c.bf16 %v170_v9, %v136_v20 }
  0x12   :  { %154 = vst [vmem:[%s212_s1 + $0x4] sm:$0x3] %v102_v12  ;;  %155 = vst [vmem:[%s212_s1 + $0x6] sm:$0x3] %v109_v16 }
  0x13   :  { %156 = vst [vmem:[%s212_s1 + $0x8] sm:$0x3] %v116_v17  ;;  %157 = vst [vmem:[%s212_s1 + $0xa] sm:$0x3] %v123_v18 }
  0x14   :  { %158 = vst [vmem:[%s212_s1 + $0xc] sm:$0x3] %v130_v21  ;;  %159 = vst [vmem:[%s212_s1 + $0xe] sm:$0x3] %v137_v22 }

// kernel: transformer_forward.13
= control target key start
LH: loop header
LB: loop body
LE: loop exit
PB: predicated region body
PF: predicated region fallthrough
CT: control target
= control target key end

     0   :  { %s3773_s24 = smov 0   ;;  %s3775_s25 = smov 0   ;;  %s4537_s0 = inlined_call_operand.vmem [shape: f32[16,512], index: 0, kind: input, shape index: {}]   ;;  %s4538_s1 = inlined_call_operand.vmem [shape: f32[1,512], index: 1, kind: input, shape index: {}]   ;;  %s4539_s2 = inlined_call_operand.vmem [shape: bf16[512,512], index: 2, kind: input, shape index: {}]   ;;  %s4540_s3 = inlined_call_operand.vmem [shape: bf16[512,512], index: 3, kind: input, shape index: {}]   ;;  %s4541_s4 = inlined_call_operand.vmem [shape: bf16[512,512], index: 4, kind: input, shape index: {}]   ;;  %s4542_s5 = inlined_call_operand.vmem [shape: bf16[16,512], index: 5, kind: output, shape index: {0}]   ;;  %s4543_s6 = inlined_call_operand.vmem [shape: bf16[16,512], index: 6, kind: output, shape index: {1}]   ;;  %s4544_s7 = inlined_call_operand.vmem [shape: bf16[16,512], index: 7, kind: output, shape index: {2}]  }
   0x1   :  { %s3777_s26 = smov 0   ;;  %s3779_s27 = smov 0  }
   0x2   :  { %s3781_s28 = smov 0  }
   0x3 LB: > { %s27_s29 = sadd.s32 1, %s3727_s27  ;;  %s3106_s30 = sadd.s32 4294967295, %s3731_s28   ;;  %s3731_s28 = sphi %s3781_s28, %s18_s28   ;;  %s3727_s27 = sphi %s3779_s27, %s4550_s27   ;;  %s3723_s26 = sphi %s3777_s26, %s4549_s26   ;;  %s3719_s25 = sphi %s3775_s25, %s4548_s25   ;;  %s3715_s24 = sphi %s3773_s24, %s4547_s24  }
   0x4   : > { %p28_p0 = scmp.ge.s32.totalorder %s27_s29, 2  ;;  %p91_p1 = scmp.ne.s32.totalorder %s3719_s25, %s3715_s24 }
   0x5   : > { %p92_p2 = scmp.eq.s32.totalorder %s3731_s28, 0  ;;  %p175_p4 = scmp.eq.s32.totalorder %s3106_s30, 1 }
   0x6   : > { %s4552_s29 = smov (%p28_p0, %s27_s29), 0  ;;  %s84_s10 = sadd.s32 1, %s3719_s25 }
   0x7   : > { %p3805_p3 = por %p92_p2, %p91_p1  ;;  %s81_s9 = ssub.s32 %s3727_s27, %s4552_s29 }
   0x8   : > { %p82_p5 = scmp.eq.s32.totalorder %s81_s9, 0  ;;  %p3812_p6 = por %p175_p4, %p91_p1 }
   0x9   : > { %p3110_p7 = scmp.ge.s32.totalorder %s3731_s28, 2 }
   0xa   : > { %s3817_s12 = scalar_select %p82_p5, %s3719_s25, %s84_s10  }
   0xb   : > { %266 = sbr.rel (%p3110_p7) target bundleno = 126 (0x7e), region = 24 }
  0x12   : > { %269 = sbr.rel (!%p3805_p3) target bundleno = 54 (0x36), region = 28  ;;  %s271_s13 = sand.u32 (%p3805_p3), 1, %s3719_s25  }
  0x13   : > { %s3337_s14 = sshll.u32 (%p3805_p3), %s3727_s27, 3  ;;  %s3111_s15 = sshll.u32 (%p3805_p3), %s271_s13, 9 }
  0x14   : > { %s3827_s18 = scalar_lea.vmem (%p3805_p3), %s4539_s2, %s3337_s14  ;;  %s3832_s19 = scalar_lea.vmem (%p3805_p3), [#allocation3], %s3111_s15 }
  0x15   : > { %v430_v0 = vld [vmem:[%s3827_s18] sm:$0xff] (%p3805_p3)  ;;  %v432_v1 = vld [vmem:[%s3827_s18 + $0x10] sm:$0xff] (%p3805_p3) }
  0x16   : > { %v434_v2 = vld [vmem:[%s3827_s18 + $0x20] sm:$0xff] (%p3805_p3)  ;;  %431 = vst [vmem:[%s3832_s19] sm:$0xff] (%p3805_p3), %v430_v0  ;;  %433 = vst [vmem:[%s3832_s19 + $0x8] sm:$0xff] (%p3805_p3), %v432_v1  ;;  %v436_v3 = vld [vmem:[%s3827_s18 + $0x30] sm:$0xff] (%p3805_p3) }
  0x17   : > { %435 = vst [vmem:[%s3832_s19 + $0x10] sm:$0xff] (%p3805_p3), %v434_v2  ;;  %v438_v4 = vld [vmem:[%s3827_s18 + $0x40] sm:$0xff] (%p3805_p3)  ;;  %v440_v5 = vld [vmem:[%s3827_s18 + $0x50] sm:$0xff] (%p3805_p3)  ;;  %437 = vst [vmem:[%s3832_s19 + $0x18] sm:$0xff] (%p3805_p3), %v436_v3 }
  0x18   : > { %439 = vst [vmem:[%s3832_s19 + $0x20] sm:$0xff] (%p3805_p3), %v438_v4  ;;  %441 = vst [vmem:[%s3832_s19 + $0x28] sm:$0xff] (%p3805_p3), %v440_v5  ;;  %v442_v6 = vld [vmem:[%s3827_s18 + $0x60] sm:$0xff] (%p3805_p3)  ;;  %v444_v7 = vld [vmem:[%s3827_s18 + $0x70] sm:$0xff] (%p3805_p3) }
  0x19   : > { %v446_v8 = vld [vmem:[%s3827_s18 + $0x80] sm:$0xff]  ;;  %443 = vst [vmem:[%s3832_s19 + $0x30] sm:$0xff] %v442_v6  ;;  %445 = vst [vmem:[%s3832_s19 + $0x38] sm:$0xff] %v444_v7  ;;  %v448_v9 = vld [vmem:[%s3827_s18 + $0x90] sm:$0xff] }
  0x1a   : > { %447 = vst [vmem:[%s3832_s19 + $0x40] sm:$0xff] %v446_v8  ;;  %v450_v10 = vld [vmem:[%s3827_s18 + $0xa0] sm:$0xff]  ;;  %v452_v11 = vld [vmem:[%s3827_s18 + $0xb0] sm:$0xff]  ;;  %449 = vst [vmem:[%s3832_s19 + $0x48] sm:$0xff] %v448_v9 }
  0x1b   : > { %451 = vst [vmem:[%s3832_s19 + $0x50] sm:$0xff] %v450_v10  ;;  %453 = vst [vmem:[%s3832_s19 + $0x58] sm:$0xff] %v452_v11  ;;  %v454_v12 = vld [vmem:[%s3827_s18 + $0xc0] sm:$0xff]  ;;  %v456_v13 = vld [vmem:[%s3827_s18 + $0xd0] sm:$0xff] }
  0x1c   : > { %v458_v14 = vld [vmem:[%s3827_s18 + $0xe0] sm:$0xff]  ;;  %455 = vst [vmem:[%s3832_s19 + $0x60] sm:$0xff] %v454_v12  ;;  %457 = vst [vmem:[%s3832_s19 + $0x68] sm:$0xff] %v456_v13  ;;  %v460_v15 = vld [vmem:[%s3827_s18 + $0xf0] sm:$0xff] }
  0x1d   : > { %459 = vst [vmem:[%s3832_s19 + $0x70] sm:$0xff] %v458_v14  ;;  %v462_v16 = vld [vmem:[%s3827_s18 + $0x100] sm:$0xff]  ;;  %v464_v17 = vld [vmem:[%s3827_s18 + $0x110] sm:$0xff]  ;;  %461 = vst [vmem:[%s3832_s19 + $0x78] sm:$0xff] %v460_v15 }
  0x1e   : > { %463 = vst [vmem:[%s3832_s19 + $0x80] sm:$0xff] %v462_v16  ;;  %465 = vst [vmem:[%s3832_s19 + $0x88] sm:$0xff] %v464_v17  ;;  %v466_v18 = vld [vmem:[%s3827_s18 + $0x120] sm:$0xff]  ;;  %v468_v19 = vld [vmem:[%s3827_s18 + $0x130] sm:$0xff] }
  0x1f   : > { %v470_v20 = vld [vmem:[%s3827_s18 + $0x140] sm:$0xff]  ;;  %467 = vst [vmem:[%s3832_s19 + $0x90] sm:$0xff] %v466_v18  ;;  %469 = vst [vmem:[%s3832_s19 + $0x98] sm:$0xff] %v468_v19  ;;  %v472_v21 = vld [vmem:[%s3827_s18 + $0x150] sm:$0xff] }
  0x20   : > { %471 = vst [vmem:[%s3832_s19 + $0xa0] sm:$0xff] %v470_v20  ;;  %v474_v22 = vld [vmem:[%s3827_s18 + $0x160] sm:$0xff]  ;;  %v476_v23 = vld [vmem:[%s3827_s18 + $0x170] sm:$0xff]  ;;  %473 = vst [vmem:[%s3832_s19 + $0xa8] sm:$0xff] %v472_v21 }
  0x21   : > { %475 = vst [vmem:[%s3832_s19 + $0xb0] sm:$0xff] %v474_v22  ;;  %477 = vst [vmem:[%s3832_s19 + $0xb8] sm:$0xff] %v476_v23  ;;  %v478_v24 = vld [vmem:[%s3827_s18 + $0x180] sm:$0xff]  ;;  %v480_v25 = vld [vmem:[%s3827_s18 + $0x190] sm:$0xff] }
  0x22   : > { %v482_v26 = vld [vmem:[%s3827_s18 + $0x1a0] sm:$0xff]  ;;  %479 = vst [vmem:[%s3832_s19 + $0xc0] sm:$0xff] %v478_v24  ;;  %481 = vst [vmem:[%s3832_s19 + $0xc8] sm:$0xff] %v480_v25  ;;  %v484_v27 = vld [vmem:[%s3827_s18 + $0x1b0] sm:$0xff] }
  0x23   : > { %483 = vst [vmem:[%s3832_s19 + $0xd0] sm:$0xff] %v482_v26  ;;  %v486_v28 = vld [vmem:[%s3827_s18 + $0x1c0] sm:$0xff]  ;;  %v488_v29 = vld [vmem:[%s3827_s18 + $0x1d0] sm:$0xff]  ;;  %485 = vst [vmem:[%s3832_s19 + $0xd8] sm:$0xff] %v484_v27 }
  0x24   : > { %487 = vst [vmem:[%s3832_s19 + $0xe0] sm:$0xff] %v486_v28  ;;  %489 = vst [vmem:[%s3832_s19 + $0xe8] sm:$0xff] %v488_v29  ;;  %v490_v30 = vld [vmem:[%s3827_s18 + $0x1e0] sm:$0xff]  ;;  %v492_v31 = vld [vmem:[%s3827_s18 + $0x1f0] sm:$0xff] }
  0x25   : > { %v494_v32 = vld [vmem:[%s3827_s18 + $0x200] sm:$0xff]  ;;  %491 = vst [vmem:[%s3832_s19 + $0xf0] sm:$0xff] %v490_v30  ;;  %493 = vst [vmem:[%s3832_s19 + $0xf8] sm:$0xff] %v492_v31  ;;  %v496_v33 = vld [vmem:[%s3827_s18 + $0x210] sm:$0xff] }
  0x26   : > { %495 = vst [vmem:[%s3832_s19 + $0x100] sm:$0xff] %v494_v32  ;;  %v498_v34 = vld [vmem:[%s3827_s18 + $0x220] sm:$0xff]  ;;  %v500_v35 = vld [vmem:[%s3827_s18 + $0x230] sm:$0xff]  ;;  %497 = vst [vmem:[%s3832_s19 + $0x108] sm:$0xff] %v496_v33 }
  0x27   : > { %499 = vst [vmem:[%s3832_s19 + $0x110] sm:$0xff] %v498_v34  ;;  %501 = vst [vmem:[%s3832_s19 + $0x118] sm:$0xff] %v500_v35  ;;  %v502_v36 = vld [vmem:[%s3827_s18 + $0x240] sm:$0xff]  ;;  %v504_v37 = vld [vmem:[%s3827_s18 + $0x250] sm:$0xff] }
  0x28   : > { %v506_v38 = vld [vmem:[%s3827_s18 + $0x260] sm:$0xff]  ;;  %503 = vst [vmem:[%s3832_s19 + $0x120] sm:$0xff] %v502_v36  ;;  %505 = vst [vmem:[%s3832_s19 + $0x128] sm:$0xff] %v504_v37  ;;  %v508_v39 = vld [vmem:[%s3827_s18 + $0x270] sm:$0xff] }
  0x29   : > { %507 = vst [vmem:[%s3832_s19 + $0x130] sm:$0xff] %v506_v38  ;;  %v510_v40 = vld [vmem:[%s3827_s18 + $0x280] sm:$0xff]  ;;  %v512_v41 = vld [vmem:[%s3827_s18 + $0x290] sm:$0xff]  ;;  %509 = vst [vmem:[%s3832_s19 + $0x138] sm:$0xff] %v508_v39 }
  0x2a   : > { %511 = vst [vmem:[%s3832_s19 + $0x140] sm:$0xff] %v510_v40  ;;  %513 = vst [vmem:[%s3832_s19 + $0x148] sm:$0xff] %v512_v41  ;;  %v514_v42 = vld [vmem:[%s3827_s18 + $0x2a0] sm:$0xff]  ;;  %v516_v43 = vld [vmem:[%s3827_s18 + $0x2b0] sm:$0xff] }
  0x2b   : > { %v518_v44 = vld [vmem:[%s3827_s18 + $0x2c0] sm:$0xff]  ;;  %515 = vst [vmem:[%s3832_s19 + $0x150] sm:$0xff] %v514_v42  ;;  %517 = vst [vmem:[%s3832_s19 + $0x158] sm:$0xff] %v516_v43  ;;  %v520_v45 = vld [vmem:[%s3827_s18 + $0x2d0] sm:$0xff] }
  0x2c   : > { %519 = vst [vmem:[%s3832_s19 + $0x160] sm:$0xff] %v518_v44  ;;  %v522_v46 = vld [vmem:[%s3827_s18 + $0x2e0] sm:$0xff]  ;;  %v524_v47 = vld [vmem:[%s3827_s18 + $0x2f0] sm:$0xff]  ;;  %521 = vst [vmem:[%s3832_s19 + $0x168] sm:$0xff] %v520_v45 }
  0x2d   : > { %523 = vst [vmem:[%s3832_s19 + $0x170] sm:$0xff] %v522_v46  ;;  %525 = vst [vmem:[%s3832_s19 + $0x178] sm:$0xff] %v524_v47  ;;  %v526_v48 = vld [vmem:[%s3827_s18 + $0x300] sm:$0xff]  ;;  %v528_v49 = vld [vmem:[%s3827_s18 + $0x310] sm:$0xff] }
  0x2e   : > { %v530_v50 = vld [vmem:[%s3827_s18 + $0x320] sm:$0xff]  ;;  %527 = vst [vmem:[%s3832_s19 + $0x180] sm:$0xff] %v526_v48  ;;  %529 = vst [vmem:[%s3832_s19 + $0x188] sm:$0xff] %v528_v49  ;;  %v532_v51 = vld [vmem:[%s3827_s18 + $0x330] sm:$0xff] }
  0x2f   : > { %531 = vst [vmem:[%s3832_s19 + $0x190] sm:$0xff] %v530_v50  ;;  %v534_v52 = vld [vmem:[%s3827_s18 + $0x340] sm:$0xff]  ;;  %v536_v53 = vld [vmem:[%s3827_s18 + $0x350] sm:$0xff]  ;;  %533 = vst [vmem:[%s3832_s19 + $0x198] sm:$0xff] %v532_v51 }
  0x30   : > { %535 = vst [vmem:[%s3832_s19 + $0x1a0] sm:$0xff] %v534_v52  ;;  %537 = vst [vmem:[%s3832_s19 + $0x1a8] sm:$0xff] %v536_v53  ;;  %v538_v54 = vld [vmem:[%s3827_s18 + $0x360] sm:$0xff]  ;;  %v540_v55 = vld [vmem:[%s3827_s18 + $0x370] sm:$0xff] }
  0x31   : > { %v542_v56 = vld [vmem:[%s3827_s18 + $0x380] sm:$0xff]  ;;  %539 = vst [vmem:[%s3832_s19 + $0x1b0] sm:$0xff] %v538_v54  ;;  %541 = vst [vmem:[%s3832_s19 + $0x1b8] sm:$0xff] %v540_v55  ;;  %v544_v57 = vld [vmem:[%s3827_s18 + $0x390] sm:$0xff] }
  0x32   : > { %543 = vst [vmem:[%s3832_s19 + $0x1c0] sm:$0xff] %v542_v56  ;;  %v546_v58 = vld [vmem:[%s3827_s18 + $0x3a0] sm:$0xff]  ;;  %v548_v59 = vld [vmem:[%s3827_s18 + $0x3b0] sm:$0xff]  ;;  %545 = vst [vmem:[%s3832_s19 + $0x1c8] sm:$0xff] %v544_v57 }
  0x33   : > { %547 = vst [vmem:[%s3832_s19 + $0x1d0] sm:$0xff] %v546_v58  ;;  %549 = vst [vmem:[%s3832_s19 + $0x1d8] sm:$0xff] %v548_v59  ;;  %v550_v60 = vld [vmem:[%s3827_s18 + $0x3c0] sm:$0xff]  ;;  %v552_v61 = vld [vmem:[%s3827_s18 + $0x3d0] sm:$0xff] }
  0x34   : > { %v554_v62 = vld [vmem:[%s3827_s18 + $0x3e0] sm:$0xff]  ;;  %551 = vst [vmem:[%s3832_s19 + $0x1e0] sm:$0xff] %v550_v60  ;;  %553 = vst [vmem:[%s3832_s19 + $0x1e8] sm:$0xff] %v552_v61  ;;  %v556_v63 = vld [vmem:[%s3827_s18 + $0x3f0] sm:$0xff] }
  0x35   : > { %555 = vst [vmem:[%s3832_s19 + $0x1f0] sm:$0xff] %v554_v62  ;;  %557 = vst [vmem:[%s3832_s19 + $0x1f8] sm:$0xff] %v556_v63 }
  0x36 PF: > { %563 = sbr.rel (!%p3805_p3) target bundleno = 90 (0x5a), region = 66  ;;  %s565_s20 = sand.u32 (%p3805_p3), 1, %s3719_s25  }
  0x37   : > { %s3338_s21 = sshll.u32 (%p3805_p3), %s3727_s27, 3  ;;  %s3114_s22 = sshll.u32 (%p3805_p3), %s565_s20, 9 }
  0x38   : > { %s3966_s9 = scalar_lea.vmem (%p3805_p3), %s4540_s3, %s3338_s21  ;;  %s3971_s10 = scalar_lea.vmem (%p3805_p3), [#allocation4], %s3114_s22 }
  0x39   : > { %v724_v0 = vld [vmem:[%s3966_s9] sm:$0xff] (%p3805_p3)  ;;  %v726_v1 = vld [vmem:[%s3966_s9 + $0x10] sm:$0xff] (%p3805_p3) }
  0x3a   : > { %v728_v2 = vld [vmem:[%s3966_s9 + $0x20] sm:$0xff] (%p3805_p3)  ;;  %725 = vst [vmem:[%s3971_s10] sm:$0xff] (%p3805_p3), %v724_v0  ;;  %727 = vst [vmem:[%s3971_s10 + $0x8] sm:$0xff] (%p3805_p3), %v726_v1  ;;  %v730_v3 = vld [vmem:[%s3966_s9 + $0x30] sm:$0xff] (%p3805_p3) }
  0x3b   : > { %729 = vst [vmem:[%s3971_s10 + $0x10] sm:$0xff] (%p3805_p3), %v728_v2  ;;  %v732_v4 = vld [vmem:[%s3966_s9 + $0x40] sm:$0xff] (%p3805_p3)  ;;  %v734_v5 = vld [vmem:[%s3966_s9 + $0x50] sm:$0xff] (%p3805_p3)  ;;  %731 = vst [vmem:[%s3971_s10 + $0x18] sm:$0xff] (%p3805_p3), %v730_v3 }
  0x3c   : > { %733 = vst [vmem:[%s3971_s10 + $0x20] sm:$0xff] (%p3805_p3), %v732_v4  ;;  %735 = vst [vmem:[%s3971_s10 + $0x28] sm:$0xff] (%p3805_p3), %v734_v5  ;;  %v736_v6 = vld [vmem:[%s3966_s9 + $0x60] sm:$0xff] (%p3805_p3)  ;;  %v738_v7 = vld [vmem:[%s3966_s9 + $0x70] sm:$0xff] (%p3805_p3) }
  0x3d   : > { %v740_v8 = vld [vmem:[%s3966_s9 + $0x80] sm:$0xff]  ;;  %737 = vst [vmem:[%s3971_s10 + $0x30] sm:$0xff] %v736_v6  ;;  %739 = vst [vmem:[%s3971_s10 + $0x38] sm:$0xff] %v738_v7  ;;  %v742_v9 = vld [vmem:[%s3966_s9 + $0x90] sm:$0xff] }
  0x3e   : > { %741 = vst [vmem:[%s3971_s10 + $0x40] sm:$0xff] %v740_v8  ;;  %v744_v10 = vld [vmem:[%s3966_s9 + $0xa0] sm:$0xff]  ;;  %v746_v11 = vld [vmem:[%s3966_s9 + $0xb0] sm:$0xff]  ;;  %743 = vst [vmem:[%s3971_s10 + $0x48] sm:$0xff] %v742_v9 }
  0x3f   : > { %745 = vst [vmem:[%s3971_s10 + $0x50] sm:$0xff] %v744_v10  ;;  %747 = vst [vmem:[%s3971_s10 + $0x58] sm:$0xff] %v746_v11  ;;  %v748_v12 = vld [vmem:[%s3966_s9 + $0xc0] sm:$0xff]  ;;  %v750_v13 = vld [vmem:[%s3966_s9 + $0xd0] sm:$0xff] }
  0x40   : > { %v752_v14 = vld [vmem:[%s3966_s9 + $0xe0] sm:$0xff]  ;;  %749 = vst [vmem:[%s3971_s10 + $0x60] sm:$0xff] %v748_v12  ;;  %751 = vst [vmem:[%s3971_s10 + $0x68] sm:$0xff] %v750_v13  ;;  %v754_v15 = vld [vmem:[%s3966_s9 + $0xf0] sm:$0xff] }
  0x41   : > { %753 = vst [vmem:[%s3971_s10 + $0x70] sm:$0xff] %v752_v14  ;;  %v756_v16 = vld [vmem:[%s3966_s9 + $0x100] sm:$0xff]  ;;  %v758_v17 = vld [vmem:[%s3966_s9 + $0x110] sm:$0xff]  ;;  %755 = vst [vmem:[%s3971_s10 + $0x78] sm:$0xff] %v754_v15 }
  0x42   : > { %757 = vst [vmem:[%s3971_s10 + $0x80] sm:$0xff] %v756_v16  ;;  %759 = vst [vmem:[%s3971_s10 + $0x88] sm:$0xff] %v758_v17  ;;  %v760_v18 = vld [vmem:[%s3966_s9 + $0x120] sm:$0xff]  ;;  %v762_v19 = vld [vmem:[%s3966_s9 + $0x130] sm:$0xff] }
  0x43   : > { %v764_v20 = vld [vmem:[%s3966_s9 + $0x140] sm:$0xff]  ;;  %761 = vst [vmem:[%s3971_s10 + $0x90] sm:$0xff] %v760_v18  ;;  %763 = vst [vmem:[%s3971_s10 + $0x98] sm:$0xff] %v762_v19  ;;  %v766_v21 = vld [vmem:[%s3966_s9 + $0x150] sm:$0xff] }
  0x44   : > { %765 = vst [vmem:[%s3971_s10 + $0xa0] sm:$0xff] %v764_v20  ;;  %v768_v22 = vld [vmem:[%s3966_s9 + $0x160] sm:$0xff]  ;;  %v770_v23 = vld [vmem:[%s3966_s9 + $0x170] sm:$0xff]  ;;  %767 = vst [vmem:[%s3971_s10 + $0xa8] sm:$0xff] %v766_v21 }
  0x45   : > { %769 = vst [vmem:[%s3971_s10 + $0xb0] sm:$0xff] %v768_v22  ;;  %771 = vst [vmem:[%s3971_s10 + $0xb8] sm:$0xff] %v770_v23  ;;  %v772_v24 = vld [vmem:[%s3966_s9 + $0x180] sm:$0xff]  ;;  %v774_v25 = vld [vmem:[%s3966_s9 + $0x190] sm:$0xff] }
  0x46   : > { %v776_v26 = vld [vmem:[%s3966_s9 + $0x1a0] sm:$0xff]  ;;  %773 = vst [vmem:[%s3971_s10 + $0xc0] sm:$0xff] %v772_v24  ;;  %775 = vst [vmem:[%s3971_s10 + $0xc8] sm:$0xff] %v774_v25  ;;  %v778_v27 = vld [vmem:[%s3966_s9 + $0x1b0] sm:$0xff] }
  0x47   : > { %777 = vst [vmem:[%s3971_s10 + $0xd0] sm:$0xff] %v776_v26  ;;  %v780_v28 = vld [vmem:[%s3966_s9 + $0x1c0] sm:$0xff]  ;;  %v782_v29 = vld [vmem:[%s3966_s9 + $0x1d0] sm:$0xff]  ;;  %779 = vst [vmem:[%s3971_s10 + $0xd8] sm:$0xff] %v778_v27 }
  0x48   : > { %781 = vst [vmem:[%s3971_s10 + $0xe0] sm:$0xff] %v780_v28  ;;  %783 = vst [vmem:[%s3971_s10 + $0xe8] sm:$0xff] %v782_v29  ;;  %v784_v30 = vld [vmem:[%s3966_s9 + $0x1e0] sm:$0xff]  ;;  %v786_v31 = vld [vmem:[%s3966_s9 + $0x1f0] sm:$0xff] }
  0x49   : > { %v788_v32 = vld [vmem:[%s3966_s9 + $0x200] sm:$0xff]  ;;  %785 = vst [vmem:[%s3971_s10 + $0xf0] sm:$0xff] %v784_v30  ;;  %787 = vst [vmem:[%s3971_s10 + $0xf8] sm:$0xff] %v786_v31  ;;  %v790_v33 = vld [vmem:[%s3966_s9 + $0x210] sm:$0xff] }
  0x4a   : > { %789 = vst [vmem:[%s3971_s10 + $0x100] sm:$0xff] %v788_v32  ;;  %v792_v34 = vld [vmem:[%s3966_s9 + $0x220] sm:$0xff]  ;;  %v794_v35 = vld [vmem:[%s3966_s9 + $0x230] sm:$0xff]  ;;  %791 = vst [vmem:[%s3971_s10 + $0x108] sm:$0xff] %v790_v33 }
  0x4b   : > { %793 = vst [vmem:[%s3971_s10 + $0x110] sm:$0xff] %v792_v34  ;;  %795 = vst [vmem:[%s3971_s10 + $0x118] sm:$0xff] %v794_v35  ;;  %v796_v36 = vld [vmem:[%s3966_s9 + $0x240] sm:$0xff]  ;;  %v798_v37 = vld [vmem:[%s3966_s9 + $0x250] sm:$0xff] }
  0x4c   : > { %v800_v38 = vld [vmem:[%s3966_s9 + $0x260] sm:$0xff]  ;;  %797 = vst [vmem:[%s3971_s10 + $0x120] sm:$0xff] %v796_v36  ;;  %799 = vst [vmem:[%s3971_s10 + $0x128] sm:$0xff] %v798_v37  ;;  %v802_v39 = vld [vmem:[%s3966_s9 + $0x270] sm:$0xff] }
  0x4d   : > { %801 = vst [vmem:[%s3971_s10 + $0x130] sm:$0xff] %v800_v38  ;;  %v804_v40 = vld [vmem:[%s3966_s9 + $0x280] sm:$0xff]  ;;  %v806_v41 = vld [vmem:[%s3966_s9 + $0x290] sm:$0xff]  ;;  %803 = vst [vmem:[%s3971_s10 + $0x138] sm:$0xff] %v802_v39 }
  0x4e   : > { %805 = vst [vmem:[%s3971_s10 + $0x140] sm:$0xff] %v804_v40  ;;  %807 = vst [vmem:[%s3971_s10 + $0x148] sm:$0xff] %v806_v41  ;;  %v808_v42 = vld [vmem:[%s3966_s9 + $0x2a0] sm:$0xff]  ;;  %v810_v43 = vld [vmem:[%s3966_s9 + $0x2b0] sm:$0xff] }
  0x4f   : > { %v812_v44 = vld [vmem:[%s3966_s9 + $0x2c0] sm:$0xff]  ;;  %809 = vst [vmem:[%s3971_s10 + $0x150] sm:$0xff] %v808_v42  ;;  %811 = vst [vmem:[%s3971_s10 + $0x158] sm:$0xff] %v810_v43  ;;  %v814_v45 = vld [vmem:[%s3966_s9 + $0x2d0] sm:$0xff] }
  0x50   : > { %813 = vst [vmem:[%s3971_s10 + $0x160] sm:$0xff] %v812_v44  ;;  %v816_v46 = vld [vmem:[%s3966_s9 + $0x2e0] sm:$0xff]  ;;  %v818_v47 = vld [vmem:[%s3966_s9 + $0x2f0] sm:$0xff]  ;;  %815 = vst [vmem:[%s3971_s10 + $0x168] sm:$0xff] %v814_v45 }
  0x51   : > { %817 = vst [vmem:[%s3971_s10 + $0x170] sm:$0xff] %v816_v46  ;;  %819 = vst [vmem:[%s3971_s10 + $0x178] sm:$0xff] %v818_v47  ;;  %v820_v48 = vld [vmem:[%s3966_s9 + $0x300] sm:$0xff]  ;;  %v822_v49 = vld [vmem:[%s3966_s9 + $0x310] sm:$0xff] }
  0x52   : > { %v824_v50 = vld [vmem:[%s3966_s9 + $0x320] sm:$0xff]  ;;  %821 = vst [vmem:[%s3971_s10 + $0x180] sm:$0xff] %v820_v48  ;;  %823 = vst [vmem:[%s3971_s10 + $0x188] sm:$0xff] %v822_v49  ;;  %v826_v51 = vld [vmem:[%s3966_s9 + $0x330] sm:$0xff] }
  0x53   : > { %825 = vst [vmem:[%s3971_s10 + $0x190] sm:$0xff] %v824_v50  ;;  %v828_v52 = vld [vmem:[%s3966_s9 + $0x340] sm:$0xff]  ;;  %v830_v53 = vld [vmem:[%s3966_s9 + $0x350] sm:$0xff]  ;;  %827 = vst [vmem:[%s3971_s10 + $0x198] sm:$0xff] %v826_v51 }
  0x54   : > { %829 = vst [vmem:[%s3971_s10 + $0x1a0] sm:$0xff] %v828_v52  ;;  %831 = vst [vmem:[%s3971_s10 + $0x1a8] sm:$0xff] %v830_v53  ;;  %v832_v54 = vld [vmem:[%s3966_s9 + $0x360] sm:$0xff]  ;;  %v834_v55 = vld [vmem:[%s3966_s9 + $0x370] sm:$0xff] }
  0x55   : > { %v836_v56 = vld [vmem:[%s3966_s9 + $0x380] sm:$0xff]  ;;  %833 = vst [vmem:[%s3971_s10 + $0x1b0] sm:$0xff] %v832_v54  ;;  %835 = vst [vmem:[%s3971_s10 + $0x1b8] sm:$0xff] %v834_v55  ;;  %v838_v57 = vld [vmem:[%s3966_s9 + $0x390] sm:$0xff] }
  0x56   : > { %837 = vst [vmem:[%s3971_s10 + $0x1c0] sm:$0xff] %v836_v56  ;;  %v840_v58 = vld [vmem:[%s3966_s9 + $0x3a0] sm:$0xff]  ;;  %v842_v59 = vld [vmem:[%s3966_s9 + $0x3b0] sm:$0xff]  ;;  %839 = vst [vmem:[%s3971_s10 + $0x1c8] sm:$0xff] %v838_v57 }
  0x57   : > { %841 = vst [vmem:[%s3971_s10 + $0x1d0] sm:$0xff] %v840_v58  ;;  %843 = vst [vmem:[%s3971_s10 + $0x1d8] sm:$0xff] %v842_v59  ;;  %v844_v60 = vld [vmem:[%s3966_s9 + $0x3c0] sm:$0xff]  ;;  %v846_v61 = vld [vmem:[%s3966_s9 + $0x3d0] sm:$0xff] }
  0x58   : > { %v848_v62 = vld [vmem:[%s3966_s9 + $0x3e0] sm:$0xff]  ;;  %845 = vst [vmem:[%s3971_s10 + $0x1e0] sm:$0xff] %v844_v60  ;;  %847 = vst [vmem:[%s3971_s10 + $0x1e8] sm:$0xff] %v846_v61  ;;  %v850_v63 = vld [vmem:[%s3966_s9 + $0x3f0] sm:$0xff] }
  0x59   : > { %849 = vst [vmem:[%s3971_s10 + $0x1f0] sm:$0xff] %v848_v62  ;;  %851 = vst [vmem:[%s3971_s10 + $0x1f8] sm:$0xff] %v850_v63 }
  0x5a PF: > { %857 = sbr.rel (!%p3805_p3) target bundleno = 126 (0x7e), region = 104  ;;  %s859_s13 = sand.u32 (%p3805_p3), 1, %s3719_s25  }
  0x5b   : > { %s3339_s14 = sshll.u32 (%p3805_p3), %s3727_s27, 3  ;;  %s3117_s15 = sshll.u32 (%p3805_p3), %s859_s13, 9 }
  0x5c   : > { %s4105_s18 = scalar_lea.vmem (%p3805_p3), %s4541_s4, %s3339_s14  ;;  %s4110_s8 = scalar_lea.vmem (%p3805_p3), [#allocation5], %s3117_s15 }
  0x5d   : > { %v1018_v0 = vld [vmem:[%s4105_s18] sm:$0xff] (%p3805_p3)  ;;  %v1020_v1 = vld [vmem:[%s4105_s18 + $0x10] sm:$0xff] (%p3805_p3) }
  0x5e   : > { %v1022_v2 = vld [vmem:[%s4105_s18 + $0x20] sm:$0xff] (%p3805_p3)  ;;  %1019 = vst [vmem:[%s4110_s8] sm:$0xff] (%p3805_p3), %v1018_v0  ;;  %1021 = vst [vmem:[%s4110_s8 + $0x8] sm:$0xff] (%p3805_p3), %v1020_v1  ;;  %v1024_v3 = vld [vmem:[%s4105_s18 + $0x30] sm:$0xff] (%p3805_p3) }
  0x5f   : > { %1023 = vst [vmem:[%s4110_s8 + $0x10] sm:$0xff] (%p3805_p3), %v1022_v2  ;;  %v1026_v4 = vld [vmem:[%s4105_s18 + $0x40] sm:$0xff] (%p3805_p3)  ;;  %v1028_v5 = vld [vmem:[%s4105_s18 + $0x50] sm:$0xff] (%p3805_p3)  ;;  %1025 = vst [vmem:[%s4110_s8 + $0x18] sm:$0xff] (%p3805_p3), %v1024_v3 }
  0x60   : > { %1027 = vst [vmem:[%s4110_s8 + $0x20] sm:$0xff] (%p3805_p3), %v1026_v4  ;;  %1029 = vst [vmem:[%s4110_s8 + $0x28] sm:$0xff] (%p3805_p3), %v1028_v5  ;;  %v1030_v6 = vld [vmem:[%s4105_s18 + $0x60] sm:$0xff] (%p3805_p3)  ;;  %v1032_v7 = vld [vmem:[%s4105_s18 + $0x70] sm:$0xff] (%p3805_p3) }
  0x61   : > { %v1034_v8 = vld [vmem:[%s4105_s18 + $0x80] sm:$0xff]  ;;  %1031 = vst [vmem:[%s4110_s8 + $0x30] sm:$0xff] %v1030_v6  ;;  %1033 = vst [vmem:[%s4110_s8 + $0x38] sm:$0xff] %v1032_v7  ;;  %v1036_v9 = vld [vmem:[%s4105_s18 + $0x90] sm:$0xff] }
  0x62   : > { %1035 = vst [vmem:[%s4110_s8 + $0x40] sm:$0xff] %v1034_v8  ;;  %v1038_v10 = vld [vmem:[%s4105_s18 + $0xa0] sm:$0xff]  ;;  %v1040_v11 = vld [vmem:[%s4105_s18 + $0xb0] sm:$0xff]  ;;  %1037 = vst [vmem:[%s4110_s8 + $0x48] sm:$0xff] %v1036_v9 }
  0x63   : > { %1039 = vst [vmem:[%s4110_s8 + $0x50] sm:$0xff] %v1038_v10  ;;  %1041 = vst [vmem:[%s4110_s8 + $0x58] sm:$0xff] %v1040_v11  ;;  %v1042_v12 = vld [vmem:[%s4105_s18 + $0xc0] sm:$0xff]  ;;  %v1044_v13 = vld [vmem:[%s4105_s18 + $0xd0] sm:$0xff] }
  0x64   : > { %v1046_v14 = vld [vmem:[%s4105_s18 + $0xe0] sm:$0xff]  ;;  %1043 = vst [vmem:[%s4110_s8 + $0x60] sm:$0xff] %v1042_v12  ;;  %1045 = vst [vmem:[%s4110_s8 + $0x68] sm:$0xff] %v1044_v13  ;;  %v1048_v15 = vld [vmem:[%s4105_s18 + $0xf0] sm:$0xff] }
  0x65   : > { %1047 = vst [vmem:[%s4110_s8 + $0x70] sm:$0xff] %v1046_v14  ;;  %v1050_v16 = vld [vmem:[%s4105_s18 + $0x100] sm:$0xff]  ;;  %v1052_v17 = vld [vmem:[%s4105_s18 + $0x110] sm:$0xff]  ;;  %1049 = vst [vmem:[%s4110_s8 + $0x78] sm:$0xff] %v1048_v15 }
  0x66   : > { %1051 = vst [vmem:[%s4110_s8 + $0x80] sm:$0xff] %v1050_v16  ;;  %1053 = vst [vmem:[%s4110_s8 + $0x88] sm:$0xff] %v1052_v17  ;;  %v1054_v18 = vld [vmem:[%s4105_s18 + $0x120] sm:$0xff]  ;;  %v1056_v19 = vld [vmem:[%s4105_s18 + $0x130] sm:$0xff] }
  0x67   : > { %v1058_v20 = vld [vmem:[%s4105_s18 + $0x140] sm:$0xff]  ;;  %1055 = vst [vmem:[%s4110_s8 + $0x90] sm:$0xff] %v1054_v18  ;;  %1057 = vst [vmem:[%s4110_s8 + $0x98] sm:$0xff] %v1056_v19  ;;  %v1060_v21 = vld [vmem:[%s4105_s18 + $0x150] sm:$0xff] }
  0x68   : > { %1059 = vst [vmem:[%s4110_s8 + $0xa0] sm:$0xff] %v1058_v20  ;;  %v1062_v22 = vld [vmem:[%s4105_s18 + $0x160] sm:$0xff]  ;;  %v1064_v23 = vld [vmem:[%s4105_s18 + $0x170] sm:$0xff]  ;;  %1061 = vst [vmem:[%s4110_s8 + $0xa8] sm:$0xff] %v1060_v21 }
  0x69   : > { %1063 = vst [vmem:[%s4110_s8 + $0xb0] sm:$0xff] %v1062_v22  ;;  %1065 = vst [vmem:[%s4110_s8 + $0xb8] sm:$0xff] %v1064_v23  ;;  %v1066_v24 = vld [vmem:[%s4105_s18 + $0x180] sm:$0xff]  ;;  %v1068_v25 = vld [vmem:[%s4105_s18 + $0x190] sm:$0xff] }
  0x6a   : > { %v1070_v26 = vld [vmem:[%s4105_s18 + $0x1a0] sm:$0xff]  ;;  %1067 = vst [vmem:[%s4110_s8 + $0xc0] sm:$0xff] %v1066_v24  ;;  %1069 = vst [vmem:[%s4110_s8 + $0xc8] sm:$0xff] %v1068_v25  ;;  %v1072_v27 = vld [vmem:[%s4105_s18 + $0x1b0] sm:$0xff] }
  0x6b   : > { %1071 = vst [vmem:[%s4110_s8 + $0xd0] sm:$0xff] %v1070_v26  ;;  %v1074_v28 = vld [vmem:[%s4105_s18 + $0x1c0] sm:$0xff]  ;;  %v1076_v29 = vld [vmem:[%s4105_s18 + $0x1d0] sm:$0xff]  ;;  %1073 = vst [vmem:[%s4110_s8 + $0xd8] sm:$0xff] %v1072_v27 }
  0x6c   : > { %1075 = vst [vmem:[%s4110_s8 + $0xe0] sm:$0xff] %v1074_v28  ;;  %1077 = vst [vmem:[%s4110_s8 + $0xe8] sm:$0xff] %v1076_v29  ;;  %v1078_v30 = vld [vmem:[%s4105_s18 + $0x1e0] sm:$0xff]  ;;  %v1080_v31 = vld [vmem:[%s4105_s18 + $0x1f0] sm:$0xff] }
  0x6d   : > { %v1082_v32 = vld [vmem:[%s4105_s18 + $0x200] sm:$0xff]  ;;  %1079 = vst [vmem:[%s4110_s8 + $0xf0] sm:$0xff] %v1078_v30  ;;  %1081 = vst [vmem:[%s4110_s8 + $0xf8] sm:$0xff] %v1080_v31  ;;  %v1084_v33 = vld [vmem:[%s4105_s18 + $0x210] sm:$0xff] }
  0x6e   : > { %1083 = vst [vmem:[%s4110_s8 + $0x100] sm:$0xff] %v1082_v32  ;;  %v1086_v34 = vld [vmem:[%s4105_s18 + $0x220] sm:$0xff]  ;;  %v1088_v35 = vld [vmem:[%s4105_s18 + $0x230] sm:$0xff]  ;;  %1085 = vst [vmem:[%s4110_s8 + $0x108] sm:$0xff] %v1084_v33 }
  0x6f   : > { %1087 = vst [vmem:[%s4110_s8 + $0x110] sm:$0xff] %v1086_v34  ;;  %1089 = vst [vmem:[%s4110_s8 + $0x118] sm:$0xff] %v1088_v35  ;;  %v1090_v36 = vld [vmem:[%s4105_s18 + $0x240] sm:$0xff]  ;;  %v1092_v37 = vld [vmem:[%s4105_s18 + $0x250] sm:$0xff] }
  0x70   : > { %v1094_v38 = vld [vmem:[%s4105_s18 + $0x260] sm:$0xff]  ;;  %1091 = vst [vmem:[%s4110_s8 + $0x120] sm:$0xff] %v1090_v36  ;;  %1093 = vst [vmem:[%s4110_s8 + $0x128] sm:$0xff] %v1092_v37  ;;  %v1096_v39 = vld [vmem:[%s4105_s18 + $0x270] sm:$0xff] }
  0x71   : > { %1095 = vst [vmem:[%s4110_s8 + $0x130] sm:$0xff] %v1094_v38  ;;  %v1098_v40 = vld [vmem:[%s4105_s18 + $0x280] sm:$0xff]  ;;  %v1100_v41 = vld [vmem:[%s4105_s18 + $0x290] sm:$0xff]  ;;  %1097 = vst [vmem:[%s4110_s8 + $0x138] sm:$0xff] %v1096_v39 }
  0x72   : > { %1099 = vst [vmem:[%s4110_s8 + $0x140] sm:$0xff] %v1098_v40  ;;  %1101 = vst [vmem:[%s4110_s8 + $0x148] sm:$0xff] %v1100_v41  ;;  %v1102_v42 = vld [vmem:[%s4105_s18 + $0x2a0] sm:$0xff]  ;;  %v1104_v43 = vld [vmem:[%s4105_s18 + $0x2b0] sm:$0xff] }
  0x73   : > { %v1106_v44 = vld [vmem:[%s4105_s18 + $0x2c0] sm:$0xff]  ;;  %1103 = vst [vmem:[%s4110_s8 + $0x150] sm:$0xff] %v1102_v42  ;;  %1105 = vst [vmem:[%s4110_s8 + $0x158] sm:$0xff] %v1104_v43  ;;  %v1108_v45 = vld [vmem:[%s4105_s18 + $0x2d0] sm:$0xff] }
  0x74   : > { %1107 = vst [vmem:[%s4110_s8 + $0x160] sm:$0xff] %v1106_v44  ;;  %v1110_v46 = vld [vmem:[%s4105_s18 + $0x2e0] sm:$0xff]  ;;  %v1112_v47 = vld [vmem:[%s4105_s18 + $0x2f0] sm:$0xff]  ;;  %1109 = vst [vmem:[%s4110_s8 + $0x168] sm:$0xff] %v1108_v45 }
  0x75   : > { %1111 = vst [vmem:[%s4110_s8 + $0x170] sm:$0xff] %v1110_v46  ;;  %1113 = vst [vmem:[%s4110_s8 + $0x178] sm:$0xff] %v1112_v47  ;;  %v1114_v48 = vld [vmem:[%s4105_s18 + $0x300] sm:$0xff]  ;;  %v1116_v49 = vld [vmem:[%s4105_s18 + $0x310] sm:$0xff] }
  0x76   : > { %v1118_v50 = vld [vmem:[%s4105_s18 + $0x320] sm:$0xff]  ;;  %1115 = vst [vmem:[%s4110_s8 + $0x180] sm:$0xff] %v1114_v48  ;;  %1117 = vst [vmem:[%s4110_s8 + $0x188] sm:$0xff] %v1116_v49  ;;  %v1120_v51 = vld [vmem:[%s4105_s18 + $0x330] sm:$0xff] }
  0x77   : > { %1119 = vst [vmem:[%s4110_s8 + $0x190] sm:$0xff] %v1118_v50  ;;  %v1122_v52 = vld [vmem:[%s4105_s18 + $0x340] sm:$0xff]  ;;  %v1124_v53 = vld [vmem:[%s4105_s18 + $0x350] sm:$0xff]  ;;  %1121 = vst [vmem:[%s4110_s8 + $0x198] sm:$0xff] %v1120_v51 }
  0x78   : > { %1123 = vst [vmem:[%s4110_s8 + $0x1a0] sm:$0xff] %v1122_v52  ;;  %1125 = vst [vmem:[%s4110_s8 + $0x1a8] sm:$0xff] %v1124_v53  ;;  %v1126_v54 = vld [vmem:[%s4105_s18 + $0x360] sm:$0xff]  ;;  %v1128_v55 = vld [vmem:[%s4105_s18 + $0x370] sm:$0xff] }
  0x79   : > { %v1130_v56 = vld [vmem:[%s4105_s18 + $0x380] sm:$0xff]  ;;  %1127 = vst [vmem:[%s4110_s8 + $0x1b0] sm:$0xff] %v1126_v54  ;;  %1129 = vst [vmem:[%s4110_s8 + $0x1b8] sm:$0xff] %v1128_v55  ;;  %v1132_v57 = vld [vmem:[%s4105_s18 + $0x390] sm:$0xff] }
  0x7a   : > { %1131 = vst [vmem:[%s4110_s8 + $0x1c0] sm:$0xff] %v1130_v56  ;;  %v1134_v58 = vld [vmem:[%s4105_s18 + $0x3a0] sm:$0xff]  ;;  %v1136_v59 = vld [vmem:[%s4105_s18 + $0x3b0] sm:$0xff]  ;;  %1133 = vst [vmem:[%s4110_s8 + $0x1c8] sm:$0xff] %v1132_v57 }
  0x7b   : > { %1135 = vst [vmem:[%s4110_s8 + $0x1d0] sm:$0xff] %v1134_v58  ;;  %1137 = vst [vmem:[%s4110_s8 + $0x1d8] sm:$0xff] %v1136_v59  ;;  %v1138_v60 = vld [vmem:[%s4105_s18 + $0x3c0] sm:$0xff]  ;;  %v1140_v61 = vld [vmem:[%s4105_s18 + $0x3d0] sm:$0xff] }
  0x7c   : > { %v1142_v62 = vld [vmem:[%s4105_s18 + $0x3e0] sm:$0xff]  ;;  %1139 = vst [vmem:[%s4110_s8 + $0x1e0] sm:$0xff] %v1138_v60  ;;  %1141 = vst [vmem:[%s4110_s8 + $0x1e8] sm:$0xff] %v1140_v61  ;;  %v1144_v63 = vld [vmem:[%s4105_s18 + $0x3f0] sm:$0xff] }
  0x7d   : > { %1143 = vst [vmem:[%s4110_s8 + $0x1f0] sm:$0xff] %v1142_v62  ;;  %1145 = vst [vmem:[%s4110_s8 + $0x1f8] sm:$0xff] %v1144_v63 }
  0x7e PF: > { %p3120_p8 = scmp.ge.s32.totalorder %s3731_s28, 1  ;;  %p1150_p9 = scmp.lt.s32.totalorder %s3731_s28, 3 }
  0x80   : > { %p1151_p10 = pnand %p3120_p8, %p1150_p9 }
  0x81   : > { %s1157_s19 = sand.u32 (!%p1151_p10), 1, %s3715_s24   ;;  %p3127_p11 = scmp.ne.s32.totalorder (!%p1151_p10), %s3723_s26, 0 }
  0x82   : > { %1154 = sbr.rel (%p1151_p10) target bundleno = 741 (0x2e5), region = 142  ;;  %s3121_s20 = sshll.u32 (!%p1151_p10), %s1157_s19, 9 }
  0x83   : > { %s3124_s21 = sshll.u32 (!%p1151_p10), %s1157_s19, 4  ;;  %s4240_s22 = scalar_lea.vmem (!%p1151_p10), [#allocation3], %s3121_s20 }
  0x84   : > { %s4242_s23 = scalar_lea.vmem (!%p1151_p10), [#allocation4], %s3121_s20  ;;  %s4244_s30 = scalar_lea.vmem (!%p1151_p10), [#allocation5], %s3121_s20 }
  0x85   : > { %s4246_s9 = scalar_lea.vmem (!%p1151_p10), [#allocation6], %s3124_s21  ;;  %s4248_s10 = scalar_lea.vmem (!%p1151_p10), [#allocation7], %s3124_s21 }
  0x86   : > { %s4250_s13 = scalar_lea.vmem (!%p1151_p10), [#allocation8], %s3124_s21 }
  0x89   : > { %1242 = sbr.rel (%p3127_p11) target bundleno = 315 (0x13b), region = 158  ;;  %v1243_v0 = vld [vmem:[%s4537_s0] sm:$0xff] (!%p3127_p11)  ;;  %v1244_v1 = vld [vmem:[%s4537_s0 + $0x8] sm:$0xff] (!%p3127_p11)  ;;  %v1245_v2 = vld [vmem:[%s4537_s0 + $0x10] sm:$0xff] (!%p3127_p11)  ;;  %v1286_v25 = vlaneseq (!%p3127_p11) }
  0x8a   : > { %v1246_v3 = vld [vmem:[%s4537_s0 + $0x18] sm:$0xff] (!%p3127_p11)  ;;  %v1251_v4 = vmul.f32 (!%p3127_p11), %v1243_v0, %v1243_v0  ;;  %v1252_v5 = vmul.f32 (!%p3127_p11), %v1244_v1, %v1244_v1  ;;  %v1253_v6 = vmul.f32 (!%p3127_p11), %v1245_v2, %v1245_v2  ;;  %v1247_v7 = vld [vmem:[%s4537_s0 + $0x20] sm:$0xff] (!%p3127_p11)  ;;  %v1248_v8 = vld [vmem:[%s4537_s0 + $0x28] sm:$0xff] (!%p3127_p11) }
  0x8b   : > { %v1249_v9 = vld [vmem:[%s4537_s0 + $0x30] sm:$0xff] (!%p3127_p11)  ;;  %v1250_v10 = vld [vmem:[%s4537_s0 + $0x38] sm:$0xff] (!%p3127_p11)  ;;  %v1255_v11 = vmul.f32 (!%p3127_p11), %v1247_v7, %v1247_v7  ;;  %v1256_v12 = vmul.f32 (!%p3127_p11), %v1248_v8, %v1248_v8  ;;  %v1254_v13 = vmul.f32 (!%p3127_p11), %v1246_v3, %v1246_v3  ;;  %v1287_v29 = vshrl.u32 (!%p3127_p11), %v1286_v25, 7  ;;  %v1284_v34 = vld [vmem:[%s4538_s1] sm:$0xf] (!%p3127_p11) }
  0x8c   : > { %v1259_v14 = vadd.f32 (!%p3127_p11), %v1252_v5, %v1251_v4  ;;  %v1257_v15 = vmul.f32 (!%p3127_p11), %v1249_v9, %v1249_v9  ;;  %v1258_v18 = vmul.f32 (!%p3127_p11), %v1250_v10, %v1250_v10 }
  0x8d   : > { %v1264_v16 = vadd.f32 (!%p3127_p11), %v1256_v12, %v1255_v11  ;;  %v1288_v30 = vsub.s32 (!%p3127_p11), 0, %v1287_v29  ;;  %v1292_v31 = vsub.s32 (!%p3127_p11), 1, %v1287_v29  ;;  %v1296_v32 = vsub.s32 (!%p3127_p11), 2, %v1287_v29 }
  0x8e   : > { %v1260_v17 = vadd.f32 (!%p3127_p11), %v1259_v14, %v1253_v6  ;;  %v1300_v33 = vsub.s32 (!%p3127_p11), 3, %v1287_v29 }
  0x8f   : > { %v1265_v19 = vadd.f32 (!%p3127_p11), %v1264_v16, %v1257_v15  ;;  %v1289_v36 = vrot.slane (!%p3127_p11), %v1284_v34, %v1288_v30  ;;  %v1293_v37 = vrot.slane (!%p3127_p11), %v1284_v34, %v1292_v31  ;;  %v1297_v38 = vrot.slane (!%p3127_p11), %v1284_v34, %v1296_v32 }
  0x90   : > { %v1261_v20 = vadd.f32 %v1260_v17, %v1254_v13  ;;  %v1301_v39 = vrot.slane %v1284_v34, %v1300_v33 }
  0x91   : > { %v1266_v21 = vadd.f32 %v1265_v19, %v1258_v18 }
  0x92   : > { %1262 = vadd.xlane.f32.xlu0 %v1261_v20 }
  0x96   : > { %1267 = vadd.xlane.f32.xlu0 %v1266_v21 }
 0x11f   : > { %v1263_v22 = vpop.xlane.xlu0 %1262 }
 0x120   : > { %v1270_v23 = vmul.f32 0.001953125, %v1263_v22 }
 0x122   : > { %v1272_v24 = vadd.f32 1e-05, %v1270_v23 }
 0x123   : > { %v1268_v26 = vpop.xlane.xlu0 %1267 }
 0x124   : > { %3401 = vrsqrt.f32 %v1272_v24  ;;  %v1271_v27 = vmul.f32 0.001953125, %v1268_v26 }
 0x126   : > { %v1273_v28 = vadd.f32 1e-05, %v1271_v27 }
 0x128   : > { %3403 = vrsqrt.f32 %v1273_v28 }
 0x12e   : > { %v3402_v35 = vpop.eup %3401 }
 0x12f   : > { %v1276_v40 = vmul.f32 %v3402_v35, %v1243_v0  ;;  %v1277_v41 = vmul.f32 %v3402_v35, %v1244_v1  ;;  %v1278_v42 = vmul.f32 %v3402_v35, %v1245_v2  ;;  %v1279_v43 = vmul.f32 %v3402_v35, %v1246_v3 }
 0x131   : > { %v1306_v49 = vmul.f32 %v1289_v36, %v1276_v40  ;;  %v1307_v50 = vmul.f32 %v1293_v37, %v1277_v41  ;;  %v1308_v51 = vmul.f32 %v1297_v38, %v1278_v42  ;;  %v1309_v52 = vmul.f32 %v1301_v39, %v1279_v43 }
 0x132   : > { %v3404_v44 = vpop.eup %3403 }
 0x133   : > { %v1280_v45 = vmul.f32 %v3404_v44, %v1247_v7  ;;  %v1281_v46 = vmul.f32 %v3404_v44, %v1248_v8  ;;  %v1282_v47 = vmul.f32 %v3404_v44, %v1249_v9  ;;  %v1283_v48 = vmul.f32 %v3404_v44, %v1250_v10 }
 0x135   : > { %v1310_v53 = vmul.f32 %v1289_v36, %v1280_v45  ;;  %v1311_v54 = vmul.f32 %v1293_v37, %v1281_v46  ;;  %v1312_v55 = vmul.f32 %v1297_v38, %v1282_v47  ;;  %v1313_v56 = vmul.f32 %v1301_v39, %v1283_v48 }
 0x137   : > { %v1314_v57 = vpack.c.bf16 %v1310_v53, %v1306_v49  ;;  %v1315_v58 = vpack.c.bf16 %v1311_v54, %v1307_v50  ;;  %v1316_v59 = vpack.c.bf16 %v1312_v55, %v1308_v51  ;;  %v1317_v60 = vpack.c.bf16 %v1313_v56, %v1309_v52 }
 0x139   : > { %1318 = vst [vmem:[#allocation2] sm:$0xff] %v1314_v57  ;;  %1319 = vst [vmem:[#allocation2 + $0x8] sm:$0xff] %v1315_v58 }
 0x13a   : > { %1320 = vst [vmem:[#allocation2 + $0x10] sm:$0xff] %v1316_v59  ;;  %1321 = vst [vmem:[#allocation2 + $0x18] sm:$0xff] %v1317_v60 }
 0x13b PF: > { %v3405_v61 = vld [vmem:[%s4240_s22 + $0x4] ss:$8 sps:$4 sm:$0xff]   ;;  %v3409_v63 = vld [vmem:[%s4240_s22] ss:$8 sps:$4 sm:$0xff]   ;;  %v3411_v1 = vld [vmem:[%s4240_s22 + $0x14] ss:$8 sps:$4 sm:$0xff]  }
 0x13c   : > { %v3407_v62 = vld [vmem:[%s4240_s22 + $0x104] ss:$8 sps:$4 sm:$0xff]   ;;  %1710 = vmatprep.subr.bf16.mxu1 %v3405_v61  ;;  %v3410_v0 = vld [vmem:[%s4240_s22 + $0x100] ss:$8 sps:$4 sm:$0xff]   ;;  %v3413_v2 = vld [vmem:[%s4240_s22 + $0x114] ss:$8 sps:$4 sm:$0xff]  }
 0x13d   : > { %1753 = vmatprep.subr.bf16.mxu0 %v3407_v62  ;;  %1711 = vmatpush1.bf16.msra.mxu1 %v3409_v63  ;;  %v3415_v3 = vld [vmem:[%s4240_s22 + $0x10] ss:$8 sps:$4 sm:$0xff]   ;;  %v3417_v5 = vld [vmem:[%s4240_s22 + $0x24] ss:$8 sps:$4 sm:$0xff]   ;;  %v3421_v7 = vld [vmem:[%s4240_s22 + $0x20] ss:$8 sps:$4 sm:$0xff]  }
 0x13e   : > { %1754 = vmatpush1.bf16.msra.mxu0 %v3410_v0  ;;  %1712 = vmatprep.subr.bf16.mxu1 %v3411_v1  ;;  %v3416_v4 = vld [vmem:[%s4240_s22 + $0x110] ss:$8 sps:$4 sm:$0xff]   ;;  %v3419_v6 = vld [vmem:[%s4240_s22 + $0x124] ss:$8 sps:$4 sm:$0xff]   ;;  %v3422_v8 = vld [vmem:[%s4240_s22 + $0x120] ss:$8 sps:$4 sm:$0xff]  }
 0x13f   : > { %1755 = vmatprep.subr.bf16.mxu0 %v3413_v2  ;;  %v3423_v9 = vld [vmem:[%s4240_s22 + $0x34] ss:$8 sps:$4 sm:$0xff]   ;;  %v3427_v11 = vld [vmem:[%s4240_s22 + $0x30] ss:$8 sps:$4 sm:$0xff]   ;;  %v3429_v13 = vld [vmem:[%s4240_s22 + $0x44] ss:$8 sps:$4 sm:$0xff]  }
 0x140   : > { %v3425_v10 = vld [vmem:[%s4240_s22 + $0x134] ss:$8 sps:$4 sm:$0xff]   ;;  %v3428_v12 = vld [vmem:[%s4240_s22 + $0x130] ss:$8 sps:$4 sm:$0xff]   ;;  %v3431_v14 = vld [vmem:[%s4240_s22 + $0x144] ss:$8 sps:$4 sm:$0xff]  }
 0x141   : > { %1713 = vmatpush1.bf16.msra.mxu1 %v3415_v3  ;;  %v3433_v15 = vld [vmem:[%s4240_s22 + $0x40] ss:$8 sps:$4 sm:$0xff]   ;;  %v3435_v17 = vld [vmem:[%s4240_s22 + $0x54] ss:$8 sps:$4 sm:$0xff]   ;;  %v3439_v19 = vld [vmem:[%s4240_s22 + $0x50] ss:$8 sps:$4 sm:$0xff]  }
 0x142   : > { %1756 = vmatpush1.bf16.msra.mxu0 %v3416_v4  ;;  %1714 = vmatprep.subr.bf16.mxu1 %v3417_v5  ;;  %v3434_v16 = vld [vmem:[%s4240_s22 + $0x140] ss:$8 sps:$4 sm:$0xff]   ;;  %v3437_v18 = vld [vmem:[%s4240_s22 + $0x154] ss:$8 sps:$4 sm:$0xff]   ;;  %v3440_v20 = vld [vmem:[%s4240_s22 + $0x150] ss:$8 sps:$4 sm:$0xff]  }
 0x143   : > { %1757 = vmatprep.subr.bf16.mxu0 %v3419_v6  ;;  %v3441_v21 = vld [vmem:[%s4240_s22 + $0x64] ss:$8 sps:$4 sm:$0xff]   ;;  %v3445_v23 = vld [vmem:[%s4240_s22 + $0x60] ss:$8 sps:$4 sm:$0xff]   ;;  %v3447_v25 = vld [vmem:[%s4240_s22 + $0x74] ss:$8 sps:$4 sm:$0xff]  }
 0x144   : > { %v3443_v22 = vld [vmem:[%s4240_s22 + $0x164] ss:$8 sps:$4 sm:$0xff]   ;;  %v3446_v24 = vld [vmem:[%s4240_s22 + $0x160] ss:$8 sps:$4 sm:$0xff]   ;;  %v3449_v26 = vld [vmem:[%s4240_s22 + $0x174] ss:$8 sps:$4 sm:$0xff]  }
 0x145   : > { %1715 = vmatpush1.bf16.msra.mxu1 %v3421_v7  ;;  %v3451_v27 = vld [vmem:[%s4240_s22 + $0x70] ss:$8 sps:$4 sm:$0xff]   ;;  %v3453_v29 = vld [vmem:[%s4240_s22 + $0x84] ss:$8 sps:$4 sm:$0xff]   ;;  %v3457_v31 = vld [vmem:[%s4240_s22 + $0x80] ss:$8 sps:$4 sm:$0xff]  }
 0x146   : > { %1758 = vmatpush1.bf16.msra.mxu0 %v3422_v8  ;;  %1716 = vmatprep.subr.bf16.mxu1 %v3423_v9  ;;  %v3452_v28 = vld [vmem:[%s4240_s22 + $0x170] ss:$8 sps:$4 sm:$0xff]   ;;  %v3455_v30 = vld [vmem:[%s4240_s22 + $0x184] ss:$8 sps:$4 sm:$0xff]   ;;  %v3458_v32 = vld [vmem:[%s4240_s22 + $0x180] ss:$8 sps:$4 sm:$0xff]  }
 0x147   : > { %1759 = vmatprep.subr.bf16.mxu0 %v3425_v10  ;;  %v3459_v33 = vld [vmem:[%s4240_s22 + $0x94] ss:$8 sps:$4 sm:$0xff]   ;;  %v3463_v35 = vld [vmem:[%s4240_s22 + $0x90] ss:$8 sps:$4 sm:$0xff]   ;;  %v3465_v37 = vld [vmem:[%s4240_s22 + $0xa4] ss:$8 sps:$4 sm:$0xff]  }
 0x148   : > { %v3461_v34 = vld [vmem:[%s4240_s22 + $0x194] ss:$8 sps:$4 sm:$0xff]   ;;  %v3464_v36 = vld [vmem:[%s4240_s22 + $0x190] ss:$8 sps:$4 sm:$0xff]   ;;  %v3467_v38 = vld [vmem:[%s4240_s22 + $0x1a4] ss:$8 sps:$4 sm:$0xff]  }
 0x149   : > { %1717 = vmatpush1.bf16.msra.mxu1 %v3427_v11  ;;  %v3469_v39 = vld [vmem:[%s4240_s22 + $0xa0] ss:$8 sps:$4 sm:$0xff]   ;;  %v3471_v41 = vld [vmem:[%s4240_s22 + $0xb4] ss:$8 sps:$4 sm:$0xff]   ;;  %v3475_v44 = vld [vmem:[%s4240_s22 + $0xb0] ss:$8 sps:$4 sm:$0xff]  }
 0x14a   : > { %1760 = vmatpush1.bf16.msra.mxu0 %v3428_v12  ;;  %1718 = vmatprep.subr.bf16.mxu1 %v3429_v13  ;;  %v3470_v40 = vld [vmem:[%s4240_s22 + $0x1a0] ss:$8 sps:$4 sm:$0xff]   ;;  %v3473_v42 = vld [vmem:[%s4240_s22 + $0x1b4] ss:$8 sps:$4 sm:$0xff]   ;;  %v3476_v45 = vld [vmem:[%s4240_s22 + $0x1b0] ss:$8 sps:$4 sm:$0xff]  }
 0x14b   : > { %1761 = vmatprep.subr.bf16.mxu0 %v3431_v14  ;;  %v4326_v43 = vld [vmem:[#allocation2 + $0x8] sm:$0xff]  ;;  %v4331_v46 = vld [vmem:[#allocation2 + $0x18] sm:$0xff]  ;;  %v4352_v1 = vld [vmem:[#allocation2] sm:$0xff] }
 0x14c   : > { %1742 = vmatprep.mubr.bf16.mxu1 %v4326_v43  ;;  %v3477_v47 = vld [vmem:[%s4240_s22 + $0xc4] ss:$8 sps:$4 sm:$0xff]   ;;  %1785 = vmatprep.mubr.bf16.mxu0 %v4331_v46  ;;  %v3481_v49 = vld [vmem:[%s4240_s22 + $0xc0] ss:$8 sps:$4 sm:$0xff]   ;;  %v3483_v51 = vld [vmem:[%s4240_s22 + $0xd4] ss:$8 sps:$4 sm:$0xff]  }
 0x14d   : > { %1719 = vmatpush1.bf16.msra.mxu1 %v3433_v15  ;;  %v3479_v48 = vld [vmem:[%s4240_s22 + $0x1c4] ss:$8 sps:$4 sm:$0xff]   ;;  %v3482_v50 = vld [vmem:[%s4240_s22 + $0x1c0] ss:$8 sps:$4 sm:$0xff]   ;;  %v3485_v52 = vld [vmem:[%s4240_s22 + $0x1d4] ss:$8 sps:$4 sm:$0xff]  }
 0x14e   : > { %1762 = vmatpush1.bf16.msra.mxu0 %v3434_v16  ;;  %1720 = vmatprep.subr.bf16.mxu1 %v3435_v17  ;;  %v3487_v53 = vld [vmem:[%s4240_s22 + $0xd0] ss:$8 sps:$4 sm:$0xff]   ;;  %v3489_v55 = vld [vmem:[%s4240_s22 + $0xe4] ss:$8 sps:$4 sm:$0xff]   ;;  %v3493_v57 = vld [vmem:[%s4240_s22 + $0xe0] ss:$8 sps:$4 sm:$0xff]  }
 0x14f   : > { %1763 = vmatprep.subr.bf16.mxu0 %v3437_v18  ;;  %v3488_v54 = vld [vmem:[%s4240_s22 + $0x1d0] ss:$8 sps:$4 sm:$0xff]   ;;  %v3491_v56 = vld [vmem:[%s4240_s22 + $0x1e4] ss:$8 sps:$4 sm:$0xff]   ;;  %v3494_v58 = vld [vmem:[%s4240_s22 + $0x1e0] ss:$8 sps:$4 sm:$0xff]  }
 0x150   : > { %v3495_v59 = vld [vmem:[%s4240_s22 + $0xf4] ss:$8 sps:$4 sm:$0xff]   ;;  %v3499_v61 = vld [vmem:[%s4240_s22 + $0xf0] ss:$8 sps:$4 sm:$0xff]   ;;  %v3503_v63 = vld [vmem:[%s4242_s23 + $0x4] ss:$8 sps:$4 sm:$0xff]  }
 0x151   : > { %1721 = vmatpush1.bf16.msra.mxu1 %v3439_v19  ;;  %v3497_v60 = vld [vmem:[%s4240_s22 + $0x1f4] ss:$8 sps:$4 sm:$0xff]   ;;  %v3500_v62 = vld [vmem:[%s4240_s22 + $0x1f0] ss:$8 sps:$4 sm:$0xff]   ;;  %v3506_v0 = vld [vmem:[%s4244_s30 + $0x4] ss:$8 sps:$4 sm:$0xff]  }
 0x152   : > { %1764 = vmatpush1.bf16.msra.mxu0 %v3440_v20  ;;  %1722 = vmatprep.subr.bf16.mxu1 %v3441_v21  ;;  %v4354_v2 = vld [vmem:[#allocation2 + $0x10] sm:$0xff]  ;;  %v3501_v3 = vld [vmem:[%s4242_s23] ss:$8 sps:$4 sm:$0xff]   ;;  %v3515_v9 = vld [vmem:[%s4242_s23 + $0x24] ss:$8 sps:$4 sm:$0xff]   ;;  %s3346_s22 = sshll.u32 (%p3812_p6), %s3723_s26, 3 }
 0x153   : > { %1765 = vmatprep.subr.bf16.mxu0 %v3443_v22  ;;  %v3504_v4 = vld [vmem:[%s4244_s30] ss:$8 sps:$4 sm:$0xff]   ;;  %v3509_v5 = vld [vmem:[%s4242_s23 + $0x14] ss:$8 sps:$4 sm:$0xff]   ;;  %v3507_v7 = vld [vmem:[%s4242_s23 + $0x10] ss:$8 sps:$4 sm:$0xff]   ;;  %s2798_s20 = scalar_lea.vmem (%p3812_p6), %s4542_s5, %s3346_s22 }
 0x154   : > { %v3512_v6 = vld [vmem:[%s4244_s30 + $0x14] ss:$8 sps:$4 sm:$0xff]   ;;  %v3510_v8 = vld [vmem:[%s4244_s30 + $0x10] ss:$8 sps:$4 sm:$0xff]   ;;  %v3518_v10 = vld [vmem:[%s4244_s30 + $0x24] ss:$8 sps:$4 sm:$0xff]  }
 0x155   : > { %1723 = vmatpush1.bf16.msra.mxu1 %v3445_v23  ;;  %v3513_v11 = vld [vmem:[%s4242_s23 + $0x20] ss:$8 sps:$4 sm:$0xff]   ;;  %v3521_v13 = vld [vmem:[%s4242_s23 + $0x34] ss:$8 sps:$4 sm:$0xff]   ;;  %v3519_v15 = vld [vmem:[%s4242_s23 + $0x30] ss:$8 sps:$4 sm:$0xff]  }
 0x156   : > { %1766 = vmatpush1.bf16.msra.mxu0 %v3446_v24  ;;  %1724 = vmatprep.subr.bf16.mxu1 %v3447_v25  ;;  %v3516_v12 = vld [vmem:[%s4244_s30 + $0x20] ss:$8 sps:$4 sm:$0xff]   ;;  %v3524_v14 = vld [vmem:[%s4244_s30 + $0x34] ss:$8 sps:$4 sm:$0xff]   ;;  %v3522_v16 = vld [vmem:[%s4244_s30 + $0x30] ss:$8 sps:$4 sm:$0xff]  }
 0x157   : > { %1767 = vmatprep.subr.bf16.mxu0 %v3449_v26  ;;  %v3527_v17 = vld [vmem:[%s4242_s23 + $0x44] ss:$8 sps:$4 sm:$0xff]   ;;  %v3525_v19 = vld [vmem:[%s4242_s23 + $0x40] ss:$8 sps:$4 sm:$0xff]   ;;  %v3533_v21 = vld [vmem:[%s4242_s23 + $0x54] ss:$8 sps:$4 sm:$0xff]  }
 0x158   : > { %v3530_v18 = vld [vmem:[%s4244_s30 + $0x44] ss:$8 sps:$4 sm:$0xff]   ;;  %v3528_v20 = vld [vmem:[%s4244_s30 + $0x40] ss:$8 sps:$4 sm:$0xff]   ;;  %v3536_v22 = vld [vmem:[%s4244_s30 + $0x54] ss:$8 sps:$4 sm:$0xff]  }
 0x159   : > { %1725 = vmatpush1.bf16.msra.mxu1 %v3451_v27  ;;  %v3531_v23 = vld [vmem:[%s4242_s23 + $0x50] ss:$8 sps:$4 sm:$0xff]   ;;  %v3539_v25 = vld [vmem:[%s4242_s23 + $0x64] ss:$8 sps:$4 sm:$0xff]   ;;  %v3537_v27 = vld [vmem:[%s4242_s23 + $0x60] ss:$8 sps:$4 sm:$0xff]  }
 0x15a   : > { %1768 = vmatpush1.bf16.msra.mxu0 %v3452_v28  ;;  %1726 = vmatprep.subr.bf16.mxu1 %v3453_v29  ;;  %v3534_v24 = vld [vmem:[%s4244_s30 + $0x50] ss:$8 sps:$4 sm:$0xff]   ;;  %v3542_v26 = vld [vmem:[%s4244_s30 + $0x64] ss:$8 sps:$4 sm:$0xff]   ;;  %v3540_v28 = vld [vmem:[%s4244_s30 + $0x60] ss:$8 sps:$4 sm:$0xff]  }
 0x15b   : > { %1769 = vmatprep.subr.bf16.mxu0 %v3455_v30  ;;  %v3545_v29 = vld [vmem:[%s4242_s23 + $0x74] ss:$8 sps:$4 sm:$0xff]  }
 0x15c   : > { %v3548_v30 = vld [vmem:[%s4244_s30 + $0x74] ss:$8 sps:$4 sm:$0xff]  }
 0x15d   : > { %1727 = vmatpush1.bf16.msra.mxu1 %v3457_v31  ;;  %v3543_v31 = vld [vmem:[%s4242_s23 + $0x70] ss:$8 sps:$4 sm:$0xff]  }
 0x15e   : > { %1770 = vmatpush1.bf16.msra.mxu0 %v3458_v32  ;;  %1728 = vmatprep.subr.bf16.mxu1 %v3459_v33  ;;  %v3546_v32 = vld [vmem:[%s4244_s30 + $0x70] ss:$8 sps:$4 sm:$0xff]   ;;  %v3551_v33 = vld [vmem:[%s4242_s23 + $0x84] ss:$8 sps:$4 sm:$0xff]  }
 0x15f   : > { %1771 = vmatprep.subr.bf16.mxu0 %v3461_v34  ;;  %v3554_v34 = vld [vmem:[%s4244_s30 + $0x84] ss:$8 sps:$4 sm:$0xff]  }
 0x161   : > { %1729 = vmatpush1.bf16.msra.mxu1 %v3463_v35  ;;  %v3549_v35 = vld [vmem:[%s4242_s23 + $0x80] ss:$8 sps:$4 sm:$0xff]  }
 0x162   : > { %1772 = vmatpush1.bf16.msra.mxu0 %v3464_v36  ;;  %1730 = vmatprep.subr.bf16.mxu1 %v3465_v37  ;;  %v3552_v36 = vld [vmem:[%s4244_s30 + $0x80] ss:$8 sps:$4 sm:$0xff]   ;;  %v3557_v37 = vld [vmem:[%s4242_s23 + $0x94] ss:$8 sps:$4 sm:$0xff]  }
 0x163   : > { %1773 = vmatprep.subr.bf16.mxu0 %v3467_v38  ;;  %v3560_v38 = vld [vmem:[%s4244_s30 + $0x94] ss:$8 sps:$4 sm:$0xff]  }
 0x165   : > { %1731 = vmatpush1.bf16.msra.mxu1 %v3469_v39  ;;  %v3555_v39 = vld [vmem:[%s4242_s23 + $0x90] ss:$8 sps:$4 sm:$0xff]  }
 0x166   : > { %1774 = vmatpush1.bf16.msra.mxu0 %v3470_v40  ;;  %1732 = vmatprep.subr.bf16.mxu1 %v3471_v41  ;;  %v3558_v40 = vld [vmem:[%s4244_s30 + $0x90] ss:$8 sps:$4 sm:$0xff]   ;;  %v3563_v41 = vld [vmem:[%s4242_s23 + $0xa4] ss:$8 sps:$4 sm:$0xff]  }
 0x167   : > { %1775 = vmatprep.subr.bf16.mxu0 %v3473_v42  ;;  %v3566_v42 = vld [vmem:[%s4244_s30 + $0xa4] ss:$8 sps:$4 sm:$0xff]  }
 0x169   : > { %1733 = vmatpush1.bf16.msra.mxu1 %v3475_v44  ;;  %v3564_v44 = vld [vmem:[%s4244_s30 + $0xa0] ss:$8 sps:$4 sm:$0xff]  }
 0x16a   : > { %1776 = vmatpush1.bf16.msra.mxu0 %v3476_v45  ;;  %1734 = vmatprep.subr.bf16.mxu1 %v3477_v47  ;;  %v3569_v45 = vld [vmem:[%s4242_s23 + $0xb4] ss:$8 sps:$4 sm:$0xff]  }
 0x16b   : > { %1777 = vmatprep.subr.bf16.mxu0 %v3479_v48  ;;  %v3572_v47 = vld [vmem:[%s4244_s30 + $0xb4] ss:$8 sps:$4 sm:$0xff]   ;;  %v3567_v48 = vld [vmem:[%s4242_s23 + $0xb0] ss:$8 sps:$4 sm:$0xff]  }
 0x16d   : > { %1735 = vmatpush1.bf16.msra.mxu1 %v3481_v49  ;;  %v3570_v49 = vld [vmem:[%s4244_s30 + $0xb0] ss:$8 sps:$4 sm:$0xff]  }
 0x16e   : > { %1778 = vmatpush1.bf16.msra.mxu0 %v3482_v50  ;;  %1736 = vmatprep.subr.bf16.mxu1 %v3483_v51  ;;  %v3575_v50 = vld [vmem:[%s4242_s23 + $0xc4] ss:$8 sps:$4 sm:$0xff]  }
 0x16f   : > { %1779 = vmatprep.subr.bf16.mxu0 %v3485_v52  ;;  %v3578_v51 = vld [vmem:[%s4244_s30 + $0xc4] ss:$8 sps:$4 sm:$0xff]   ;;  %v3573_v52 = vld [vmem:[%s4242_s23 + $0xc0] ss:$8 sps:$4 sm:$0xff]  }
 0x171   : > { %1737 = vmatpush1.bf16.msra.mxu1 %v3487_v53  ;;  %v3576_v53 = vld [vmem:[%s4244_s30 + $0xc0] ss:$8 sps:$4 sm:$0xff]  }
 0x172   : > { %1780 = vmatpush1.bf16.msra.mxu0 %v3488_v54  ;;  %1738 = vmatprep.subr.bf16.mxu1 %v3489_v55  ;;  %v3581_v54 = vld [vmem:[%s4242_s23 + $0xd4] ss:$8 sps:$4 sm:$0xff]  }
 0x173   : > { %1781 = vmatprep.subr.bf16.mxu0 %v3491_v56  ;;  %v3584_v55 = vld [vmem:[%s4244_s30 + $0xd4] ss:$8 sps:$4 sm:$0xff]   ;;  %v3579_v56 = vld [vmem:[%s4242_s23 + $0xd0] ss:$8 sps:$4 sm:$0xff]  }
 0x175   : > { %1739 = vmatpush1.bf16.msra.mxu1 %v3493_v57  ;;  %v3582_v57 = vld [vmem:[%s4244_s30 + $0xd0] ss:$8 sps:$4 sm:$0xff]  }
 0x176   : > { %1782 = vmatpush1.bf16.msra.mxu0 %v3494_v58  ;;  %1740 = vmatprep.subr.bf16.mxu1 %v3495_v59  ;;  %v3587_v58 = vld [vmem:[%s4242_s23 + $0xe4] ss:$8 sps:$4 sm:$0xff]  }
 0x177   : > { %1783 = vmatprep.subr.bf16.mxu0 %v3497_v60  ;;  %v3590_v59 = vld [vmem:[%s4244_s30 + $0xe4] ss:$8 sps:$4 sm:$0xff]   ;;  %v3585_v60 = vld [vmem:[%s4242_s23 + $0xe0] ss:$8 sps:$4 sm:$0xff]  }
 0x179   : > { %1741 = vmatpush1.bf16.msra.mxu1 %v3499_v61  ;;  %v3588_v61 = vld [vmem:[%s4244_s30 + $0xe0] ss:$8 sps:$4 sm:$0xff]  }
 0x17a   : > { %1784 = vmatpush1.bf16.msra.mxu0 %v3500_v62  ;;  %2194 = vmatprep.subr.bf16.mxu1 %v3503_v63  ;;  %v3593_v62 = vld [vmem:[%s4242_s23 + $0xf4] ss:$8 sps:$4 sm:$0xff]  }
 0x17b   : > { %2678 = vmatprep.subr.bf16.mxu0 %v3506_v0  ;;  %v3596_v63 = vld [vmem:[%s4244_s30 + $0xf4] ss:$8 sps:$4 sm:$0xff]   ;;  %v3591_v0 = vld [vmem:[%s4242_s23 + $0xf0] ss:$8 sps:$4 sm:$0xff]  }
 0x17c   : > { %1743 = vmatmul.mubr.bf16.vlgmr.msra.gmra.mrb[0].mxu1 %v4352_v1 }
 0x17d   : > { %1786 = vmatmul.mubr.bf16.vlgmr.msra.gmra.mrb[0].mxu0 %v4354_v2  ;;  %2195 = vmatpush1.bf16.msra.mxu1 %v3501_v3  ;;  %v3594_v3 = vld [vmem:[%s4244_s30 + $0xf0] ss:$8 sps:$4 sm:$0xff]  }
 0x17e   : > { %2679 = vmatpush1.bf16.msra.mxu0 %v3504_v4  ;;  %2196 = vmatprep.subr.bf16.mxu1 %v3509_v5  ;;  %v3599_v4 = vld [vmem:[%s4242_s23 + $0x104] ss:$8 sps:$4 sm:$0xff]  }
 0x17f   : > { %2680 = vmatprep.subr.bf16.mxu0 %v3512_v6  ;;  %2226 = vmatprep.mubr.bf16.mxu1 %v4326_v43  ;;  %v3602_v5 = vld [vmem:[%s4244_s30 + $0x104] ss:$8 sps:$4 sm:$0xff]   ;;  %v3597_v6 = vld [vmem:[%s4242_s23 + $0x100] ss:$8 sps:$4 sm:$0xff]  }
 0x180   : > { %2710 = vmatprep.mubr.bf16.mxu0 %v4326_v43  ;;  %v3561_v43 = vld [vmem:[%s4242_s23 + $0xa0] ss:$8 sps:$4 sm:$0xff]  }
 0x181   : > { %2197 = vmatpush1.bf16.msra.mxu1 %v3507_v7  ;;  %v3600_v7 = vld [vmem:[%s4244_s30 + $0x100] ss:$8 sps:$4 sm:$0xff]  }
 0x182   : > { %2681 = vmatpush1.bf16.msra.mxu0 %v3510_v8  ;;  %2198 = vmatprep.subr.bf16.mxu1 %v3515_v9  ;;  %v3605_v8 = vld [vmem:[%s4242_s23 + $0x114] ss:$8 sps:$4 sm:$0xff]  }
 0x183   : > { %2682 = vmatprep.subr.bf16.mxu0 %v3518_v10  ;;  %v3608_v9 = vld [vmem:[%s4244_s30 + $0x114] ss:$8 sps:$4 sm:$0xff]   ;;  %v3603_v10 = vld [vmem:[%s4242_s23 + $0x110] ss:$8 sps:$4 sm:$0xff]  }
 0x185   : > { %2199 = vmatpush1.bf16.msra.mxu1 %v3513_v11  ;;  %v3606_v11 = vld [vmem:[%s4244_s30 + $0x110] ss:$8 sps:$4 sm:$0xff]  }
 0x186   : > { %2683 = vmatpush1.bf16.msra.mxu0 %v3516_v12  ;;  %2200 = vmatprep.subr.bf16.mxu1 %v3521_v13  ;;  %v3611_v12 = vld [vmem:[%s4242_s23 + $0x124] ss:$8 sps:$4 sm:$0xff]  }
 0x187   : > { %2684 = vmatprep.subr.bf16.mxu0 %v3524_v14  ;;  %v3614_v13 = vld [vmem:[%s4244_s30 + $0x124] ss:$8 sps:$4 sm:$0xff]   ;;  %v3612_v14 = vld [vmem:[%s4244_s30 + $0x120] ss:$8 sps:$4 sm:$0xff]  }
 0x189   : > { %2201 = vmatpush1.bf16.msra.mxu1 %v3519_v15  ;;  %v3617_v15 = vld [vmem:[%s4242_s23 + $0x134] ss:$8 sps:$4 sm:$0xff]  }
 0x18a   : > { %2685 = vmatpush1.bf16.msra.mxu0 %v3522_v16  ;;  %2202 = vmatprep.subr.bf16.mxu1 %v3527_v17  ;;  %v3620_v16 = vld [vmem:[%s4244_s30 + $0x134] ss:$8 sps:$4 sm:$0xff]   ;;  %v3615_v17 = vld [vmem:[%s4242_s23 + $0x130] ss:$8 sps:$4 sm:$0xff]  }
 0x18b   : > { %2686 = vmatprep.subr.bf16.mxu0 %v3530_v18  ;;  %v3618_v18 = vld [vmem:[%s4244_s30 + $0x130] ss:$8 sps:$4 sm:$0xff]  }
 0x18d   : > { %2203 = vmatpush1.bf16.msra.mxu1 %v3525_v19  ;;  %v3626_v19 = vld [vmem:[%s4244_s30 + $0x144] ss:$8 sps:$4 sm:$0xff]  }
 0x18e   : > { %2687 = vmatpush1.bf16.msra.mxu0 %v3528_v20  ;;  %2204 = vmatprep.subr.bf16.mxu1 %v3533_v21  ;;  %v3621_v20 = vld [vmem:[%s4242_s23 + $0x140] ss:$8 sps:$4 sm:$0xff]  }
 0x18f   : > { %2688 = vmatprep.subr.bf16.mxu0 %v3536_v22  ;;  %v3624_v21 = vld [vmem:[%s4244_s30 + $0x140] ss:$8 sps:$4 sm:$0xff]   ;;  %v3629_v22 = vld [vmem:[%s4242_s23 + $0x154] ss:$8 sps:$4 sm:$0xff]  }
 0x191   : > { %2205 = vmatpush1.bf16.msra.mxu1 %v3531_v23  ;;  %v3632_v23 = vld [vmem:[%s4244_s30 + $0x154] ss:$8 sps:$4 sm:$0xff]  }
 0x192   : > { %2689 = vmatpush1.bf16.msra.mxu0 %v3534_v24  ;;  %2206 = vmatprep.subr.bf16.mxu1 %v3539_v25  ;;  %v3627_v24 = vld [vmem:[%s4242_s23 + $0x150] ss:$8 sps:$4 sm:$0xff]  }
 0x193   : > { %2690 = vmatprep.subr.bf16.mxu0 %v3542_v26  ;;  %v3630_v25 = vld [vmem:[%s4244_s30 + $0x150] ss:$8 sps:$4 sm:$0xff]   ;;  %v3635_v26 = vld [vmem:[%s4242_s23 + $0x164] ss:$8 sps:$4 sm:$0xff]  }
 0x195   : > { %2207 = vmatpush1.bf16.msra.mxu1 %v3537_v27  ;;  %v3638_v27 = vld [vmem:[%s4244_s30 + $0x164] ss:$8 sps:$4 sm:$0xff]  }
 0x196   : > { %2691 = vmatpush1.bf16.msra.mxu0 %v3540_v28  ;;  %2208 = vmatprep.subr.bf16.mxu1 %v3545_v29  ;;  %v3633_v28 = vld [vmem:[%s4242_s23 + $0x160] ss:$8 sps:$4 sm:$0xff]  }
 0x197   : > { %2692 = vmatprep.subr.bf16.mxu0 %v3548_v30  ;;  %v3636_v29 = vld [vmem:[%s4244_s30 + $0x160] ss:$8 sps:$4 sm:$0xff]   ;;  %v3641_v30 = vld [vmem:[%s4242_s23 + $0x174] ss:$8 sps:$4 sm:$0xff]  }
 0x199   : > { %2209 = vmatpush1.bf16.msra.mxu1 %v3543_v31  ;;  %v3644_v31 = vld [vmem:[%s4244_s30 + $0x174] ss:$8 sps:$4 sm:$0xff]  }
 0x19a   : > { %2693 = vmatpush1.bf16.msra.mxu0 %v3546_v32  ;;  %2210 = vmatprep.subr.bf16.mxu1 %v3551_v33  ;;  %v3639_v32 = vld [vmem:[%s4242_s23 + $0x170] ss:$8 sps:$4 sm:$0xff]  }
 0x19b   : > { %2694 = vmatprep.subr.bf16.mxu0 %v3554_v34  ;;  %v3642_v33 = vld [vmem:[%s4244_s30 + $0x170] ss:$8 sps:$4 sm:$0xff]   ;;  %v3647_v34 = vld [vmem:[%s4242_s23 + $0x184] ss:$8 sps:$4 sm:$0xff]  }
 0x19d   : > { %2211 = vmatpush1.bf16.msra.mxu1 %v3549_v35  ;;  %v3650_v35 = vld [vmem:[%s4244_s30 + $0x184] ss:$8 sps:$4 sm:$0xff]  }
 0x19e   : > { %2695 = vmatpush1.bf16.msra.mxu0 %v3552_v36  ;;  %2212 = vmatprep.subr.bf16.mxu1 %v3557_v37  ;;  %v3645_v36 = vld [vmem:[%s4242_s23 + $0x180] ss:$8 sps:$4 sm:$0xff]  }
 0x19f   : > { %2696 = vmatprep.subr.bf16.mxu0 %v3560_v38  ;;  %v3648_v37 = vld [vmem:[%s4244_s30 + $0x180] ss:$8 sps:$4 sm:$0xff]   ;;  %v3653_v38 = vld [vmem:[%s4242_s23 + $0x194] ss:$8 sps:$4 sm:$0xff]  }
 0x1a1   : > { %2213 = vmatpush1.bf16.msra.mxu1 %v3555_v39  ;;  %v3656_v39 = vld [vmem:[%s4244_s30 + $0x194] ss:$8 sps:$4 sm:$0xff]  }
 0x1a2   : > { %2697 = vmatpush1.bf16.msra.mxu0 %v3558_v40  ;;  %2214 = vmatprep.subr.bf16.mxu1 %v3563_v41  ;;  %v3651_v40 = vld [vmem:[%s4242_s23 + $0x190] ss:$8 sps:$4 sm:$0xff]  }
 0x1a3   : > { %2698 = vmatprep.subr.bf16.mxu0 %v3566_v42  ;;  %v3654_v41 = vld [vmem:[%s4244_s30 + $0x190] ss:$8 sps:$4 sm:$0xff]   ;;  %v3659_v42 = vld [vmem:[%s4242_s23 + $0x1a4] ss:$8 sps:$4 sm:$0xff]  }
 0x1a5   : > { %2215 = vmatpush1.bf16.msra.mxu1 %v3561_v43  ;;  %v3662_v43 = vld [vmem:[%s4244_s30 + $0x1a4] ss:$8 sps:$4 sm:$0xff]  }
 0x1a6   : > { %2699 = vmatpush1.bf16.msra.mxu0 %v3564_v44  ;;  %2216 = vmatprep.subr.bf16.mxu1 %v3569_v45  ;;  %v3657_v44 = vld [vmem:[%s4242_s23 + $0x1a0] ss:$8 sps:$4 sm:$0xff]  }
 0x1a7   : > { %2700 = vmatprep.subr.bf16.mxu0 %v3572_v47  ;;  %v3660_v45 = vld [vmem:[%s4244_s30 + $0x1a0] ss:$8 sps:$4 sm:$0xff]   ;;  %v3665_v47 = vld [vmem:[%s4242_s23 + $0x1b4] ss:$8 sps:$4 sm:$0xff]  }
 0x1a9   : > { %2217 = vmatpush1.bf16.msra.mxu1 %v3567_v48  ;;  %v3668_v48 = vld [vmem:[%s4244_s30 + $0x1b4] ss:$8 sps:$4 sm:$0xff]  }
 0x1aa   : > { %2701 = vmatpush1.bf16.msra.mxu0 %v3570_v49  ;;  %2218 = vmatprep.subr.bf16.mxu1 %v3575_v50  ;;  %v3663_v49 = vld [vmem:[%s4242_s23 + $0x1b0] ss:$8 sps:$4 sm:$0xff]  }
 0x1ab   : > { %2702 = vmatprep.subr.bf16.mxu0 %v3578_v51  ;;  %v3666_v50 = vld [vmem:[%s4244_s30 + $0x1b0] ss:$8 sps:$4 sm:$0xff]   ;;  %v3671_v51 = vld [vmem:[%s4242_s23 + $0x1c4] ss:$8 sps:$4 sm:$0xff]  }
 0x1ad   : > { %2219 = vmatpush1.bf16.msra.mxu1 %v3573_v52  ;;  %v3674_v52 = vld [vmem:[%s4244_s30 + $0x1c4] ss:$8 sps:$4 sm:$0xff]  }
 0x1ae   : > { %2703 = vmatpush1.bf16.msra.mxu0 %v3576_v53  ;;  %2220 = vmatprep.subr.bf16.mxu1 %v3581_v54  ;;  %v3669_v53 = vld [vmem:[%s4242_s23 + $0x1c0] ss:$8 sps:$4 sm:$0xff]  }
 0x1af   : > { %2704 = vmatprep.subr.bf16.mxu0 %v3584_v55  ;;  %v3672_v54 = vld [vmem:[%s4244_s30 + $0x1c0] ss:$8 sps:$4 sm:$0xff]   ;;  %v3677_v55 = vld [vmem:[%s4242_s23 + $0x1d4] ss:$8 sps:$4 sm:$0xff]  }
 0x1b1   : > { %2221 = vmatpush1.bf16.msra.mxu1 %v3579_v56  ;;  %v3680_v56 = vld [vmem:[%s4244_s30 + $0x1d4] ss:$8 sps:$4 sm:$0xff]  }
 0x1b2   : > { %2705 = vmatpush1.bf16.msra.mxu0 %v3582_v57  ;;  %2222 = vmatprep.subr.bf16.mxu1 %v3587_v58  ;;  %v3675_v57 = vld [vmem:[%s4242_s23 + $0x1d0] ss:$8 sps:$4 sm:$0xff]  }
 0x1b3   : > { %2706 = vmatprep.subr.bf16.mxu0 %v3590_v59  ;;  %v3678_v58 = vld [vmem:[%s4244_s30 + $0x1d0] ss:$8 sps:$4 sm:$0xff]   ;;  %v3683_v59 = vld [vmem:[%s4242_s23 + $0x1e4] ss:$8 sps:$4 sm:$0xff]  }
 0x1b5   : > { %2223 = vmatpush1.bf16.msra.mxu1 %v3585_v60  ;;  %v3686_v60 = vld [vmem:[%s4244_s30 + $0x1e4] ss:$8 sps:$4 sm:$0xff]  }
 0x1b6   : > { %2707 = vmatpush1.bf16.msra.mxu0 %v3588_v61  ;;  %2224 = vmatprep.subr.bf16.mxu1 %v3593_v62  ;;  %v3681_v61 = vld [vmem:[%s4242_s23 + $0x1e0] ss:$8 sps:$4 sm:$0xff]  }
 0x1b7   : > { %2708 = vmatprep.subr.bf16.mxu0 %v3596_v63  ;;  %v3684_v62 = vld [vmem:[%s4244_s30 + $0x1e0] ss:$8 sps:$4 sm:$0xff]   ;;  %v3689_v63 = vld [vmem:[%s4242_s23 + $0x1f4] ss:$8 sps:$4 sm:$0xff]  }
 0x1b9   : > { %2225 = vmatpush1.bf16.msra.mxu1 %v3591_v0  ;;  %v3692_v0 = vld [vmem:[%s4244_s30 + $0x1f4] ss:$8 sps:$4 sm:$0xff]  }
 0x1ba   : > { %2709 = vmatpush1.bf16.msra.mxu0 %v3594_v3  ;;  %2237 = vmatprep.subr.bf16.mxu1 %v3599_v4  ;;  %v3687_v3 = vld [vmem:[%s4242_s23 + $0x1f0] ss:$8 sps:$4 sm:$0xff]  }
 0x1bb   : > { %2721 = vmatprep.subr.bf16.mxu0 %v3602_v5  ;;  %v3690_v4 = vld [vmem:[%s4244_s30 + $0x1f0] ss:$8 sps:$4 sm:$0xff]  }
 0x1bc   : > { %2227 = vmatmul.mubr.bf16.vlgmr.msra.gmra.mrb[4].mxu1 %v4352_v1 }
 0x1bd   : > { %2711 = vmatmul.mubr.bf16.vlgmr.msra.gmra.mrb[4].mxu0 %v4352_v1  ;;  %2238 = vmatpush1.bf16.msra.mxu1 %v3597_v6  ;;  %v3609_v1 = vld [vmem:[%s4242_s23 + $0x120] ss:$8 sps:$4 sm:$0xff]  }
 0x1be   : > { %2722 = vmatpush1.bf16.msra.mxu0 %v3600_v7  ;;  %2239 = vmatprep.subr.bf16.mxu1 %v3605_v8 }
 0x1bf   : > { %2723 = vmatprep.subr.bf16.mxu0 %v3608_v9  ;;  %2269 = vmatprep.mubr.bf16.mxu1 %v4331_v46 }
 0x1c0   : > { %2753 = vmatprep.mubr.bf16.mxu0 %v4331_v46  ;;  %v3623_v46 = vld [vmem:[%s4242_s23 + $0x144] ss:$8 sps:$4 sm:$0xff]  }
 0x1c1   : > { %2240 = vmatpush1.bf16.msra.mxu1 %v3603_v10 }
 0x1c2   : > { %2724 = vmatpush1.bf16.msra.mxu0 %v3606_v11  ;;  %2241 = vmatprep.subr.bf16.mxu1 %v3611_v12 }
 0x1c3   : > { %2725 = vmatprep.subr.bf16.mxu0 %v3614_v13 }
 0x1c5   : > { %2242 = vmatpush1.bf16.msra.mxu1 %v3609_v1 }
 0x1c6   : > { %2726 = vmatpush1.bf16.msra.mxu0 %v3612_v14  ;;  %2243 = vmatprep.subr.bf16.mxu1 %v3617_v15 }
 0x1c7   : > { %2727 = vmatprep.subr.bf16.mxu0 %v3620_v16 }
 0x1c9   : > { %2244 = vmatpush1.bf16.msra.mxu1 %v3615_v17 }
 0x1ca   : > { %2728 = vmatpush1.bf16.msra.mxu0 %v3618_v18  ;;  %2245 = vmatprep.subr.bf16.mxu1 %v3623_v46 }
 0x1cb   : > { %2729 = vmatprep.subr.bf16.mxu0 %v3626_v19 }
 0x1cd   : > { %2246 = vmatpush1.bf16.msra.mxu1 %v3621_v20 }
 0x1ce   : > { %2730 = vmatpush1.bf16.msra.mxu0 %v3624_v21  ;;  %2247 = vmatprep.subr.bf16.mxu1 %v3629_v22 }
 0x1cf   : > { %2731 = vmatprep.subr.bf16.mxu0 %v3632_v23 }
 0x1d1   : > { %2248 = vmatpush1.bf16.msra.mxu1 %v3627_v24 }
 0x1d2   : > { %2732 = vmatpush1.bf16.msra.mxu0 %v3630_v25  ;;  %2249 = vmatprep.subr.bf16.mxu1 %v3635_v26 }
 0x1d3   : > { %2733 = vmatprep.subr.bf16.mxu0 %v3638_v27 }
 0x1d5   : > { %2250 = vmatpush1.bf16.msra.mxu1 %v3633_v28 }
 0x1d6   : > { %2734 = vmatpush1.bf16.msra.mxu0 %v3636_v29  ;;  %2251 = vmatprep.subr.bf16.mxu1 %v3641_v30 }
 0x1d7   : > { %2735 = vmatprep.subr.bf16.mxu0 %v3644_v31 }
 0x1d9   : > { %2252 = vmatpush1.bf16.msra.mxu1 %v3639_v32 }
 0x1da   : > { %2736 = vmatpush1.bf16.msra.mxu0 %v3642_v33  ;;  %2253 = vmatprep.subr.bf16.mxu1 %v3647_v34 }
 0x1db   : > { %2737 = vmatprep.subr.bf16.mxu0 %v3650_v35 }
 0x1dd   : > { %2254 = vmatpush1.bf16.msra.mxu1 %v3645_v36 }
 0x1de   : > { %2738 = vmatpush1.bf16.msra.mxu0 %v3648_v37  ;;  %2255 = vmatprep.subr.bf16.mxu1 %v3653_v38 }
 0x1df   : > { %2739 = vmatprep.subr.bf16.mxu0 %v3656_v39 }
 0x1e1   : > { %2256 = vmatpush1.bf16.msra.mxu1 %v3651_v40 }
 0x1e2   : > { %2740 = vmatpush1.bf16.msra.mxu0 %v3654_v41  ;;  %2257 = vmatprep.subr.bf16.mxu1 %v3659_v42 }
 0x1e3   : > { %2741 = vmatprep.subr.bf16.mxu0 %v3662_v43 }
 0x1e5   : > { %2258 = vmatpush1.bf16.msra.mxu1 %v3657_v44 }
 0x1e6   : > { %2742 = vmatpush1.bf16.msra.mxu0 %v3660_v45  ;;  %2259 = vmatprep.subr.bf16.mxu1 %v3665_v47 }
 0x1e7   : > { %2743 = vmatprep.subr.bf16.mxu0 %v3668_v48 }
 0x1e9   : > { %2260 = vmatpush1.bf16.msra.mxu1 %v3663_v49 }
 0x1ea   : > { %2744 = vmatpush1.bf16.msra.mxu0 %v3666_v50  ;;  %2261 = vmatprep.subr.bf16.mxu1 %v3671_v51 }
 0x1eb   : > { %2745 = vmatprep.subr.bf16.mxu0 %v3674_v52 }
 0x1ed   : > { %2262 = vmatpush1.bf16.msra.mxu1 %v3669_v53 }
 0x1ee   : > { %2746 = vmatpush1.bf16.msra.mxu0 %v3672_v54  ;;  %2263 = vmatprep.subr.bf16.mxu1 %v3677_v55 }
 0x1ef   : > { %2747 = vmatprep.subr.bf16.mxu0 %v3680_v56 }
 0x1f1   : > { %2264 = vmatpush1.bf16.msra.mxu1 %v3675_v57 }
 0x1f2   : > { %2748 = vmatpush1.bf16.msra.mxu0 %v3678_v58  ;;  %2265 = vmatprep.subr.bf16.mxu1 %v3683_v59 }
 0x1f3   : > { %2749 = vmatprep.subr.bf16.mxu0 %v3686_v60 }
 0x1f5   : > { %2266 = vmatpush1.bf16.msra.mxu1 %v3681_v61 }
 0x1f6   : > { %2750 = vmatpush1.bf16.msra.mxu0 %v3684_v62  ;;  %2267 = vmatprep.subr.bf16.mxu1 %v3689_v63 }
 0x1f7   : > { %2751 = vmatprep.subr.bf16.mxu0 %v3692_v0 }
 0x1f9   : > { %2268 = vmatpush1.bf16.msra.mxu1 %v3687_v3 }
 0x1fa   : > { %2752 = vmatpush1.bf16.msra.mxu0 %v3690_v4 }
 0x1fc   : > { %2270 = vmatmul.mubr.bf16.vlgmr.msra.gmra.mrb[4].mxu1 %v4354_v2 }
 0x1fd   : > { %2754 = vmatmul.mubr.bf16.vlgmr.msra.gmra.mrb[4].mxu0 %v4354_v2 }
 0x24f   : > { %v1744_v5 = vpop.f32.mrb[0].mxu1 }
 0x250   : > { %v1787_v6 = vpop.f32.mrb[0].mxu0  ;;  %v1746_v8 = vpop.f32.mrb[1].mxu1 }
 0x251   : > { %v1788_v7 = vadd.f32 %v1787_v6, %v1744_v5  ;;  %v1789_v9 = vpop.f32.mrb[1].mxu0  ;;  %v1748_v11 = vpop.f32.mrb[2].mxu1 }
 0x252   : > { %v1790_v10 = vadd.f32 %v1789_v9, %v1746_v8  ;;  %v1791_v12 = vpop.f32.mrb[2].mxu0  ;;  %v1750_v1 = vpop.f32.mrb[3].mxu1 }
 0x253   : > { %v1792_v13 = vadd.f32 %v1791_v12, %v1748_v11  ;;  %v1793_v14 = vpop.f32.mrb[3].mxu0 }
 0x254   : > { %v3340_v15 = vpack.c.bf16 %v1790_v10, %v1788_v7  ;;  %v1794_v16 = vadd.f32 %v1793_v14, %v1750_v1 }
 0x256   : > { %1808 = vst [vmem:[%s4246_s9] sm:$0xff] %v3340_v15  ;;  %v3341_v17 = vpack.c.bf16 %v1794_v16, %v1792_v13 }
 0x258   : > { %1809 = vst [vmem:[%s4246_s9 + $0x8] sm:$0xff] %v3341_v17 }
 0x25d   : > { %v2828_v28 = vld [vmem:[%s4246_s9] sm:$0xff] (%p3812_p6) }
 0x25e   : > { %2829 = vst [vmem:[%s2798_s20] sm:$0xff] (%p3812_p6), %v2828_v28 }
 0x25f   : > { %v2830_v29 = vld [vmem:[%s4246_s9 + $0x8] sm:$0xff] (%p3812_p6) }
 0x260   : > { %2831 = vst [vmem:[%s2798_s20 + $0x10] sm:$0xff] (%p3812_p6), %v2830_v29 }
 0x2cf   : > { %v2271_v2 = vpop.f32.mrb[4].mxu1 }
 0x2d0   : > { %v2755_v18 = vpop.f32.mrb[4].mxu0  ;;  %v2273_v46 = vpop.f32.mrb[5].mxu1  ;;  %2792 = sbr.rel (!%p3812_p6) target bundleno = 727 (0x2d7), region = 162 }
 0x2d1   : > { %v2757_v19 = vpop.f32.mrb[5].mxu0  ;;  %v3342_v20 = vpack.c.bf16 %v2273_v46, %v2271_v2  ;;  %v2275_v22 = vpop.f32.mrb[6].mxu1 }
 0x2d2   : > { %v3344_v21 = vpack.c.bf16 %v2757_v19, %v2755_v18  ;;  %v2759_v23 = vpop.f32.mrb[6].mxu0  ;;  %v2277_v24 = vpop.f32.mrb[7].mxu1 }
 0x2d3   : > { %v2761_v25 = vpop.f32.mrb[7].mxu0  ;;  %2292 = vst [vmem:[%s4248_s10] sm:$0xff] %v3342_v20  ;;  %v3343_v26 = vpack.c.bf16 %v2277_v24, %v2275_v22 }
 0x2d4   : > { %2776 = vst [vmem:[%s4250_s13] sm:$0xff] %v3344_v21  ;;  %v3345_v27 = vpack.c.bf16 %v2761_v25, %v2759_v23 }
 0x2d5   : > { %2293 = vst [vmem:[%s4248_s10 + $0x8] sm:$0xff] %v3343_v26 }
 0x2d6   : > { %2777 = vst [vmem:[%s4250_s13 + $0x8] sm:$0xff] %v3345_v27 }
 0x2d7 PF: > { %2837 = sbr.rel (!%p3812_p6) target bundleno = 734 (0x2de), region = 200  ;;  %s3347_s21 = sshll.u32 (%p3812_p6), %s3723_s26, 3 }
 0x2d8   : > { %s2843_s9 = scalar_lea.vmem (%p3812_p6), %s4543_s6, %s3347_s21 }
 0x2da   : > { %v2873_v30 = vld [vmem:[%s4248_s10] sm:$0xff] (%p3812_p6) }
 0x2db   : > { %2874 = vst [vmem:[%s2843_s9] sm:$0xff] (%p3812_p6), %v2873_v30 }
 0x2dc   : > { %v2875_v31 = vld [vmem:[%s4248_s10 + $0x8] sm:$0xff] (%p3812_p6) }
 0x2dd   : > { %2876 = vst [vmem:[%s2843_s9 + $0x10] sm:$0xff] (%p3812_p6), %v2875_v31 }
 0x2de PF: > { %2882 = sbr.rel (!%p3812_p6) target bundleno = 741 (0x2e5), region = 238  ;;  %s3348_s24 = sshll.u32 (%p3812_p6), %s3723_s26, 3  ;;  %v2918_v32 = vld [vmem:[%s4250_s13] sm:$0xff] (%p3812_p6)  ;;  %v2920_v33 = vld [vmem:[%s4250_s13 + $0x8] sm:$0xff] (%p3812_p6) }
 0x2df   : > { %s2888_s10 = scalar_lea.vmem (%p3812_p6), %s4544_s7, %s3348_s24 }
 0x2e0   : > { %2919 = vst [vmem:[%s2888_s10] sm:$0xff] (%p3812_p6), %v2918_v32  ;;  %2921 = vst [vmem:[%s2888_s10 + $0x10] sm:$0xff] (%p3812_p6), %v2920_v33 }
 0x2e5 PF: > { %s18_s28 = sadd.s32 1, %s3731_s28   ;;  %s4547_s24 = smov %s3719_s25 }
 0x2e6   : > { %p15_p12 = scmp.ge.s32.totalorder %s18_s28, 4   ;;  %s4548_s25 = smov %s3817_s12 }
 0x2e7   : > { %s4549_s26 = smov %s3727_s27  ;;  %s4550_s27 = smov %s4552_s29 }
 0x2e8   :  { %17 = sbr.rel (!%p15_p12) target bundleno = 3 (0x3), region = 350 }

// kernel: transformer_forward.15
= control target key start
LH: loop header
LB: loop body
LE: loop exit
PB: predicated region body
PF: predicated region fallthrough
CT: control target
= control target key end

     0   :  { %s1229_s12 = smov 0   ;;  %s1231_s13 = smov 0   ;;  %s1531_s0 = inlined_call_operand.vmem [shape: bf16[16,512], index: 0, kind: input, shape index: {}]   ;;  %s1532_s1 = inlined_call_operand.vmem [shape: bf16[512,512], index: 1, kind: input, shape index: {}]   ;;  %s1533_s2 = inlined_call_operand.vmem [shape: f32[16,512], index: 2, kind: input, shape index: {}]   ;;  %s1534_s3 = inlined_call_operand.vmem [shape: f32[16,512], index: 3, kind: output, shape index: {}]  }
   0x1   :  { %s1233_s14 = smov 0   ;;  %s1235_s15 = smov 0  }
   0x2   :  { %s1237_s16 = smov 0   ;;  %s1239_s17 = smov 0  }
   0x3   :  { %s1241_s18 = smov 0   ;;  %s1243_s19 = smov 0  }
   0x4   :  { %s1245_s20 = smov 0   ;;  %s1247_s21 = smov 0  }
   0x5   :  { %s1249_s22 = smov 0  }
   0x6 LB: > { %1538 = sst [smem:[#allocation7_spill]] %s1186_s17  ;;  %s915_s23 = sadd.s32 4294967295, %s1206_s22   ;;  %s1206_s22 = sphi %s1249_s22, %s13_s22   ;;  %s1202_s21 = sphi %s1247_s21, %s1557_s21   ;;  %s1198_s20 = sphi %s1245_s20, %s1556_s20   ;;  %s1194_s19 = sphi %s1243_s19, %s1555_s19   ;;  %s1190_s18 = sphi %s1241_s18, %s1554_s18   ;;  %s1186_s17 = sphi %s1239_s17, %s1547_s17   ;;  %s1182_s16 = sphi %s1237_s16, %s1546_s16   ;;  %s1178_s15 = sphi %s1235_s15, %s1553_s15   ;;  %s1174_s14 = sphi %s1233_s14, %s1552_s14   ;;  %s1170_s13 = sphi %s1231_s13, %s1551_s13   ;;  %s1166_s12 = sphi %s1229_s12, %s1550_s12  }
   0x7   : > { %s25_s24 = sadd.s32 1, %s1198_s20  ;;  %s28_s25 = sadd.s32 1, %s1202_s21 }
   0x8   : > { %p26_p0 = scmp.ge.s32.totalorder %s25_s24, 2  ;;  %s41_s26 = sadd.s32 1, %s1186_s17 }
   0x9   : > { %p48_p1 = scmp.ne.s32.totalorder %s1186_s17, %s1182_s16  ;;  %p49_p2 = scmp.eq.s32.totalorder %s1206_s22, 0 }
   0xa   : > { %s1559_s24 = smov (%p26_p0, %s25_s24), 0  ;;  %s1561_s25 = smov (!%p26_p0, %s28_s25), %s1202_s21 }
   0xb   : > { %1539 = sst [smem:[#allocation8_spill]] %s1559_s24  ;;  %s37_s27 = ssub.s32 %s1198_s20, %s1559_s24 }
   0xc   : > { %p30_p3 = scmp.ge.s32.totalorder %s1561_s25, 2  ;;  %p39_p4 = scmp.eq.s32.totalorder %s37_s27, 0 }
   0xd   : > { %p1298_p5 = por %p49_p2, %p48_p1  ;;  %s69_s29 = sadd.s32 1, %s1178_s15 }
   0xe   : > { %s1563_s25 = smov (%p30_p3, %s1561_s25), 0  ;;  %p76_p6 = scmp.ne.s32.totalorder %s1178_s15, %s1174_s14 }
   0xf   : > { %1541 = sst [smem:[#allocation9_spill]] %s1563_s25  ;;  %s65_s4 = ssub.s32 %s1202_s21, %s1563_s25 }
  0x10   : > { %s1306_s30 = scalar_select %p39_p4, %s1186_s17, %s41_s26  }
  0x11   : > { %s66_s5 = sor.u32 %s65_s4, %s37_s27  ;;  %p95_p7 = scmp.eq.s32.totalorder %s65_s4, 0 }
  0x12   : > { %1542 = sst [smem:[#allocation10_spill]] %s1306_s30  ;;  %p67_p8 = scmp.eq.s32.totalorder %s66_s5, 0 }
  0x13   : > { %p1314_p9 = por %p76_p6, %p49_p2  ;;  %s97_s7 = sadd.s32 1, %s1170_s13 }
  0x14   : > { %p104_p10 = scmp.ne.s32.totalorder %s1170_s13, %s1166_s12  ;;  %p136_p12 = scmp.eq.s32.totalorder %s915_s23, 3 }
  0x15   : > { %s1322_s8 = scalar_select %p67_p8, %s1178_s15, %s69_s29  }
  0x16   : > { %s1325_s9 = scalar_select %p95_p7, %s1170_s13, %s97_s7  }
  0x17   : > { %p1329_p11 = por %p104_p10, %p49_p2  ;;  %p1333_p13 = por %p136_p12, %p104_p10 }
  0x18   : > { %p918_p0 = scmp.ge.s32.totalorder %s1206_s22, 4 }
  0x1a   : > { %158 = sbr.rel (%p918_p0) target bundleno = 70 (0x46), region = 16 }
  0x21   : > { %161 = sbr.rel (!%p1298_p5) target bundleno = 40 (0x28), region = 20  ;;  %s163_s26 = sand.u32 (%p1298_p5), 1, %s1186_s17  }
  0x22   : > { %s976_s27 = sshll.u32 (%p1298_p5), %s1198_s20, 3  ;;  %s919_s29 = sshll.u32 (%p1298_p5), %s163_s26, 4 }
  0x23   : > { %s171_s7 = scalar_lea.vmem (%p1298_p5), %s1531_s0, %s976_s27  ;;  %s165_s23 = scalar_lea.vmem (%p1298_p5), [#allocation3], %s919_s29 }
  0x24   : > { %v201_v0 = vld [vmem:[%s171_s7] sm:$0xff] (%p1298_p5)  ;;  %v203_v1 = vld [vmem:[%s171_s7 + $0x10] sm:$0xff] (%p1298_p5) }
  0x25   : > { %202 = vst [vmem:[%s165_s23] sm:$0xff] (%p1298_p5), %v201_v0  ;;  %204 = vst [vmem:[%s165_s23 + $0x8] sm:$0xff] (%p1298_p5), %v203_v1 }
  0x28 PF: > { %210 = sbr.rel (!%p1314_p9) target bundleno = 63 (0x3f), region = 58  ;;  %s212_s28 = sand.u32 (%p1314_p9), 1, %s1178_s15  }
  0x29   : > { %s924_s25 = sshll.u32 (%p1314_p9), %s1202_s21, 1  ;;  %s922_s24 = sshll.u32 (%p1314_p9), %s212_s28, 8 }
  0x2a   : > { %s977_s26 = sshll.u32 (%p1314_p9), %s1198_s20, 7  ;;  %s1358_s6 = scalar_lea.vmem (%p1314_p9), [#allocation4], %s922_s24 }
  0x2b   : > { %s218_s30 = sadd.s32 (%p1314_p9), %s977_s26, %s924_s25 }
  0x2c   : > { %s926_s17 = sshll.u32 (%p1314_p9), %s218_s30, 2 }
  0x2d   : > { %s1353_s5 = scalar_lea.vmem (%p1314_p9), %s1532_s1, %s926_s17 }
  0x2e   : > { %v310_v2 = vld [vmem:[%s1353_s5] sm:$0xff] (%p1314_p9)  ;;  %v312_v3 = vld [vmem:[%s1353_s5 + $0x10] sm:$0xff] (%p1314_p9) }
  0x2f   : > { %v314_v4 = vld [vmem:[%s1353_s5 + $0x20] sm:$0xff]  ;;  %311 = vst [vmem:[%s1358_s6] sm:$0xff] %v310_v2  ;;  %313 = vst [vmem:[%s1358_s6 + $0x8] sm:$0xff] %v312_v3  ;;  %v316_v5 = vld [vmem:[%s1353_s5 + $0x30] sm:$0xff] }
  0x30   : > { %315 = vst [vmem:[%s1358_s6 + $0x10] sm:$0xff] %v314_v4  ;;  %v318_v6 = vld [vmem:[%s1353_s5 + $0x40] sm:$0xff]  ;;  %v320_v7 = vld [vmem:[%s1353_s5 + $0x50] sm:$0xff]  ;;  %317 = vst [vmem:[%s1358_s6 + $0x18] sm:$0xff] %v316_v5 }
  0x31   : > { %319 = vst [vmem:[%s1358_s6 + $0x20] sm:$0xff] %v318_v6  ;;  %321 = vst [vmem:[%s1358_s6 + $0x28] sm:$0xff] %v320_v7  ;;  %v322_v8 = vld [vmem:[%s1353_s5 + $0x60] sm:$0xff]  ;;  %v324_v9 = vld [vmem:[%s1353_s5 + $0x70] sm:$0xff] }
  0x32   : > { %v326_v10 = vld [vmem:[%s1353_s5 + $0x80] sm:$0xff]  ;;  %323 = vst [vmem:[%s1358_s6 + $0x30] sm:$0xff] %v322_v8  ;;  %325 = vst [vmem:[%s1358_s6 + $0x38] sm:$0xff] %v324_v9  ;;  %v328_v11 = vld [vmem:[%s1353_s5 + $0x90] sm:$0xff] }
  0x33   : > { %327 = vst [vmem:[%s1358_s6 + $0x40] sm:$0xff] %v326_v10  ;;  %v330_v12 = vld [vmem:[%s1353_s5 + $0xa0] sm:$0xff]  ;;  %v332_v13 = vld [vmem:[%s1353_s5 + $0xb0] sm:$0xff]  ;;  %329 = vst [vmem:[%s1358_s6 + $0x48] sm:$0xff] %v328_v11 }
  0x34   : > { %331 = vst [vmem:[%s1358_s6 + $0x50] sm:$0xff] %v330_v12  ;;  %333 = vst [vmem:[%s1358_s6 + $0x58] sm:$0xff] %v332_v13  ;;  %v334_v14 = vld [vmem:[%s1353_s5 + $0xc0] sm:$0xff]  ;;  %v336_v15 = vld [vmem:[%s1353_s5 + $0xd0] sm:$0xff] }
  0x35   : > { %v338_v16 = vld [vmem:[%s1353_s5 + $0xe0] sm:$0xff]  ;;  %335 = vst [vmem:[%s1358_s6 + $0x60] sm:$0xff] %v334_v14  ;;  %337 = vst [vmem:[%s1358_s6 + $0x68] sm:$0xff] %v336_v15  ;;  %v340_v17 = vld [vmem:[%s1353_s5 + $0xf0] sm:$0xff] }
  0x36   : > { %339 = vst [vmem:[%s1358_s6 + $0x70] sm:$0xff] %v338_v16  ;;  %v342_v18 = vld [vmem:[%s1353_s5 + $0x100] sm:$0xff]  ;;  %v344_v19 = vld [vmem:[%s1353_s5 + $0x110] sm:$0xff]  ;;  %341 = vst [vmem:[%s1358_s6 + $0x78] sm:$0xff] %v340_v17 }
  0x37   : > { %343 = vst [vmem:[%s1358_s6 + $0x80] sm:$0xff] %v342_v18  ;;  %345 = vst [vmem:[%s1358_s6 + $0x88] sm:$0xff] %v344_v19  ;;  %v346_v20 = vld [vmem:[%s1353_s5 + $0x120] sm:$0xff]  ;;  %v348_v21 = vld [vmem:[%s1353_s5 + $0x130] sm:$0xff] }
  0x38   : > { %v350_v22 = vld [vmem:[%s1353_s5 + $0x140] sm:$0xff]  ;;  %347 = vst [vmem:[%s1358_s6 + $0x90] sm:$0xff] %v346_v20  ;;  %349 = vst [vmem:[%s1358_s6 + $0x98] sm:$0xff] %v348_v21  ;;  %v352_v23 = vld [vmem:[%s1353_s5 + $0x150] sm:$0xff] }
  0x39   : > { %351 = vst [vmem:[%s1358_s6 + $0xa0] sm:$0xff] %v350_v22  ;;  %v354_v24 = vld [vmem:[%s1353_s5 + $0x160] sm:$0xff]  ;;  %v356_v25 = vld [vmem:[%s1353_s5 + $0x170] sm:$0xff]  ;;  %353 = vst [vmem:[%s1358_s6 + $0xa8] sm:$0xff] %v352_v23 }
  0x3a   : > { %355 = vst [vmem:[%s1358_s6 + $0xb0] sm:$0xff] %v354_v24  ;;  %357 = vst [vmem:[%s1358_s6 + $0xb8] sm:$0xff] %v356_v25  ;;  %v358_v26 = vld [vmem:[%s1353_s5 + $0x180] sm:$0xff]  ;;  %v360_v27 = vld [vmem:[%s1353_s5 + $0x190] sm:$0xff] }
  0x3b   : > { %v362_v28 = vld [vmem:[%s1353_s5 + $0x1a0] sm:$0xff]  ;;  %359 = vst [vmem:[%s1358_s6 + $0xc0] sm:$0xff] %v358_v26  ;;  %361 = vst [vmem:[%s1358_s6 + $0xc8] sm:$0xff] %v360_v27  ;;  %v364_v29 = vld [vmem:[%s1353_s5 + $0x1b0] sm:$0xff] }
  0x3c   : > { %363 = vst [vmem:[%s1358_s6 + $0xd0] sm:$0xff] %v362_v28  ;;  %v366_v30 = vld [vmem:[%s1353_s5 + $0x1c0] sm:$0xff]  ;;  %v368_v31 = vld [vmem:[%s1353_s5 + $0x1d0] sm:$0xff]  ;;  %365 = vst [vmem:[%s1358_s6 + $0xd8] sm:$0xff] %v364_v29 }
  0x3d   : > { %367 = vst [vmem:[%s1358_s6 + $0xe0] sm:$0xff] %v366_v30  ;;  %369 = vst [vmem:[%s1358_s6 + $0xe8] sm:$0xff] %v368_v31  ;;  %v370_v32 = vld [vmem:[%s1353_s5 + $0x1e0] sm:$0xff]  ;;  %v372_v33 = vld [vmem:[%s1353_s5 + $0x1f0] sm:$0xff] }
  0x3e   : > { %371 = vst [vmem:[%s1358_s6 + $0xf0] sm:$0xff] %v370_v32  ;;  %373 = vst [vmem:[%s1358_s6 + $0xf8] sm:$0xff] %v372_v33 }
  0x3f PF: > { %379 = sbr.rel (!%p1329_p11) target bundleno = 70 (0x46), region = 96  ;;  %s381_s17 = sand.u32 (%p1329_p11), 1, %s1170_s13  }
  0x40   : > { %s978_s24 = sshll.u32 (%p1329_p11), %s1202_s21, 4  ;;  %s927_s25 = sshll.u32 (%p1329_p11), %s381_s17, 5 }
  0x41   : > { %s389_s7 = scalar_lea.vmem (%p1329_p11), %s1533_s2, %s978_s24  ;;  %s383_s23 = scalar_lea.vmem (%p1329_p11), [#allocation5], %s927_s25 }
  0x42   : > { %v402_v34 = vld [vmem:[%s389_s7] sm:$0xff] (%p1329_p11)  ;;  %v404_v35 = vld [vmem:[%s389_s7 + $0x8] sm:$0xff] (%p1329_p11) }
  0x43   : > { %v406_v36 = vld [vmem:[%s389_s7 + $0x20] sm:$0xff] (%p1329_p11)  ;;  %403 = vst [vmem:[%s383_s23] sm:$0xff] (%p1329_p11), %v402_v34  ;;  %405 = vst [vmem:[%s383_s23 + $0x8] sm:$0xff] (%p1329_p11), %v404_v35  ;;  %v408_v37 = vld [vmem:[%s389_s7 + $0x28] sm:$0xff] (%p1329_p11) }
  0x44   : > { %407 = vst [vmem:[%s383_s23 + $0x10] sm:$0xff] (%p1329_p11), %v406_v36  ;;  %409 = vst [vmem:[%s383_s23 + $0x18] sm:$0xff] (%p1329_p11), %v408_v37 }
  0x46 PF: > { %p930_p1 = scmp.ge.s32.totalorder %s1206_s22, 1  ;;  %p414_p2 = scmp.lt.s32.totalorder %s1206_s22, 5 }
  0x48   : > { %p415_p3 = pnand %p930_p1, %p414_p2 }
  0x49   : > { %s421_s10 = sand.u32 (!%p415_p3), 1, %s1182_s16   ;;  %s428_s28 = sand.u32 (!%p415_p3), 1, %s1174_s14  }
  0x4a   : > { %418 = sbr.rel (%p415_p3) target bundleno = 389 (0x185), region = 119  ;;  %s1432_s26 = sshll.u32 (!%p415_p3), %s421_s10, 4 }
  0x4b   : > { %s932_s4 = sshll.u32 (!%p415_p3), %s428_s28, 8  ;;  %s435_s27 = sand.u32 (!%p415_p3), 1, %s1166_s12  }
  0x4c   : > { %s933_s5 = sshll.u32 (!%p415_p3), %s435_s27, 5  ;;  %s423_s6 = scalar_lea.vmem (!%p415_p3), [#allocation3], %s1432_s26 }
  0x4d   : > { %s1436_s17 = scalar_lea.vmem (!%p415_p3), [#allocation4], %s932_s4  ;;  %s1438_s24 = scalar_lea.vmem (!%p415_p3), [#allocation5], %s933_s5 }
  0x4e   : > { %s1440_s25 = scalar_lea.vmem (!%p415_p3), [#allocation6], %s933_s5  ;;  %p935_p4 = scmp.ne.s32.totalorder (!%p415_p3), %s1190_s18, 0 }
  0x51   : > { %476 = sbr.rel (%p935_p4) target bundleno = 88 (0x58), region = 135  ;;  %v1208_v38 = vmov (!%p935_p4), 0.0  }
  0x52   : > { %477 = vst [vmem:[#allocation2] sm:$0xff] (!%p935_p4), %v1208_v38  ;;  %478 = vst [vmem:[#allocation2 + $0x8] sm:$0xff] (!%p935_p4), %v1208_v38 }
  0x53   : > { %479 = vst [vmem:[#allocation2 + $0x10] sm:$0xff] (!%p935_p4), %v1208_v38  ;;  %480 = vst [vmem:[#allocation2 + $0x18] sm:$0xff] (!%p935_p4), %v1208_v38 }
  0x58 PF: > { %v1069_v39 = vld [vmem:[%s1436_s17 + $0x4] ss:$8 sps:$4 sm:$0xff]   ;;  %v1071_v40 = vld [vmem:[%s1436_s17] ss:$8 sps:$4 sm:$0xff]   ;;  %v1072_v41 = vld [vmem:[%s1436_s17 + $0x14] ss:$8 sps:$4 sm:$0xff]  }
  0x59   : > { %689 = vmatprep.subr.bf16.mxu0 %v1069_v39  ;;  %v1074_v42 = vld [vmem:[%s1436_s17 + $0x10] ss:$8 sps:$4 sm:$0xff]   ;;  %v1075_v43 = vld [vmem:[%s1436_s17 + $0x24] ss:$8 sps:$4 sm:$0xff]   ;;  %v1077_v44 = vld [vmem:[%s1436_s17 + $0x20] ss:$8 sps:$4 sm:$0xff]  }
  0x5a   : > { %690 = vmatpush1.bf16.msra.mxu0 %v1071_v40  ;;  %v1078_v45 = vld [vmem:[%s1436_s17 + $0x34] ss:$8 sps:$4 sm:$0xff]   ;;  %v1080_v46 = vld [vmem:[%s1436_s17 + $0x30] ss:$8 sps:$4 sm:$0xff]   ;;  %v1081_v47 = vld [vmem:[%s1436_s17 + $0x44] ss:$8 sps:$4 sm:$0xff]  }
  0x5b   : > { %691 = vmatprep.subr.bf16.mxu0 %v1072_v41  ;;  %v1083_v48 = vld [vmem:[%s1436_s17 + $0x40] ss:$8 sps:$4 sm:$0xff]   ;;  %v1084_v49 = vld [vmem:[%s1436_s17 + $0x54] ss:$8 sps:$4 sm:$0xff]   ;;  %v1086_v50 = vld [vmem:[%s1436_s17 + $0x50] ss:$8 sps:$4 sm:$0xff]  }
  0x5c   : > { %v1087_v51 = vld [vmem:[%s1436_s17 + $0x64] ss:$8 sps:$4 sm:$0xff]   ;;  %v1089_v53 = vld [vmem:[%s1436_s17 + $0x60] ss:$8 sps:$4 sm:$0xff]   ;;  %v1090_v54 = vld [vmem:[%s1436_s17 + $0x74] ss:$8 sps:$4 sm:$0xff]  }
  0x5d   : > { %v1119_v52 = vld [vmem:[%s423_s6 + $0x4] ss:$8 sps:$4 sm:$0xff]   ;;  %v1092_v55 = vld [vmem:[%s1436_s17 + $0x70] ss:$8 sps:$4 sm:$0xff]   ;;  %v1095_v57 = vld [vmem:[%s1436_s17 + $0x80] ss:$8 sps:$4 sm:$0xff]  }
  0x5e   : > { %692 = vmatpush1.bf16.msra.mxu0 %v1074_v42  ;;  %721 = vmatprep.mubr.bf16.mxu0 %v1119_v52  ;;  %v1093_v56 = vld [vmem:[%s1436_s17 + $0x84] ss:$8 sps:$4 sm:$0xff]   ;;  %v1096_v58 = vld [vmem:[%s1436_s17 + $0x94] ss:$8 sps:$4 sm:$0xff]   ;;  %v1098_v59 = vld [vmem:[%s1436_s17 + $0x90] ss:$8 sps:$4 sm:$0xff]  }
  0x5f   : > { %693 = vmatprep.subr.bf16.mxu0 %v1075_v43  ;;  %v1099_v60 = vld [vmem:[%s1436_s17 + $0xa4] ss:$8 sps:$4 sm:$0xff]   ;;  %v1101_v61 = vld [vmem:[%s1436_s17 + $0xa0] ss:$8 sps:$4 sm:$0xff]   ;;  %v1102_v62 = vld [vmem:[%s1436_s17 + $0xb4] ss:$8 sps:$4 sm:$0xff]  }
  0x60   : > { %v1104_v63 = vld [vmem:[%s1436_s17 + $0xb0] ss:$8 sps:$4 sm:$0xff]   ;;  %v1105_v0 = vld [vmem:[%s1436_s17 + $0xc4] ss:$8 sps:$4 sm:$0xff]   ;;  %v1107_v1 = vld [vmem:[%s1436_s17 + $0xc0] ss:$8 sps:$4 sm:$0xff]  }
  0x61   : > { %v1108_v2 = vld [vmem:[%s1436_s17 + $0xd4] ss:$8 sps:$4 sm:$0xff]   ;;  %v1110_v3 = vld [vmem:[%s1436_s17 + $0xd0] ss:$8 sps:$4 sm:$0xff]   ;;  %v1111_v4 = vld [vmem:[%s1436_s17 + $0xe4] ss:$8 sps:$4 sm:$0xff]  }
  0x62   : > { %694 = vmatpush1.bf16.msra.mxu0 %v1077_v44  ;;  %v1113_v5 = vld [vmem:[%s1436_s17 + $0xe0] ss:$8 sps:$4 sm:$0xff]   ;;  %v1114_v6 = vld [vmem:[%s1436_s17 + $0xf4] ss:$8 sps:$4 sm:$0xff]   ;;  %v1116_v7 = vld [vmem:[%s1436_s17 + $0xf0] ss:$8 sps:$4 sm:$0xff]  }
  0x63   : > { %695 = vmatprep.subr.bf16.mxu0 %v1078_v45  ;;  %v1117_v8 = vld [vmem:[%s423_s6] ss:$8 sps:$4 sm:$0xff]   ;;  %p970_p5 = scmp.ne.s32.totalorder %s1190_s18, 1 }
  0x64   : > { %v481_v9 = vld [vmem:[#allocation2] sm:$0xff]  ;;  %v482_v10 = vld [vmem:[#allocation2 + $0x8] sm:$0xff]  ;;  %v483_v12 = vld [vmem:[#allocation2 + $0x10] sm:$0xff] }
  0x65   : > { %v484_v15 = vld [vmem:[#allocation2 + $0x18] sm:$0xff]  ;;  %v748_v22 = vld [vmem:[%s1438_s24] sm:$0xff] (!%p970_p5)  ;;  %v749_v25 = vld [vmem:[%s1438_s24 + $0x8] sm:$0xff] (!%p970_p5) }
  0x66   : > { %696 = vmatpush1.bf16.msra.mxu0 %v1080_v46  ;;  %v750_v27 = vld [vmem:[%s1438_s24 + $0x10] sm:$0xff] (!%p970_p5)  ;;  %v751_v31 = vld [vmem:[%s1438_s24 + $0x18] sm:$0xff] (!%p970_p5) }
  0x67   : > { %697 = vmatprep.subr.bf16.mxu0 %v1081_v47 }
  0x6a   : > { %698 = vmatpush1.bf16.msra.mxu0 %v1083_v48 }
  0x6b   : > { %699 = vmatprep.subr.bf16.mxu0 %v1084_v49 }
  0x6e   : > { %700 = vmatpush1.bf16.msra.mxu0 %v1086_v50 }
  0x6f   : > { %701 = vmatprep.subr.bf16.mxu0 %v1087_v51 }
  0x72   : > { %702 = vmatpush1.bf16.msra.mxu0 %v1089_v53 }
  0x73   : > { %703 = vmatprep.subr.bf16.mxu0 %v1090_v54 }
  0x76   : > { %704 = vmatpush1.bf16.msra.mxu0 %v1092_v55 }
  0x77   : > { %705 = vmatprep.subr.bf16.mxu0 %v1093_v56 }
  0x7a   : > { %706 = vmatpush1.bf16.msra.mxu0 %v1095_v57 }
  0x7b   : > { %707 = vmatprep.subr.bf16.mxu0 %v1096_v58 }
  0x7e   : > { %708 = vmatpush1.bf16.msra.mxu0 %v1098_v59 }
  0x7f   : > { %709 = vmatprep.subr.bf16.mxu0 %v1099_v60 }
  0x82   : > { %710 = vmatpush1.bf16.msra.mxu0 %v1101_v61 }
  0x83   : > { %711 = vmatprep.subr.bf16.mxu0 %v1102_v62 }
  0x86   : > { %712 = vmatpush1.bf16.msra.mxu0 %v1104_v63 }
  0x87   : > { %713 = vmatprep.subr.bf16.mxu0 %v1105_v0 }
  0x8a   : > { %714 = vmatpush1.bf16.msra.mxu0 %v1107_v1 }
  0x8b   : > { %715 = vmatprep.subr.bf16.mxu0 %v1108_v2 }
  0x8e   : > { %716 = vmatpush1.bf16.msra.mxu0 %v1110_v3 }
  0x8f   : > { %717 = vmatprep.subr.bf16.mxu0 %v1111_v4 }
  0x92   : > { %718 = vmatpush1.bf16.msra.mxu0 %v1113_v5 }
  0x93   : > { %719 = vmatprep.subr.bf16.mxu0 %v1114_v6 }
  0x96   : > { %720 = vmatpush1.bf16.msra.mxu0 %v1116_v7 }
  0x99   : > { %722 = vmatmul.mubr.bf16.vlgmr.msra.gmra.mrb[0].mxu0 %v1117_v8 }
 0x16c   : > { %v723_v11 = vpop.f32.mrb[0].mxu0  ;;  %743 = sbr.rel (%p970_p5) target bundleno = 381 (0x17d), region = 139 }
 0x16d   : > { %v732_v13 = vadd.f32 %v723_v11, %v481_v9  ;;  %v725_v14 = vpop.f32.mrb[1].mxu0 }
 0x16e   : > { %v733_v16 = vadd.f32 %v725_v14, %v482_v10  ;;  %v727_v17 = vpop.f32.mrb[2].mxu0 }
 0x16f   : > { %736 = vst [vmem:[#allocation2] sm:$0xff] %v732_v13  ;;  %v734_v18 = vadd.f32 %v727_v17, %v483_v12  ;;  %v729_v19 = vpop.f32.mrb[3].mxu0 }
 0x170   : > { %737 = vst [vmem:[#allocation2 + $0x8] sm:$0xff] %v733_v16  ;;  %v735_v20 = vadd.f32 %v729_v19, %v484_v15 }
 0x171   : > { %738 = vst [vmem:[#allocation2 + $0x10] sm:$0xff] %v734_v18 }
 0x172   : > { %739 = vst [vmem:[#allocation2 + $0x18] sm:$0xff] %v735_v20 }
 0x176   : > { %v744_v21 = vld [vmem:[#allocation2] sm:$0xff] }
 0x177   : > { %v745_v23 = vld [vmem:[#allocation2 + $0x8] sm:$0xff]  ;;  %v752_v24 = vadd.f32 %v748_v22, %v744_v21 }
 0x178   : > { %v746_v26 = vld [vmem:[#allocation2 + $0x10] sm:$0xff]  ;;  %v753_v28 = vadd.f32 %v749_v25, %v745_v23 }
 0x179   : > { %v754_v29 = vadd.f32 %v750_v27, %v746_v26  ;;  %v747_v30 = vld [vmem:[#allocation2 + $0x18] sm:$0xff]  ;;  %756 = vst [vmem:[%s1440_s25] sm:$0xff] %v752_v24 }
 0x17a   : > { %v755_v32 = vadd.f32 %v751_v31, %v747_v30  ;;  %757 = vst [vmem:[%s1440_s25 + $0x8] sm:$0xff] %v753_v28 }
 0x17b   : > { %758 = vst [vmem:[%s1440_s25 + $0x10] sm:$0xff] %v754_v29 }
 0x17c   : > { %759 = vst [vmem:[%s1440_s25 + $0x18] sm:$0xff] %v755_v32 }
 0x17d PF: > { %766 = sbr.rel (!%p1333_p13) target bundleno = 389 (0x185), region = 143  ;;  %s979_s12 = sshll.u32 (%p1333_p13), %s1194_s19, 4 }
 0x17e   : > { %s772_s18 = scalar_lea.vmem (%p1333_p13), %s1534_s3, %s979_s12 }
 0x180   : > { %v785_v33 = vld [vmem:[%s1440_s25] sm:$0xff] (%p1333_p13) }
 0x181   : > { %v787_v34 = vld [vmem:[%s1440_s25 + $0x8] sm:$0xff] (%p1333_p13)  ;;  %786 = vst [vmem:[%s772_s18] sm:$0xff] (%p1333_p13), %v785_v33 }
 0x182   : > { %v789_v35 = vld [vmem:[%s1440_s25 + $0x10] sm:$0xff] (%p1333_p13)  ;;  %788 = vst [vmem:[%s772_s18 + $0x8] sm:$0xff] (%p1333_p13), %v787_v34 }
 0x183   : > { %v791_v36 = vld [vmem:[%s1440_s25 + $0x18] sm:$0xff] (%p1333_p13)  ;;  %790 = vst [vmem:[%s772_s18 + $0x20] sm:$0xff] (%p1333_p13), %v789_v35 }
 0x184   : > { %792 = vst [vmem:[%s772_s18 + $0x28] sm:$0xff] %v791_v36 }
 0x185 PF: > { %s13_s22 = sadd.s32 1, %s1206_s22   ;;  %s1546_s16 = sld [smem:[#allocation7_spill]] }
 0x186   : > { %p10_p6 = scmp.ge.s32.totalorder %s13_s22, 6   ;;  %s1547_s17 = sld [smem:[#allocation10_spill]] }
 0x187   : > { %s1548_s11 = sld [smem:[#allocation8_spill]]  ;;  %s1549_s30 = sld [smem:[#allocation9_spill]] }
 0x188   : > { %s1550_s12 = smov %s1170_s13  ;;  %s1551_s13 = smov %s1325_s9 }
 0x189   : > { %s1552_s14 = smov %s1178_s15  ;;  %s1553_s15 = smov %s1322_s8 }
 0x18a   : > { %s1554_s18 = smov %s1198_s20  ;;  %s1555_s19 = smov %s1202_s21 }
 0x18b   :  { %12 = sbr.rel (!%p10_p6) target bundleno = 6 (0x6), region = 213 }
 0x18d   : > { %s1556_s20 = smov %s1548_s11  ;;  %s1557_s21 = smov %s1549_s30 }

// kernel: transformer_forward.12
= control target key start
LH: loop header
LB: loop body
LE: loop exit
PB: predicated region body
PF: predicated region fallthrough
CT: control target
= control target key end

     0   :  { %s2998_s15 = smov 0   ;;  %s3323_s0 = inlined_call_operand.vmem [shape: f32[2,8,512], index: 0, kind: input, shape index: {}]   ;;  %s3324_s1 = inlined_call_operand.vmem [shape: bf16[2,512,512], index: 1, kind: input, shape index: {}]   ;;  %s3325_s2 = inlined_call_operand.vmem [shape: bf16[2,512,512], index: 2, kind: input, shape index: {}]   ;;  %s3326_s3 = inlined_call_operand.vmem [shape: bf16[2,8,512], index: 3, kind: output, shape index: {0}]   ;;  %s3327_s4 = inlined_call_operand.vmem [shape: bf16[2,8,512], index: 4, kind: output, shape index: {1}]  }
   0x1 LB: > { %s2271_s16 = sadd.s32 4294967295, %s2971_s15   ;;  %p2275_p0 = scmp.ge.s32.totalorder %s2971_s15, 1  ;;  %s2971_s15 = sphi %s2998_s15, %s15_s15  }
   0x2   : > { %p185_p1 = scmp.lt.s32.totalorder %s2971_s15, 3 }
   0x4   : > { %p186_p2 = pnand %p2275_p0, %p185_p1 }
   0x5   : > { %p226_p3 = scmp.lt.s32.totalorder (!%p186_p2), %s2271_s16, 1 }
   0x6   : > { %189 = sbr.rel (%p186_p2) target bundleno = 489 (0x1e9), region = 32 }
   0xd   : > { %s3329_s16 = smov (!%p226_p3, %s2271_s16), 1 }
   0xe   : > { %s2549_s17 = sshll.u32 %s3329_s16, 10  ;;  %s2548_s21 = sshll.u32 %s3329_s16, 5 }
   0xf   : > { %s3014_s20 = scalar_lea.vmem %s3324_s1, %s2549_s17  ;;  %s3064_s24 = scalar_lea.vmem %s3323_s0, %s2548_s21 }
  0x10   : > { %v2581_v0 = vld [vmem:[%s3014_s20 + $0x4] ss:$16 sps:$4 sm:$0xff]   ;;  %v2583_v1 = vld [vmem:[%s3014_s20 + $0xc] ss:$16 sps:$4 sm:$0xff]   ;;  %v2585_v2 = vld [vmem:[%s3014_s20] ss:$16 sps:$4 sm:$0xff]   ;;  %s3125_s27 = scalar_lea.vmem %s3325_s2, %s2549_s17 }
  0x11   : > { %1027 = vmatprep.subr.bf16.mxu0 %v2581_v0  ;;  %v2586_v3 = vld [vmem:[%s3014_s20 + $0x8] ss:$16 sps:$4 sm:$0xff]   ;;  %1109 = vmatprep.subr.bf16.mxu1 %v2583_v1  ;;  %v2587_v4 = vld [vmem:[%s3014_s20 + $0x24] ss:$16 sps:$4 sm:$0xff]   ;;  %v2589_v5 = vld [vmem:[%s3014_s20 + $0x2c] ss:$16 sps:$4 sm:$0xff]  }
  0x12   : > { %1028 = vmatpush1.bf16.msra.mxu0 %v2585_v2  ;;  %1110 = vmatpush1.bf16.msra.mxu1 %v2586_v3  ;;  %v2591_v6 = vld [vmem:[%s3014_s20 + $0x20] ss:$16 sps:$4 sm:$0xff]   ;;  %v2592_v7 = vld [vmem:[%s3014_s20 + $0x28] ss:$16 sps:$4 sm:$0xff]   ;;  %v2593_v8 = vld [vmem:[%s3014_s20 + $0x44] ss:$16 sps:$4 sm:$0xff]  }
  0x13   : > { %1029 = vmatprep.subr.bf16.mxu0 %v2587_v4  ;;  %1111 = vmatprep.subr.bf16.mxu1 %v2589_v5  ;;  %v2595_v9 = vld [vmem:[%s3014_s20 + $0x4c] ss:$16 sps:$4 sm:$0xff]   ;;  %v2597_v10 = vld [vmem:[%s3014_s20 + $0x40] ss:$16 sps:$4 sm:$0xff]   ;;  %v2598_v11 = vld [vmem:[%s3014_s20 + $0x48] ss:$16 sps:$4 sm:$0xff]  }
  0x14   : > { %v2599_v12 = vld [vmem:[%s3014_s20 + $0x64] ss:$16 sps:$4 sm:$0xff]   ;;  %v2601_v13 = vld [vmem:[%s3014_s20 + $0x6c] ss:$16 sps:$4 sm:$0xff]   ;;  %v2603_v14 = vld [vmem:[%s3014_s20 + $0x60] ss:$16 sps:$4 sm:$0xff]  }
  0x15   : > { %v2604_v15 = vld [vmem:[%s3014_s20 + $0x68] ss:$16 sps:$4 sm:$0xff]   ;;  %v2605_v16 = vld [vmem:[%s3014_s20 + $0x84] ss:$16 sps:$4 sm:$0xff]   ;;  %v2607_v17 = vld [vmem:[%s3014_s20 + $0x8c] ss:$16 sps:$4 sm:$0xff]  }
  0x16   : > { %1030 = vmatpush1.bf16.msra.mxu0 %v2591_v6  ;;  %1112 = vmatpush1.bf16.msra.mxu1 %v2592_v7  ;;  %v2609_v18 = vld [vmem:[%s3014_s20 + $0x80] ss:$16 sps:$4 sm:$0xff]   ;;  %v2610_v19 = vld [vmem:[%s3014_s20 + $0x88] ss:$16 sps:$4 sm:$0xff]   ;;  %v2611_v20 = vld [vmem:[%s3014_s20 + $0xa4] ss:$16 sps:$4 sm:$0xff]  }
  0x17   : > { %1031 = vmatprep.subr.bf16.mxu0 %v2593_v8  ;;  %1113 = vmatprep.subr.bf16.mxu1 %v2595_v9  ;;  %v2613_v21 = vld [vmem:[%s3014_s20 + $0xac] ss:$16 sps:$4 sm:$0xff]   ;;  %v2615_v22 = vld [vmem:[%s3014_s20 + $0xa0] ss:$16 sps:$4 sm:$0xff]   ;;  %v2616_v23 = vld [vmem:[%s3014_s20 + $0xa8] ss:$16 sps:$4 sm:$0xff]  }
  0x18   : > { %v2617_v24 = vld [vmem:[%s3014_s20 + $0xc4] ss:$16 sps:$4 sm:$0xff]   ;;  %v2619_v25 = vld [vmem:[%s3014_s20 + $0xcc] ss:$16 sps:$4 sm:$0xff]   ;;  %v2621_v26 = vld [vmem:[%s3014_s20 + $0xc0] ss:$16 sps:$4 sm:$0xff]  }
  0x19   : > { %v2622_v27 = vld [vmem:[%s3014_s20 + $0xc8] ss:$16 sps:$4 sm:$0xff]   ;;  %v2623_v28 = vld [vmem:[%s3014_s20 + $0xe4] ss:$16 sps:$4 sm:$0xff]   ;;  %v2625_v29 = vld [vmem:[%s3014_s20 + $0xec] ss:$16 sps:$4 sm:$0xff]  }
  0x1a   : > { %1032 = vmatpush1.bf16.msra.mxu0 %v2597_v10  ;;  %1114 = vmatpush1.bf16.msra.mxu1 %v2598_v11  ;;  %v2627_v30 = vld [vmem:[%s3014_s20 + $0xe0] ss:$16 sps:$4 sm:$0xff]   ;;  %v2628_v31 = vld [vmem:[%s3014_s20 + $0xe8] ss:$16 sps:$4 sm:$0xff]   ;;  %v2629_v32 = vld [vmem:[%s3014_s20 + $0x104] ss:$16 sps:$4 sm:$0xff]  }
  0x1b   : > { %1033 = vmatprep.subr.bf16.mxu0 %v2599_v12  ;;  %1115 = vmatprep.subr.bf16.mxu1 %v2601_v13  ;;  %v2631_v33 = vld [vmem:[%s3014_s20 + $0x10c] ss:$16 sps:$4 sm:$0xff]   ;;  %v2633_v34 = vld [vmem:[%s3014_s20 + $0x100] ss:$16 sps:$4 sm:$0xff]   ;;  %v2634_v35 = vld [vmem:[%s3014_s20 + $0x108] ss:$16 sps:$4 sm:$0xff]  }
  0x1c   : > { %v2635_v36 = vld [vmem:[%s3014_s20 + $0x124] ss:$16 sps:$4 sm:$0xff]   ;;  %v2637_v37 = vld [vmem:[%s3014_s20 + $0x12c] ss:$16 sps:$4 sm:$0xff]   ;;  %v2639_v38 = vld [vmem:[%s3014_s20 + $0x120] ss:$16 sps:$4 sm:$0xff]  }
  0x1d   : > { %v2640_v39 = vld [vmem:[%s3014_s20 + $0x128] ss:$16 sps:$4 sm:$0xff]   ;;  %v2641_v40 = vld [vmem:[%s3014_s20 + $0x144] ss:$16 sps:$4 sm:$0xff]   ;;  %v2643_v41 = vld [vmem:[%s3014_s20 + $0x14c] ss:$16 sps:$4 sm:$0xff]  }
  0x1e   : > { %1034 = vmatpush1.bf16.msra.mxu0 %v2603_v14  ;;  %1116 = vmatpush1.bf16.msra.mxu1 %v2604_v15  ;;  %v2645_v42 = vld [vmem:[%s3014_s20 + $0x140] ss:$16 sps:$4 sm:$0xff]   ;;  %v2646_v43 = vld [vmem:[%s3014_s20 + $0x148] ss:$16 sps:$4 sm:$0xff]   ;;  %v2647_v44 = vld [vmem:[%s3014_s20 + $0x164] ss:$16 sps:$4 sm:$0xff]  }
  0x1f   : > { %1035 = vmatprep.subr.bf16.mxu0 %v2605_v16  ;;  %1117 = vmatprep.subr.bf16.mxu1 %v2607_v17  ;;  %v2649_v45 = vld [vmem:[%s3014_s20 + $0x16c] ss:$16 sps:$4 sm:$0xff]   ;;  %v2651_v47 = vld [vmem:[%s3014_s20 + $0x160] ss:$16 sps:$4 sm:$0xff]   ;;  %v2652_v49 = vld [vmem:[%s3014_s20 + $0x168] ss:$16 sps:$4 sm:$0xff]  }
  0x20   : > { %v252_v46 = vld [vmem:[%s3064_s24 + $0x8] sm:$0xff]  ;;  %v2653_v50 = vld [vmem:[%s3014_s20 + $0x184] ss:$16 sps:$4 sm:$0xff]   ;;  %v2657_v52 = vld [vmem:[%s3014_s20 + $0x180] ss:$16 sps:$4 sm:$0xff]   ;;  %s2551_s28 = sshll.u32 %s3329_s16, 4 }
  0x21   : > { %v3070_v48 = vpack.c.bf16 %v252_v46, %v252_v46  ;;  %v2655_v51 = vld [vmem:[%s3014_s20 + $0x18c] ss:$16 sps:$4 sm:$0xff]   ;;  %v2658_v53 = vld [vmem:[%s3014_s20 + $0x188] ss:$16 sps:$4 sm:$0xff]   ;;  %v2659_v54 = vld [vmem:[%s3014_s20 + $0x1a4] ss:$16 sps:$4 sm:$0xff]   ;;  %s245_s5 = scalar_lea.vmem %s3326_s3, %s2551_s28  ;;  %s250_s8 = scalar_lea.vmem %s3327_s4, %s2551_s28 }
  0x22   : > { %1036 = vmatpush1.bf16.msra.mxu0 %v2609_v18  ;;  %1118 = vmatpush1.bf16.msra.mxu1 %v2610_v19  ;;  %v2661_v55 = vld [vmem:[%s3014_s20 + $0x1ac] ss:$16 sps:$4 sm:$0xff]   ;;  %v2663_v56 = vld [vmem:[%s3014_s20 + $0x1a0] ss:$16 sps:$4 sm:$0xff]   ;;  %v2664_v57 = vld [vmem:[%s3014_s20 + $0x1a8] ss:$16 sps:$4 sm:$0xff]  }
  0x23   : > { %1037 = vmatprep.subr.bf16.mxu0 %v2611_v20  ;;  %1119 = vmatprep.subr.bf16.mxu1 %v2613_v21  ;;  %v2665_v58 = vld [vmem:[%s3014_s20 + $0x1c4] ss:$16 sps:$4 sm:$0xff]   ;;  %v2667_v59 = vld [vmem:[%s3014_s20 + $0x1cc] ss:$16 sps:$4 sm:$0xff]   ;;  %v2669_v60 = vld [vmem:[%s3014_s20 + $0x1c0] ss:$16 sps:$4 sm:$0xff]  }
  0x24   : > { %1059 = vmatprep.mubr.bf16.mxu0 %v3070_v48  ;;  %1141 = vmatprep.mubr.bf16.mxu1 %v3070_v48  ;;  %v2670_v61 = vld [vmem:[%s3014_s20 + $0x1c8] ss:$16 sps:$4 sm:$0xff]   ;;  %v2671_v62 = vld [vmem:[%s3014_s20 + $0x1e4] ss:$16 sps:$4 sm:$0xff]   ;;  %v2673_v63 = vld [vmem:[%s3014_s20 + $0x1ec] ss:$16 sps:$4 sm:$0xff]  }
  0x25   : > { %v2675_v0 = vld [vmem:[%s3014_s20 + $0x1e0] ss:$16 sps:$4 sm:$0xff]   ;;  %v2676_v1 = vld [vmem:[%s3014_s20 + $0x1e8] ss:$16 sps:$4 sm:$0xff]   ;;  %v2679_v3 = vld [vmem:[%s3014_s20 + $0x204] ss:$16 sps:$4 sm:$0xff]  }
  0x26   : > { %1038 = vmatpush1.bf16.msra.mxu0 %v2615_v22  ;;  %1120 = vmatpush1.bf16.msra.mxu1 %v2616_v23  ;;  %v251_v2 = vld [vmem:[%s3064_s24] sm:$0xff]  ;;  %v2682_v4 = vld [vmem:[%s3014_s20 + $0x20c] ss:$16 sps:$4 sm:$0xff]   ;;  %v2680_v7 = vld [vmem:[%s3014_s20 + $0x208] ss:$16 sps:$4 sm:$0xff]  }
  0x27   : > { %1039 = vmatprep.subr.bf16.mxu0 %v2617_v24  ;;  %1121 = vmatprep.subr.bf16.mxu1 %v2619_v25  ;;  %v3094_v5 = vpack.c.bf16 %v251_v2, %v251_v2  ;;  %v2677_v6 = vld [vmem:[%s3014_s20 + $0x200] ss:$16 sps:$4 sm:$0xff]   ;;  %v2685_v8 = vld [vmem:[%s3014_s20 + $0x224] ss:$16 sps:$4 sm:$0xff]   ;;  %v2688_v9 = vld [vmem:[%s3014_s20 + $0x22c] ss:$16 sps:$4 sm:$0xff]  }
  0x28   : > { %v2683_v10 = vld [vmem:[%s3014_s20 + $0x220] ss:$16 sps:$4 sm:$0xff]   ;;  %v2686_v11 = vld [vmem:[%s3014_s20 + $0x228] ss:$16 sps:$4 sm:$0xff]   ;;  %v2691_v12 = vld [vmem:[%s3014_s20 + $0x244] ss:$16 sps:$4 sm:$0xff]  }
  0x29   : > { %v2694_v13 = vld [vmem:[%s3014_s20 + $0x24c] ss:$16 sps:$4 sm:$0xff]   ;;  %v2689_v14 = vld [vmem:[%s3014_s20 + $0x240] ss:$16 sps:$4 sm:$0xff]   ;;  %v2692_v15 = vld [vmem:[%s3014_s20 + $0x248] ss:$16 sps:$4 sm:$0xff]  }
  0x2a   : > { %1040 = vmatpush1.bf16.msra.mxu0 %v2621_v26  ;;  %1122 = vmatpush1.bf16.msra.mxu1 %v2622_v27  ;;  %v2697_v16 = vld [vmem:[%s3014_s20 + $0x264] ss:$16 sps:$4 sm:$0xff]   ;;  %v2700_v17 = vld [vmem:[%s3014_s20 + $0x26c] ss:$16 sps:$4 sm:$0xff]   ;;  %v2695_v18 = vld [vmem:[%s3014_s20 + $0x260] ss:$16 sps:$4 sm:$0xff]  }
  0x2b   : > { %1041 = vmatprep.subr.bf16.mxu0 %v2623_v28  ;;  %1123 = vmatprep.subr.bf16.mxu1 %v2625_v29  ;;  %v2698_v19 = vld [vmem:[%s3014_s20 + $0x268] ss:$16 sps:$4 sm:$0xff]   ;;  %v2703_v20 = vld [vmem:[%s3014_s20 + $0x284] ss:$16 sps:$4 sm:$0xff]   ;;  %v2706_v21 = vld [vmem:[%s3014_s20 + $0x28c] ss:$16 sps:$4 sm:$0xff]  }
  0x2c   : > { %v2701_v22 = vld [vmem:[%s3014_s20 + $0x280] ss:$16 sps:$4 sm:$0xff]   ;;  %v2704_v23 = vld [vmem:[%s3014_s20 + $0x288] ss:$16 sps:$4 sm:$0xff]   ;;  %v2709_v24 = vld [vmem:[%s3014_s20 + $0x2a4] ss:$16 sps:$4 sm:$0xff]  }
  0x2d   : > { %v2712_v25 = vld [vmem:[%s3014_s20 + $0x2ac] ss:$16 sps:$4 sm:$0xff]   ;;  %v2707_v26 = vld [vmem:[%s3014_s20 + $0x2a0] ss:$16 sps:$4 sm:$0xff]   ;;  %v2710_v27 = vld [vmem:[%s3014_s20 + $0x2a8] ss:$16 sps:$4 sm:$0xff]  }
  0x2e   : > { %1042 = vmatpush1.bf16.msra.mxu0 %v2627_v30  ;;  %1124 = vmatpush1.bf16.msra.mxu1 %v2628_v31  ;;  %v2715_v28 = vld [vmem:[%s3014_s20 + $0x2c4] ss:$16 sps:$4 sm:$0xff]   ;;  %v2718_v29 = vld [vmem:[%s3014_s20 + $0x2cc] ss:$16 sps:$4 sm:$0xff]   ;;  %v2713_v31 = vld [vmem:[%s3014_s20 + $0x2c0] ss:$16 sps:$4 sm:$0xff]  }
  0x2f   : > { %1043 = vmatprep.subr.bf16.mxu0 %v2629_v32  ;;  %1125 = vmatprep.subr.bf16.mxu1 %v2631_v33  ;;  %v254_v30 = vld [vmem:[%s3064_s24 + $0x18] sm:$0xff]  ;;  %v2739_v46 = vld [vmem:[%s3014_s20 + $0x344] ss:$16 sps:$4 sm:$0xff]  }
  0x30   : > { %v2716_v32 = vld [vmem:[%s3014_s20 + $0x2c8] ss:$16 sps:$4 sm:$0xff]   ;;  %v3132_v33 = vpack.c.bf16 %v254_v30, %v254_v30  ;;  %v2808_v30 = vld [vmem:[%s3125_s27 + $0xac] ss:$16 sps:$4 sm:$0xff]  }
  0x31   : > { %v2764_v2 = vld [vmem:[%s3014_s20 + $0x3c8] ss:$16 sps:$4 sm:$0xff]  }
  0x32   : > { %1044 = vmatpush1.bf16.msra.mxu0 %v2633_v34  ;;  %1126 = vmatpush1.bf16.msra.mxu1 %v2634_v35  ;;  %v2721_v34 = vld [vmem:[%s3014_s20 + $0x2e4] ss:$16 sps:$4 sm:$0xff]   ;;  %v2724_v35 = vld [vmem:[%s3014_s20 + $0x2ec] ss:$16 sps:$4 sm:$0xff]  }
  0x33   : > { %1045 = vmatprep.subr.bf16.mxu0 %v2635_v36  ;;  %1127 = vmatprep.subr.bf16.mxu1 %v2637_v37  ;;  %v2719_v36 = vld [vmem:[%s3014_s20 + $0x2e0] ss:$16 sps:$4 sm:$0xff]   ;;  %v2722_v37 = vld [vmem:[%s3014_s20 + $0x2e8] ss:$16 sps:$4 sm:$0xff]  }
  0x36   : > { %1046 = vmatpush1.bf16.msra.mxu0 %v2639_v38  ;;  %1128 = vmatpush1.bf16.msra.mxu1 %v2640_v39  ;;  %v2727_v38 = vld [vmem:[%s3014_s20 + $0x304] ss:$16 sps:$4 sm:$0xff]   ;;  %v2730_v39 = vld [vmem:[%s3014_s20 + $0x30c] ss:$16 sps:$4 sm:$0xff]  }
  0x37   : > { %1047 = vmatprep.subr.bf16.mxu0 %v2641_v40  ;;  %1129 = vmatprep.subr.bf16.mxu1 %v2643_v41  ;;  %v2725_v40 = vld [vmem:[%s3014_s20 + $0x300] ss:$16 sps:$4 sm:$0xff]   ;;  %v2728_v41 = vld [vmem:[%s3014_s20 + $0x308] ss:$16 sps:$4 sm:$0xff]  }
  0x3a   : > { %1048 = vmatpush1.bf16.msra.mxu0 %v2645_v42  ;;  %1130 = vmatpush1.bf16.msra.mxu1 %v2646_v43  ;;  %v2733_v42 = vld [vmem:[%s3014_s20 + $0x324] ss:$16 sps:$4 sm:$0xff]   ;;  %v2736_v43 = vld [vmem:[%s3014_s20 + $0x32c] ss:$16 sps:$4 sm:$0xff]  }
  0x3b   : > { %1049 = vmatprep.subr.bf16.mxu0 %v2647_v44  ;;  %1131 = vmatprep.subr.bf16.mxu1 %v2649_v45  ;;  %v2731_v44 = vld [vmem:[%s3014_s20 + $0x320] ss:$16 sps:$4 sm:$0xff]   ;;  %v2734_v45 = vld [vmem:[%s3014_s20 + $0x328] ss:$16 sps:$4 sm:$0xff]  }
  0x3e   : > { %1050 = vmatpush1.bf16.msra.mxu0 %v2651_v47  ;;  %1132 = vmatpush1.bf16.msra.mxu1 %v2652_v49  ;;  %v2742_v47 = vld [vmem:[%s3014_s20 + $0x34c] ss:$16 sps:$4 sm:$0xff]   ;;  %v2737_v49 = vld [vmem:[%s3014_s20 + $0x340] ss:$16 sps:$4 sm:$0xff]  }
  0x3f   : > { %1051 = vmatprep.subr.bf16.mxu0 %v2653_v50  ;;  %1133 = vmatprep.subr.bf16.mxu1 %v2655_v51  ;;  %v2740_v50 = vld [vmem:[%s3014_s20 + $0x348] ss:$16 sps:$4 sm:$0xff]   ;;  %v2745_v51 = vld [vmem:[%s3014_s20 + $0x364] ss:$16 sps:$4 sm:$0xff]  }
  0x42   : > { %1052 = vmatpush1.bf16.msra.mxu0 %v2657_v52  ;;  %1134 = vmatpush1.bf16.msra.mxu1 %v2658_v53  ;;  %v2748_v52 = vld [vmem:[%s3014_s20 + $0x36c] ss:$16 sps:$4 sm:$0xff]   ;;  %v2743_v53 = vld [vmem:[%s3014_s20 + $0x360] ss:$16 sps:$4 sm:$0xff]  }
  0x43   : > { %1053 = vmatprep.subr.bf16.mxu0 %v2659_v54  ;;  %1135 = vmatprep.subr.bf16.mxu1 %v2661_v55  ;;  %v2746_v54 = vld [vmem:[%s3014_s20 + $0x368] ss:$16 sps:$4 sm:$0xff]   ;;  %v2751_v55 = vld [vmem:[%s3014_s20 + $0x384] ss:$16 sps:$4 sm:$0xff]  }
  0x46   : > { %1054 = vmatpush1.bf16.msra.mxu0 %v2663_v56  ;;  %1136 = vmatpush1.bf16.msra.mxu1 %v2664_v57  ;;  %v2754_v56 = vld [vmem:[%s3014_s20 + $0x38c] ss:$16 sps:$4 sm:$0xff]   ;;  %v2749_v57 = vld [vmem:[%s3014_s20 + $0x380] ss:$16 sps:$4 sm:$0xff]  }
  0x47   : > { %1055 = vmatprep.subr.bf16.mxu0 %v2665_v58  ;;  %1137 = vmatprep.subr.bf16.mxu1 %v2667_v59  ;;  %v2752_v58 = vld [vmem:[%s3014_s20 + $0x388] ss:$16 sps:$4 sm:$0xff]   ;;  %v2757_v59 = vld [vmem:[%s3014_s20 + $0x3a4] ss:$16 sps:$4 sm:$0xff]  }
  0x4a   : > { %1056 = vmatpush1.bf16.msra.mxu0 %v2669_v60  ;;  %1138 = vmatpush1.bf16.msra.mxu1 %v2670_v61  ;;  %v2760_v60 = vld [vmem:[%s3014_s20 + $0x3ac] ss:$16 sps:$4 sm:$0xff]   ;;  %v2755_v61 = vld [vmem:[%s3014_s20 + $0x3a0] ss:$16 sps:$4 sm:$0xff]  }
  0x4b   : > { %1057 = vmatprep.subr.bf16.mxu0 %v2671_v62  ;;  %1139 = vmatprep.subr.bf16.mxu1 %v2673_v63  ;;  %v2758_v62 = vld [vmem:[%s3014_s20 + $0x3a8] ss:$16 sps:$4 sm:$0xff]   ;;  %v2763_v63 = vld [vmem:[%s3014_s20 + $0x3c4] ss:$16 sps:$4 sm:$0xff]  }
  0x4e   : > { %1058 = vmatpush1.bf16.msra.mxu0 %v2675_v0  ;;  %1140 = vmatpush1.bf16.msra.mxu1 %v2676_v1  ;;  %v2766_v0 = vld [vmem:[%s3014_s20 + $0x3cc] ss:$16 sps:$4 sm:$0xff]   ;;  %v2761_v1 = vld [vmem:[%s3014_s20 + $0x3c0] ss:$16 sps:$4 sm:$0xff]  }
  0x4f   : > { %1068 = vmatprep.subr.bf16.mxu0 %v2679_v3  ;;  %1150 = vmatprep.subr.bf16.mxu1 %v2682_v4  ;;  %v2769_v3 = vld [vmem:[%s3014_s20 + $0x3e4] ss:$16 sps:$4 sm:$0xff]   ;;  %v2772_v4 = vld [vmem:[%s3014_s20 + $0x3ec] ss:$16 sps:$4 sm:$0xff]  }
  0x51   : > { %1060 = vmatmul.mubr.bf16.vlgmr.msra.gmra.mrb[0].mxu0 %v3094_v5  ;;  %1142 = vmatmul.mubr.bf16.vlgmr.msra.gmra.mrb[0].mxu1 %v3094_v5 }
  0x52   : > { %1069 = vmatpush1.bf16.msra.mxu0 %v2677_v6  ;;  %1151 = vmatpush1.bf16.msra.mxu1 %v2680_v7  ;;  %v2767_v6 = vld [vmem:[%s3014_s20 + $0x3e0] ss:$16 sps:$4 sm:$0xff]   ;;  %v2770_v7 = vld [vmem:[%s3014_s20 + $0x3e8] ss:$16 sps:$4 sm:$0xff]  }
  0x53   : > { %1070 = vmatprep.subr.bf16.mxu0 %v2685_v8  ;;  %1152 = vmatprep.subr.bf16.mxu1 %v2688_v9  ;;  %v253_v8 = vld [vmem:[%s3064_s24 + $0x10] sm:$0xff] }
  0x54   : > { %1100 = vmatprep.mubr.bf16.mxu0 %v3132_v33  ;;  %1182 = vmatprep.mubr.bf16.mxu1 %v3132_v33  ;;  %v2775_v9 = vld [vmem:[%s3125_s27 + $0x4] ss:$16 sps:$4 sm:$0xff]  }
  0x56   : > { %1071 = vmatpush1.bf16.msra.mxu0 %v2683_v10  ;;  %1153 = vmatpush1.bf16.msra.mxu1 %v2686_v11  ;;  %v2778_v10 = vld [vmem:[%s3125_s27 + $0xc] ss:$16 sps:$4 sm:$0xff]   ;;  %v3175_v11 = vpack.c.bf16 %v253_v8, %v253_v8  ;;  %v2865_v8 = vld [vmem:[%s3125_s27 + $0x1e4] ss:$16 sps:$4 sm:$0xff]  }
  0x57   : > { %1072 = vmatprep.subr.bf16.mxu0 %v2691_v12  ;;  %1154 = vmatprep.subr.bf16.mxu1 %v2694_v13  ;;  %v2773_v12 = vld [vmem:[%s3125_s27] ss:$16 sps:$4 sm:$0xff]   ;;  %v2776_v13 = vld [vmem:[%s3125_s27 + $0x8] ss:$16 sps:$4 sm:$0xff]  }
  0x5a   : > { %1073 = vmatpush1.bf16.msra.mxu0 %v2689_v14  ;;  %1155 = vmatpush1.bf16.msra.mxu1 %v2692_v15  ;;  %v2781_v14 = vld [vmem:[%s3125_s27 + $0x24] ss:$16 sps:$4 sm:$0xff]   ;;  %v2784_v15 = vld [vmem:[%s3125_s27 + $0x2c] ss:$16 sps:$4 sm:$0xff]  }
  0x5b   : > { %1074 = vmatprep.subr.bf16.mxu0 %v2697_v16  ;;  %1156 = vmatprep.subr.bf16.mxu1 %v2700_v17  ;;  %v2779_v16 = vld [vmem:[%s3125_s27 + $0x20] ss:$16 sps:$4 sm:$0xff]   ;;  %v2782_v17 = vld [vmem:[%s3125_s27 + $0x28] ss:$16 sps:$4 sm:$0xff]  }
  0x5e   : > { %1075 = vmatpush1.bf16.msra.mxu0 %v2695_v18  ;;  %1157 = vmatpush1.bf16.msra.mxu1 %v2698_v19  ;;  %v2787_v18 = vld [vmem:[%s3125_s27 + $0x44] ss:$16 sps:$4 sm:$0xff]   ;;  %v2790_v19 = vld [vmem:[%s3125_s27 + $0x4c] ss:$16 sps:$4 sm:$0xff]  }
  0x5f   : > { %1076 = vmatprep.subr.bf16.mxu0 %v2703_v20  ;;  %1158 = vmatprep.subr.bf16.mxu1 %v2706_v21  ;;  %v2785_v20 = vld [vmem:[%s3125_s27 + $0x40] ss:$16 sps:$4 sm:$0xff]   ;;  %v2788_v21 = vld [vmem:[%s3125_s27 + $0x48] ss:$16 sps:$4 sm:$0xff]  }
  0x62   : > { %1077 = vmatpush1.bf16.msra.mxu0 %v2701_v22  ;;  %1159 = vmatpush1.bf16.msra.mxu1 %v2704_v23  ;;  %v2793_v22 = vld [vmem:[%s3125_s27 + $0x64] ss:$16 sps:$4 sm:$0xff]   ;;  %v2796_v23 = vld [vmem:[%s3125_s27 + $0x6c] ss:$16 sps:$4 sm:$0xff]  }
  0x63   : > { %1078 = vmatprep.subr.bf16.mxu0 %v2709_v24  ;;  %1160 = vmatprep.subr.bf16.mxu1 %v2712_v25  ;;  %v2791_v24 = vld [vmem:[%s3125_s27 + $0x60] ss:$16 sps:$4 sm:$0xff]   ;;  %v2794_v25 = vld [vmem:[%s3125_s27 + $0x68] ss:$16 sps:$4 sm:$0xff]  }
  0x66   : > { %1079 = vmatpush1.bf16.msra.mxu0 %v2707_v26  ;;  %1161 = vmatpush1.bf16.msra.mxu1 %v2710_v27  ;;  %v2802_v26 = vld [vmem:[%s3125_s27 + $0x8c] ss:$16 sps:$4 sm:$0xff]   ;;  %v2797_v27 = vld [vmem:[%s3125_s27 + $0x80] ss:$16 sps:$4 sm:$0xff]  }
  0x67   : > { %1080 = vmatprep.subr.bf16.mxu0 %v2715_v28  ;;  %1162 = vmatprep.subr.bf16.mxu1 %v2718_v29  ;;  %v2800_v28 = vld [vmem:[%s3125_s27 + $0x88] ss:$16 sps:$4 sm:$0xff]   ;;  %v2805_v29 = vld [vmem:[%s3125_s27 + $0xa4] ss:$16 sps:$4 sm:$0xff]  }
  0x6a   : > { %1081 = vmatpush1.bf16.msra.mxu0 %v2713_v31  ;;  %1163 = vmatpush1.bf16.msra.mxu1 %v2716_v32  ;;  %v2803_v31 = vld [vmem:[%s3125_s27 + $0xa0] ss:$16 sps:$4 sm:$0xff]   ;;  %v2806_v32 = vld [vmem:[%s3125_s27 + $0xa8] ss:$16 sps:$4 sm:$0xff]  }
  0x6b   : > { %1082 = vmatprep.subr.bf16.mxu0 %v2721_v34  ;;  %1164 = vmatprep.subr.bf16.mxu1 %v2724_v35  ;;  %v2811_v34 = vld [vmem:[%s3125_s27 + $0xc4] ss:$16 sps:$4 sm:$0xff]   ;;  %v2814_v35 = vld [vmem:[%s3125_s27 + $0xcc] ss:$16 sps:$4 sm:$0xff]  }
  0x6e   : > { %1083 = vmatpush1.bf16.msra.mxu0 %v2719_v36  ;;  %1165 = vmatpush1.bf16.msra.mxu1 %v2722_v37  ;;  %v2809_v36 = vld [vmem:[%s3125_s27 + $0xc0] ss:$16 sps:$4 sm:$0xff]   ;;  %v2812_v37 = vld [vmem:[%s3125_s27 + $0xc8] ss:$16 sps:$4 sm:$0xff]  }
  0x6f   : > { %1084 = vmatprep.subr.bf16.mxu0 %v2727_v38  ;;  %1166 = vmatprep.subr.bf16.mxu1 %v2730_v39  ;;  %v2817_v38 = vld [vmem:[%s3125_s27 + $0xe4] ss:$16 sps:$4 sm:$0xff]   ;;  %v2820_v39 = vld [vmem:[%s3125_s27 + $0xec] ss:$16 sps:$4 sm:$0xff]  }
  0x72   : > { %1085 = vmatpush1.bf16.msra.mxu0 %v2725_v40  ;;  %1167 = vmatpush1.bf16.msra.mxu1 %v2728_v41  ;;  %v2815_v40 = vld [vmem:[%s3125_s27 + $0xe0] ss:$16 sps:$4 sm:$0xff]   ;;  %v2818_v41 = vld [vmem:[%s3125_s27 + $0xe8] ss:$16 sps:$4 sm:$0xff]  }
  0x73   : > { %1086 = vmatprep.subr.bf16.mxu0 %v2733_v42  ;;  %1168 = vmatprep.subr.bf16.mxu1 %v2736_v43  ;;  %v2823_v42 = vld [vmem:[%s3125_s27 + $0x104] ss:$16 sps:$4 sm:$0xff]   ;;  %v2826_v43 = vld [vmem:[%s3125_s27 + $0x10c] ss:$16 sps:$4 sm:$0xff]  }
  0x76   : > { %1087 = vmatpush1.bf16.msra.mxu0 %v2731_v44  ;;  %1169 = vmatpush1.bf16.msra.mxu1 %v2734_v45  ;;  %v2821_v44 = vld [vmem:[%s3125_s27 + $0x100] ss:$16 sps:$4 sm:$0xff]   ;;  %v2824_v45 = vld [vmem:[%s3125_s27 + $0x108] ss:$16 sps:$4 sm:$0xff]  }
  0x77   : > { %1088 = vmatprep.subr.bf16.mxu0 %v2739_v46  ;;  %1170 = vmatprep.subr.bf16.mxu1 %v2742_v47  ;;  %v2829_v46 = vld [vmem:[%s3125_s27 + $0x124] ss:$16 sps:$4 sm:$0xff]   ;;  %v2832_v47 = vld [vmem:[%s3125_s27 + $0x12c] ss:$16 sps:$4 sm:$0xff]  }
  0x7a   : > { %1089 = vmatpush1.bf16.msra.mxu0 %v2737_v49  ;;  %1171 = vmatpush1.bf16.msra.mxu1 %v2740_v50  ;;  %v2827_v49 = vld [vmem:[%s3125_s27 + $0x120] ss:$16 sps:$4 sm:$0xff]   ;;  %v2830_v50 = vld [vmem:[%s3125_s27 + $0x128] ss:$16 sps:$4 sm:$0xff]  }
  0x7b   : > { %1090 = vmatprep.subr.bf16.mxu0 %v2745_v51  ;;  %1172 = vmatprep.subr.bf16.mxu1 %v2748_v52  ;;  %v2835_v51 = vld [vmem:[%s3125_s27 + $0x144] ss:$16 sps:$4 sm:$0xff]   ;;  %v2838_v52 = vld [vmem:[%s3125_s27 + $0x14c] ss:$16 sps:$4 sm:$0xff]  }
  0x7e   : > { %1091 = vmatpush1.bf16.msra.mxu0 %v2743_v53  ;;  %1173 = vmatpush1.bf16.msra.mxu1 %v2746_v54  ;;  %v2833_v53 = vld [vmem:[%s3125_s27 + $0x140] ss:$16 sps:$4 sm:$0xff]   ;;  %v2836_v54 = vld [vmem:[%s3125_s27 + $0x148] ss:$16 sps:$4 sm:$0xff]  }
  0x7f   : > { %1092 = vmatprep.subr.bf16.mxu0 %v2751_v55  ;;  %1174 = vmatprep.subr.bf16.mxu1 %v2754_v56  ;;  %v2841_v55 = vld [vmem:[%s3125_s27 + $0x164] ss:$16 sps:$4 sm:$0xff]   ;;  %v2844_v56 = vld [vmem:[%s3125_s27 + $0x16c] ss:$16 sps:$4 sm:$0xff]  }
  0x82   : > { %1093 = vmatpush1.bf16.msra.mxu0 %v2749_v57  ;;  %1175 = vmatpush1.bf16.msra.mxu1 %v2752_v58  ;;  %v2839_v57 = vld [vmem:[%s3125_s27 + $0x160] ss:$16 sps:$4 sm:$0xff]   ;;  %v2842_v58 = vld [vmem:[%s3125_s27 + $0x168] ss:$16 sps:$4 sm:$0xff]  }
  0x83   : > { %1094 = vmatprep.subr.bf16.mxu0 %v2757_v59  ;;  %1176 = vmatprep.subr.bf16.mxu1 %v2760_v60  ;;  %v2847_v59 = vld [vmem:[%s3125_s27 + $0x184] ss:$16 sps:$4 sm:$0xff]   ;;  %v2850_v60 = vld [vmem:[%s3125_s27 + $0x18c] ss:$16 sps:$4 sm:$0xff]  }
  0x86   : > { %1095 = vmatpush1.bf16.msra.mxu0 %v2755_v61  ;;  %1177 = vmatpush1.bf16.msra.mxu1 %v2758_v62  ;;  %v2845_v61 = vld [vmem:[%s3125_s27 + $0x180] ss:$16 sps:$4 sm:$0xff]   ;;  %v2848_v62 = vld [vmem:[%s3125_s27 + $0x188] ss:$16 sps:$4 sm:$0xff]  }
  0x87   : > { %1096 = vmatprep.subr.bf16.mxu0 %v2763_v63  ;;  %1178 = vmatprep.subr.bf16.mxu1 %v2766_v0  ;;  %v2853_v63 = vld [vmem:[%s3125_s27 + $0x1a4] ss:$16 sps:$4 sm:$0xff]   ;;  %v2856_v0 = vld [vmem:[%s3125_s27 + $0x1ac] ss:$16 sps:$4 sm:$0xff]  }
  0x8a   : > { %1097 = vmatpush1.bf16.msra.mxu0 %v2761_v1  ;;  %1179 = vmatpush1.bf16.msra.mxu1 %v2764_v2  ;;  %v2851_v1 = vld [vmem:[%s3125_s27 + $0x1a0] ss:$16 sps:$4 sm:$0xff]   ;;  %v2854_v2 = vld [vmem:[%s3125_s27 + $0x1a8] ss:$16 sps:$4 sm:$0xff]  }
  0x8b   : > { %1098 = vmatprep.subr.bf16.mxu0 %v2769_v3  ;;  %1180 = vmatprep.subr.bf16.mxu1 %v2772_v4  ;;  %v2859_v3 = vld [vmem:[%s3125_s27 + $0x1c4] ss:$16 sps:$4 sm:$0xff]   ;;  %v2862_v4 = vld [vmem:[%s3125_s27 + $0x1cc] ss:$16 sps:$4 sm:$0xff]  }
  0x8e   : > { %1099 = vmatpush1.bf16.msra.mxu0 %v2767_v6  ;;  %1181 = vmatpush1.bf16.msra.mxu1 %v2770_v7  ;;  %v2857_v6 = vld [vmem:[%s3125_s27 + $0x1c0] ss:$16 sps:$4 sm:$0xff]   ;;  %v2860_v7 = vld [vmem:[%s3125_s27 + $0x1c8] ss:$16 sps:$4 sm:$0xff]  }
  0x8f   : > { %1977 = vmatprep.subr.bf16.mxu0 %v2775_v9  ;;  %2059 = vmatprep.subr.bf16.mxu1 %v2778_v10  ;;  %v2868_v9 = vld [vmem:[%s3125_s27 + $0x1ec] ss:$16 sps:$4 sm:$0xff]   ;;  %v2863_v10 = vld [vmem:[%s3125_s27 + $0x1e0] ss:$16 sps:$4 sm:$0xff]  }
  0x91   : > { %1101 = vmatmul.mubr.bf16.vlgmr.msra.gmra.mrb[0].mxu0 %v3175_v11  ;;  %1183 = vmatmul.mubr.bf16.vlgmr.msra.gmra.mrb[0].mxu1 %v3175_v11 }
  0x92   : > { %1978 = vmatpush1.bf16.msra.mxu0 %v2773_v12  ;;  %2060 = vmatpush1.bf16.msra.mxu1 %v2776_v13  ;;  %v2866_v12 = vld [vmem:[%s3125_s27 + $0x1e8] ss:$16 sps:$4 sm:$0xff]   ;;  %v2871_v13 = vld [vmem:[%s3125_s27 + $0x204] ss:$16 sps:$4 sm:$0xff]  }
  0x93   : > { %1979 = vmatprep.subr.bf16.mxu0 %v2781_v14  ;;  %2061 = vmatprep.subr.bf16.mxu1 %v2784_v15  ;;  %v2874_v14 = vld [vmem:[%s3125_s27 + $0x20c] ss:$16 sps:$4 sm:$0xff]   ;;  %v2869_v15 = vld [vmem:[%s3125_s27 + $0x200] ss:$16 sps:$4 sm:$0xff]  }
  0x94   : > { %2009 = vmatprep.mubr.bf16.mxu0 %v3070_v48  ;;  %2091 = vmatprep.mubr.bf16.mxu1 %v3070_v48  ;;  %v2799_v48 = vld [vmem:[%s3125_s27 + $0x84] ss:$16 sps:$4 sm:$0xff]  }
  0x96   : > { %1980 = vmatpush1.bf16.msra.mxu0 %v2779_v16  ;;  %2062 = vmatpush1.bf16.msra.mxu1 %v2782_v17  ;;  %v2872_v16 = vld [vmem:[%s3125_s27 + $0x208] ss:$16 sps:$4 sm:$0xff]   ;;  %v2877_v17 = vld [vmem:[%s3125_s27 + $0x224] ss:$16 sps:$4 sm:$0xff]  }
  0x97   : > { %1981 = vmatprep.subr.bf16.mxu0 %v2787_v18  ;;  %2063 = vmatprep.subr.bf16.mxu1 %v2790_v19  ;;  %v2880_v18 = vld [vmem:[%s3125_s27 + $0x22c] ss:$16 sps:$4 sm:$0xff]   ;;  %v2875_v19 = vld [vmem:[%s3125_s27 + $0x220] ss:$16 sps:$4 sm:$0xff]  }
  0x9a   : > { %1982 = vmatpush1.bf16.msra.mxu0 %v2785_v20  ;;  %2064 = vmatpush1.bf16.msra.mxu1 %v2788_v21  ;;  %v2878_v20 = vld [vmem:[%s3125_s27 + $0x228] ss:$16 sps:$4 sm:$0xff]   ;;  %v2883_v21 = vld [vmem:[%s3125_s27 + $0x244] ss:$16 sps:$4 sm:$0xff]  }
  0x9b   : > { %1983 = vmatprep.subr.bf16.mxu0 %v2793_v22  ;;  %2065 = vmatprep.subr.bf16.mxu1 %v2796_v23  ;;  %v2886_v22 = vld [vmem:[%s3125_s27 + $0x24c] ss:$16 sps:$4 sm:$0xff]   ;;  %v2884_v23 = vld [vmem:[%s3125_s27 + $0x248] ss:$16 sps:$4 sm:$0xff]  }
  0x9e   : > { %1984 = vmatpush1.bf16.msra.mxu0 %v2791_v24  ;;  %2066 = vmatpush1.bf16.msra.mxu1 %v2794_v25  ;;  %v2889_v24 = vld [vmem:[%s3125_s27 + $0x264] ss:$16 sps:$4 sm:$0xff]   ;;  %v2892_v25 = vld [vmem:[%s3125_s27 + $0x26c] ss:$16 sps:$4 sm:$0xff]  }
  0x9f   : > { %1985 = vmatprep.subr.bf16.mxu0 %v2799_v48  ;;  %2067 = vmatprep.subr.bf16.mxu1 %v2802_v26  ;;  %v2887_v48 = vld [vmem:[%s3125_s27 + $0x260] ss:$16 sps:$4 sm:$0xff]   ;;  %v2890_v26 = vld [vmem:[%s3125_s27 + $0x268] ss:$16 sps:$4 sm:$0xff]  }
  0xa2   : > { %1986 = vmatpush1.bf16.msra.mxu0 %v2797_v27  ;;  %2068 = vmatpush1.bf16.msra.mxu1 %v2800_v28  ;;  %v2898_v27 = vld [vmem:[%s3125_s27 + $0x28c] ss:$16 sps:$4 sm:$0xff]   ;;  %v2893_v28 = vld [vmem:[%s3125_s27 + $0x280] ss:$16 sps:$4 sm:$0xff]  }
  0xa3   : > { %1987 = vmatprep.subr.bf16.mxu0 %v2805_v29  ;;  %2069 = vmatprep.subr.bf16.mxu1 %v2808_v30  ;;  %v2896_v29 = vld [vmem:[%s3125_s27 + $0x288] ss:$16 sps:$4 sm:$0xff]   ;;  %v2901_v30 = vld [vmem:[%s3125_s27 + $0x2a4] ss:$16 sps:$4 sm:$0xff]  }
  0xa6   : > { %1988 = vmatpush1.bf16.msra.mxu0 %v2803_v31  ;;  %2070 = vmatpush1.bf16.msra.mxu1 %v2806_v32  ;;  %v2904_v31 = vld [vmem:[%s3125_s27 + $0x2ac] ss:$16 sps:$4 sm:$0xff]   ;;  %v2899_v32 = vld [vmem:[%s3125_s27 + $0x2a0] ss:$16 sps:$4 sm:$0xff]  }
  0xa7   : > { %1989 = vmatprep.subr.bf16.mxu0 %v2811_v34  ;;  %2071 = vmatprep.subr.bf16.mxu1 %v2814_v35  ;;  %v2902_v34 = vld [vmem:[%s3125_s27 + $0x2a8] ss:$16 sps:$4 sm:$0xff]   ;;  %v2907_v35 = vld [vmem:[%s3125_s27 + $0x2c4] ss:$16 sps:$4 sm:$0xff]  }
  0xaa   : > { %1990 = vmatpush1.bf16.msra.mxu0 %v2809_v36  ;;  %2072 = vmatpush1.bf16.msra.mxu1 %v2812_v37  ;;  %v2910_v36 = vld [vmem:[%s3125_s27 + $0x2cc] ss:$16 sps:$4 sm:$0xff]   ;;  %v2905_v37 = vld [vmem:[%s3125_s27 + $0x2c0] ss:$16 sps:$4 sm:$0xff]  }
  0xab   : > { %1991 = vmatprep.subr.bf16.mxu0 %v2817_v38  ;;  %2073 = vmatprep.subr.bf16.mxu1 %v2820_v39  ;;  %v2908_v38 = vld [vmem:[%s3125_s27 + $0x2c8] ss:$16 sps:$4 sm:$0xff]   ;;  %v2913_v39 = vld [vmem:[%s3125_s27 + $0x2e4] ss:$16 sps:$4 sm:$0xff]  }
  0xae   : > { %1992 = vmatpush1.bf16.msra.mxu0 %v2815_v40  ;;  %2074 = vmatpush1.bf16.msra.mxu1 %v2818_v41  ;;  %v2916_v40 = vld [vmem:[%s3125_s27 + $0x2ec] ss:$16 sps:$4 sm:$0xff]   ;;  %v2911_v41 = vld [vmem:[%s3125_s27 + $0x2e0] ss:$16 sps:$4 sm:$0xff]  }
  0xaf   : > { %1993 = vmatprep.subr.bf16.mxu0 %v2823_v42  ;;  %2075 = vmatprep.subr.bf16.mxu1 %v2826_v43  ;;  %v2914_v42 = vld [vmem:[%s3125_s27 + $0x2e8] ss:$16 sps:$4 sm:$0xff]   ;;  %v2919_v43 = vld [vmem:[%s3125_s27 + $0x304] ss:$16 sps:$4 sm:$0xff]  }
  0xb2   : > { %1994 = vmatpush1.bf16.msra.mxu0 %v2821_v44  ;;  %2076 = vmatpush1.bf16.msra.mxu1 %v2824_v45  ;;  %v2922_v44 = vld [vmem:[%s3125_s27 + $0x30c] ss:$16 sps:$4 sm:$0xff]   ;;  %v2917_v45 = vld [vmem:[%s3125_s27 + $0x300] ss:$16 sps:$4 sm:$0xff]  }
  0xb3   : > { %1995 = vmatprep.subr.bf16.mxu0 %v2829_v46  ;;  %2077 = vmatprep.subr.bf16.mxu1 %v2832_v47  ;;  %v2920_v46 = vld [vmem:[%s3125_s27 + $0x308] ss:$16 sps:$4 sm:$0xff]   ;;  %v2925_v47 = vld [vmem:[%s3125_s27 + $0x324] ss:$16 sps:$4 sm:$0xff]  }
  0xb6   : > { %1996 = vmatpush1.bf16.msra.mxu0 %v2827_v49  ;;  %2078 = vmatpush1.bf16.msra.mxu1 %v2830_v50  ;;  %v2928_v49 = vld [vmem:[%s3125_s27 + $0x32c] ss:$16 sps:$4 sm:$0xff]   ;;  %v2923_v50 = vld [vmem:[%s3125_s27 + $0x320] ss:$16 sps:$4 sm:$0xff]  }
  0xb7   : > { %1997 = vmatprep.subr.bf16.mxu0 %v2835_v51  ;;  %2079 = vmatprep.subr.bf16.mxu1 %v2838_v52  ;;  %v2926_v51 = vld [vmem:[%s3125_s27 + $0x328] ss:$16 sps:$4 sm:$0xff]   ;;  %v2931_v52 = vld [vmem:[%s3125_s27 + $0x344] ss:$16 sps:$4 sm:$0xff]  }
  0xba   : > { %1998 = vmatpush1.bf16.msra.mxu0 %v2833_v53  ;;  %2080 = vmatpush1.bf16.msra.mxu1 %v2836_v54  ;;  %v2934_v53 = vld [vmem:[%s3125_s27 + $0x34c] ss:$16 sps:$4 sm:$0xff]   ;;  %v2929_v54 = vld [vmem:[%s3125_s27 + $0x340] ss:$16 sps:$4 sm:$0xff]  }
  0xbb   : > { %1999 = vmatprep.subr.bf16.mxu0 %v2841_v55  ;;  %2081 = vmatprep.subr.bf16.mxu1 %v2844_v56  ;;  %v2932_v55 = vld [vmem:[%s3125_s27 + $0x348] ss:$16 sps:$4 sm:$0xff]   ;;  %v2937_v56 = vld [vmem:[%s3125_s27 + $0x364] ss:$16 sps:$4 sm:$0xff]  }
  0xbe   : > { %2000 = vmatpush1.bf16.msra.mxu0 %v2839_v57  ;;  %2082 = vmatpush1.bf16.msra.mxu1 %v2842_v58  ;;  %v2940_v57 = vld [vmem:[%s3125_s27 + $0x36c] ss:$16 sps:$4 sm:$0xff]   ;;  %v2935_v58 = vld [vmem:[%s3125_s27 + $0x360] ss:$16 sps:$4 sm:$0xff]  }
  0xbf   : > { %2001 = vmatprep.subr.bf16.mxu0 %v2847_v59  ;;  %2083 = vmatprep.subr.bf16.mxu1 %v2850_v60  ;;  %v2938_v59 = vld [vmem:[%s3125_s27 + $0x368] ss:$16 sps:$4 sm:$0xff]   ;;  %v2943_v60 = vld [vmem:[%s3125_s27 + $0x384] ss:$16 sps:$4 sm:$0xff]  }
  0xc2   : > { %2002 = vmatpush1.bf16.msra.mxu0 %v2845_v61  ;;  %2084 = vmatpush1.bf16.msra.mxu1 %v2848_v62  ;;  %v2946_v61 = vld [vmem:[%s3125_s27 + $0x38c] ss:$16 sps:$4 sm:$0xff]   ;;  %v2941_v62 = vld [vmem:[%s3125_s27 + $0x380] ss:$16 sps:$4 sm:$0xff]  }
  0xc3   : > { %2003 = vmatprep.subr.bf16.mxu0 %v2853_v63  ;;  %2085 = vmatprep.subr.bf16.mxu1 %v2856_v0  ;;  %v2944_v63 = vld [vmem:[%s3125_s27 + $0x388] ss:$16 sps:$4 sm:$0xff]   ;;  %v2949_v0 = vld [vmem:[%s3125_s27 + $0x3a4] ss:$16 sps:$4 sm:$0xff]  }
  0xc6   : > { %2004 = vmatpush1.bf16.msra.mxu0 %v2851_v1  ;;  %2086 = vmatpush1.bf16.msra.mxu1 %v2854_v2  ;;  %v2952_v1 = vld [vmem:[%s3125_s27 + $0x3ac] ss:$16 sps:$4 sm:$0xff]   ;;  %v2947_v2 = vld [vmem:[%s3125_s27 + $0x3a0] ss:$16 sps:$4 sm:$0xff]  }
  0xc7   : > { %2005 = vmatprep.subr.bf16.mxu0 %v2859_v3  ;;  %2087 = vmatprep.subr.bf16.mxu1 %v2862_v4  ;;  %v2950_v3 = vld [vmem:[%s3125_s27 + $0x3a8] ss:$16 sps:$4 sm:$0xff]   ;;  %v2955_v4 = vld [vmem:[%s3125_s27 + $0x3c4] ss:$16 sps:$4 sm:$0xff]  }
  0xca   : > { %2006 = vmatpush1.bf16.msra.mxu0 %v2857_v6  ;;  %2088 = vmatpush1.bf16.msra.mxu1 %v2860_v7  ;;  %v2958_v6 = vld [vmem:[%s3125_s27 + $0x3cc] ss:$16 sps:$4 sm:$0xff]   ;;  %v2953_v7 = vld [vmem:[%s3125_s27 + $0x3c0] ss:$16 sps:$4 sm:$0xff]  }
  0xcb   : > { %2007 = vmatprep.subr.bf16.mxu0 %v2865_v8  ;;  %2089 = vmatprep.subr.bf16.mxu1 %v2868_v9  ;;  %v2956_v8 = vld [vmem:[%s3125_s27 + $0x3c8] ss:$16 sps:$4 sm:$0xff]   ;;  %v2961_v9 = vld [vmem:[%s3125_s27 + $0x3e4] ss:$16 sps:$4 sm:$0xff]  }
  0xce   : > { %2008 = vmatpush1.bf16.msra.mxu0 %v2863_v10  ;;  %2090 = vmatpush1.bf16.msra.mxu1 %v2866_v12  ;;  %v2964_v10 = vld [vmem:[%s3125_s27 + $0x3ec] ss:$16 sps:$4 sm:$0xff]   ;;  %v2959_v12 = vld [vmem:[%s3125_s27 + $0x3e0] ss:$16 sps:$4 sm:$0xff]  }
  0xcf   : > { %2018 = vmatprep.subr.bf16.mxu0 %v2871_v13  ;;  %2100 = vmatprep.subr.bf16.mxu1 %v2874_v14  ;;  %v2962_v13 = vld [vmem:[%s3125_s27 + $0x3e8] ss:$16 sps:$4 sm:$0xff]  }
  0xd1   : > { %2010 = vmatmul.mubr.bf16.vlgmr.msra.gmra.mrb[4].mxu0 %v3094_v5  ;;  %2092 = vmatmul.mubr.bf16.vlgmr.msra.gmra.mrb[4].mxu1 %v3094_v5  ;;  %v2881_v5 = vld [vmem:[%s3125_s27 + $0x240] ss:$16 sps:$4 sm:$0xff]  }
  0xd2   : > { %2019 = vmatpush1.bf16.msra.mxu0 %v2869_v15  ;;  %2101 = vmatpush1.bf16.msra.mxu1 %v2872_v16 }
  0xd3   : > { %2020 = vmatprep.subr.bf16.mxu0 %v2877_v17  ;;  %2102 = vmatprep.subr.bf16.mxu1 %v2880_v18 }
  0xd4   : > { %2050 = vmatprep.mubr.bf16.mxu0 %v3132_v33  ;;  %2132 = vmatprep.mubr.bf16.mxu1 %v3132_v33  ;;  %v2895_v33 = vld [vmem:[%s3125_s27 + $0x284] ss:$16 sps:$4 sm:$0xff]  }
  0xd6   : > { %2021 = vmatpush1.bf16.msra.mxu0 %v2875_v19  ;;  %2103 = vmatpush1.bf16.msra.mxu1 %v2878_v20 }
  0xd7   : > { %2022 = vmatprep.subr.bf16.mxu0 %v2883_v21  ;;  %2104 = vmatprep.subr.bf16.mxu1 %v2886_v22 }
  0xda   : > { %2023 = vmatpush1.bf16.msra.mxu0 %v2881_v5  ;;  %2105 = vmatpush1.bf16.msra.mxu1 %v2884_v23 }
  0xdb   : > { %2024 = vmatprep.subr.bf16.mxu0 %v2889_v24  ;;  %2106 = vmatprep.subr.bf16.mxu1 %v2892_v25 }
  0xde   : > { %2025 = vmatpush1.bf16.msra.mxu0 %v2887_v48  ;;  %2107 = vmatpush1.bf16.msra.mxu1 %v2890_v26 }
  0xdf   : > { %2026 = vmatprep.subr.bf16.mxu0 %v2895_v33  ;;  %2108 = vmatprep.subr.bf16.mxu1 %v2898_v27 }
  0xe2   : > { %2027 = vmatpush1.bf16.msra.mxu0 %v2893_v28  ;;  %2109 = vmatpush1.bf16.msra.mxu1 %v2896_v29 }
  0xe3   : > { %2028 = vmatprep.subr.bf16.mxu0 %v2901_v30  ;;  %2110 = vmatprep.subr.bf16.mxu1 %v2904_v31 }
  0xe6   : > { %2029 = vmatpush1.bf16.msra.mxu0 %v2899_v32  ;;  %2111 = vmatpush1.bf16.msra.mxu1 %v2902_v34 }
  0xe7   : > { %2030 = vmatprep.subr.bf16.mxu0 %v2907_v35  ;;  %2112 = vmatprep.subr.bf16.mxu1 %v2910_v36 }
  0xea   : > { %2031 = vmatpush1.bf16.msra.mxu0 %v2905_v37  ;;  %2113 = vmatpush1.bf16.msra.mxu1 %v2908_v38 }
  0xeb   : > { %2032 = vmatprep.subr.bf16.mxu0 %v2913_v39  ;;  %2114 = vmatprep.subr.bf16.mxu1 %v2916_v40 }
  0xee   : > { %2033 = vmatpush1.bf16.msra.mxu0 %v2911_v41  ;;  %2115 = vmatpush1.bf16.msra.mxu1 %v2914_v42 }
  0xef   : > { %2034 = vmatprep.subr.bf16.mxu0 %v2919_v43  ;;  %2116 = vmatprep.subr.bf16.mxu1 %v2922_v44 }
  0xf2   : > { %2035 = vmatpush1.bf16.msra.mxu0 %v2917_v45  ;;  %2117 = vmatpush1.bf16.msra.mxu1 %v2920_v46 }
  0xf3   : > { %2036 = vmatprep.subr.bf16.mxu0 %v2925_v47  ;;  %2118 = vmatprep.subr.bf16.mxu1 %v2928_v49 }
  0xf6   : > { %2037 = vmatpush1.bf16.msra.mxu0 %v2923_v50  ;;  %2119 = vmatpush1.bf16.msra.mxu1 %v2926_v51 }
  0xf7   : > { %2038 = vmatprep.subr.bf16.mxu0 %v2931_v52  ;;  %2120 = vmatprep.subr.bf16.mxu1 %v2934_v53 }
  0xfa   : > { %2039 = vmatpush1.bf16.msra.mxu0 %v2929_v54  ;;  %2121 = vmatpush1.bf16.msra.mxu1 %v2932_v55 }
  0xfb   : > { %2040 = vmatprep.subr.bf16.mxu0 %v2937_v56  ;;  %2122 = vmatprep.subr.bf16.mxu1 %v2940_v57 }
  0xfe   : > { %2041 = vmatpush1.bf16.msra.mxu0 %v2935_v58  ;;  %2123 = vmatpush1.bf16.msra.mxu1 %v2938_v59 }
  0xff   : > { %2042 = vmatprep.subr.bf16.mxu0 %v2943_v60  ;;  %2124 = vmatprep.subr.bf16.mxu1 %v2946_v61 }
 0x102   : > { %2043 = vmatpush1.bf16.msra.mxu0 %v2941_v62  ;;  %2125 = vmatpush1.bf16.msra.mxu1 %v2944_v63 }
 0x103   : > { %2044 = vmatprep.subr.bf16.mxu0 %v2949_v0  ;;  %2126 = vmatprep.subr.bf16.mxu1 %v2952_v1 }
 0x106   : > { %2045 = vmatpush1.bf16.msra.mxu0 %v2947_v2  ;;  %2127 = vmatpush1.bf16.msra.mxu1 %v2950_v3 }
 0x107   : > { %2046 = vmatprep.subr.bf16.mxu0 %v2955_v4  ;;  %2128 = vmatprep.subr.bf16.mxu1 %v2958_v6 }
 0x10a   : > { %2047 = vmatpush1.bf16.msra.mxu0 %v2953_v7  ;;  %2129 = vmatpush1.bf16.msra.mxu1 %v2956_v8 }
 0x10b   : > { %2048 = vmatprep.subr.bf16.mxu0 %v2961_v9  ;;  %2130 = vmatprep.subr.bf16.mxu1 %v2964_v10 }
 0x10e   : > { %2049 = vmatpush1.bf16.msra.mxu0 %v2959_v12  ;;  %2131 = vmatpush1.bf16.msra.mxu1 %v2962_v13 }
 0x111   : > { %2051 = vmatmul.mubr.bf16.vlgmr.msra.gmra.mrb[4].mxu0 %v3175_v11  ;;  %2133 = vmatmul.mubr.bf16.vlgmr.msra.gmra.mrb[4].mxu1 %v3175_v11 }
 0x164   : > { %v1102_v14 = vpop.f32.mrb[0].mxu0  ;;  %v1184_v15 = vpop.f32.mrb[0].mxu1 }
 0x165   : > { %v1104_v16 = vpop.f32.mrb[1].mxu0  ;;  %v1186_v17 = vpop.f32.mrb[1].mxu1 }
 0x166   : > { %v2553_v18 = vpack.c.bf16 %v1104_v16, %v1102_v14  ;;  %v2554_v19 = vpack.c.bf16 %v1186_v17, %v1184_v15  ;;  %v1106_v20 = vpop.f32.mrb[2].mxu0  ;;  %v1188_v21 = vpop.f32.mrb[2].mxu1 }
 0x167   : > { %v1107_v22 = vpop.f32.mrb[3].mxu0  ;;  %v1189_v5 = vpop.f32.mrb[3].mxu1 }
 0x168   : > { %1207 = vst [vmem:[%s245_s5] sm:$0xff] %v2553_v18  ;;  %1208 = vst [vmem:[%s245_s5 + $0x8] sm:$0xff] %v2554_v19 }
 0x1e4   : > { %v2052_v23 = vpop.f32.mrb[4].mxu0  ;;  %v2134_v24 = vpop.f32.mrb[4].mxu1 }
 0x1e5   : > { %v2054_v11 = vpop.f32.mrb[5].mxu0  ;;  %v2136_v25 = vpop.f32.mrb[5].mxu1 }
 0x1e6   : > { %v2555_v48 = vpack.c.bf16 %v2054_v11, %v2052_v23  ;;  %v2556_v26 = vpack.c.bf16 %v2136_v25, %v2134_v24  ;;  %v2056_v33 = vpop.f32.mrb[6].mxu0  ;;  %v2138_v27 = vpop.f32.mrb[6].mxu1 }
 0x1e7   : > { %v2057_v28 = vpop.f32.mrb[7].mxu0  ;;  %v2139_v29 = vpop.f32.mrb[7].mxu1 }
 0x1e8   : > { %2157 = vst [vmem:[%s250_s8] sm:$0xff] %v2555_v48  ;;  %2158 = vst [vmem:[%s250_s8 + $0x8] sm:$0xff] %v2556_v26 }
 0x1e9 PF: > { %s15_s15 = sadd.s32 1, %s2971_s15  }
 0x1ea   : > { %p12_p4 = scmp.ge.s32.totalorder %s15_s15, 4  }
 0x1ec   :  { %14 = sbr.rel (!%p12_p4) target bundleno = 1 (0x1), region = 80 }

// kernel: transformer_forward.14
= control target key start
LH: loop header
LB: loop body
LE: loop exit
PB: predicated region body
PF: predicated region fallthrough
CT: control target
= control target key end

     0   :  { %s2671_s21 = smov 0   ;;  %s2673_s22 = smov 0   ;;  %s3033_s0 = inlined_call_operand.vmem [shape: bf16[2,8,4,128], index: 0, kind: input, shape index: {}]   ;;  %s3034_s1 = inlined_call_operand.vmem [shape: bf16[2,8,4,128], index: 1, kind: input, shape index: {}]   ;;  %s3035_s2 = inlined_call_operand.vmem [shape: bf16[2,8,4,128], index: 2, kind: input, shape index: {}]   ;;  %s3036_s3 = inlined_call_operand.vmem [shape: bf16[8,4,128], index: 3, kind: input, shape index: {}]   ;;  %s3037_s4 = inlined_call_operand.vmem [shape: bf16[8,4,128], index: 4, kind: input, shape index: {}]   ;;  %s3038_s5 = inlined_call_operand.vmem [shape: f32[4,128], index: 5, kind: input, shape index: {}]   ;;  %s3039_s6 = inlined_call_operand.vmem [shape: bf16[2,8,512], index: 6, kind: output, shape index: {}]  }
   0x1   :  { %s2675_s23 = smov 0  }
   0x2 LB: > { %s42_s24 = sadd.s32 1, %s2624_s22  ;;  %p2329_p0 = scmp.ge.s32.totalorder %s2628_s23, 1  ;;  %s2628_s23 = sphi %s2675_s23, %s16_s23   ;;  %s2624_s22 = sphi %s2673_s22, %s3041_s22   ;;  %s2620_s21 = sphi %s2671_s21, %s3040_s21  }
   0x3   : > { %p44_p1 = scmp.ge.s32.totalorder %s42_s24, 2  ;;  %p325_p2 = scmp.lt.s32.totalorder %s2628_s23, 3 }
   0x5   : > { %s3043_s24 = smov (%p44_p1, %s42_s24), 0  ;;  %p326_p3 = pnand %p2329_p0, %p325_p2 }
   0x6   : > { %p407_p4 = scmp.lt.s32.totalorder (!%p326_p3), %s2620_s21, 1  ;;  %v508_v0 = vlaneseq (!%p326_p3)  ;;  %v2630_v1 = vmov (!%p326_p3), 0.0   ;;  %vm2631_vm0 = vmmov (!%p326_p3), 0   ;;  %v2632_v3 = vmov (!%p326_p3), 0  }
   0x7   : > { %329 = sbr.rel (%p326_p3) target bundleno = 1163 (0x48b), region = 44  ;;  %2389 = vmatprep.subr.bf16.mxu0 (!%p326_p3), %v2630_v1  ;;  %2395 = vmatprep.subr.bf16.mxu1 (!%p326_p3), %v2630_v1  ;;  %v2633_v4 = vmov (!%p326_p3), 1983009808   ;;  %vm476_vm1 = vcmask (!%p326_p3), 7168   ;;  %vm955_vm3 = vcmask (!%p326_p3), 64512   ;;  %vm1088_vm4 = vcmask (!%p326_p3), 1043456  }
   0x8   : > { %v2692_v2 = vshrl.u32 (!%p326_p3), %v508_v0, 7  ;;  %2391 = vmatprep.mubr.msk.bf16.mxu0 (!%p326_p3), %vm2631_vm0, %v2630_v1  ;;  %2397 = vmatprep.mubr.msk.bf16.mxu1 (!%p326_p3), %vm2631_vm0, %v2630_v1  ;;  %v702_v5 = vunpack.c.l.s4 (!%p326_p3), %v2633_v4  ;;  %481 = vst.msk [vmem:[#allocation3] sm:$0xff] (!%p326_p3), %vm476_vm1, %v2630_v1  ;;  %482 = vst.msk [vmem:[#allocation3 + $0x8] sm:$0xff] (!%p326_p3), %vm476_vm1, %v2630_v1 }
   0x9   : > { %2516 = vset.pattern.permute.xlu0 (!%p326_p3), %v2632_v3  ;;  %2517 = vset.pattern.permute.xlu1 (!%p326_p3), %v2632_v3  ;;  %483 = vst.msk [vmem:[#allocation3 + $0x10] sm:$0xff] (!%p326_p3), %vm476_vm1, %v2630_v1  ;;  %484 = vst.msk [vmem:[#allocation3 + $0x18] sm:$0xff] (!%p326_p3), %vm476_vm1, %v2630_v1 }
   0xa   : > { %v703_v7 = vunpack.c.0.s8 (!%p326_p3), %v702_v5 }
   0xc   : > { %v2713_v11 = vsub.s32 (!%p326_p3), %v703_v7, %v2692_v2 }
   0xe   : > { %s3045_s21 = smov (!%p407_p4, %s2620_s21), 1 }
   0xf   : > { %s2700_s25 = sshll.u32 %s3045_s21, 4 }
  0x10   : > { %s430_s28 = scalar_lea.vmem %s3034_s1, %s2700_s25  ;;  %s2710_s7 = scalar_lea.vmem %s3033_s0, %s2700_s25 }
  0x11   : > { %v2582_v6 = vld.sshfl [vmem:[%s430_s28] sm:$0x33 pattern:$0x73516240]  ;;  %s443_s10 = scalar_lea.vmem %s3035_s2, %s2700_s25  ;;  %s469_s11 = scalar_lea.vmem %s3039_s6, %s2700_s25 }
  0x12   : > { %v2583_v8 = vld.sshfl [vmem:[%s430_s28 + $0x2] sm:$0x33 pattern:$0x73516240]  ;;  %v611_v12 = vshrl.u32 %v2582_v6, 16  ;;  %v580_v13 = vcombine.high %v2582_v6, %v2632_v3 }
  0x13   : > { %v2584_v9 = vld.sshfl [vmem:[%s430_s28 + $0x8] sm:$0x33 pattern:$0x73516240]  ;;  %v610_v14 = vpack.i.b16 %v2583_v8, %v2582_v6  ;;  %v612_v16 = vshrl.u32 %v2583_v8, 16  ;;  %v589_v23 = vcombine.high %v2583_v8, %v2632_v3 }
  0x14   : > { %v2585_v10 = vld.sshfl [vmem:[%s430_s28 + $0xa] sm:$0x33 pattern:$0x73516240]  ;;  %v623_v17 = vshrl.u32 %v2584_v9, 16  ;;  %v598_v24 = vcombine.high %v2584_v9, %v2632_v3  ;;  %v617_v40 = vshrl.u32 %v580_v13, 16 }
  0x15   : > { %v622_v15 = vpack.i.b16 %v2585_v10, %v2584_v9  ;;  %v2586_v18 = vld.sshfl [vmem:[%s2710_s7] sm:$0x33 pattern:$0x73516240]  ;;  %v624_v20 = vshrl.u32 %v2585_v10, 16  ;;  %v607_v25 = vcombine.high %v2585_v10, %v2632_v3  ;;  %v613_v27 = vpack.i.b16 %v612_v16, %v611_v12 }
  0x16   : > { %v2587_v19 = vld.sshfl [vmem:[%s2710_s7 + $0x2] sm:$0x33 pattern:$0x73516240]  ;;  %v616_v29 = vpack.i.b16 %v589_v23, %v580_v13  ;;  %v543_v33 = vshrl.u32 %v2586_v18, 16  ;;  %v618_v41 = vshrl.u32 %v589_v23, 16  ;;  %v512_v50 = vcombine.high %v2586_v18, %v2632_v3 }
  0x17   : > { %v2588_v21 = vld.sshfl [vmem:[%s2710_s7 + $0x8] sm:$0x33 pattern:$0x73516240]  ;;  %v709_v26 = vcombine.low %v610_v14, %v622_v15  ;;  %v625_v28 = vpack.i.b16 %v624_v20, %v623_v17  ;;  %v542_v31 = vpack.i.b16 %v2587_v19, %v2586_v18  ;;  %v628_v32 = vpack.i.b16 %v607_v25, %v598_v24 }
  0x18   : > { %v2589_v22 = vld.sshfl [vmem:[%s2710_s7 + $0xa] sm:$0x33 pattern:$0x73516240]  ;;  %v544_v36 = vshrl.u32 %v2587_v19, 16  ;;  %v555_v37 = vshrl.u32 %v2588_v21, 16  ;;  %v619_v47 = vpack.i.b16 %v618_v41, %v617_v40  ;;  %v521_v51 = vcombine.high %v2587_v19, %v2632_v3 }
  0x19   : > { %v716_v30 = vrot.slane %v709_v26, %v2713_v11  ;;  %v767_v34 = vcombine.low %v613_v27, %v625_v28  ;;  %v554_v35 = vpack.i.b16 %v2589_v22, %v2588_v21  ;;  %v825_v38 = vcombine.low %v616_v29, %v628_v32 }
  0x1a   : > { %v556_v39 = vshrl.u32 %v2589_v22, 16  ;;  %v545_v44 = vpack.i.b16 %v544_v36, %v543_v33  ;;  %v629_v45 = vshrl.u32 %v598_v24, 16  ;;  %v630_v48 = vshrl.u32 %v607_v25, 16 }
  0x1b   : > { %2390 = vmatpush3.bf16.xpose.msra.mxu0 %v716_v30  ;;  %v774_v42 = vrot.slane %v767_v34, %v2713_v11  ;;  %v700_v43 = vcombine.low %v542_v31, %v554_v35  ;;  %v530_v52 = vcombine.high %v2588_v21, %v2632_v3  ;;  %v832_v53 = vrot.slane %v825_v38, %v2713_v11 }
  0x1c   : > { %2401 = vmatprep.subr.bf16.mxu0 %v2630_v1  ;;  %v557_v46 = vpack.i.b16 %v556_v39, %v555_v37  ;;  %v631_v55 = vpack.i.b16 %v630_v48, %v629_v45  ;;  %v539_v56 = vcombine.high %v2589_v22, %v2632_v3  ;;  %v548_v57 = vpack.i.b16 %v521_v51, %v512_v50 }
  0x1d   : > { %2396 = vmatpush3.bf16.xpose.msra.mxu1 %v774_v42  ;;  %v707_v49 = vrot.slane %v700_v43, %v2713_v11  ;;  %v549_v58 = vshrl.u32 %v512_v50, 16  ;;  %v550_v59 = vshrl.u32 %v521_v51, 16  ;;  %v561_v60 = vshrl.u32 %v530_v52, 16 }
  0x1e   : > { %v758_v54 = vcombine.low %v545_v44, %v557_v46  ;;  %2407 = vmatprep.subr.bf16.mxu1 %v2630_v1  ;;  %v883_v62 = vcombine.low %v619_v47, %v631_v55  ;;  %v560_v63 = vpack.i.b16 %v539_v56, %v530_v52  ;;  %v562_v4 = vshrl.u32 %v539_v56, 16  ;;  %v2590_v52 = vld.sshfl [vmem:[%s443_s10] sm:$0x33 pattern:$0x73516240] }
  0x1f   : > { %v551_v5 = vpack.i.b16 %v550_v59, %v549_v58  ;;  %v2634_v13 = vmov -inf   ;;  %v941_v14 = vand.u32 127, %v508_v0  ;;  %v2592_v55 = vld.sshfl [vmem:[%s443_s10 + $0x8] sm:$0x33 pattern:$0x73516240] }
  0x20   : > { %v765_v61 = vrot.slane %v758_v54, %v2713_v11  ;;  %v890_v6 = vrot.slane %v883_v62, %v2713_v11  ;;  %v816_v7 = vcombine.low %v548_v57, %v560_v63  ;;  %v563_v8 = vpack.i.b16 %v562_v4, %v561_v60  ;;  %477 = vst.msk [vmem:[#allocation2] sm:$0xff] %vm476_vm1, %v2634_v13  ;;  %v2591_v54 = vld.sshfl [vmem:[%s443_s10 + $0x2] sm:$0x33 pattern:$0x73516240] }
  0x21   : > { %478 = vst.msk [vmem:[#allocation2 + $0x8] sm:$0xff] %vm476_vm1, %v2634_v13  ;;  %479 = vst.msk [vmem:[#allocation2 + $0x10] sm:$0xff] %vm476_vm1, %v2634_v13  ;;  %vm944_vm2 = vcmp.ge.s32.totalorder %v2692_v2, %v941_v14  ;;  %v2593_v57 = vld.sshfl [vmem:[%s443_s10 + $0xa] sm:$0x33 pattern:$0x73516240]  ;;  %v678_v62 = vpack.i.b16 %v2591_v54, %v2590_v52  ;;  %v648_v4 = vcombine.high %v2590_v52, %v2632_v3 }
  0x22   : > { %2392 = vmatmul.mubr.bf16.vlgmr.msra.gmra.mrb[0].mxu0 %v707_v49  ;;  %v874_v9 = vcombine.low %v551_v5, %v563_v8  ;;  %v823_v10 = vrot.slane %v816_v7, %v2713_v11  ;;  %480 = vst.msk [vmem:[#allocation2 + $0x18] sm:$0xff] %vm476_vm1, %v2634_v13  ;;  %v679_v60 = vshrl.u32 %v2590_v52, 16  ;;  %v680_v63 = vshrl.u32 %v2591_v54, 16 }
  0x23   : > { %2402 = vmatpush3.bf16.xpose.msra.mxu0 %v832_v53  ;;  %2403 = vmatprep.mubr.msk.bf16.mxu0 %vm2631_vm0, %v2630_v1  ;;  %v690_v5 = vpack.i.b16 %v2593_v57, %v2592_v55  ;;  %v692_v7 = vshrl.u32 %v2593_v57, 16  ;;  %v657_v8 = vcombine.high %v2591_v54, %v2632_v3  ;;  %v666_v14 = vcombine.high %v2592_v55, %v2632_v3 }
  0x24   : > { %2413 = vmatprep.subr.bf16.mxu0 %v2630_v1  ;;  %2398 = vmatmul.mubr.bf16.vlgmr.msra.gmra.mrb[0].mxu1 %v765_v61  ;;  %v881_v12 = vrot.slane %v874_v9, %v2713_v11 }
  0x25   : > { %2408 = vmatpush3.bf16.xpose.msra.mxu1 %v890_v6  ;;  %2409 = vmatprep.mubr.msk.bf16.mxu1 %vm2631_vm0, %v2630_v1  ;;  %v691_v6 = vshrl.u32 %v2592_v55, 16  ;;  %v2598_v55 = vld.sshfl [vmem:[%s2710_s7] sm:$0x33 pattern:$0x73516240] }
  0x26   : > { %2419 = vmatprep.subr.bf16.mxu1 %v2630_v1 }
  0x27   : > { %v2785_v42 = vld [vmem:[#allocation2] sm:$0xff]  ;;  %v693_v13 = vpack.i.b16 %v692_v7, %v691_v6 }
  0x28   : > { %v2790_v45 = vld [vmem:[#allocation2 + $0x8] sm:$0xff]  ;;  %v2800_v49 = vld [vmem:[#allocation2 + $0x10] sm:$0xff] }
  0x29   : > { %v2814_v56 = vld [vmem:[#allocation2 + $0x18] sm:$0xff] }
  0x2a   : > { %2404 = vmatmul.mubr.bf16.vlgmr.msra.gmra.mrb[4].mxu0 %v823_v10  ;;  %v681_v10 = vpack.i.b16 %v680_v63, %v679_v60  ;;  %v2601_v60 = vld.sshfl [vmem:[%s2710_s7 + $0xa] sm:$0x33 pattern:$0x73516240] }
  0x2b   : > { %2415 = vmatprep.mubr.msk.bf16.mxu0 %vm2631_vm0, %v2630_v1 }
  0x2c   : > { %2410 = vmatmul.mubr.bf16.vlgmr.msra.gmra.mrb[4].mxu1 %v881_v12  ;;  %v1077_v12 = vcombine.low %v678_v62, %v690_v5 }
  0x2d   : > { %2421 = vmatprep.mubr.msk.bf16.mxu1 %vm2631_vm0, %v2630_v1 }
  0xf5   : > { %v752_v15 = vpop.f32.mrb[0].mxu0 }
  0xf6   : > { %v932_v16 = vmul.f32 0.088388346, %v752_v15  ;;  %v2393_v17 = vpop.f32.mrb[1].mxu0  ;;  %v675_v15 = vcombine.high %v2593_v57, %v2632_v3 }
  0xf7   : > { %v755_v18 = vpop.f32.mrb[2].mxu0  ;;  %v810_v19 = vpop.f32.mrb[0].mxu1  ;;  %v685_v17 = vshrl.u32 %v648_v4, 16 }
  0xf8   : > { %v2394_v20 = vpop.f32.mrb[3].mxu0  ;;  %v2763_v21 = vsel %vm944_vm2, %v932_v16, -inf  ;;  %v933_v22 = vmul.f32 0.088388346, %v810_v19  ;;  %v2399_v23 = vpop.f32.mrb[1].mxu1  ;;  %v684_v16 = vpack.i.b16 %v657_v8, %v648_v4  ;;  %v686_v18 = vshrl.u32 %v657_v8, 16 }
  0xf9   : > { %v956_v24 = vsel %vm955_vm3, %v2763_v21, -inf  ;;  %v813_v25 = vpop.f32.mrb[2].mxu1  ;;  %v1084_v19 = vrot.slane %v1077_v12, %v2713_v11  ;;  %v1132_v20 = vcombine.low %v681_v10, %v693_v13  ;;  %v697_v23 = vshrl.u32 %v666_v14, 16 }
  0xfa   : > { %957 = vmax.xlane.f32.xlu0 %v956_v24  ;;  %v2400_v0 = vpop.f32.mrb[3].mxu1  ;;  %v2769_v26 = vsel %vm944_vm2, %v933_v22, -inf  ;;  %v696_v22 = vpack.i.b16 %v675_v15, %v666_v14  ;;  %v687_v24 = vpack.i.b16 %v686_v18, %v685_v17  ;;  %v698_v25 = vshrl.u32 %v675_v15, 16 }
  0xfb   : > { %v959_v27 = vsel %vm955_vm3, %v2769_v26, -inf  ;;  %v1090_v0 = vsel %vm1088_vm4, %v1084_v19, 0 }
  0xfc   : > { %2414 = vmatpush3.bf16.msra.mxu0 %v1090_v0 }
  0xfd   : > { %v868_v28 = vpop.f32.mrb[4].mxu0  ;;  %2425 = vmatprep.subr.bf16.mxu0 %v2630_v1 }
  0xfe   : > { %v934_v29 = vmul.f32 0.088388346, %v868_v28  ;;  %960 = vmax.xlane.f32.xlu0 %v959_v27  ;;  %v2405_v30 = vpop.f32.mrb[5].mxu0  ;;  %v1139_v27 = vrot.slane %v1132_v20, %v2713_v11  ;;  %v1186_v28 = vcombine.low %v684_v16, %v696_v22 }
  0xff   : > { %v871_v31 = vpop.f32.mrb[6].mxu0  ;;  %v926_v32 = vpop.f32.mrb[4].mxu1 }
 0x100   : > { %v2406_v33 = vpop.f32.mrb[7].mxu0  ;;  %v2775_v34 = vsel %vm944_vm2, %v934_v29, -inf  ;;  %v935_v35 = vmul.f32 0.088388346, %v926_v32  ;;  %v2411_v36 = vpop.f32.mrb[5].mxu1  ;;  %v699_v29 = vpack.i.b16 %v698_v25, %v697_v23  ;;  %v1144_v30 = vsel %vm1088_vm4, %v1139_v27, 0 }
 0x101   : > { %v962_v37 = vsel %vm955_vm3, %v2775_v34, -inf  ;;  %v929_v38 = vpop.f32.mrb[6].mxu1  ;;  %2420 = vmatpush3.bf16.msra.mxu1 %v1144_v30  ;;  %v1193_v54 = vrot.slane %v1186_v28, %v2713_v11  ;;  %v1356_v27 = vshrl.u32 %v2598_v55, 16  ;;  %v1369_v30 = vshrl.u32 %v2601_v60, 16 }
 0x102   : > { %963 = vmax.xlane.f32.xlu1 %v962_v37  ;;  %v2412_v39 = vpop.f32.mrb[7].mxu1  ;;  %v2781_v40 = vsel %vm944_vm2, %v935_v35, -inf  ;;  %v1240_v31 = vcombine.low %v687_v24, %v699_v29  ;;  %2431 = vmatprep.subr.bf16.mxu1 %v2630_v1  ;;  %v2594_v37 = vld.sshfl [vmem:[%s3036_s3] sm:$0x33 pattern:$0x73516240] }
 0x103   : > { %v965_v41 = vsel %vm955_vm3, %v2781_v40, -inf  ;;  %v2595_v38 = vld.sshfl [vmem:[%s3036_s3 + $0x2] sm:$0x33 pattern:$0x73516240]  ;;  %v1424_v5 = vshrl.u32 %v2594_v37, 16  ;;  %v1393_v17 = vcombine.high %v2594_v37, %v2632_v3 }
 0x104   : > { %v1423_v63 = vpack.i.b16 %v2595_v38, %v2594_v37  ;;  %v1425_v6 = vshrl.u32 %v2595_v38, 16  ;;  %v1198_v12 = vsel %vm1088_vm4, %v1193_v54, 0  ;;  %v1247_v13 = vrot.slane %v1240_v31, %v2713_v11 }
 0x105   : > { %v1402_v19 = vcombine.high %v2595_v38, %v2632_v3  ;;  %v1430_v37 = vshrl.u32 %v1393_v17, 16 }
 0x106   : > { %966 = vmax.xlane.f32.xlu1 %v965_v41  ;;  %v2597_v41 = vld.sshfl [vmem:[%s3036_s3 + $0xa] sm:$0x33 pattern:$0x73516240]  ;;  %v1426_v15 = vpack.i.b16 %v1425_v6, %v1424_v5  ;;  %v1252_v24 = vsel %vm1088_vm4, %v1247_v13, 0 }
 0x107   : > { %v1437_v8 = vshrl.u32 %v2597_v41, 16  ;;  %v1420_v22 = vcombine.high %v2597_v41, %v2632_v3 }
 0x187   : > { %v958_v43 = vpop.xlane.xlu0 %957 }
 0x188   : > { %v2788_v44 = vmax.f32 %v2785_v42, %v958_v43 }
 0x18a   : > { %v972_v46 = vsub.f32 %v2785_v42, %v2788_v44  ;;  %1302 = vst.msk [vmem:[#allocation2] sm:$0xff] %vm476_vm1, %v2788_v44  ;;  %986 = vperm.xlu0 %2516, %v2788_v44   ;;  %v2605_v44 = vld.sshfl [vmem:[%s3037_s4 + $0xa] sm:$0x33 pattern:$0x73516240] }
 0x18b   : > { %v961_v47 = vpop.xlane.xlu0 %960 }
 0x18c   : > { %v2798_v48 = vmax.f32 %v2790_v45, %v961_v47 }
 0x18e   : > { %v973_v50 = vsub.f32 %v2790_v45, %v2798_v48  ;;  %1303 = vst.msk [vmem:[#allocation2 + $0x8] sm:$0xff] %vm476_vm1, %v2798_v48  ;;  %991 = vperm.xlu1 %2517, %v2798_v48  }
 0x18f   : > { %v964_v51 = vpop.xlane.xlu1 %963 }
 0x190   : > { %v2812_v53 = vmax.f32 %v2800_v49, %v964_v51 }
 0x192   : > { %v974_v58 = vsub.f32 %v2800_v49, %v2812_v53  ;;  %1304 = vst.msk [vmem:[#allocation2 + $0x10] sm:$0xff] %vm476_vm1, %v2812_v53  ;;  %996 = vperm.xlu1 %2517, %v2812_v53  }
 0x193   : > { %v967_v59 = vpop.xlane.xlu1 %966 }
 0x194   : > { %v2822_v61 = vmax.f32 %v2814_v56, %v967_v59  ;;  %v2599_v59 = vld.sshfl [vmem:[%s2710_s7 + $0x2] sm:$0x33 pattern:$0x73516240]  ;;  %v980_v45 = vmul.f32 1.442695, %v974_v58 }
 0x195   : > { %v1355_v25 = vpack.i.b16 %v2599_v59, %v2598_v55  ;;  %v1357_v28 = vshrl.u32 %v2599_v59, 16  ;;  %v1334_v54 = vcombine.high %v2599_v59, %v2632_v3 }
 0x196   : > { %v975_v9 = vsub.f32 %v2814_v56, %v2822_v61  ;;  %1305 = vst.msk [vmem:[#allocation2 + $0x18] sm:$0xff] %vm476_vm1, %v2822_v61  ;;  %1001 = vperm.xlu1 %2517, %v2822_v61  }
 0x198   : > { %v982_v42 = vmul.f32 1.442695, %v975_v9 }
 0x209   : > { %v987_v32 = vpop.permute.xlu0 %986 }
 0x20a   : > { %v1004_v33 = vsub.f32 %v2763_v21, %v987_v32  ;;  %v2596_v21 = vld.sshfl [vmem:[%s3036_s3 + $0x8] sm:$0x33 pattern:$0x73516240] }
 0x20b   : > { %v1435_v4 = vpack.i.b16 %v2597_v41, %v2596_v21  ;;  %v1436_v7 = vshrl.u32 %v2596_v21, 16  ;;  %v1411_v20 = vcombine.high %v2596_v21, %v2632_v3  ;;  %v1443_v41 = vshrl.u32 %v1420_v22, 16 }
 0x20c   : > { %v1008_v35 = vmul.f32 1.442695, %v1004_v33 }
 0x20d   : > { %v992_v36 = vpop.permute.xlu1 %991  ;;  %v1438_v16 = vpack.i.b16 %v1437_v8, %v1436_v7  ;;  %v1442_v21 = vshrl.u32 %v1411_v20, 16 }
 0x20e   : > { %2542 = vpow2.f32 %v1008_v35  ;;  %v1005_v39 = vsub.f32 %v2769_v26, %v992_v36  ;;  %v2600_v26 = vld.sshfl [vmem:[%s2710_s7 + $0x8] sm:$0x33 pattern:$0x73516240]  ;;  %v1429_v35 = vpack.i.b16 %v1402_v19, %v1393_v17  ;;  %v1441_v36 = vpack.i.b16 %v1420_v22, %v1411_v20 }
 0x20f   : > { %v1367_v0 = vpack.i.b16 %v2601_v60, %v2600_v26  ;;  %v1368_v29 = vshrl.u32 %v2600_v26, 16  ;;  %v1580_v33 = vcombine.low %v1426_v15, %v1438_v16 }
 0x210   : > { %v1010_v43 = vmul.f32 1.442695, %v1005_v39  ;;  %v1431_v39 = vshrl.u32 %v1402_v19, 16  ;;  %v1638_v6 = vcombine.low %v1429_v35, %v1441_v36 }
 0x211   : > { %v997_v47 = vpop.permute.xlu1 %996 }
 0x212   : > { %2544 = vpow2.f32 %v1010_v43  ;;  %v1006_v51 = vsub.f32 %v2775_v34, %v997_v47  ;;  %v1513_v43 = vcombine.low %v1355_v25, %v1367_v0  ;;  %v1358_v47 = vpack.i.b16 %v1357_v28, %v1356_v27 }
 0x213   : > { %v1432_v7 = vpack.i.b16 %v1431_v39, %v1430_v37 }
 0x214   : > { %v1012_v52 = vmul.f32 1.442695, %v1006_v51  ;;  %v1370_v51 = vpack.i.b16 %v1369_v30, %v1368_v29  ;;  %v1520_v59 = vrot.slane %v1513_v43, %v2713_v11 }
 0x215   : > { %v1002_v57 = vpop.permute.xlu1 %1001 }
 0x216   : > { %2546 = vpow2.f32 %v1012_v52  ;;  %v1007_v62 = vsub.f32 %v2781_v40, %v1002_v57  ;;  %v1522_v40 = vcombine.low %v1423_v63, %v1435_v4  ;;  %v1325_v52 = vcombine.high %v2598_v55, %v2632_v3 }
 0x217   : > { %v1343_v57 = vcombine.high %v2600_v26, %v2632_v3  ;;  %v1587_v4 = vrot.slane %v1580_v33, %v2713_v11  ;;  %v1444_v55 = vpack.i.b16 %v1443_v41, %v1442_v21  ;;  %v1571_v26 = vcombine.low %v1358_v47, %v1370_v51 }
 0x218   : > { %v2860_v10 = vpop.eup %2542  ;;  %v1014_v34 = vmul.f32 1.442695, %v1007_v62  ;;  %v1529_v31 = vrot.slane %v1522_v40, %v2713_v11  ;;  %v1352_v62 = vcombine.high %v2601_v60, %v2632_v3  ;;  %v1361_v60 = vpack.i.b16 %v1334_v54, %v1325_v52 }
 0x219   : > { %v1073_v14 = vpack.c.bf16 %v2860_v10, %v2860_v10  ;;  %v1374_v13 = vshrl.u32 %v1343_v57, 16  ;;  %v1645_v40 = vrot.slane %v1638_v6, %v2713_v11  ;;  %v1696_v15 = vcombine.low %v1432_v7, %v1444_v55 }
 0x21a   : > { %2548 = vpow2.f32 %v1014_v34  ;;  %v1373_v8 = vpack.i.b16 %v1352_v62, %v1343_v57  ;;  %v1362_v34 = vshrl.u32 %v1325_v52, 16  ;;  %v1578_v16 = vrot.slane %v1571_v26, %v2713_v11 }
 0x21b   : > { %2416 = vmatmul.mubr.msk.bf16.vlgmr.msra.gmra.mrb[8].mxu0 %vm955_vm3, %v1073_v14  ;;  %v1375_v14 = vshrl.u32 %v1352_v62, 16  ;;  %v1703_v22 = vrot.slane %v1696_v15, %v2713_v11 }
 0x21c   : > { %v2868_v18 = vpop.eup %2544  ;;  %2426 = vmatpush3.bf16.msra.mxu0 %v1198_v12  ;;  %2427 = vmatprep.mubr.msk.bf16.mxu0 %vm2631_vm0, %v2630_v1  ;;  %v1363_v12 = vshrl.u32 %v1334_v54, 16  ;;  %v1629_v17 = vcombine.low %v1361_v60, %v1373_v8 }
 0x21d   : > { %v1074_v23 = vpack.c.bf16 %v2868_v18, %v2868_v18  ;;  %2437 = vmatprep.subr.bf16.mxu0 %v2630_v1  ;;  %v1376_v20 = vpack.i.b16 %v1375_v14, %v1374_v13 }
 0x21e   : > { %v1364_v19 = vpack.i.b16 %v1363_v12, %v1362_v34 }
 0x21f   : > { %2422 = vmatmul.mubr.msk.bf16.vlgmr.msra.gmra.mrb[8].mxu1 %vm955_vm3, %v1074_v23  ;;  %v1636_v23 = vrot.slane %v1629_v17, %v2713_v11 }
 0x220   : > { %v2881_v32 = vpop.eup %2546  ;;  %2432 = vmatpush3.bf16.msra.mxu1 %v1252_v24  ;;  %2433 = vmatprep.mubr.msk.bf16.mxu1 %vm2631_vm0, %v2630_v1  ;;  %v1687_v24 = vcombine.low %v1364_v19, %v1376_v20 }
 0x221   : > { %v1075_v38 = vpack.c.bf16 %v2881_v32, %v2881_v32  ;;  %2443 = vmatprep.subr.bf16.mxu1 %v2630_v1  ;;  %v1030_v14 = vsel %vm955_vm3, %v2881_v32, 0.0  ;;  %v1024_v32 = vsel %vm955_vm3, %v2860_v10, 0.0 }
 0x222   : > { %v1694_v25 = vrot.slane %v1687_v24, %v2713_v11  ;;  %v2602_v24 = vld.sshfl [vmem:[%s3037_s4] sm:$0x33 pattern:$0x73516240] }
 0x223   : > { %2428 = vmatmul.mubr.msk.bf16.vlgmr.msra.gmra.mrb[12].mxu0 %vm955_vm3, %v1075_v38 }
 0x224   : > { %v2893_v63 = vpop.eup %2548  ;;  %2439 = vmatprep.mubr.msk.bf16.mxu0 %vm2631_vm0, %v2630_v1 }
 0x225   : > { %2438 = vmatpush3.bf16.xpose.msra.mxu0 %v1529_v31  ;;  %v1076_v5 = vpack.c.bf16 %v2893_v63, %v2893_v63 }
 0x226   : > { %2449 = vmatprep.subr.bf16.mxu0 %v2630_v1 }
 0x227   : > { %2434 = vmatmul.mubr.msk.bf16.vlgmr.msra.gmra.mrb[12].mxu1 %vm955_vm3, %v1076_v5 }
 0x228   : > { %2445 = vmatprep.mubr.msk.bf16.mxu1 %vm2631_vm0, %v2630_v1 }
 0x229   : > { %2444 = vmatpush3.bf16.xpose.msra.mxu1 %v1587_v4 }
 0x22a   : > { %2455 = vmatprep.subr.bf16.mxu1 %v2630_v1 }
 0x22c   : > { %2440 = vmatmul.mubr.bf16.vlgmr.msra.gmra.mrb[16].mxu0 %v1520_v59 }
 0x22d   : > { %2450 = vmatpush3.bf16.xpose.msra.mxu0 %v1645_v40  ;;  %2451 = vmatprep.mubr.msk.bf16.mxu0 %vm2631_vm0, %v2630_v1 }
 0x22e   : > { %2461 = vmatprep.subr.bf16.mxu0 %v2630_v1 }
 0x230   : > { %2446 = vmatmul.mubr.bf16.vlgmr.msra.gmra.mrb[16].mxu1 %v1578_v16 }
 0x231   : > { %2456 = vmatpush3.bf16.xpose.msra.mxu1 %v1703_v22  ;;  %2457 = vmatprep.mubr.msk.bf16.mxu1 %vm2631_vm0, %v2630_v1 }
 0x232   : > { %2467 = vmatprep.subr.bf16.mxu1 %v2630_v1 }
 0x234   : > { %2452 = vmatmul.mubr.bf16.vlgmr.msra.gmra.mrb[20].mxu0 %v1636_v23  ;;  %v976_v23 = vmul.f32 1.442695, %v972_v46  ;;  %v1027_v46 = vsel %vm955_vm3, %v2868_v18, 0.0 }
 0x235   : > { %2463 = vmatprep.mubr.msk.bf16.mxu0 %vm2631_vm0, %v2630_v1 }
 0x236   : > { %2550 = vpow2.f32 %v976_v23 }
 0x237   : > { %2552 = vpow2.f32 %v982_v42 }
 0x238   : > { %2458 = vmatmul.mubr.bf16.vlgmr.msra.gmra.mrb[20].mxu1 %v1694_v25  ;;  %v2603_v25 = vld.sshfl [vmem:[%s3037_s4 + $0x2] sm:$0x33 pattern:$0x73516240] }
 0x239   : > { %2469 = vmatprep.mubr.msk.bf16.mxu1 %vm2631_vm0, %v2630_v1  ;;  %v1491_v10 = vpack.i.b16 %v2603_v25, %v2602_v24 }
 0x2ee   : > { %v2921_v0 = vpop.f32.mrb[8].mxu0 }
 0x2ef   : > { %v2417_v27 = vpop.f32.mrb[9].mxu0 }
 0x2f0   : > { %v1129_v28 = vpop.f32.mrb[10].mxu0  ;;  %v2604_v27 = vld.sshfl [vmem:[%s3037_s4 + $0x8] sm:$0x33 pattern:$0x73516240] }
 0x2f1   : > { %v2418_v29 = vpop.f32.mrb[11].mxu0  ;;  %v1033_v28 = vsel %vm955_vm3, %v2893_v63, 0.0  ;;  %v1470_v63 = vcombine.high %v2603_v25, %v2632_v3 }
 0x2f2   : > { %v2923_v30 = vpop.f32.mrb[8].mxu1  ;;  %v1503_v29 = vpack.i.b16 %v2605_v44, %v2604_v27 }
 0x2f3   : > { %v2423_v31 = vpop.f32.mrb[9].mxu1 }
 0x2f4   : > { %v1183_v33 = vpop.f32.mrb[10].mxu1  ;;  %v1492_v31 = vshrl.u32 %v2602_v24, 16  ;;  %v1794_v56 = vcombine.low %v1491_v10, %v1503_v29  ;;  %v1017_v29 = vld [vmem:[#allocation3 + $0x8] sm:$0xff] }
 0x2f5   : > { %v2424_v35 = vpop.f32.mrb[11].mxu1  ;;  %v1493_v33 = vshrl.u32 %v2603_v25, 16 }
 0x2f6   : > { %v2925_v36 = vpop.f32.mrb[12].mxu0  ;;  %v1504_v35 = vshrl.u32 %v2604_v27, 16  ;;  %v1801_v18 = vrot.slane %v1794_v56, %v2713_v11 }
 0x2f7   : > { %v2429_v37 = vpop.f32.mrb[13].mxu0  ;;  %v1494_v61 = vpack.i.b16 %v1493_v33, %v1492_v31 }
 0x2f8   : > { %v1237_v38 = vpop.f32.mrb[14].mxu0  ;;  %v1505_v37 = vshrl.u32 %v2605_v44, 16 }
 0x2f9   : > { %v2430_v39 = vpop.f32.mrb[15].mxu0  ;;  %v978_v38 = vmul.f32 1.442695, %v973_v50 }
 0x2fa   : > { %v2927_v21 = vpop.f32.mrb[12].mxu1  ;;  %v1506_v9 = vpack.i.b16 %v1505_v37, %v1504_v35 }
 0x2fb   : > { %v2435_v41 = vpop.f32.mrb[13].mxu1  ;;  %2554 = vpow2.f32 %v978_v38 }
 0x2fc   : > { %v1291_v43 = vpop.f32.mrb[14].mxu1  ;;  %v1849_v39 = vcombine.low %v1494_v61, %v1506_v9  ;;  %v1461_v41 = vcombine.high %v2602_v24, %v2632_v3  ;;  %2556 = vpow2.f32 %v980_v45  ;;  %v1019_v9 = vld [vmem:[#allocation3 + $0x18] sm:$0xff] }
 0x2fd   : > { %v2436_v47 = vpop.f32.mrb[15].mxu1  ;;  %v1479_v43 = vcombine.high %v2604_v27, %v2632_v3  ;;  %v1016_v27 = vld [vmem:[#allocation3] sm:$0xff] }
 0x2fe   : > { %v2551_v47 = vpop.eup %2550 }
 0x2ff   : > { %v1565_v51 = vpop.f32.mrb[16].mxu0 }
 0x300   : > { %v2929_v52 = vmul.f32 0.088388346, %v1565_v51  ;;  %v2441_v54 = vpop.f32.mrb[17].mxu0  ;;  %v1807_v51 = vsel %vm1088_vm4, %v1801_v18, 0 }
 0x301   : > { %v1568_v57 = vpop.f32.mrb[18].mxu0  ;;  %v1488_v54 = vcombine.high %v2605_v44, %v2632_v3  ;;  %2462 = vmatpush3.bf16.msra.mxu0 %v1807_v51 }
 0x302   : > { %v2442_v62 = vpop.f32.mrb[19].mxu0  ;;  %v1750_v4 = vsel %vm955_vm3, %v2929_v52, -inf  ;;  %v1856_v57 = vrot.slane %v1849_v39, %v2713_v11  ;;  %2473 = vmatprep.subr.bf16.mxu0 %v2630_v1 }
 0x303   : > { %v1623_v5 = vpop.f32.mrb[16].mxu1  ;;  %1751 = vmax.xlane.f32.xlu1 %v1750_v4  ;;  %v1497_v62 = vpack.i.b16 %v1470_v63, %v1461_v41  ;;  %v1509_v48 = vpack.i.b16 %v1488_v54, %v1479_v43  ;;  %v1498_v4 = vshrl.u32 %v1461_v41, 16 }
 0x304   : > { %v2933_v6 = vmul.f32 0.088388346, %v1623_v5  ;;  %v2447_v7 = vpop.f32.mrb[17].mxu1  ;;  %v1861_v50 = vsel %vm1088_vm4, %v1856_v57, 0  ;;  %v1499_v5 = vshrl.u32 %v1470_v63, 16 }
 0x305   : > { %v1626_v55 = vpop.f32.mrb[18].mxu1  ;;  %v1510_v7 = vshrl.u32 %v1479_v43, 16  ;;  %2468 = vmatpush3.bf16.msra.mxu1 %v1861_v50  ;;  %v1903_v3 = vcombine.low %v1497_v62, %v1509_v48 }
 0x306   : > { %v2448_v59 = vpop.f32.mrb[19].mxu1  ;;  %v1753_v26 = vsel %vm955_vm3, %v2933_v6, -inf  ;;  %v2553_v55 = vpop.eup %2552  ;;  %2479 = vmatprep.subr.bf16.mxu1 %v2630_v1 }
 0x307   : > { %1754 = vmax.xlane.f32.xlu0 %v1753_v26  ;;  %v1681_v60 = vpop.f32.mrb[20].mxu0  ;;  %v1511_v59 = vshrl.u32 %v1488_v54, 16  ;;  %v1500_v26 = vpack.i.b16 %v1499_v5, %v1498_v4  ;;  %v2555_v58 = vpop.eup %2554  ;;  %v1023_v18 = vmul.f32 %v2553_v55, %v1019_v9 }
 0x308   : > { %v2937_v8 = vmul.f32 0.088388346, %v1681_v60  ;;  %v2453_v34 = vpop.f32.mrb[21].mxu0  ;;  %v2557_v60 = vpop.eup %2556  ;;  %v1021_v37 = vmul.f32 %v2555_v58, %v1017_v29 }
 0x309   : > { %v1684_v12 = vpop.f32.mrb[22].mxu0  ;;  %v1512_v49 = vpack.i.b16 %v1511_v59, %v1510_v7 }
 0x30a   : > { %v2454_v13 = vpop.f32.mrb[23].mxu0  ;;  %v1756_v40 = vsel %vm955_vm3, %v2937_v8, -inf }
 0x30b   : > { %1031 = vadd.xlane.f32.xlu0 %v1030_v14  ;;  %v1739_v15 = vpop.f32.mrb[20].mxu1  ;;  %1757 = vmax.xlane.f32.xlu1 %v1756_v40  ;;  %v1957_v53 = vcombine.low %v1500_v26, %v1512_v49  ;;  %v1018_v40 = vld [vmem:[#allocation3 + $0x10] sm:$0xff] }
 0x30c   : > { %v2943_v16 = vmul.f32 0.088388346, %v1739_v15  ;;  %v2459_v17 = vpop.f32.mrb[21].mxu1 }
 0x30d   : > { %v1742_v19 = vpop.f32.mrb[22].mxu1 }
 0x30e   : > { %v2460_v20 = vpop.f32.mrb[23].mxu1  ;;  %v1759_v22 = vsel %vm955_vm3, %v2943_v16, -inf  ;;  %v1022_v19 = vmul.f32 %v2557_v60, %v1018_v40 }
 0x30f   : > { %1760 = vmax.xlane.f32.xlu1 %v1759_v22 }
 0x313   : > { %1025 = vadd.xlane.f32.xlu1 %v1024_v32 }
 0x317   : > { %1028 = vadd.xlane.f32.xlu1 %v1027_v46  ;;  %v1020_v46 = vmul.f32 %v2551_v47, %v1016_v27 }
 0x31b   : > { %1034 = vadd.xlane.f32.xlu1 %v1033_v28 }
 0x321   : > { %1051 = vperm.xlu0 %2516, %v2551_v47  }
 0x325   : > { %1066 = vperm.xlu0 %2516, %v2553_v55  }
 0x32c   : > { %1056 = vperm.xlu1 %2517, %v2555_v58   ;;  %v2635_v58 = vmov 1966171168  }
 0x330   : > { %1061 = vperm.xlu1 %2517, %v2557_v60   ;;  %v2062_v60 = vunpack.c.l.s4 %v2635_v58 }
 0x390   : > { %v1752_v34 = vpop.xlane.xlu1 %1751 }
 0x391   : > { %v1762_v12 = vsub.f32 %v2929_v52, %v1752_v34  ;;  %v1910_v52 = vrot.slane %v1903_v3, %v2713_v11 }
 0x393   : > { %v1766_v13 = vmul.f32 1.442695, %v1762_v12  ;;  %v1915_v31 = vsel %vm1088_vm4, %v1910_v52, 0 }
 0x394   : > { %v1755_v14 = vpop.xlane.xlu0 %1754 }
 0x395   : > { %2558 = vpow2.f32 %v1766_v13  ;;  %v1763_v15 = vsub.f32 %v2933_v6, %v1755_v14  ;;  %v2063_v13 = vunpack.c.0.s8 %v2062_v60 }
 0x397   : > { %v1768_v17 = vmul.f32 1.442695, %v1763_v15  ;;  %v2066_v40 = vsub.s32 %v2063_v13, %v2692_v2  ;;  %v2346_v15 = vld.sshfl [vmem:[%s3038_s5] sm:$0x33 pattern:$0x75316420] }
 0x398   : > { %v1032_v20 = vpop.xlane.xlu0 %1031  ;;  %v1758_v22 = vpop.xlane.xlu1 %1757 }
 0x399   : > { %2560 = vpow2.f32 %v1768_v17  ;;  %v1038_v23 = vadd.f32 %v1032_v20, %v1022_v19  ;;  %v1764_v32 = vsub.f32 %v2937_v8, %v1758_v22  ;;  %v1964_v8 = vrot.slane %v1957_v53, %v2713_v11 }
 0x39a   : > { %v2067_v19 = vrot.slane %v2346_v15, %v2066_v40  ;;  %v2079_v20 = vsub.s32 0, %v2692_v2  ;;  %v2060_v22 = vcombine.high %v2346_v15, %v2346_v15 }
 0x39b   : > { %1043 = vst.msk [vmem:[#allocation3 + $0x10] sm:$0xff] %vm476_vm1, %v1038_v23  ;;  %v1770_v24 = vmul.f32 1.442695, %v1764_v32  ;;  %v1969_v61 = vsel %vm1088_vm4, %v1964_v8, 0 }
 0x39c   : > { %v1761_v25 = vpop.xlane.xlu1 %1760  ;;  %v2075_v2 = vcombine.high %v2067_v19, %v2067_v19 }
 0x39d   : > { %2562 = vpow2.f32 %v1770_v24  ;;  %v1765_v42 = vsub.f32 %v2943_v16, %v1761_v25  ;;  %v2080_v24 = vrot.slane %v2067_v19, %v2079_v20  ;;  %v2074_v25 = vrot.slane %v2060_v22, %v2066_v40 }
 0x39f   : > { %v2559_v44 = vpop.eup %2558  ;;  %v1772_v6 = vmul.f32 1.442695, %v1765_v42  ;;  %v2084_v8 = vrot.slane %v2074_v25, %v2079_v20 }
 0x3a0   : > { %v1026_v10 = vpop.xlane.xlu1 %1025  ;;  %v1790_v28 = vpack.c.bf16 %v2559_v44, %v2559_v44  ;;  %v1052_v3 = vpop.permute.xlu0 %1051 }
 0x3a1   : > { %2564 = vpow2.f32 %v1772_v6  ;;  %v1036_v33 = vadd.f32 %v1026_v10, %v1020_v46  ;;  %v1069_v23 = vmul.f32 0.0, %v1052_v3 }
 0x3a2   : > { %2464 = vmatmul.mubr.msk.bf16.vlgmr.msra.gmra.mrb[24].mxu0 %vm955_vm3, %v1790_v28  ;;  %v2017_v4 = vld [vmem:[#allocation3 + $0x10] sm:$0xff] }
 0x3a3   : > { %v2561_v35 = vpop.eup %2560  ;;  %1041 = vst.msk [vmem:[#allocation3] sm:$0xff] %vm476_vm1, %v1036_v33  ;;  %2474 = vmatpush3.bf16.msra.mxu0 %v1915_v31  ;;  %2475 = vmatprep.mubr.msk.bf16.mxu0 %vm2631_vm0, %v2630_v1 }
 0x3a4   : > { %v1029_v16 = vpop.xlane.xlu1 %1028  ;;  %v1791_v56 = vpack.c.bf16 %v2561_v35, %v2561_v35  ;;  %v1777_v45 = vsel %vm955_vm3, %v2561_v35, 0.0  ;;  %v1067_v26 = vpop.permute.xlu0 %1066 }
 0x3a5   : > { %v1037_v38 = vadd.f32 %v1029_v16, %v1021_v37 }
 0x3a6   : > { %2470 = vmatmul.mubr.msk.bf16.vlgmr.msra.gmra.mrb[24].mxu1 %vm955_vm3, %v1791_v56 }
 0x3a7   : > { %v2563_v11 = vpop.eup %2562  ;;  %1042 = vst.msk [vmem:[#allocation3 + $0x8] sm:$0xff] %vm476_vm1, %v1037_v38  ;;  %2480 = vmatpush3.bf16.msra.mxu1 %v1969_v61  ;;  %2481 = vmatprep.mubr.msk.bf16.mxu1 %vm2631_vm0, %v2630_v1  ;;  %v1774_v1 = vsel %vm955_vm3, %v2559_v44, 0.0  ;;  %v1294_v44 = vadd.f32 %v2921_v0, %v1069_v23 }
 0x3a8   : > { %v1035_v39 = vpop.xlane.xlu1 %1034  ;;  %v1792_v41 = vpack.c.bf16 %v2563_v11, %v2563_v11  ;;  %v1780_v48 = vsel %vm955_vm3, %v2563_v11, 0.0 }
 0x3a9   : > { %v1039_v63 = vadd.f32 %v1035_v39, %v1023_v18  ;;  %v2088_v39 = vrot.slane %v2075_v2, %v2079_v20 }
 0x3aa   : > { %2476 = vmatmul.mubr.msk.bf16.vlgmr.msra.gmra.mrb[28].mxu0 %vm955_vm3, %v1792_v41  ;;  %v2015_v43 = vld [vmem:[#allocation3] sm:$0xff]  ;;  %v2076_v41 = vcombine.high %v2074_v25, %v2074_v25 }
 0x3ab   : > { %v2565_v47 = vpop.eup %2564  ;;  %1044 = vst.msk [vmem:[#allocation3 + $0x18] sm:$0xff] %vm476_vm1, %v1039_v63  ;;  %2566 = vrcp.f32 %v2015_v43 }
 0x3ac   : > { %v1793_v51 = vpack.c.bf16 %v2565_v47, %v2565_v47  ;;  %v1783_v50 = vsel %vm955_vm3, %v2565_v47, 0.0  ;;  %v1057_v59 = vpop.permute.xlu1 %1056 }
 0x3ad   : > { %v1070_v42 = vmul.f32 0.0, %v1057_v59 }
 0x3ae   : > { %2482 = vmatmul.mubr.msk.bf16.vlgmr.msra.gmra.mrb[28].mxu1 %vm955_vm3, %v1793_v51  ;;  %v2016_v54 = vld [vmem:[#allocation3 + $0x8] sm:$0xff]  ;;  %v1072_v51 = vmul.f32 0.0, %v1067_v26 }
 0x3af   : > { %2568 = vrcp.f32 %v2016_v54  ;;  %v1295_v16 = vadd.f32 %v2923_v30, %v1070_v42 }
 0x3b0   : > { %2570 = vrcp.f32 %v2017_v4  ;;  %v1062_v49 = vpop.permute.xlu1 %1061  ;;  %v1297_v59 = vadd.f32 %v2927_v21, %v1072_v51 }
 0x3b1   : > { %v1071_v37 = vmul.f32 0.0, %v1062_v49 }
 0x3b2   : > { %v2018_v5 = vld [vmem:[#allocation3 + $0x18] sm:$0xff] }
 0x3b3   : > { %2572 = vrcp.f32 %v2018_v5  ;;  %v1296_v54 = vadd.f32 %v2925_v36, %v1071_v37  ;;  %v2092_v5 = vrot.slane %v2076_v41, %v2079_v20 }
 0x3b5   : > { %v2567_v57 = vpop.eup %2566 }
 0x3b6   : > { %2029 = vperm.xlu1 %2517, %v2567_v57  }
 0x3b9   : > { %v2569_v62 = vpop.eup %2568 }
 0x3ba   : > { %2034 = vperm.xlu0 %2516, %v2569_v62   ;;  %v2571_v7 = vpop.eup %2570 }
 0x3bd   : > { %v2573_v55 = vpop.eup %2572 }
 0x3d9   : > { %1775 = vadd.xlane.f32.xlu0 %v1774_v1 }
 0x3da   : > { %1778 = vadd.xlane.f32.xlu1 %v1777_v45 }
 0x3dd   : > { %1781 = vadd.xlane.f32.xlu0 %v1780_v48 }
 0x3de   : > { %1784 = vadd.xlane.f32.xlu1 %v1783_v50 }
 0x3ef   : > { %2039 = vperm.xlu1 %2517, %v2571_v7  }
 0x3f3   : > { %2044 = vperm.xlu0 %2516, %v2573_v55  }
 0x435   : > { %v2030_v34 = vpop.permute.xlu1 %2029 }
 0x436   : > { %v2047_v28 = vmul.f32 %v2030_v34, %v1294_v44 }
 0x439   : > { %v2035_v53 = vpop.permute.xlu0 %2034 }
 0x43a   : > { %v2048_v0 = vmul.f32 %v2035_v53, %v1295_v16 }
 0x466   : > { %v1776_v12 = vpop.xlane.xlu0 %1775 }
 0x467   : > { %2574 = vrcp.f32 %v1776_v12  ;;  %v1779_v14 = vpop.xlane.xlu1 %1778 }
 0x468   : > { %2576 = vrcp.f32 %v1779_v14 }
 0x46a   : > { %v1782_v17 = vpop.xlane.xlu0 %1781 }
 0x46b   : > { %2578 = vrcp.f32 %v1782_v17  ;;  %v1785_v32 = vpop.xlane.xlu1 %1784 }
 0x46c   : > { %2580 = vrcp.f32 %v1785_v32 }
 0x46f   : > { %v2040_v43 = vpop.permute.xlu1 %2039 }
 0x470   : > { %v2049_v45 = vmul.f32 %v2040_v43, %v1296_v54 }
 0x471   : > { %v2575_v27 = vpop.eup %2574 }
 0x472   : > { %v2577_v33 = vpop.eup %2576  ;;  %v2045_v55 = vpop.permute.xlu0 %2044 }
 0x473   : > { %v2050_v58 = vmul.f32 %v2045_v55, %v1297_v59 }
 0x475   : > { %v1843_v52 = vpop.f32.mrb[24].mxu0  ;;  %v2579_v63 = vpop.eup %2578 }
 0x476   : > { %v2011_v6 = vmul.f32 %v2575_v27, %v1843_v52  ;;  %v2465_v46 = vpop.f32.mrb[25].mxu0  ;;  %v2581_v7 = vpop.eup %2580 }
 0x477   : > { %v1846_v10 = vpop.f32.mrb[26].mxu0 }
 0x478   : > { %v2097_v29 = vmul.f32 %v2080_v24, %v2011_v6  ;;  %v2466_v31 = vpop.f32.mrb[27].mxu0 }
 0x479   : > { %v1897_v35 = vpop.f32.mrb[24].mxu1 }
 0x47a   : > { %v2101_v56 = vadd.f32 %v2097_v29, %v2047_v28  ;;  %v2012_v61 = vmul.f32 %v2577_v33, %v1897_v35  ;;  %v2471_v9 = vpop.f32.mrb[25].mxu1 }
 0x47b   : > { %v1900_v38 = vpop.f32.mrb[26].mxu1 }
 0x47c   : > { %v2098_v11 = vmul.f32 %v2084_v8, %v2012_v61  ;;  %v2472_v18 = vpop.f32.mrb[27].mxu1 }
 0x47d   : > { %v1951_v47 = vpop.f32.mrb[28].mxu0 }
 0x47e   : > { %v2102_v57 = vadd.f32 %v2098_v11, %v2048_v0  ;;  %v2013_v62 = vmul.f32 %v2579_v63, %v1951_v47  ;;  %v2477_v1 = vpop.f32.mrb[29].mxu0 }
 0x47f   : > { %v1954_v30 = vpop.f32.mrb[30].mxu0 }
 0x480   : > { %v2355_v48 = vpack.c.bf16 %v2102_v57, %v2101_v56  ;;  %v2099_v50 = vmul.f32 %v2088_v39, %v2013_v62  ;;  %v2478_v4 = vpop.f32.mrb[31].mxu0 }
 0x481   : > { %v2005_v3 = vpop.f32.mrb[28].mxu1 }
 0x482   : > { %2121 = vst [vmem:[%s469_s11] sm:$0xff] %v2355_v48  ;;  %v2103_v36 = vadd.f32 %v2099_v50, %v2049_v45  ;;  %v2014_v26 = vmul.f32 %v2581_v7, %v2005_v3  ;;  %v2483_v49 = vpop.f32.mrb[29].mxu1 }
 0x483   : > { %v2008_v53 = vpop.f32.mrb[30].mxu1 }
 0x484   : > { %v2100_v60 = vmul.f32 %v2092_v5, %v2014_v26  ;;  %v2484_v34 = vpop.f32.mrb[31].mxu1 }
 0x486   : > { %v2104_v12 = vadd.f32 %v2100_v60, %v2050_v58 }
 0x488   : > { %v2356_v13 = vpack.c.bf16 %v2104_v12, %v2103_v36 }
 0x48a   : > { %2122 = vst [vmem:[%s469_s11 + $0x8] sm:$0xff] %v2356_v13 }
 0x48b PF: > { %s16_s23 = sadd.s32 1, %s2628_s23   ;;  %s3040_s21 = smov %s2624_s22 }
 0x48c   : > { %p13_p5 = scmp.ge.s32.totalorder %s16_s23, 4   ;;  %s3041_s22 = smov %s3043_s24 }
 0x48e   :  { %15 = sbr.rel (!%p13_p5) target bundleno = 2 (0x2), region = 101 }

// kernel: transformer_forward.16
= control target key start
LH: loop header
LB: loop body
LE: loop exit
PB: predicated region body
PF: predicated region fallthrough
CT: control target
= control target key end

     0   :  { %s2145_s15 = smov 0   ;;  %s2147_s16 = smov 0   ;;  %s2603_s0 = inlined_call_operand.vmem [shape: f32[16,512], index: 0, kind: input, shape index: {}]   ;;  %s2604_s1 = inlined_call_operand.vmem [shape: f32[1,512], index: 1, kind: input, shape index: {}]   ;;  %s2605_s2 = inlined_call_operand.vmem [shape: bf16[512,1408], index: 2, kind: input, shape index: {}]   ;;  %s2606_s3 = inlined_call_operand.vmem [shape: bf16[512,1408], index: 3, kind: input, shape index: {}]   ;;  %s2607_s4 = inlined_call_operand.vmem [shape: bf16[16,1408], index: 4, kind: output, shape index: {}]  }
   0x1   :  { %s2149_s17 = smov 0   ;;  %s2151_s18 = smov 0  }
   0x2   :  { %s2153_s19 = smov 0  }
   0x3 LB: > { %s23_s20 = sadd.s32 1, %s2114_s18  ;;  %s1783_s21 = sadd.s32 4294967295, %s2118_s19   ;;  %s2118_s19 = sphi %s2153_s19, %s14_s19   ;;  %s2114_s18 = sphi %s2151_s18, %s2613_s18   ;;  %s2110_s17 = sphi %s2149_s17, %s2612_s17   ;;  %s2106_s16 = sphi %s2147_s16, %s2611_s16   ;;  %s2102_s15 = sphi %s2145_s15, %s2610_s15  }
   0x4   : > { %p24_p0 = scmp.ge.s32.totalorder %s23_s20, 11  ;;  %p87_p1 = scmp.ne.s32.totalorder %s2106_s16, %s2102_s15 }
   0x5   : > { %p88_p2 = scmp.eq.s32.totalorder %s2118_s19, 0  ;;  %p145_p4 = scmp.eq.s32.totalorder %s1783_s21, 10 }
   0x6   : > { %s2615_s20 = smov (%p24_p0, %s23_s20), 0  ;;  %s80_s24 = sadd.s32 1, %s2106_s16 }
   0x7   : > { %p2177_p3 = por %p88_p2, %p87_p1  ;;  %s77_s23 = ssub.s32 %s2114_s18, %s2615_s20 }
   0x8   : > { %p78_p5 = scmp.eq.s32.totalorder %s77_s23, 0  ;;  %p2184_p6 = por %p145_p4, %p87_p1 }
   0x9   : > { %p1787_p7 = scmp.ge.s32.totalorder %s2118_s19, 11 }
   0xa   : > { %s2189_s26 = scalar_select %p78_p5, %s2106_s16, %s80_s24  }
   0xb   : > { %180 = sbr.rel (%p1787_p7) target bundleno = 110 (0x6e), region = 24 }
  0x12   : > { %183 = sbr.rel (!%p2177_p3) target bundleno = 64 (0x40), region = 28  ;;  %s185_s27 = sand.u32 (%p2177_p3), 1, %s2106_s16  }
  0x13   : > { %s1789_s28 = sshll.u32 (%p2177_p3), %s2114_s18, 2  ;;  %s1788_s29 = sshll.u32 (%p2177_p3), %s185_s27, 8 }
  0x14   : > { %s2199_s6 = scalar_lea.vmem (%p2177_p3), %s2605_s2, %s1789_s28  ;;  %s2203_s7 = scalar_lea.vmem (%p2177_p3), [#allocation3], %s1788_s29 }
  0x15   : > { %v205_v0 = vld [vmem:[%s2199_s6] sm:$0xf] (%p2177_p3)  ;;  %v207_v1 = vld [vmem:[%s2199_s6 + $0x2c] sm:$0xf] (%p2177_p3)  ;;  %v209_v2 = vld [vmem:[%s2199_s6 + $0x58] sm:$0xf] (%p2177_p3) }
  0x16   : > { %206 = vst [vmem:[%s2203_s7] sm:$0xf] (%p2177_p3), %v205_v0  ;;  %208 = vst [vmem:[%s2203_s7 + $0x4] sm:$0xf] (%p2177_p3), %v207_v1  ;;  %v211_v3 = vld [vmem:[%s2199_s6 + $0x84] sm:$0xf] (%p2177_p3) }
  0x17   : > { %v213_v4 = vld [vmem:[%s2199_s6 + $0xb0] sm:$0xf] (%p2177_p3)  ;;  %210 = vst [vmem:[%s2203_s7 + $0x8] sm:$0xf] (%p2177_p3), %v209_v2  ;;  %212 = vst [vmem:[%s2203_s7 + $0xc] sm:$0xf] (%p2177_p3), %v211_v3 }
  0x18   : > { %214 = vst [vmem:[%s2203_s7 + $0x10] sm:$0xf] (%p2177_p3), %v213_v4  ;;  %v215_v5 = vld [vmem:[%s2199_s6 + $0xdc] sm:$0xf] (%p2177_p3)  ;;  %v217_v6 = vld [vmem:[%s2199_s6 + $0x108] sm:$0xf] (%p2177_p3) }
  0x19   : > { %v219_v7 = vld [vmem:[%s2199_s6 + $0x134] sm:$0xf]  ;;  %216 = vst [vmem:[%s2203_s7 + $0x14] sm:$0xf] %v215_v5  ;;  %218 = vst [vmem:[%s2203_s7 + $0x18] sm:$0xf] %v217_v6 }
  0x1a   : > { %220 = vst [vmem:[%s2203_s7 + $0x1c] sm:$0xf] %v219_v7  ;;  %v221_v8 = vld [vmem:[%s2199_s6 + $0x160] sm:$0xf]  ;;  %v223_v9 = vld [vmem:[%s2199_s6 + $0x18c] sm:$0xf] }
  0x1b   : > { %v225_v10 = vld [vmem:[%s2199_s6 + $0x1b8] sm:$0xf]  ;;  %222 = vst [vmem:[%s2203_s7 + $0x20] sm:$0xf] %v221_v8  ;;  %224 = vst [vmem:[%s2203_s7 + $0x24] sm:$0xf] %v223_v9 }
  0x1c   : > { %226 = vst [vmem:[%s2203_s7 + $0x28] sm:$0xf] %v225_v10  ;;  %v227_v11 = vld [vmem:[%s2199_s6 + $0x1e4] sm:$0xf]  ;;  %v229_v12 = vld [vmem:[%s2199_s6 + $0x210] sm:$0xf] }
  0x1d   : > { %v231_v13 = vld [vmem:[%s2199_s6 + $0x23c] sm:$0xf]  ;;  %228 = vst [vmem:[%s2203_s7 + $0x2c] sm:$0xf] %v227_v11  ;;  %230 = vst [vmem:[%s2203_s7 + $0x30] sm:$0xf] %v229_v12 }
  0x1e   : > { %232 = vst [vmem:[%s2203_s7 + $0x34] sm:$0xf] %v231_v13  ;;  %v233_v14 = vld [vmem:[%s2199_s6 + $0x268] sm:$0xf]  ;;  %v235_v15 = vld [vmem:[%s2199_s6 + $0x294] sm:$0xf] }
  0x1f   : > { %v237_v16 = vld [vmem:[%s2199_s6 + $0x2c0] sm:$0xf]  ;;  %234 = vst [vmem:[%s2203_s7 + $0x38] sm:$0xf] %v233_v14  ;;  %236 = vst [vmem:[%s2203_s7 + $0x3c] sm:$0xf] %v235_v15 }
  0x20   : > { %238 = vst [vmem:[%s2203_s7 + $0x40] sm:$0xf] %v237_v16  ;;  %v239_v17 = vld [vmem:[%s2199_s6 + $0x2ec] sm:$0xf]  ;;  %v241_v18 = vld [vmem:[%s2199_s6 + $0x318] sm:$0xf] }
  0x21   : > { %v243_v19 = vld [vmem:[%s2199_s6 + $0x344] sm:$0xf]  ;;  %240 = vst [vmem:[%s2203_s7 + $0x44] sm:$0xf] %v239_v17  ;;  %242 = vst [vmem:[%s2203_s7 + $0x48] sm:$0xf] %v241_v18 }
  0x22   : > { %244 = vst [vmem:[%s2203_s7 + $0x4c] sm:$0xf] %v243_v19  ;;  %v245_v20 = vld [vmem:[%s2199_s6 + $0x370] sm:$0xf]  ;;  %v247_v21 = vld [vmem:[%s2199_s6 + $0x39c] sm:$0xf] }
  0x23   : > { %v249_v22 = vld [vmem:[%s2199_s6 + $0x3c8] sm:$0xf]  ;;  %246 = vst [vmem:[%s2203_s7 + $0x50] sm:$0xf] %v245_v20  ;;  %248 = vst [vmem:[%s2203_s7 + $0x54] sm:$0xf] %v247_v21 }
  0x24   : > { %250 = vst [vmem:[%s2203_s7 + $0x58] sm:$0xf] %v249_v22  ;;  %v251_v23 = vld [vmem:[%s2199_s6 + $0x3f4] sm:$0xf]  ;;  %v253_v24 = vld [vmem:[%s2199_s6 + $0x420] sm:$0xf] }
  0x25   : > { %v255_v25 = vld [vmem:[%s2199_s6 + $0x44c] sm:$0xf]  ;;  %252 = vst [vmem:[%s2203_s7 + $0x5c] sm:$0xf] %v251_v23  ;;  %254 = vst [vmem:[%s2203_s7 + $0x60] sm:$0xf] %v253_v24 }
  0x26   : > { %256 = vst [vmem:[%s2203_s7 + $0x64] sm:$0xf] %v255_v25  ;;  %v257_v26 = vld [vmem:[%s2199_s6 + $0x478] sm:$0xf]  ;;  %v259_v27 = vld [vmem:[%s2199_s6 + $0x4a4] sm:$0xf] }
  0x27   : > { %v261_v28 = vld [vmem:[%s2199_s6 + $0x4d0] sm:$0xf]  ;;  %258 = vst [vmem:[%s2203_s7 + $0x68] sm:$0xf] %v257_v26  ;;  %260 = vst [vmem:[%s2203_s7 + $0x6c] sm:$0xf] %v259_v27 }
  0x28   : > { %262 = vst [vmem:[%s2203_s7 + $0x70] sm:$0xf] %v261_v28  ;;  %v263_v29 = vld [vmem:[%s2199_s6 + $0x4fc] sm:$0xf]  ;;  %v265_v30 = vld [vmem:[%s2199_s6 + $0x528] sm:$0xf] }
  0x29   : > { %v267_v31 = vld [vmem:[%s2199_s6 + $0x554] sm:$0xf]  ;;  %264 = vst [vmem:[%s2203_s7 + $0x74] sm:$0xf] %v263_v29  ;;  %266 = vst [vmem:[%s2203_s7 + $0x78] sm:$0xf] %v265_v30 }
  0x2a   : > { %268 = vst [vmem:[%s2203_s7 + $0x7c] sm:$0xf] %v267_v31  ;;  %v269_v32 = vld [vmem:[%s2199_s6 + $0x580] sm:$0xf]  ;;  %v271_v33 = vld [vmem:[%s2199_s6 + $0x5ac] sm:$0xf] }
  0x2b   : > { %v273_v34 = vld [vmem:[%s2199_s6 + $0x5d8] sm:$0xf]  ;;  %270 = vst [vmem:[%s2203_s7 + $0x80] sm:$0xf] %v269_v32  ;;  %272 = vst [vmem:[%s2203_s7 + $0x84] sm:$0xf] %v271_v33 }
  0x2c   : > { %274 = vst [vmem:[%s2203_s7 + $0x88] sm:$0xf] %v273_v34  ;;  %v275_v35 = vld [vmem:[%s2199_s6 + $0x604] sm:$0xf]  ;;  %v277_v36 = vld [vmem:[%s2199_s6 + $0x630] sm:$0xf] }
  0x2d   : > { %v279_v37 = vld [vmem:[%s2199_s6 + $0x65c] sm:$0xf]  ;;  %276 = vst [vmem:[%s2203_s7 + $0x8c] sm:$0xf] %v275_v35  ;;  %278 = vst [vmem:[%s2203_s7 + $0x90] sm:$0xf] %v277_v36 }
  0x2e   : > { %280 = vst [vmem:[%s2203_s7 + $0x94] sm:$0xf] %v279_v37  ;;  %v281_v38 = vld [vmem:[%s2199_s6 + $0x688] sm:$0xf]  ;;  %v283_v39 = vld [vmem:[%s2199_s6 + $0x6b4] sm:$0xf] }
  0x2f   : > { %v285_v40 = vld [vmem:[%s2199_s6 + $0x6e0] sm:$0xf]  ;;  %282 = vst [vmem:[%s2203_s7 + $0x98] sm:$0xf] %v281_v38  ;;  %284 = vst [vmem:[%s2203_s7 + $0x9c] sm:$0xf] %v283_v39 }
  0x30   : > { %286 = vst [vmem:[%s2203_s7 + $0xa0] sm:$0xf] %v285_v40  ;;  %v287_v41 = vld [vmem:[%s2199_s6 + $0x70c] sm:$0xf]  ;;  %v289_v42 = vld [vmem:[%s2199_s6 + $0x738] sm:$0xf] }
  0x31   : > { %v291_v43 = vld [vmem:[%s2199_s6 + $0x764] sm:$0xf]  ;;  %288 = vst [vmem:[%s2203_s7 + $0xa4] sm:$0xf] %v287_v41  ;;  %290 = vst [vmem:[%s2203_s7 + $0xa8] sm:$0xf] %v289_v42 }
  0x32   : > { %292 = vst [vmem:[%s2203_s7 + $0xac] sm:$0xf] %v291_v43  ;;  %v293_v44 = vld [vmem:[%s2199_s6 + $0x790] sm:$0xf]  ;;  %v295_v45 = vld [vmem:[%s2199_s6 + $0x7bc] sm:$0xf] }
  0x33   : > { %v297_v46 = vld [vmem:[%s2199_s6 + $0x7e8] sm:$0xf]  ;;  %294 = vst [vmem:[%s2203_s7 + $0xb0] sm:$0xf] %v293_v44  ;;  %296 = vst [vmem:[%s2203_s7 + $0xb4] sm:$0xf] %v295_v45 }
  0x34   : > { %298 = vst [vmem:[%s2203_s7 + $0xb8] sm:$0xf] %v297_v46  ;;  %v299_v47 = vld [vmem:[%s2199_s6 + $0x814] sm:$0xf]  ;;  %v301_v48 = vld [vmem:[%s2199_s6 + $0x840] sm:$0xf] }
  0x35   : > { %v303_v49 = vld [vmem:[%s2199_s6 + $0x86c] sm:$0xf]  ;;  %300 = vst [vmem:[%s2203_s7 + $0xbc] sm:$0xf] %v299_v47  ;;  %302 = vst [vmem:[%s2203_s7 + $0xc0] sm:$0xf] %v301_v48 }
  0x36   : > { %304 = vst [vmem:[%s2203_s7 + $0xc4] sm:$0xf] %v303_v49  ;;  %v305_v50 = vld [vmem:[%s2199_s6 + $0x898] sm:$0xf]  ;;  %v307_v51 = vld [vmem:[%s2199_s6 + $0x8c4] sm:$0xf] }
  0x37   : > { %v309_v52 = vld [vmem:[%s2199_s6 + $0x8f0] sm:$0xf]  ;;  %306 = vst [vmem:[%s2203_s7 + $0xc8] sm:$0xf] %v305_v50  ;;  %308 = vst [vmem:[%s2203_s7 + $0xcc] sm:$0xf] %v307_v51 }
  0x38   : > { %310 = vst [vmem:[%s2203_s7 + $0xd0] sm:$0xf] %v309_v52  ;;  %v311_v53 = vld [vmem:[%s2199_s6 + $0x91c] sm:$0xf]  ;;  %v313_v54 = vld [vmem:[%s2199_s6 + $0x948] sm:$0xf] }
  0x39   : > { %v315_v55 = vld [vmem:[%s2199_s6 + $0x974] sm:$0xf]  ;;  %312 = vst [vmem:[%s2203_s7 + $0xd4] sm:$0xf] %v311_v53  ;;  %314 = vst [vmem:[%s2203_s7 + $0xd8] sm:$0xf] %v313_v54 }
  0x3a   : > { %316 = vst [vmem:[%s2203_s7 + $0xdc] sm:$0xf] %v315_v55  ;;  %v317_v56 = vld [vmem:[%s2199_s6 + $0x9a0] sm:$0xf]  ;;  %v319_v57 = vld [vmem:[%s2199_s6 + $0x9cc] sm:$0xf] }
  0x3b   : > { %v321_v58 = vld [vmem:[%s2199_s6 + $0x9f8] sm:$0xf]  ;;  %318 = vst [vmem:[%s2203_s7 + $0xe0] sm:$0xf] %v317_v56  ;;  %320 = vst [vmem:[%s2203_s7 + $0xe4] sm:$0xf] %v319_v57 }
  0x3c   : > { %322 = vst [vmem:[%s2203_s7 + $0xe8] sm:$0xf] %v321_v58  ;;  %v323_v59 = vld [vmem:[%s2199_s6 + $0xa24] sm:$0xf]  ;;  %v325_v60 = vld [vmem:[%s2199_s6 + $0xa50] sm:$0xf] }
  0x3d   : > { %v327_v61 = vld [vmem:[%s2199_s6 + $0xa7c] sm:$0xf]  ;;  %324 = vst [vmem:[%s2203_s7 + $0xec] sm:$0xf] %v323_v59  ;;  %326 = vst [vmem:[%s2203_s7 + $0xf0] sm:$0xf] %v325_v60 }
  0x3e   : > { %328 = vst [vmem:[%s2203_s7 + $0xf4] sm:$0xf] %v327_v61  ;;  %v329_v62 = vld [vmem:[%s2199_s6 + $0xaa8] sm:$0xf]  ;;  %v331_v63 = vld [vmem:[%s2199_s6 + $0xad4] sm:$0xf] }
  0x3f   : > { %330 = vst [vmem:[%s2203_s7 + $0xf8] sm:$0xf] %v329_v62  ;;  %332 = vst [vmem:[%s2203_s7 + $0xfc] sm:$0xf] %v331_v63 }
  0x40 PF: > { %483 = sbr.rel (!%p2177_p3) target bundleno = 110 (0x6e), region = 69  ;;  %s485_s8 = sand.u32 (%p2177_p3), 1, %s2106_s16  }
  0x41   : > { %s1791_s9 = sshll.u32 (%p2177_p3), %s2114_s18, 2  ;;  %s1790_s10 = sshll.u32 (%p2177_p3), %s485_s8, 8 }
  0x42   : > { %s2338_s13 = scalar_lea.vmem (%p2177_p3), %s2606_s3, %s1791_s9  ;;  %s2342_s14 = scalar_lea.vmem (%p2177_p3), [#allocation4], %s1790_s10 }
  0x43   : > { %v505_v0 = vld [vmem:[%s2338_s13] sm:$0xf] (%p2177_p3)  ;;  %v507_v1 = vld [vmem:[%s2338_s13 + $0x2c] sm:$0xf] (%p2177_p3)  ;;  %v509_v2 = vld [vmem:[%s2338_s13 + $0x58] sm:$0xf] (%p2177_p3) }
  0x44   : > { %506 = vst [vmem:[%s2342_s14] sm:$0xf] (%p2177_p3), %v505_v0  ;;  %508 = vst [vmem:[%s2342_s14 + $0x4] sm:$0xf] (%p2177_p3), %v507_v1  ;;  %v511_v3 = vld [vmem:[%s2338_s13 + $0x84] sm:$0xf] (%p2177_p3) }
  0x45   : > { %v513_v4 = vld [vmem:[%s2338_s13 + $0xb0] sm:$0xf] (%p2177_p3)  ;;  %510 = vst [vmem:[%s2342_s14 + $0x8] sm:$0xf] (%p2177_p3), %v509_v2  ;;  %512 = vst [vmem:[%s2342_s14 + $0xc] sm:$0xf] (%p2177_p3), %v511_v3 }
  0x46   : > { %514 = vst [vmem:[%s2342_s14 + $0x10] sm:$0xf] (%p2177_p3), %v513_v4  ;;  %v515_v5 = vld [vmem:[%s2338_s13 + $0xdc] sm:$0xf] (%p2177_p3)  ;;  %v517_v6 = vld [vmem:[%s2338_s13 + $0x108] sm:$0xf] (%p2177_p3) }
  0x47   : > { %v519_v7 = vld [vmem:[%s2338_s13 + $0x134] sm:$0xf]  ;;  %516 = vst [vmem:[%s2342_s14 + $0x14] sm:$0xf] %v515_v5  ;;  %518 = vst [vmem:[%s2342_s14 + $0x18] sm:$0xf] %v517_v6 }
  0x48   : > { %520 = vst [vmem:[%s2342_s14 + $0x1c] sm:$0xf] %v519_v7  ;;  %v521_v8 = vld [vmem:[%s2338_s13 + $0x160] sm:$0xf]  ;;  %v523_v9 = vld [vmem:[%s2338_s13 + $0x18c] sm:$0xf] }
  0x49   : > { %v525_v10 = vld [vmem:[%s2338_s13 + $0x1b8] sm:$0xf]  ;;  %522 = vst [vmem:[%s2342_s14 + $0x20] sm:$0xf] %v521_v8  ;;  %524 = vst [vmem:[%s2342_s14 + $0x24] sm:$0xf] %v523_v9 }
  0x4a   : > { %526 = vst [vmem:[%s2342_s14 + $0x28] sm:$0xf] %v525_v10  ;;  %v527_v11 = vld [vmem:[%s2338_s13 + $0x1e4] sm:$0xf]  ;;  %v529_v12 = vld [vmem:[%s2338_s13 + $0x210] sm:$0xf] }
  0x4b   : > { %v531_v13 = vld [vmem:[%s2338_s13 + $0x23c] sm:$0xf]  ;;  %528 = vst [vmem:[%s2342_s14 + $0x2c] sm:$0xf] %v527_v11  ;;  %530 = vst [vmem:[%s2342_s14 + $0x30] sm:$0xf] %v529_v12 }
  0x4c   : > { %532 = vst [vmem:[%s2342_s14 + $0x34] sm:$0xf] %v531_v13  ;;  %v533_v14 = vld [vmem:[%s2338_s13 + $0x268] sm:$0xf]  ;;  %v535_v15 = vld [vmem:[%s2338_s13 + $0x294] sm:$0xf] }
  0x4d   : > { %v537_v16 = vld [vmem:[%s2338_s13 + $0x2c0] sm:$0xf]  ;;  %534 = vst [vmem:[%s2342_s14 + $0x38] sm:$0xf] %v533_v14  ;;  %536 = vst [vmem:[%s2342_s14 + $0x3c] sm:$0xf] %v535_v15 }
  0x4e   : > { %538 = vst [vmem:[%s2342_s14 + $0x40] sm:$0xf] %v537_v16  ;;  %v539_v17 = vld [vmem:[%s2338_s13 + $0x2ec] sm:$0xf]  ;;  %v541_v18 = vld [vmem:[%s2338_s13 + $0x318] sm:$0xf] }
  0x4f   : > { %v543_v19 = vld [vmem:[%s2338_s13 + $0x344] sm:$0xf]  ;;  %540 = vst [vmem:[%s2342_s14 + $0x44] sm:$0xf] %v539_v17  ;;  %542 = vst [vmem:[%s2342_s14 + $0x48] sm:$0xf] %v541_v18 }
  0x50   : > { %544 = vst [vmem:[%s2342_s14 + $0x4c] sm:$0xf] %v543_v19  ;;  %v545_v20 = vld [vmem:[%s2338_s13 + $0x370] sm:$0xf]  ;;  %v547_v21 = vld [vmem:[%s2338_s13 + $0x39c] sm:$0xf] }
  0x51   : > { %v549_v22 = vld [vmem:[%s2338_s13 + $0x3c8] sm:$0xf]  ;;  %546 = vst [vmem:[%s2342_s14 + $0x50] sm:$0xf] %v545_v20  ;;  %548 = vst [vmem:[%s2342_s14 + $0x54] sm:$0xf] %v547_v21 }
  0x52   : > { %550 = vst [vmem:[%s2342_s14 + $0x58] sm:$0xf] %v549_v22  ;;  %v551_v23 = vld [vmem:[%s2338_s13 + $0x3f4] sm:$0xf]  ;;  %v553_v24 = vld [vmem:[%s2338_s13 + $0x420] sm:$0xf] }
  0x53   : > { %v555_v25 = vld [vmem:[%s2338_s13 + $0x44c] sm:$0xf]  ;;  %552 = vst [vmem:[%s2342_s14 + $0x5c] sm:$0xf] %v551_v23  ;;  %554 = vst [vmem:[%s2342_s14 + $0x60] sm:$0xf] %v553_v24 }
  0x54   : > { %556 = vst [vmem:[%s2342_s14 + $0x64] sm:$0xf] %v555_v25  ;;  %v557_v26 = vld [vmem:[%s2338_s13 + $0x478] sm:$0xf]  ;;  %v559_v27 = vld [vmem:[%s2338_s13 + $0x4a4] sm:$0xf] }
  0x55   : > { %v561_v28 = vld [vmem:[%s2338_s13 + $0x4d0] sm:$0xf]  ;;  %558 = vst [vmem:[%s2342_s14 + $0x68] sm:$0xf] %v557_v26  ;;  %560 = vst [vmem:[%s2342_s14 + $0x6c] sm:$0xf] %v559_v27 }
  0x56   : > { %562 = vst [vmem:[%s2342_s14 + $0x70] sm:$0xf] %v561_v28  ;;  %v563_v29 = vld [vmem:[%s2338_s13 + $0x4fc] sm:$0xf]  ;;  %v565_v30 = vld [vmem:[%s2338_s13 + $0x528] sm:$0xf] }
  0x57   : > { %v567_v31 = vld [vmem:[%s2338_s13 + $0x554] sm:$0xf]  ;;  %564 = vst [vmem:[%s2342_s14 + $0x74] sm:$0xf] %v563_v29  ;;  %566 = vst [vmem:[%s2342_s14 + $0x78] sm:$0xf] %v565_v30 }
  0x58   : > { %568 = vst [vmem:[%s2342_s14 + $0x7c] sm:$0xf] %v567_v31  ;;  %v569_v32 = vld [vmem:[%s2338_s13 + $0x580] sm:$0xf]  ;;  %v571_v33 = vld [vmem:[%s2338_s13 + $0x5ac] sm:$0xf] }
  0x59   : > { %v573_v34 = vld [vmem:[%s2338_s13 + $0x5d8] sm:$0xf]  ;;  %570 = vst [vmem:[%s2342_s14 + $0x80] sm:$0xf] %v569_v32  ;;  %572 = vst [vmem:[%s2342_s14 + $0x84] sm:$0xf] %v571_v33 }
  0x5a   : > { %574 = vst [vmem:[%s2342_s14 + $0x88] sm:$0xf] %v573_v34  ;;  %v575_v35 = vld [vmem:[%s2338_s13 + $0x604] sm:$0xf]  ;;  %v577_v36 = vld [vmem:[%s2338_s13 + $0x630] sm:$0xf] }
  0x5b   : > { %v579_v37 = vld [vmem:[%s2338_s13 + $0x65c] sm:$0xf]  ;;  %576 = vst [vmem:[%s2342_s14 + $0x8c] sm:$0xf] %v575_v35  ;;  %578 = vst [vmem:[%s2342_s14 + $0x90] sm:$0xf] %v577_v36 }
  0x5c   : > { %580 = vst [vmem:[%s2342_s14 + $0x94] sm:$0xf] %v579_v37  ;;  %v581_v38 = vld [vmem:[%s2338_s13 + $0x688] sm:$0xf]  ;;  %v583_v39 = vld [vmem:[%s2338_s13 + $0x6b4] sm:$0xf] }
  0x5d   : > { %v585_v40 = vld [vmem:[%s2338_s13 + $0x6e0] sm:$0xf]  ;;  %582 = vst [vmem:[%s2342_s14 + $0x98] sm:$0xf] %v581_v38  ;;  %584 = vst [vmem:[%s2342_s14 + $0x9c] sm:$0xf] %v583_v39 }
  0x5e   : > { %586 = vst [vmem:[%s2342_s14 + $0xa0] sm:$0xf] %v585_v40  ;;  %v587_v41 = vld [vmem:[%s2338_s13 + $0x70c] sm:$0xf]  ;;  %v589_v42 = vld [vmem:[%s2338_s13 + $0x738] sm:$0xf] }
  0x5f   : > { %v591_v43 = vld [vmem:[%s2338_s13 + $0x764] sm:$0xf]  ;;  %588 = vst [vmem:[%s2342_s14 + $0xa4] sm:$0xf] %v587_v41  ;;  %590 = vst [vmem:[%s2342_s14 + $0xa8] sm:$0xf] %v589_v42 }
  0x60   : > { %592 = vst [vmem:[%s2342_s14 + $0xac] sm:$0xf] %v591_v43  ;;  %v593_v44 = vld [vmem:[%s2338_s13 + $0x790] sm:$0xf]  ;;  %v595_v45 = vld [vmem:[%s2338_s13 + $0x7bc] sm:$0xf] }
  0x61   : > { %v597_v46 = vld [vmem:[%s2338_s13 + $0x7e8] sm:$0xf]  ;;  %594 = vst [vmem:[%s2342_s14 + $0xb0] sm:$0xf] %v593_v44  ;;  %596 = vst [vmem:[%s2342_s14 + $0xb4] sm:$0xf] %v595_v45 }
  0x62   : > { %598 = vst [vmem:[%s2342_s14 + $0xb8] sm:$0xf] %v597_v46  ;;  %v599_v47 = vld [vmem:[%s2338_s13 + $0x814] sm:$0xf]  ;;  %v601_v48 = vld [vmem:[%s2338_s13 + $0x840] sm:$0xf] }
  0x63   : > { %v603_v49 = vld [vmem:[%s2338_s13 + $0x86c] sm:$0xf]  ;;  %600 = vst [vmem:[%s2342_s14 + $0xbc] sm:$0xf] %v599_v47  ;;  %602 = vst [vmem:[%s2342_s14 + $0xc0] sm:$0xf] %v601_v48 }
  0x64   : > { %604 = vst [vmem:[%s2342_s14 + $0xc4] sm:$0xf] %v603_v49  ;;  %v605_v50 = vld [vmem:[%s2338_s13 + $0x898] sm:$0xf]  ;;  %v607_v51 = vld [vmem:[%s2338_s13 + $0x8c4] sm:$0xf] }
  0x65   : > { %v609_v52 = vld [vmem:[%s2338_s13 + $0x8f0] sm:$0xf]  ;;  %606 = vst [vmem:[%s2342_s14 + $0xc8] sm:$0xf] %v605_v50  ;;  %608 = vst [vmem:[%s2342_s14 + $0xcc] sm:$0xf] %v607_v51 }
  0x66   : > { %610 = vst [vmem:[%s2342_s14 + $0xd0] sm:$0xf] %v609_v52  ;;  %v611_v53 = vld [vmem:[%s2338_s13 + $0x91c] sm:$0xf]  ;;  %v613_v54 = vld [vmem:[%s2338_s13 + $0x948] sm:$0xf] }
  0x67   : > { %v615_v55 = vld [vmem:[%s2338_s13 + $0x974] sm:$0xf]  ;;  %612 = vst [vmem:[%s2342_s14 + $0xd4] sm:$0xf] %v611_v53  ;;  %614 = vst [vmem:[%s2342_s14 + $0xd8] sm:$0xf] %v613_v54 }
  0x68   : > { %616 = vst [vmem:[%s2342_s14 + $0xdc] sm:$0xf] %v615_v55  ;;  %v617_v56 = vld [vmem:[%s2338_s13 + $0x9a0] sm:$0xf]  ;;  %v619_v57 = vld [vmem:[%s2338_s13 + $0x9cc] sm:$0xf] }
  0x69   : > { %v621_v58 = vld [vmem:[%s2338_s13 + $0x9f8] sm:$0xf]  ;;  %618 = vst [vmem:[%s2342_s14 + $0xe0] sm:$0xf] %v617_v56  ;;  %620 = vst [vmem:[%s2342_s14 + $0xe4] sm:$0xf] %v619_v57 }
  0x6a   : > { %622 = vst [vmem:[%s2342_s14 + $0xe8] sm:$0xf] %v621_v58  ;;  %v623_v59 = vld [vmem:[%s2338_s13 + $0xa24] sm:$0xf]  ;;  %v625_v60 = vld [vmem:[%s2338_s13 + $0xa50] sm:$0xf] }
  0x6b   : > { %v627_v61 = vld [vmem:[%s2338_s13 + $0xa7c] sm:$0xf]  ;;  %624 = vst [vmem:[%s2342_s14 + $0xec] sm:$0xf] %v623_v59  ;;  %626 = vst [vmem:[%s2342_s14 + $0xf0] sm:$0xf] %v625_v60 }
  0x6c   : > { %628 = vst [vmem:[%s2342_s14 + $0xf4] sm:$0xf] %v627_v61  ;;  %v629_v62 = vld [vmem:[%s2338_s13 + $0xaa8] sm:$0xf]  ;;  %v631_v63 = vld [vmem:[%s2338_s13 + $0xad4] sm:$0xf] }
  0x6d   : > { %630 = vst [vmem:[%s2342_s14 + $0xf8] sm:$0xf] %v629_v62  ;;  %632 = vst [vmem:[%s2342_s14 + $0xfc] sm:$0xf] %v631_v63 }
  0x6e PF: > { %p1792_p8 = scmp.ge.s32.totalorder %s2118_s19, 1  ;;  %p782_p9 = scmp.lt.s32.totalorder %s2118_s19, 12 }
  0x70   : > { %p783_p10 = pnand %p1792_p8, %p782_p9 }
  0x71   : > { %s789_s21 = sand.u32 (!%p783_p10), 1, %s2102_s15   ;;  %p1796_p11 = scmp.ne.s32.totalorder (!%p783_p10), %s2110_s17, 0 }
  0x72   : > { %786 = sbr.rel (%p783_p10) target bundleno = 599 (0x257), region = 110  ;;  %s1793_s22 = sshll.u32 (!%p783_p10), %s789_s21, 8 }
  0x73   : > { %s1795_s23 = sshll.u32 (!%p783_p10), %s789_s21, 3  ;;  %s2473_s24 = scalar_lea.vmem (!%p783_p10), [#allocation3], %s1793_s22 }
  0x74   : > { %s2475_s27 = scalar_lea.vmem (!%p783_p10), [#allocation4], %s1793_s22  ;;  %s2477_s28 = scalar_lea.vmem (!%p783_p10), [#allocation5], %s1795_s23 }
  0x79   : > { %842 = sbr.rel (%p1796_p11) target bundleno = 299 (0x12b), region = 122  ;;  %v843_v0 = vld [vmem:[%s2603_s0] sm:$0xff] (!%p1796_p11)  ;;  %v844_v1 = vld [vmem:[%s2603_s0 + $0x8] sm:$0xff] (!%p1796_p11)  ;;  %v845_v2 = vld [vmem:[%s2603_s0 + $0x10] sm:$0xff] (!%p1796_p11)  ;;  %v886_v25 = vlaneseq (!%p1796_p11) }
  0x7a   : > { %v846_v3 = vld [vmem:[%s2603_s0 + $0x18] sm:$0xff] (!%p1796_p11)  ;;  %v851_v4 = vmul.f32 (!%p1796_p11), %v843_v0, %v843_v0  ;;  %v852_v5 = vmul.f32 (!%p1796_p11), %v844_v1, %v844_v1  ;;  %v853_v6 = vmul.f32 (!%p1796_p11), %v845_v2, %v845_v2  ;;  %v847_v7 = vld [vmem:[%s2603_s0 + $0x20] sm:$0xff] (!%p1796_p11)  ;;  %v848_v8 = vld [vmem:[%s2603_s0 + $0x28] sm:$0xff] (!%p1796_p11) }
  0x7b   : > { %v849_v9 = vld [vmem:[%s2603_s0 + $0x30] sm:$0xff] (!%p1796_p11)  ;;  %v850_v10 = vld [vmem:[%s2603_s0 + $0x38] sm:$0xff] (!%p1796_p11)  ;;  %v855_v11 = vmul.f32 (!%p1796_p11), %v847_v7, %v847_v7  ;;  %v856_v12 = vmul.f32 (!%p1796_p11), %v848_v8, %v848_v8  ;;  %v854_v13 = vmul.f32 (!%p1796_p11), %v846_v3, %v846_v3  ;;  %v887_v29 = vshrl.u32 (!%p1796_p11), %v886_v25, 7  ;;  %v884_v34 = vld [vmem:[%s2604_s1] sm:$0xf] (!%p1796_p11) }
  0x7c   : > { %v859_v14 = vadd.f32 (!%p1796_p11), %v852_v5, %v851_v4  ;;  %v857_v15 = vmul.f32 (!%p1796_p11), %v849_v9, %v849_v9  ;;  %v858_v18 = vmul.f32 (!%p1796_p11), %v850_v10, %v850_v10 }
  0x7d   : > { %v864_v16 = vadd.f32 (!%p1796_p11), %v856_v12, %v855_v11  ;;  %v888_v30 = vsub.s32 (!%p1796_p11), 0, %v887_v29  ;;  %v892_v31 = vsub.s32 (!%p1796_p11), 1, %v887_v29  ;;  %v896_v32 = vsub.s32 (!%p1796_p11), 2, %v887_v29 }
  0x7e   : > { %v860_v17 = vadd.f32 (!%p1796_p11), %v859_v14, %v853_v6  ;;  %v900_v33 = vsub.s32 (!%p1796_p11), 3, %v887_v29 }
  0x7f   : > { %v865_v19 = vadd.f32 (!%p1796_p11), %v864_v16, %v857_v15  ;;  %v889_v36 = vrot.slane (!%p1796_p11), %v884_v34, %v888_v30  ;;  %v893_v37 = vrot.slane (!%p1796_p11), %v884_v34, %v892_v31  ;;  %v897_v38 = vrot.slane (!%p1796_p11), %v884_v34, %v896_v32 }
  0x80   : > { %v861_v20 = vadd.f32 %v860_v17, %v854_v13  ;;  %v901_v39 = vrot.slane %v884_v34, %v900_v33 }
  0x81   : > { %v866_v21 = vadd.f32 %v865_v19, %v858_v18 }
  0x82   : > { %862 = vadd.xlane.f32.xlu0 %v861_v20 }
  0x86   : > { %867 = vadd.xlane.f32.xlu0 %v866_v21 }
 0x10f   : > { %v863_v22 = vpop.xlane.xlu0 %862 }
 0x110   : > { %v870_v23 = vmul.f32 0.001953125, %v863_v22 }
 0x112   : > { %v872_v24 = vadd.f32 1e-05, %v870_v23 }
 0x113   : > { %v868_v26 = vpop.xlane.xlu0 %867 }
 0x114   : > { %2004 = vrsqrt.f32 %v872_v24  ;;  %v871_v27 = vmul.f32 0.001953125, %v868_v26 }
 0x116   : > { %v873_v28 = vadd.f32 1e-05, %v871_v27 }
 0x118   : > { %2006 = vrsqrt.f32 %v873_v28 }
 0x11e   : > { %v2005_v35 = vpop.eup %2004 }
 0x11f   : > { %v876_v40 = vmul.f32 %v2005_v35, %v843_v0  ;;  %v877_v41 = vmul.f32 %v2005_v35, %v844_v1  ;;  %v878_v42 = vmul.f32 %v2005_v35, %v845_v2  ;;  %v879_v43 = vmul.f32 %v2005_v35, %v846_v3 }
 0x121   : > { %v906_v49 = vmul.f32 %v889_v36, %v876_v40  ;;  %v907_v50 = vmul.f32 %v893_v37, %v877_v41  ;;  %v908_v51 = vmul.f32 %v897_v38, %v878_v42  ;;  %v909_v52 = vmul.f32 %v901_v39, %v879_v43 }
 0x122   : > { %v2007_v44 = vpop.eup %2006 }
 0x123   : > { %v880_v45 = vmul.f32 %v2007_v44, %v847_v7  ;;  %v881_v46 = vmul.f32 %v2007_v44, %v848_v8  ;;  %v882_v47 = vmul.f32 %v2007_v44, %v849_v9  ;;  %v883_v48 = vmul.f32 %v2007_v44, %v850_v10 }
 0x125   : > { %v910_v53 = vmul.f32 %v889_v36, %v880_v45  ;;  %v911_v54 = vmul.f32 %v893_v37, %v881_v46  ;;  %v912_v55 = vmul.f32 %v897_v38, %v882_v47  ;;  %v913_v56 = vmul.f32 %v901_v39, %v883_v48 }
 0x127   : > { %v914_v57 = vpack.c.bf16 %v910_v53, %v906_v49  ;;  %v915_v58 = vpack.c.bf16 %v911_v54, %v907_v50  ;;  %v916_v59 = vpack.c.bf16 %v912_v55, %v908_v51  ;;  %v917_v60 = vpack.c.bf16 %v913_v56, %v909_v52 }
 0x129   : > { %918 = vst [vmem:[#allocation2] sm:$0xff] %v914_v57  ;;  %919 = vst [vmem:[#allocation2 + $0x8] sm:$0xff] %v915_v58 }
 0x12a   : > { %920 = vst [vmem:[#allocation2 + $0x10] sm:$0xff] %v916_v59  ;;  %921 = vst [vmem:[#allocation2 + $0x18] sm:$0xff] %v917_v60 }
 0x12b PF: > { %v2008_v61 = vld [vmem:[%s2473_s24 + $0x40] sm:$0xff]   ;;  %v2012_v1 = vld [vmem:[%s2473_s24 + $0x48] sm:$0xff]   ;;  %v2016_v5 = vld [vmem:[%s2473_s24 + $0x50] sm:$0xff]  }
 0x12c   : > { %v2009_v62 = vld [vmem:[%s2473_s24 + $0xc0] sm:$0xff]   ;;  %1876 = vmatprep.subr.bf16.mxu0 %v2008_v61  ;;  %v2013_v2 = vld [vmem:[%s2473_s24 + $0xc8] sm:$0xff]   ;;  %v2017_v6 = vld [vmem:[%s2473_s24 + $0xd0] sm:$0xff]  }
 0x12d   : > { %v2010_v63 = vld [vmem:[%s2473_s24] sm:$0xff]   ;;  %1898 = vmatprep.subr.bf16.mxu1 %v2009_v62  ;;  %v2014_v3 = vld [vmem:[%s2473_s24 + $0x8] sm:$0xff]   ;;  %v2018_v7 = vld [vmem:[%s2473_s24 + $0x10] sm:$0xff]  }
 0x12e   : > { %v2011_v0 = vld [vmem:[%s2473_s24 + $0x80] sm:$0xff]   ;;  %1877 = vmatpush3.bf16.msra.mxu0 %v2010_v63  ;;  %v2015_v4 = vld [vmem:[%s2473_s24 + $0x88] sm:$0xff]   ;;  %v2019_v8 = vld [vmem:[%s2473_s24 + $0x90] sm:$0xff]  }
 0x12f   : > { %1899 = vmatpush3.bf16.msra.mxu1 %v2011_v0  ;;  %1878 = vmatprep.subr.bf16.mxu0 %v2012_v1  ;;  %v2020_v9 = vld [vmem:[%s2473_s24 + $0x58] sm:$0xff]   ;;  %v2024_v13 = vld [vmem:[%s2473_s24 + $0x60] sm:$0xff]   ;;  %v2028_v17 = vld [vmem:[%s2473_s24 + $0x68] sm:$0xff]  }
 0x130   : > { %1900 = vmatprep.subr.bf16.mxu1 %v2013_v2  ;;  %v2021_v10 = vld [vmem:[%s2473_s24 + $0xd8] sm:$0xff]   ;;  %v2025_v14 = vld [vmem:[%s2473_s24 + $0xe0] sm:$0xff]   ;;  %v2029_v18 = vld [vmem:[%s2473_s24 + $0xe8] sm:$0xff]  }
 0x131   : > { %v2022_v11 = vld [vmem:[%s2473_s24 + $0x18] sm:$0xff]   ;;  %v2026_v15 = vld [vmem:[%s2473_s24 + $0x20] sm:$0xff]   ;;  %v2030_v19 = vld [vmem:[%s2473_s24 + $0x28] sm:$0xff]  }
 0x132   : > { %1879 = vmatpush3.bf16.msra.mxu0 %v2014_v3  ;;  %v2023_v12 = vld [vmem:[%s2473_s24 + $0x98] sm:$0xff]   ;;  %v2027_v16 = vld [vmem:[%s2473_s24 + $0xa0] sm:$0xff]   ;;  %v2031_v20 = vld [vmem:[%s2473_s24 + $0xa8] sm:$0xff]  }
 0x133   : > { %1901 = vmatpush3.bf16.msra.mxu1 %v2015_v4  ;;  %1880 = vmatprep.subr.bf16.mxu0 %v2016_v5  ;;  %v2032_v21 = vld [vmem:[%s2473_s24 + $0x70] sm:$0xff]   ;;  %v2036_v25 = vld [vmem:[%s2473_s24 + $0x78] sm:$0xff]   ;;  %v923_v29 = vld [vmem:[#allocation2 + $0x8] sm:$0xff] }
 0x134   : > { %1902 = vmatprep.subr.bf16.mxu1 %v2017_v6  ;;  %v2033_v22 = vld [vmem:[%s2473_s24 + $0xf0] sm:$0xff]   ;;  %v2037_v26 = vld [vmem:[%s2473_s24 + $0xf8] sm:$0xff]   ;;  %v2539_v31 = vld [vmem:[#allocation2] sm:$0xff]  ;;  %1214 = vmatprep.mubr.bf16.mxu0 %v923_v29 }
 0x135   : > { %v2034_v23 = vld [vmem:[%s2473_s24 + $0x30] sm:$0xff]   ;;  %v2038_v27 = vld [vmem:[%s2473_s24 + $0x38] sm:$0xff]   ;;  %v2040_v33 = vld [vmem:[%s2475_s27 + $0x40] sm:$0xff]  }
 0x136   : > { %1881 = vmatpush3.bf16.msra.mxu0 %v2018_v7  ;;  %v2035_v24 = vld [vmem:[%s2473_s24 + $0xb0] sm:$0xff]   ;;  %v2039_v28 = vld [vmem:[%s2473_s24 + $0xb8] sm:$0xff]   ;;  %v2041_v34 = vld [vmem:[%s2475_s27 + $0xc0] sm:$0xff]   ;;  %s1866_s24 = sshll.u32 (%p2184_p6), %s2110_s17, 2 }
 0x137   : > { %1903 = vmatpush3.bf16.msra.mxu1 %v2019_v8  ;;  %1882 = vmatprep.subr.bf16.mxu0 %v2020_v9  ;;  %v925_v30 = vld [vmem:[#allocation2 + $0x18] sm:$0xff]  ;;  %v2541_v32 = vld [vmem:[#allocation2 + $0x10] sm:$0xff]  ;;  %v2042_v35 = vld [vmem:[%s2475_s27] sm:$0xff]   ;;  %s1639_s6 = scalar_lea.vmem (%p2184_p6), %s2607_s4, %s1866_s24 }
 0x138   : > { %1904 = vmatprep.subr.bf16.mxu1 %v2021_v10  ;;  %1255 = vmatprep.mubr.bf16.mxu1 %v925_v30  ;;  %v2043_v36 = vld [vmem:[%s2475_s27 + $0x80] sm:$0xff]   ;;  %v2044_v37 = vld [vmem:[%s2475_s27 + $0x48] sm:$0xff]   ;;  %v2048_v41 = vld [vmem:[%s2475_s27 + $0x50] sm:$0xff]  }
 0x139   : > { %v2045_v38 = vld [vmem:[%s2475_s27 + $0xc8] sm:$0xff]   ;;  %v2049_v42 = vld [vmem:[%s2475_s27 + $0xd0] sm:$0xff]   ;;  %v2052_v45 = vld [vmem:[%s2475_s27 + $0x58] sm:$0xff]  }
 0x13a   : > { %1883 = vmatpush3.bf16.msra.mxu0 %v2022_v11  ;;  %v2046_v39 = vld [vmem:[%s2475_s27 + $0x8] sm:$0xff]   ;;  %v2050_v43 = vld [vmem:[%s2475_s27 + $0x10] sm:$0xff]   ;;  %v2053_v46 = vld [vmem:[%s2475_s27 + $0xd8] sm:$0xff]  }
 0x13b   : > { %1905 = vmatpush3.bf16.msra.mxu1 %v2023_v12  ;;  %1884 = vmatprep.subr.bf16.mxu0 %v2024_v13  ;;  %v2047_v40 = vld [vmem:[%s2475_s27 + $0x88] sm:$0xff]   ;;  %v2051_v44 = vld [vmem:[%s2475_s27 + $0x90] sm:$0xff]   ;;  %v2054_v47 = vld [vmem:[%s2475_s27 + $0x18] sm:$0xff]  }
 0x13c   : > { %1906 = vmatprep.subr.bf16.mxu1 %v2025_v14  ;;  %v2055_v48 = vld [vmem:[%s2475_s27 + $0x98] sm:$0xff]   ;;  %v2056_v49 = vld [vmem:[%s2475_s27 + $0x60] sm:$0xff]   ;;  %v2060_v53 = vld [vmem:[%s2475_s27 + $0x68] sm:$0xff]  }
 0x13d   : > { %v2057_v50 = vld [vmem:[%s2475_s27 + $0xe0] sm:$0xff]   ;;  %v2061_v54 = vld [vmem:[%s2475_s27 + $0xe8] sm:$0xff]   ;;  %v2064_v57 = vld [vmem:[%s2475_s27 + $0x70] sm:$0xff]  }
 0x13e   : > { %1885 = vmatpush3.bf16.msra.mxu0 %v2026_v15  ;;  %v2058_v51 = vld [vmem:[%s2475_s27 + $0x20] sm:$0xff]   ;;  %v2062_v55 = vld [vmem:[%s2475_s27 + $0x28] sm:$0xff]   ;;  %v2065_v58 = vld [vmem:[%s2475_s27 + $0xf0] sm:$0xff]  }
 0x13f   : > { %1907 = vmatpush3.bf16.msra.mxu1 %v2027_v16  ;;  %1886 = vmatprep.subr.bf16.mxu0 %v2028_v17  ;;  %v2059_v52 = vld [vmem:[%s2475_s27 + $0xa0] sm:$0xff]   ;;  %v2063_v56 = vld [vmem:[%s2475_s27 + $0xa8] sm:$0xff]   ;;  %v2066_v59 = vld [vmem:[%s2475_s27 + $0x30] sm:$0xff]  }
 0x140   : > { %1908 = vmatprep.subr.bf16.mxu1 %v2029_v18  ;;  %v2067_v60 = vld [vmem:[%s2475_s27 + $0xb0] sm:$0xff]   ;;  %v2068_v61 = vld [vmem:[%s2475_s27 + $0x78] sm:$0xff]  }
 0x141   : > { %v2069_v62 = vld [vmem:[%s2475_s27 + $0xf8] sm:$0xff]  }
 0x142   : > { %1887 = vmatpush3.bf16.msra.mxu0 %v2030_v19  ;;  %v2070_v63 = vld [vmem:[%s2475_s27 + $0x38] sm:$0xff]  }
 0x143   : > { %1909 = vmatpush3.bf16.msra.mxu1 %v2031_v20  ;;  %1888 = vmatprep.subr.bf16.mxu0 %v2032_v21  ;;  %v2071_v0 = vld [vmem:[%s2475_s27 + $0xb8] sm:$0xff]  }
 0x144   : > { %1910 = vmatprep.subr.bf16.mxu1 %v2033_v22 }
 0x146   : > { %1889 = vmatpush3.bf16.msra.mxu0 %v2034_v23 }
 0x147   : > { %1911 = vmatpush3.bf16.msra.mxu1 %v2035_v24  ;;  %1890 = vmatprep.subr.bf16.mxu0 %v2036_v25 }
 0x148   : > { %1912 = vmatprep.subr.bf16.mxu1 %v2037_v26 }
 0x14a   : > { %1891 = vmatpush3.bf16.msra.mxu0 %v2038_v27 }
 0x14b   : > { %1913 = vmatpush3.bf16.msra.mxu1 %v2039_v28  ;;  %1920 = vmatprep.subr.bf16.mxu0 %v2040_v33 }
 0x14c   : > { %1942 = vmatprep.subr.bf16.mxu1 %v2041_v34 }
 0x14d   : > { %1215 = vmatmul.mubr.bf16.vlgmr.msra.gmra.mrb[0].mxu0 %v2539_v31 }
 0x14e   : > { %1256 = vmatmul.mubr.bf16.vlgmr.msra.gmra.mrb[0].mxu1 %v2541_v32  ;;  %1552 = vmatprep.mubr.bf16.mxu0 %v923_v29 }
 0x14f   : > { %1921 = vmatpush3.bf16.msra.mxu0 %v2042_v35  ;;  %1593 = vmatprep.mubr.bf16.mxu1 %v925_v30 }
 0x150   : > { %1943 = vmatpush3.bf16.msra.mxu1 %v2043_v36  ;;  %1922 = vmatprep.subr.bf16.mxu0 %v2044_v37 }
 0x151   : > { %1944 = vmatprep.subr.bf16.mxu1 %v2045_v38 }
 0x153   : > { %1923 = vmatpush3.bf16.msra.mxu0 %v2046_v39 }
 0x154   : > { %1945 = vmatpush3.bf16.msra.mxu1 %v2047_v40  ;;  %1924 = vmatprep.subr.bf16.mxu0 %v2048_v41 }
 0x155   : > { %1946 = vmatprep.subr.bf16.mxu1 %v2049_v42 }
 0x157   : > { %1925 = vmatpush3.bf16.msra.mxu0 %v2050_v43 }
 0x158   : > { %1947 = vmatpush3.bf16.msra.mxu1 %v2051_v44  ;;  %1926 = vmatprep.subr.bf16.mxu0 %v2052_v45 }
 0x159   : > { %1948 = vmatprep.subr.bf16.mxu1 %v2053_v46 }
 0x15b   : > { %1927 = vmatpush3.bf16.msra.mxu0 %v2054_v47 }
 0x15c   : > { %1949 = vmatpush3.bf16.msra.mxu1 %v2055_v48  ;;  %1928 = vmatprep.subr.bf16.mxu0 %v2056_v49 }
 0x15d   : > { %1950 = vmatprep.subr.bf16.mxu1 %v2057_v50 }
 0x15f   : > { %1929 = vmatpush3.bf16.msra.mxu0 %v2058_v51 }
 0x160   : > { %1951 = vmatpush3.bf16.msra.mxu1 %v2059_v52  ;;  %1930 = vmatprep.subr.bf16.mxu0 %v2060_v53 }
 0x161   : > { %1952 = vmatprep.subr.bf16.mxu1 %v2061_v54 }
 0x163   : > { %1931 = vmatpush3.bf16.msra.mxu0 %v2062_v55 }
 0x164   : > { %1953 = vmatpush3.bf16.msra.mxu1 %v2063_v56  ;;  %1932 = vmatprep.subr.bf16.mxu0 %v2064_v57 }
 0x165   : > { %1954 = vmatprep.subr.bf16.mxu1 %v2065_v58 }
 0x167   : > { %1933 = vmatpush3.bf16.msra.mxu0 %v2066_v59 }
 0x168   : > { %1955 = vmatpush3.bf16.msra.mxu1 %v2067_v60  ;;  %1934 = vmatprep.subr.bf16.mxu0 %v2068_v61 }
 0x169   : > { %1956 = vmatprep.subr.bf16.mxu1 %v2069_v62 }
 0x16b   : > { %1935 = vmatpush3.bf16.msra.mxu0 %v2070_v63 }
 0x16c   : > { %1957 = vmatpush3.bf16.msra.mxu1 %v2071_v0 }
 0x16e   : > { %1553 = vmatmul.mubr.bf16.vlgmr.msra.gmra.mrb[4].mxu0 %v2539_v31 }
 0x16f   : > { %1594 = vmatmul.mubr.bf16.vlgmr.msra.gmra.mrb[4].mxu1 %v2541_v32 }
 0x220   : > { %v1892_v1 = vpop.f32.mrb[0].mxu0 }
 0x221   : > { %v1914_v2 = vpop.f32.mrb[0].mxu1  ;;  %v1893_v3 = vpop.f32.mrb[1].mxu0 }
 0x222   : > { %v1894_v4 = vadd.f32 %v1893_v3, %v1892_v1  ;;  %v1915_v5 = vpop.f32.mrb[1].mxu1  ;;  %v1895_v6 = vpop.f32.mrb[2].mxu0 }
 0x223   : > { %v1916_v7 = vadd.f32 %v1915_v5, %v1914_v2  ;;  %v1917_v8 = vpop.f32.mrb[2].mxu1  ;;  %v1896_v9 = vpop.f32.mrb[3].mxu0 }
 0x224   : > { %v1897_v10 = vadd.f32 %v1896_v9, %v1895_v6  ;;  %v1918_v11 = vpop.f32.mrb[3].mxu1 }
 0x225   : > { %v1258_v12 = vadd.f32 %v1916_v7, %v1894_v4  ;;  %v1919_v13 = vadd.f32 %v1918_v11, %v1917_v8 }
 0x227   : > { %v1861_v14 = vmul.f32 -1.442695, %v1258_v12  ;;  %v1261_v15 = vadd.f32 %v1919_v13, %v1897_v10 }
 0x229   : > { %2072 = vpow2.f32 %v1861_v14  ;;  %v1862_v16 = vmul.f32 -1.442695, %v1261_v15 }
 0x22b   : > { %2074 = vpow2.f32 %v1862_v16 }
 0x233   : > { %v2073_v17 = vpop.eup %2072 }
 0x234   : > { %v1608_v19 = vadd.f32 1.0, %v2073_v17 }
 0x235   : > { %v2075_v18 = vpop.eup %2074 }
 0x236   : > { %v1609_v20 = vadd.f32 1.0, %v2075_v18  ;;  %2076 = vrcp.f32 %v1608_v19 }
 0x238   : > { %2078 = vrcp.f32 %v1609_v20 }
 0x240   : > { %v2077_v24 = vpop.eup %2076 }
 0x241   : > { %v1936_v21 = vpop.f32.mrb[4].mxu0  ;;  %v1614_v34 = vmul.f32 %v2077_v24, %v1258_v12 }
 0x242   : > { %v1958_v22 = vpop.f32.mrb[4].mxu1  ;;  %v1937_v23 = vpop.f32.mrb[5].mxu0 }
 0x243   : > { %v1938_v25 = vadd.f32 %v1937_v23, %v1936_v21  ;;  %v1959_v26 = vpop.f32.mrb[5].mxu1  ;;  %v1939_v27 = vpop.f32.mrb[6].mxu0 }
 0x244   : > { %v1960_v28 = vadd.f32 %v1959_v26, %v1958_v22  ;;  %v1961_v29 = vpop.f32.mrb[6].mxu1  ;;  %v1940_v30 = vpop.f32.mrb[7].mxu0 }
 0x245   : > { %v2079_v31 = vpop.eup %2078  ;;  %v1941_v32 = vadd.f32 %v1940_v30, %v1939_v27  ;;  %v1962_v33 = vpop.f32.mrb[7].mxu1 }
 0x246   : > { %v1596_v35 = vadd.f32 %v1960_v28, %v1938_v25  ;;  %v1963_v36 = vadd.f32 %v1962_v33, %v1961_v29  ;;  %v1615_v37 = vmul.f32 %v2079_v31, %v1261_v15 }
 0x248   : > { %v1616_v38 = vmul.f32 %v1614_v34, %v1596_v35  ;;  %v1599_v39 = vadd.f32 %v1963_v36, %v1941_v32  ;;  %1634 = sbr.rel (!%p2184_p6) target bundleno = 599 (0x257), region = 126 }
 0x24a   : > { %v1617_v40 = vmul.f32 %v1615_v37, %v1599_v39 }
 0x24c   : > { %v1874_v41 = vpack.c.bf16 %v1617_v40, %v1616_v38 }
 0x24e   : > { %1875 = vst [vmem:[%s2477_s28] sm:$0xff] %v1874_v41  }
 0x255   : > { %v1655_v42 = vld [vmem:[%s2477_s28] sm:$0xf]  ;;  %v1657_v43 = vld [vmem:[%s2477_s28 + $0x4] sm:$0xf] }
 0x256   : > { %1656 = vst [vmem:[%s1639_s6] sm:$0xf] %v1655_v42  ;;  %1658 = vst [vmem:[%s1639_s6 + $0x2c] sm:$0xf] %v1657_v43 }
 0x257 PF: > { %s14_s19 = sadd.s32 1, %s2118_s19   ;;  %s2610_s15 = smov %s2106_s16 }
 0x258   : > { %p11_p12 = scmp.ge.s32.totalorder %s14_s19, 13   ;;  %s2611_s16 = smov %s2189_s26 }
 0x259   : > { %s2612_s17 = smov %s2114_s18  ;;  %s2613_s18 = smov %s2615_s20 }
 0x25a   :  { %13 = sbr.rel (!%p11_p12) target bundleno = 3 (0x3), region = 209 }

// kernel: transformer_forward.17
= control target key start
LH: loop header
LB: loop body
LE: loop exit
PB: predicated region body
PF: predicated region fallthrough
CT: control target
= control target key end

     0   :  { %s1027_s12 = smov 0   ;;  %s1029_s13 = smov 0   ;;  %s1261_s0 = inlined_call_operand.vmem [shape: bf16[16,1408], index: 0, kind: input, shape index: {}]   ;;  %s1262_s1 = inlined_call_operand.vmem [shape: bf16[1408,512], index: 1, kind: input, shape index: {}]   ;;  %s1263_s2 = inlined_call_operand.vmem [shape: f32[16,512], index: 2, kind: input, shape index: {}]   ;;  %s1264_s3 = inlined_call_operand.vmem [shape: f32[16,512], index: 3, kind: output, shape index: {}]  }
   0x1   :  { %s1031_s14 = smov 0   ;;  %s1033_s15 = smov 0  }
   0x2   :  { %s1035_s16 = smov 0   ;;  %s1037_s17 = smov 0  }
   0x3   :  { %s1039_s18 = smov 0   ;;  %s1041_s19 = smov 0  }
   0x4   :  { %s1043_s20 = smov 0   ;;  %s1045_s21 = smov 0  }
   0x5   :  { %s1047_s22 = smov 0  }
   0x6 LB: > { %1268 = sst [smem:[#allocation7_spill]] %s983_s17  ;;  %s756_s23 = sadd.s32 4294967295, %s1003_s22   ;;  %s1003_s22 = sphi %s1047_s22, %s13_s22   ;;  %s999_s21 = sphi %s1045_s21, %s1287_s21   ;;  %s995_s20 = sphi %s1043_s20, %s1286_s20   ;;  %s991_s19 = sphi %s1041_s19, %s1285_s19   ;;  %s987_s18 = sphi %s1039_s18, %s1284_s18   ;;  %s983_s17 = sphi %s1037_s17, %s1277_s17   ;;  %s979_s16 = sphi %s1035_s16, %s1276_s16   ;;  %s975_s15 = sphi %s1033_s15, %s1283_s15   ;;  %s971_s14 = sphi %s1031_s14, %s1282_s14   ;;  %s967_s13 = sphi %s1029_s13, %s1281_s13   ;;  %s963_s12 = sphi %s1027_s12, %s1280_s12  }
   0x7   : > { %s25_s24 = sadd.s32 1, %s995_s20  ;;  %s28_s25 = sadd.s32 1, %s999_s21 }
   0x8   : > { %p26_p0 = scmp.ge.s32.totalorder %s25_s24, 11  ;;  %s41_s26 = sadd.s32 1, %s983_s17 }
   0x9   : > { %p48_p1 = scmp.ne.s32.totalorder %s983_s17, %s979_s16  ;;  %p49_p2 = scmp.eq.s32.totalorder %s1003_s22, 0 }
   0xa   : > { %s1289_s24 = smov (%p26_p0, %s25_s24), 0  ;;  %s1291_s25 = smov (!%p26_p0, %s28_s25), %s999_s21 }
   0xb   : > { %1269 = sst [smem:[#allocation8_spill]] %s1289_s24  ;;  %s37_s27 = ssub.s32 %s995_s20, %s1289_s24 }
   0xc   : > { %p30_p3 = scmp.ge.s32.totalorder %s1291_s25, 2  ;;  %p39_p4 = scmp.eq.s32.totalorder %s37_s27, 0 }
   0xd   : > { %p1096_p5 = por %p49_p2, %p48_p1  ;;  %s69_s29 = sadd.s32 1, %s975_s15 }
   0xe   : > { %s1293_s25 = smov (%p30_p3, %s1291_s25), 0  ;;  %p76_p6 = scmp.ne.s32.totalorder %s975_s15, %s971_s14 }
   0xf   : > { %1271 = sst [smem:[#allocation9_spill]] %s1293_s25  ;;  %s65_s4 = ssub.s32 %s999_s21, %s1293_s25 }
  0x10   : > { %s1104_s30 = scalar_select %p39_p4, %s983_s17, %s41_s26  }
  0x11   : > { %s66_s5 = sor.u32 %s65_s4, %s37_s27  ;;  %p95_p7 = scmp.eq.s32.totalorder %s65_s4, 0 }
  0x12   : > { %1272 = sst [smem:[#allocation10_spill]] %s1104_s30  ;;  %p67_p8 = scmp.eq.s32.totalorder %s66_s5, 0 }
  0x13   : > { %p1112_p9 = por %p76_p6, %p49_p2  ;;  %s97_s7 = sadd.s32 1, %s967_s13 }
  0x14   : > { %p104_p10 = scmp.ne.s32.totalorder %s967_s13, %s963_s12  ;;  %p136_p12 = scmp.eq.s32.totalorder %s756_s23, 21 }
  0x15   : > { %s1120_s8 = scalar_select %p67_p8, %s975_s15, %s69_s29  }
  0x16   : > { %s1123_s9 = scalar_select %p95_p7, %s967_s13, %s97_s7  }
  0x17   : > { %p1127_p11 = por %p104_p10, %p49_p2  ;;  %p1131_p13 = por %p136_p12, %p104_p10 }
  0x18   : > { %p759_p0 = scmp.ge.s32.totalorder %s1003_s22, 22 }
  0x1a   : > { %158 = sbr.rel (%p759_p0) target bundleno = 62 (0x3e), region = 16 }
  0x21   : > { %161 = sbr.rel (!%p1096_p5) target bundleno = 40 (0x28), region = 20  ;;  %s163_s26 = sand.u32 (%p1096_p5), 1, %s983_s17  }
  0x22   : > { %s761_s27 = sshll.u32 (%p1096_p5), %s995_s20, 2  ;;  %s760_s29 = sshll.u32 (%p1096_p5), %s163_s26, 3 }
  0x23   : > { %s170_s7 = scalar_lea.vmem (%p1096_p5), %s1261_s0, %s761_s27  ;;  %s165_s23 = scalar_lea.vmem (%p1096_p5), [#allocation3], %s760_s29 }
  0x24   : > { %v186_v0 = vld [vmem:[%s170_s7] sm:$0xf] (%p1096_p5)  ;;  %v188_v1 = vld [vmem:[%s170_s7 + $0x2c] sm:$0xf] (%p1096_p5) }
  0x25   : > { %187 = vst [vmem:[%s165_s23] sm:$0xf] (%p1096_p5), %v186_v0  ;;  %189 = vst [vmem:[%s165_s23 + $0x4] sm:$0xf] (%p1096_p5), %v188_v1 }
  0x28 PF: > { %216 = sbr.rel (!%p1112_p9) target bundleno = 55 (0x37), region = 61  ;;  %s218_s28 = sand.u32 (%p1112_p9), 1, %s975_s15  }
  0x29   : > { %s764_s25 = sshll.u32 (%p1112_p9), %s999_s21, 1  ;;  %s762_s24 = sshll.u32 (%p1112_p9), %s218_s28, 7 }
  0x2a   : > { %s799_s26 = sshll.u32 (%p1112_p9), %s995_s20, 6  ;;  %s220_s6 = scalar_lea.vmem (%p1112_p9), [#allocation4], %s762_s24 }
  0x2b   : > { %s224_s30 = sadd.s32 (%p1112_p9), %s799_s26, %s764_s25 }
  0x2c   : > { %s766_s17 = sshll.u32 (%p1112_p9), %s224_s30, 2 }
  0x2d   : > { %s1151_s5 = scalar_lea.vmem (%p1112_p9), %s1262_s1, %s766_s17 }
  0x2e   : > { %v284_v2 = vld [vmem:[%s1151_s5] sm:$0xff] (%p1112_p9)  ;;  %v286_v3 = vld [vmem:[%s1151_s5 + $0x10] sm:$0xff] (%p1112_p9) }
  0x2f   : > { %v288_v4 = vld [vmem:[%s1151_s5 + $0x20] sm:$0xff]  ;;  %285 = vst [vmem:[%s220_s6] sm:$0xff] %v284_v2  ;;  %287 = vst [vmem:[%s220_s6 + $0x8] sm:$0xff] %v286_v3  ;;  %v290_v5 = vld [vmem:[%s1151_s5 + $0x30] sm:$0xff] }
  0x30   : > { %289 = vst [vmem:[%s220_s6 + $0x10] sm:$0xff] %v288_v4  ;;  %v292_v6 = vld [vmem:[%s1151_s5 + $0x40] sm:$0xff]  ;;  %v294_v7 = vld [vmem:[%s1151_s5 + $0x50] sm:$0xff]  ;;  %291 = vst [vmem:[%s220_s6 + $0x18] sm:$0xff] %v290_v5 }
  0x31   : > { %293 = vst [vmem:[%s220_s6 + $0x20] sm:$0xff] %v292_v6  ;;  %295 = vst [vmem:[%s220_s6 + $0x28] sm:$0xff] %v294_v7  ;;  %v296_v8 = vld [vmem:[%s1151_s5 + $0x60] sm:$0xff]  ;;  %v298_v9 = vld [vmem:[%s1151_s5 + $0x70] sm:$0xff] }
  0x32   : > { %v300_v10 = vld [vmem:[%s1151_s5 + $0x80] sm:$0xff]  ;;  %297 = vst [vmem:[%s220_s6 + $0x30] sm:$0xff] %v296_v8  ;;  %299 = vst [vmem:[%s220_s6 + $0x38] sm:$0xff] %v298_v9  ;;  %v302_v11 = vld [vmem:[%s1151_s5 + $0x90] sm:$0xff] }
  0x33   : > { %301 = vst [vmem:[%s220_s6 + $0x40] sm:$0xff] %v300_v10  ;;  %v304_v12 = vld [vmem:[%s1151_s5 + $0xa0] sm:$0xff]  ;;  %v306_v13 = vld [vmem:[%s1151_s5 + $0xb0] sm:$0xff]  ;;  %303 = vst [vmem:[%s220_s6 + $0x48] sm:$0xff] %v302_v11 }
  0x34   : > { %305 = vst [vmem:[%s220_s6 + $0x50] sm:$0xff] %v304_v12  ;;  %307 = vst [vmem:[%s220_s6 + $0x58] sm:$0xff] %v306_v13  ;;  %v308_v14 = vld [vmem:[%s1151_s5 + $0xc0] sm:$0xff]  ;;  %v310_v15 = vld [vmem:[%s1151_s5 + $0xd0] sm:$0xff] }
  0x35   : > { %v312_v16 = vld [vmem:[%s1151_s5 + $0xe0] sm:$0xff]  ;;  %309 = vst [vmem:[%s220_s6 + $0x60] sm:$0xff] %v308_v14  ;;  %311 = vst [vmem:[%s220_s6 + $0x68] sm:$0xff] %v310_v15  ;;  %v314_v17 = vld [vmem:[%s1151_s5 + $0xf0] sm:$0xff] }
  0x36   : > { %313 = vst [vmem:[%s220_s6 + $0x70] sm:$0xff] %v312_v16  ;;  %315 = vst [vmem:[%s220_s6 + $0x78] sm:$0xff] %v314_v17 }
  0x37 PF: > { %321 = sbr.rel (!%p1127_p11) target bundleno = 62 (0x3e), region = 99  ;;  %s323_s17 = sand.u32 (%p1127_p11), 1, %s967_s13  }
  0x38   : > { %s800_s24 = sshll.u32 (%p1127_p11), %s999_s21, 4  ;;  %s767_s25 = sshll.u32 (%p1127_p11), %s323_s17, 5 }
  0x39   : > { %s331_s7 = scalar_lea.vmem (%p1127_p11), %s1263_s2, %s800_s24  ;;  %s325_s23 = scalar_lea.vmem (%p1127_p11), [#allocation5], %s767_s25 }
  0x3a   : > { %v344_v18 = vld [vmem:[%s331_s7] sm:$0xff] (%p1127_p11)  ;;  %v346_v19 = vld [vmem:[%s331_s7 + $0x8] sm:$0xff] (%p1127_p11) }
  0x3b   : > { %v348_v20 = vld [vmem:[%s331_s7 + $0x20] sm:$0xff] (%p1127_p11)  ;;  %345 = vst [vmem:[%s325_s23] sm:$0xff] (%p1127_p11), %v344_v18  ;;  %347 = vst [vmem:[%s325_s23 + $0x8] sm:$0xff] (%p1127_p11), %v346_v19  ;;  %v350_v21 = vld [vmem:[%s331_s7 + $0x28] sm:$0xff] (%p1127_p11) }
  0x3c   : > { %349 = vst [vmem:[%s325_s23 + $0x10] sm:$0xff] (%p1127_p11), %v348_v20  ;;  %351 = vst [vmem:[%s325_s23 + $0x18] sm:$0xff] (%p1127_p11), %v350_v21 }
  0x3e PF: > { %p770_p1 = scmp.ge.s32.totalorder %s1003_s22, 1  ;;  %p356_p2 = scmp.lt.s32.totalorder %s1003_s22, 23 }
  0x40   : > { %p357_p3 = pnand %p770_p1, %p356_p2 }
  0x41   : > { %s363_s10 = sand.u32 (!%p357_p3), 1, %s979_s16   ;;  %s370_s28 = sand.u32 (!%p357_p3), 1, %s971_s14  }
  0x42   : > { %360 = sbr.rel (%p357_p3) target bundleno = 349 (0x15d), region = 122  ;;  %s1180_s26 = sshll.u32 (!%p357_p3), %s363_s10, 3 }
  0x43   : > { %s772_s4 = sshll.u32 (!%p357_p3), %s370_s28, 7  ;;  %s377_s27 = sand.u32 (!%p357_p3), 1, %s963_s12  }
  0x44   : > { %s773_s5 = sshll.u32 (!%p357_p3), %s377_s27, 5  ;;  %s365_s6 = scalar_lea.vmem (!%p357_p3), [#allocation3], %s1180_s26 }
  0x45   : > { %s1184_s17 = scalar_lea.vmem (!%p357_p3), [#allocation4], %s772_s4  ;;  %s1186_s24 = scalar_lea.vmem (!%p357_p3), [#allocation5], %s773_s5 }
  0x46   : > { %s1188_s25 = scalar_lea.vmem (!%p357_p3), [#allocation6], %s773_s5  ;;  %p775_p4 = scmp.ne.s32.totalorder (!%p357_p3), %s987_s18, 0 }
  0x49   : > { %418 = sbr.rel (%p775_p4) target bundleno = 80 (0x50), region = 138  ;;  %v1005_v22 = vmov (!%p775_p4), 0.0  }
  0x4a   : > { %419 = vst [vmem:[#allocation2] sm:$0xff] (!%p775_p4), %v1005_v22  ;;  %420 = vst [vmem:[#allocation2 + $0x8] sm:$0xff] (!%p775_p4), %v1005_v22 }
  0x4b   : > { %421 = vst [vmem:[#allocation2 + $0x10] sm:$0xff] (!%p775_p4), %v1005_v22  ;;  %422 = vst [vmem:[#allocation2 + $0x18] sm:$0xff] (!%p775_p4), %v1005_v22 }
  0x50 PF: > { %v892_v23 = vld [vmem:[%s1184_s17 + $0x4] ss:$8 sps:$4 sm:$0xff]   ;;  %v894_v24 = vld [vmem:[%s1184_s17] ss:$8 sps:$4 sm:$0xff]   ;;  %v1006_v25 = vmov 0   ;;  %v916_v40 = vld [vmem:[%s365_s6] sm:$0xff]  }
  0x51   : > { %563 = vmatprep.mubr.bf16.mxu0 %v1006_v25  ;;  %531 = vmatprep.subr.bf16.mxu0 %v892_v23  ;;  %v895_v26 = vld [vmem:[%s1184_s17 + $0x14] ss:$8 sps:$4 sm:$0xff]   ;;  %v897_v27 = vld [vmem:[%s1184_s17 + $0x10] ss:$8 sps:$4 sm:$0xff]   ;;  %v898_v28 = vld [vmem:[%s1184_s17 + $0x24] ss:$8 sps:$4 sm:$0xff]  }
  0x52   : > { %532 = vmatpush1.bf16.msra.mxu0 %v894_v24  ;;  %v900_v29 = vld [vmem:[%s1184_s17 + $0x20] ss:$8 sps:$4 sm:$0xff]   ;;  %v901_v30 = vld [vmem:[%s1184_s17 + $0x34] ss:$8 sps:$4 sm:$0xff]   ;;  %v903_v31 = vld [vmem:[%s1184_s17 + $0x30] ss:$8 sps:$4 sm:$0xff]  }
  0x53   : > { %533 = vmatprep.subr.bf16.mxu0 %v895_v26  ;;  %v904_v32 = vld [vmem:[%s1184_s17 + $0x44] ss:$8 sps:$4 sm:$0xff]   ;;  %v906_v33 = vld [vmem:[%s1184_s17 + $0x40] ss:$8 sps:$4 sm:$0xff]   ;;  %v907_v34 = vld [vmem:[%s1184_s17 + $0x54] ss:$8 sps:$4 sm:$0xff]  }
  0x54   : > { %v909_v35 = vld [vmem:[%s1184_s17 + $0x50] ss:$8 sps:$4 sm:$0xff]   ;;  %v910_v36 = vld [vmem:[%s1184_s17 + $0x64] ss:$8 sps:$4 sm:$0xff]   ;;  %v912_v37 = vld [vmem:[%s1184_s17 + $0x60] ss:$8 sps:$4 sm:$0xff]  }
  0x55   : > { %v913_v38 = vld [vmem:[%s1184_s17 + $0x74] ss:$8 sps:$4 sm:$0xff]   ;;  %v915_v39 = vld [vmem:[%s1184_s17 + $0x70] ss:$8 sps:$4 sm:$0xff]   ;;  %v425_v44 = vld [vmem:[#allocation2 + $0x10] sm:$0xff]  ;;  %p793_p5 = scmp.ne.s32.totalorder %s987_s18, 10 }
  0x56   : > { %534 = vmatpush1.bf16.msra.mxu0 %v897_v27  ;;  %v423_v41 = vld [vmem:[#allocation2] sm:$0xff]  ;;  %v424_v42 = vld [vmem:[#allocation2 + $0x8] sm:$0xff]  ;;  %v426_v47 = vld [vmem:[#allocation2 + $0x18] sm:$0xff] }
  0x57   : > { %535 = vmatprep.subr.bf16.mxu0 %v898_v28  ;;  %v590_v54 = vld [vmem:[%s1186_s24] sm:$0xff] (!%p793_p5)  ;;  %v591_v57 = vld [vmem:[%s1186_s24 + $0x8] sm:$0xff] (!%p793_p5)  ;;  %v592_v59 = vld [vmem:[%s1186_s24 + $0x10] sm:$0xff] (!%p793_p5) }
  0x58   : > { %v593_v63 = vld [vmem:[%s1186_s24 + $0x18] sm:$0xff] (!%p793_p5) }
  0x5a   : > { %536 = vmatpush1.bf16.msra.mxu0 %v900_v29 }
  0x5b   : > { %537 = vmatprep.subr.bf16.mxu0 %v901_v30 }
  0x5e   : > { %538 = vmatpush1.bf16.msra.mxu0 %v903_v31 }
  0x5f   : > { %539 = vmatprep.subr.bf16.mxu0 %v904_v32 }
  0x62   : > { %540 = vmatpush1.bf16.msra.mxu0 %v906_v33 }
  0x63   : > { %541 = vmatprep.subr.bf16.mxu0 %v907_v34 }
  0x66   : > { %542 = vmatpush1.bf16.msra.mxu0 %v909_v35 }
  0x67   : > { %543 = vmatprep.subr.bf16.mxu0 %v910_v36 }
  0x6a   : > { %544 = vmatpush1.bf16.msra.mxu0 %v912_v37 }
  0x6b   : > { %545 = vmatprep.subr.bf16.mxu0 %v913_v38 }
  0x6e   : > { %546 = vmatpush1.bf16.msra.mxu0 %v915_v39 }
  0x71   : > { %564 = vmatmul.mubr.bf16.vlgmr.msra.gmra.mrb[0].mxu0 %v916_v40 }
 0x144   : > { %v565_v43 = vpop.f32.mrb[0].mxu0  ;;  %585 = sbr.rel (%p793_p5) target bundleno = 341 (0x155), region = 142 }
 0x145   : > { %v574_v45 = vadd.f32 %v565_v43, %v423_v41  ;;  %v567_v46 = vpop.f32.mrb[1].mxu0 }
 0x146   : > { %v575_v48 = vadd.f32 %v567_v46, %v424_v42  ;;  %v569_v49 = vpop.f32.mrb[2].mxu0 }
 0x147   : > { %578 = vst [vmem:[#allocation2] sm:$0xff] %v574_v45  ;;  %v576_v50 = vadd.f32 %v569_v49, %v425_v44  ;;  %v571_v51 = vpop.f32.mrb[3].mxu0 }
 0x148   : > { %579 = vst [vmem:[#allocation2 + $0x8] sm:$0xff] %v575_v48  ;;  %v577_v52 = vadd.f32 %v571_v51, %v426_v47 }
 0x149   : > { %580 = vst [vmem:[#allocation2 + $0x10] sm:$0xff] %v576_v50 }
 0x14a   : > { %581 = vst [vmem:[#allocation2 + $0x18] sm:$0xff] %v577_v52 }
 0x14e   : > { %v586_v53 = vld [vmem:[#allocation2] sm:$0xff] }
 0x14f   : > { %v587_v55 = vld [vmem:[#allocation2 + $0x8] sm:$0xff]  ;;  %v594_v56 = vadd.f32 %v590_v54, %v586_v53 }
 0x150   : > { %v588_v58 = vld [vmem:[#allocation2 + $0x10] sm:$0xff]  ;;  %v595_v60 = vadd.f32 %v591_v57, %v587_v55 }
 0x151   : > { %v596_v61 = vadd.f32 %v592_v59, %v588_v58  ;;  %v589_v62 = vld [vmem:[#allocation2 + $0x18] sm:$0xff]  ;;  %598 = vst [vmem:[%s1188_s25] sm:$0xff] %v594_v56 }
 0x152   : > { %v597_v0 = vadd.f32 %v593_v63, %v589_v62  ;;  %599 = vst [vmem:[%s1188_s25 + $0x8] sm:$0xff] %v595_v60 }
 0x153   : > { %600 = vst [vmem:[%s1188_s25 + $0x10] sm:$0xff] %v596_v61 }
 0x154   : > { %601 = vst [vmem:[%s1188_s25 + $0x18] sm:$0xff] %v597_v0 }
 0x155 PF: > { %608 = sbr.rel (!%p1131_p13) target bundleno = 349 (0x15d), region = 146  ;;  %s801_s12 = sshll.u32 (%p1131_p13), %s991_s19, 4 }
 0x156   : > { %s614_s18 = scalar_lea.vmem (%p1131_p13), %s1264_s3, %s801_s12 }
 0x158   : > { %v627_v1 = vld [vmem:[%s1188_s25] sm:$0xff] (%p1131_p13) }
 0x159   : > { %v629_v2 = vld [vmem:[%s1188_s25 + $0x8] sm:$0xff] (%p1131_p13)  ;;  %628 = vst [vmem:[%s614_s18] sm:$0xff] (%p1131_p13), %v627_v1 }
 0x15a   : > { %v631_v3 = vld [vmem:[%s1188_s25 + $0x10] sm:$0xff] (%p1131_p13)  ;;  %630 = vst [vmem:[%s614_s18 + $0x8] sm:$0xff] (%p1131_p13), %v629_v2 }
 0x15b   : > { %v633_v4 = vld [vmem:[%s1188_s25 + $0x18] sm:$0xff] (%p1131_p13)  ;;  %632 = vst [vmem:[%s614_s18 + $0x20] sm:$0xff] (%p1131_p13), %v631_v3 }
 0x15c   : > { %634 = vst [vmem:[%s614_s18 + $0x28] sm:$0xff] %v633_v4 }
 0x15d PF: > { %s13_s22 = sadd.s32 1, %s1003_s22   ;;  %s1276_s16 = sld [smem:[#allocation7_spill]] }
 0x15e   : > { %p10_p6 = scmp.ge.s32.totalorder %s13_s22, 24   ;;  %s1277_s17 = sld [smem:[#allocation10_spill]] }
 0x15f   : > { %s1278_s11 = sld [smem:[#allocation8_spill]]  ;;  %s1279_s30 = sld [smem:[#allocation9_spill]] }
 0x160   : > { %s1280_s12 = smov %s967_s13  ;;  %s1281_s13 = smov %s1123_s9 }
 0x161   : > { %s1282_s14 = smov %s975_s15  ;;  %s1283_s15 = smov %s1120_s8 }
 0x162   : > { %s1284_s18 = smov %s995_s20  ;;  %s1285_s19 = smov %s999_s21 }
 0x163   :  { %12 = sbr.rel (!%p10_p6) target bundleno = 6 (0x6), region = 216 }
 0x165   : > { %s1286_s20 = smov %s1278_s11  ;;  %s1287_s21 = smov %s1279_s30 }

// kernel: transformer_forward.23
= control target key start
LH: loop header
LB: loop body
LE: loop exit
PB: predicated region body
PF: predicated region fallthrough
CT: control target
= control target key end

     0   :  { %8 = vsyncpa [#allocation5], 0  ;;  %s1651_s0 = inlined_call_operand.vmem [shape: f32[16,512], index: 0, kind: input, shape index: {}]   ;;  %s1652_s1 = inlined_call_operand.vmem [shape: f32[1,512], index: 1, kind: input, shape index: {}]   ;;  %s1653_s2 = inlined_call_operand.vmem [shape: bf16[512,256], index: 2, kind: input, shape index: {}]   ;;  %s1654_s3 = inlined_call_operand.hbm [shape: f32[16,256], index: 3, kind: output, shape index: {}]  }
   0x1   :  { %10 = vsyncpa [#allocation5 + $0x1], 0  ;;  %s1328_s12 = smov 0   ;;  %s1330_s13 = smov 0  }
   0x2   :  { %s1332_s14 = smov 0   ;;  %s1334_s15 = smov 0  }
   0x3   :  { %s1336_s16 = smov 0   ;;  %s1338_s17 = smov 0  }
   0x4 LB: > { %s1039_s18 = sadd.s32 4294967295, %s1302_s17   ;;  %s1040_s19 = sadd.s32 4294967294, %s1302_s17   ;;  %s1302_s17 = sphi %s1338_s17, %s16_s17   ;;  %s1298_s16 = sphi %s1336_s16, %s1661_s16   ;;  %s1294_s15 = sphi %s1334_s15, %s1660_s15   ;;  %s1290_s14 = sphi %s1332_s14, %s1659_s14   ;;  %s1286_s13 = sphi %s1330_s13, %s1658_s13   ;;  %s1282_s12 = sphi %s1328_s12, %s1657_s12  }
   0x5   : > { %s25_s20 = sadd.s32 1, %s1298_s16  ;;  %s82_s21 = sadd.s32 1, %s1290_s14 }
   0x6   : > { %p26_p0 = scmp.ge.s32.totalorder %s25_s20, 2  ;;  %p89_p1 = scmp.ne.s32.totalorder %s1290_s14, %s1286_s13 }
   0x7   : > { %p90_p2 = scmp.eq.s32.totalorder %s1302_s17, 0  ;;  %p121_p3 = scmp.eq.s32.totalorder %s1039_s18, 1 }
   0x8   : > { %s1663_s20 = smov (%p26_p0, %s25_s20), 0  ;;  %p126_p6 = scmp.ne.s32.totalorder %s1286_s13, %s1282_s12 }
   0x9   : > { %p91_p4 = por %p90_p2, %p89_p1  ;;  %p1367_p5 = por %p121_p3, %p89_p1 }
   0xa   : > { %s79_s23 = ssub.s32 %s1298_s16, %s1663_s20  ;;  %p127_p8 = scmp.eq.s32.totalorder %s1040_s19, 1 }
   0xb   : > { %p80_p7 = scmp.eq.s32.totalorder %s79_s23, 0  ;;  %p1043_p10 = scmp.ge.s32.totalorder %s1302_s17, 2 }
   0xc   : > { %p1378_p9 = por %p127_p8, %p126_p6 }
   0xd   : > { %s1376_s24 = scalar_select %p80_p7, %s1290_s14, %s82_s21  }
   0xe   : > { %156 = sbr.rel (%p1043_p10) target bundleno = 67 (0x43), region = 24 }
  0x15   : > { %159 = sbr.rel (!%p91_p4) target bundleno = 67 (0x43), region = 28  ;;  %s161_s26 = sand.u32 (%p91_p4), 1, %s1290_s14  }
  0x16   : > { %s1045_s27 = sshll.u32 (%p91_p4), %s1298_s16, 2  ;;  %s1044_s28 = sshll.u32 (%p91_p4), %s161_s26, 8 }
  0x17   : > { %s1390_s4 = scalar_lea.vmem (%p91_p4), %s1653_s2, %s1045_s27  ;;  %s1394_s5 = scalar_lea.vmem (%p91_p4), [#allocation3], %s1044_s28 }
  0x18   : > { %v181_v0 = vld [vmem:[%s1390_s4] sm:$0xf] (%p91_p4)  ;;  %v183_v1 = vld [vmem:[%s1390_s4 + $0x8] sm:$0xf] (%p91_p4)  ;;  %v185_v2 = vld [vmem:[%s1390_s4 + $0x10] sm:$0xf] (%p91_p4) }
  0x19   : > { %182 = vst [vmem:[%s1394_s5] sm:$0xf] (%p91_p4), %v181_v0  ;;  %184 = vst [vmem:[%s1394_s5 + $0x4] sm:$0xf] (%p91_p4), %v183_v1  ;;  %v187_v3 = vld [vmem:[%s1390_s4 + $0x18] sm:$0xf] (%p91_p4) }
  0x1a   : > { %v189_v4 = vld [vmem:[%s1390_s4 + $0x20] sm:$0xf] (%p91_p4)  ;;  %186 = vst [vmem:[%s1394_s5 + $0x8] sm:$0xf] (%p91_p4), %v185_v2  ;;  %188 = vst [vmem:[%s1394_s5 + $0xc] sm:$0xf] (%p91_p4), %v187_v3 }
  0x1b   : > { %190 = vst [vmem:[%s1394_s5 + $0x10] sm:$0xf] (%p91_p4), %v189_v4  ;;  %v191_v5 = vld [vmem:[%s1390_s4 + $0x28] sm:$0xf] (%p91_p4)  ;;  %v193_v6 = vld [vmem:[%s1390_s4 + $0x30] sm:$0xf] (%p91_p4) }
  0x1c   : > { %v195_v7 = vld [vmem:[%s1390_s4 + $0x38] sm:$0xf]  ;;  %192 = vst [vmem:[%s1394_s5 + $0x14] sm:$0xf] %v191_v5  ;;  %194 = vst [vmem:[%s1394_s5 + $0x18] sm:$0xf] %v193_v6 }
  0x1d   : > { %196 = vst [vmem:[%s1394_s5 + $0x1c] sm:$0xf] %v195_v7  ;;  %v197_v8 = vld [vmem:[%s1390_s4 + $0x40] sm:$0xf]  ;;  %v199_v9 = vld [vmem:[%s1390_s4 + $0x48] sm:$0xf] }
  0x1e   : > { %v201_v10 = vld [vmem:[%s1390_s4 + $0x50] sm:$0xf]  ;;  %198 = vst [vmem:[%s1394_s5 + $0x20] sm:$0xf] %v197_v8  ;;  %200 = vst [vmem:[%s1394_s5 + $0x24] sm:$0xf] %v199_v9 }
  0x1f   : > { %202 = vst [vmem:[%s1394_s5 + $0x28] sm:$0xf] %v201_v10  ;;  %v203_v11 = vld [vmem:[%s1390_s4 + $0x58] sm:$0xf]  ;;  %v205_v12 = vld [vmem:[%s1390_s4 + $0x60] sm:$0xf] }
  0x20   : > { %v207_v13 = vld [vmem:[%s1390_s4 + $0x68] sm:$0xf]  ;;  %204 = vst [vmem:[%s1394_s5 + $0x2c] sm:$0xf] %v203_v11  ;;  %206 = vst [vmem:[%s1394_s5 + $0x30] sm:$0xf] %v205_v12 }
  0x21   : > { %208 = vst [vmem:[%s1394_s5 + $0x34] sm:$0xf] %v207_v13  ;;  %v209_v14 = vld [vmem:[%s1390_s4 + $0x70] sm:$0xf]  ;;  %v211_v15 = vld [vmem:[%s1390_s4 + $0x78] sm:$0xf] }
  0x22   : > { %v213_v16 = vld [vmem:[%s1390_s4 + $0x80] sm:$0xf]  ;;  %210 = vst [vmem:[%s1394_s5 + $0x38] sm:$0xf] %v209_v14  ;;  %212 = vst [vmem:[%s1394_s5 + $0x3c] sm:$0xf] %v211_v15 }
  0x23   : > { %214 = vst [vmem:[%s1394_s5 + $0x40] sm:$0xf] %v213_v16  ;;  %v215_v17 = vld [vmem:[%s1390_s4 + $0x88] sm:$0xf]  ;;  %v217_v18 = vld [vmem:[%s1390_s4 + $0x90] sm:$0xf] }
  0x24   : > { %v219_v19 = vld [vmem:[%s1390_s4 + $0x98] sm:$0xf]  ;;  %216 = vst [vmem:[%s1394_s5 + $0x44] sm:$0xf] %v215_v17  ;;  %218 = vst [vmem:[%s1394_s5 + $0x48] sm:$0xf] %v217_v18 }
  0x25   : > { %220 = vst [vmem:[%s1394_s5 + $0x4c] sm:$0xf] %v219_v19  ;;  %v221_v20 = vld [vmem:[%s1390_s4 + $0xa0] sm:$0xf]  ;;  %v223_v21 = vld [vmem:[%s1390_s4 + $0xa8] sm:$0xf] }
  0x26   : > { %v225_v22 = vld [vmem:[%s1390_s4 + $0xb0] sm:$0xf]  ;;  %222 = vst [vmem:[%s1394_s5 + $0x50] sm:$0xf] %v221_v20  ;;  %224 = vst [vmem:[%s1394_s5 + $0x54] sm:$0xf] %v223_v21 }
  0x27   : > { %226 = vst [vmem:[%s1394_s5 + $0x58] sm:$0xf] %v225_v22  ;;  %v227_v23 = vld [vmem:[%s1390_s4 + $0xb8] sm:$0xf]  ;;  %v229_v24 = vld [vmem:[%s1390_s4 + $0xc0] sm:$0xf] }
  0x28   : > { %v231_v25 = vld [vmem:[%s1390_s4 + $0xc8] sm:$0xf]  ;;  %228 = vst [vmem:[%s1394_s5 + $0x5c] sm:$0xf] %v227_v23  ;;  %230 = vst [vmem:[%s1394_s5 + $0x60] sm:$0xf] %v229_v24 }
  0x29   : > { %232 = vst [vmem:[%s1394_s5 + $0x64] sm:$0xf] %v231_v25  ;;  %v233_v26 = vld [vmem:[%s1390_s4 + $0xd0] sm:$0xf]  ;;  %v235_v27 = vld [vmem:[%s1390_s4 + $0xd8] sm:$0xf] }
  0x2a   : > { %v237_v28 = vld [vmem:[%s1390_s4 + $0xe0] sm:$0xf]  ;;  %234 = vst [vmem:[%s1394_s5 + $0x68] sm:$0xf] %v233_v26  ;;  %236 = vst [vmem:[%s1394_s5 + $0x6c] sm:$0xf] %v235_v27 }
  0x2b   : > { %238 = vst [vmem:[%s1394_s5 + $0x70] sm:$0xf] %v237_v28  ;;  %v239_v29 = vld [vmem:[%s1390_s4 + $0xe8] sm:$0xf]  ;;  %v241_v30 = vld [vmem:[%s1390_s4 + $0xf0] sm:$0xf] }
  0x2c   : > { %v243_v31 = vld [vmem:[%s1390_s4 + $0xf8] sm:$0xf]  ;;  %240 = vst [vmem:[%s1394_s5 + $0x74] sm:$0xf] %v239_v29  ;;  %242 = vst [vmem:[%s1394_s5 + $0x78] sm:$0xf] %v241_v30 }
  0x2d   : > { %244 = vst [vmem:[%s1394_s5 + $0x7c] sm:$0xf] %v243_v31  ;;  %v245_v32 = vld [vmem:[%s1390_s4 + $0x100] sm:$0xf]  ;;  %v247_v33 = vld [vmem:[%s1390_s4 + $0x108] sm:$0xf] }
  0x2e   : > { %v249_v34 = vld [vmem:[%s1390_s4 + $0x110] sm:$0xf]  ;;  %246 = vst [vmem:[%s1394_s5 + $0x80] sm:$0xf] %v245_v32  ;;  %248 = vst [vmem:[%s1394_s5 + $0x84] sm:$0xf] %v247_v33 }
  0x2f   : > { %250 = vst [vmem:[%s1394_s5 + $0x88] sm:$0xf] %v249_v34  ;;  %v251_v35 = vld [vmem:[%s1390_s4 + $0x118] sm:$0xf]  ;;  %v253_v36 = vld [vmem:[%s1390_s4 + $0x120] sm:$0xf] }
  0x30   : > { %v255_v37 = vld [vmem:[%s1390_s4 + $0x128] sm:$0xf]  ;;  %252 = vst [vmem:[%s1394_s5 + $0x8c] sm:$0xf] %v251_v35  ;;  %254 = vst [vmem:[%s1394_s5 + $0x90] sm:$0xf] %v253_v36 }
  0x31   : > { %256 = vst [vmem:[%s1394_s5 + $0x94] sm:$0xf] %v255_v37  ;;  %v257_v38 = vld [vmem:[%s1390_s4 + $0x130] sm:$0xf]  ;;  %v259_v39 = vld [vmem:[%s1390_s4 + $0x138] sm:$0xf] }
  0x32   : > { %v261_v40 = vld [vmem:[%s1390_s4 + $0x140] sm:$0xf]  ;;  %258 = vst [vmem:[%s1394_s5 + $0x98] sm:$0xf] %v257_v38  ;;  %260 = vst [vmem:[%s1394_s5 + $0x9c] sm:$0xf] %v259_v39 }
  0x33   : > { %262 = vst [vmem:[%s1394_s5 + $0xa0] sm:$0xf] %v261_v40  ;;  %v263_v41 = vld [vmem:[%s1390_s4 + $0x148] sm:$0xf]  ;;  %v265_v42 = vld [vmem:[%s1390_s4 + $0x150] sm:$0xf] }
  0x34   : > { %v267_v43 = vld [vmem:[%s1390_s4 + $0x158] sm:$0xf]  ;;  %264 = vst [vmem:[%s1394_s5 + $0xa4] sm:$0xf] %v263_v41  ;;  %266 = vst [vmem:[%s1394_s5 + $0xa8] sm:$0xf] %v265_v42 }
  0x35   : > { %268 = vst [vmem:[%s1394_s5 + $0xac] sm:$0xf] %v267_v43  ;;  %v269_v44 = vld [vmem:[%s1390_s4 + $0x160] sm:$0xf]  ;;  %v271_v45 = vld [vmem:[%s1390_s4 + $0x168] sm:$0xf] }
  0x36   : > { %v273_v46 = vld [vmem:[%s1390_s4 + $0x170] sm:$0xf]  ;;  %270 = vst [vmem:[%s1394_s5 + $0xb0] sm:$0xf] %v269_v44  ;;  %272 = vst [vmem:[%s1394_s5 + $0xb4] sm:$0xf] %v271_v45 }
  0x37   : > { %274 = vst [vmem:[%s1394_s5 + $0xb8] sm:$0xf] %v273_v46  ;;  %v275_v47 = vld [vmem:[%s1390_s4 + $0x178] sm:$0xf]  ;;  %v277_v48 = vld [vmem:[%s1390_s4 + $0x180] sm:$0xf] }
  0x38   : > { %v279_v49 = vld [vmem:[%s1390_s4 + $0x188] sm:$0xf]  ;;  %276 = vst [vmem:[%s1394_s5 + $0xbc] sm:$0xf] %v275_v47  ;;  %278 = vst [vmem:[%s1394_s5 + $0xc0] sm:$0xf] %v277_v48 }
  0x39   : > { %280 = vst [vmem:[%s1394_s5 + $0xc4] sm:$0xf] %v279_v49  ;;  %v281_v50 = vld [vmem:[%s1390_s4 + $0x190] sm:$0xf]  ;;  %v283_v51 = vld [vmem:[%s1390_s4 + $0x198] sm:$0xf] }
  0x3a   : > { %v285_v52 = vld [vmem:[%s1390_s4 + $0x1a0] sm:$0xf]  ;;  %282 = vst [vmem:[%s1394_s5 + $0xc8] sm:$0xf] %v281_v50  ;;  %284 = vst [vmem:[%s1394_s5 + $0xcc] sm:$0xf] %v283_v51 }
  0x3b   : > { %286 = vst [vmem:[%s1394_s5 + $0xd0] sm:$0xf] %v285_v52  ;;  %v287_v53 = vld [vmem:[%s1390_s4 + $0x1a8] sm:$0xf]  ;;  %v289_v54 = vld [vmem:[%s1390_s4 + $0x1b0] sm:$0xf] }
  0x3c   : > { %v291_v55 = vld [vmem:[%s1390_s4 + $0x1b8] sm:$0xf]  ;;  %288 = vst [vmem:[%s1394_s5 + $0xd4] sm:$0xf] %v287_v53  ;;  %290 = vst [vmem:[%s1394_s5 + $0xd8] sm:$0xf] %v289_v54 }
  0x3d   : > { %292 = vst [vmem:[%s1394_s5 + $0xdc] sm:$0xf] %v291_v55  ;;  %v293_v56 = vld [vmem:[%s1390_s4 + $0x1c0] sm:$0xf]  ;;  %v295_v57 = vld [vmem:[%s1390_s4 + $0x1c8] sm:$0xf] }
  0x3e   : > { %v297_v58 = vld [vmem:[%s1390_s4 + $0x1d0] sm:$0xf]  ;;  %294 = vst [vmem:[%s1394_s5 + $0xe0] sm:$0xf] %v293_v56  ;;  %296 = vst [vmem:[%s1394_s5 + $0xe4] sm:$0xf] %v295_v57 }
  0x3f   : > { %298 = vst [vmem:[%s1394_s5 + $0xe8] sm:$0xf] %v297_v58  ;;  %v299_v59 = vld [vmem:[%s1390_s4 + $0x1d8] sm:$0xf]  ;;  %v301_v60 = vld [vmem:[%s1390_s4 + $0x1e0] sm:$0xf] }
  0x40   : > { %v303_v61 = vld [vmem:[%s1390_s4 + $0x1e8] sm:$0xf]  ;;  %300 = vst [vmem:[%s1394_s5 + $0xec] sm:$0xf] %v299_v59  ;;  %302 = vst [vmem:[%s1394_s5 + $0xf0] sm:$0xf] %v301_v60 }
  0x41   : > { %304 = vst [vmem:[%s1394_s5 + $0xf4] sm:$0xf] %v303_v61  ;;  %v305_v62 = vld [vmem:[%s1390_s4 + $0x1f0] sm:$0xf]  ;;  %v307_v63 = vld [vmem:[%s1390_s4 + $0x1f8] sm:$0xf] }
  0x42   : > { %306 = vst [vmem:[%s1394_s5 + $0xf8] sm:$0xf] %v305_v62  ;;  %308 = vst [vmem:[%s1394_s5 + $0xfc] sm:$0xf] %v307_v63 }
  0x43 PF: > { %p1046_p11 = scmp.ge.s32.totalorder %s1302_s17, 1  ;;  %p458_p12 = scmp.lt.s32.totalorder %s1302_s17, 3 }
  0x45   : > { %p459_p13 = pnand %p1046_p11, %p458_p12 }
  0x46   : > { %s1525_s6 = sand.u32 (!%p459_p13), 1, %s1286_s13   ;;  %p1049_p0 = scmp.ne.s32.totalorder (!%p459_p13), %s1294_s15, 0 }
  0x47   : > { %462 = sbr.rel (%p459_p13) target bundleno = 526 (0x20e), region = 69  ;;  %s1047_s7 = sshll.u32 (!%p459_p13), %s1525_s6, 8 }
  0x48   : > { %s1048_s8 = sshll.u32 (!%p459_p13), %s1525_s6, 4  ;;  %s1529_s9 = scalar_lea.vmem (!%p459_p13), [#allocation3], %s1047_s7 }
  0x49   : > { %s1531_s10 = scalar_lea.vmem (!%p459_p13), [#allocation4], %s1048_s8 }
  0x4e   : > { %506 = sbr.rel (%p1049_p0) target bundleno = 256 (0x100), region = 77  ;;  %v507_v0 = vld [vmem:[%s1651_s0] sm:$0xff] (!%p1049_p0)  ;;  %v508_v1 = vld [vmem:[%s1651_s0 + $0x8] sm:$0xff] (!%p1049_p0)  ;;  %v509_v2 = vld [vmem:[%s1651_s0 + $0x10] sm:$0xff] (!%p1049_p0)  ;;  %v550_v25 = vlaneseq (!%p1049_p0) }
  0x4f   : > { %v510_v3 = vld [vmem:[%s1651_s0 + $0x18] sm:$0xff] (!%p1049_p0)  ;;  %v515_v4 = vmul.f32 (!%p1049_p0), %v507_v0, %v507_v0  ;;  %v516_v5 = vmul.f32 (!%p1049_p0), %v508_v1, %v508_v1  ;;  %v517_v6 = vmul.f32 (!%p1049_p0), %v509_v2, %v509_v2  ;;  %v511_v7 = vld [vmem:[%s1651_s0 + $0x20] sm:$0xff] (!%p1049_p0)  ;;  %v512_v8 = vld [vmem:[%s1651_s0 + $0x28] sm:$0xff] (!%p1049_p0) }
  0x50   : > { %v513_v9 = vld [vmem:[%s1651_s0 + $0x30] sm:$0xff] (!%p1049_p0)  ;;  %v514_v10 = vld [vmem:[%s1651_s0 + $0x38] sm:$0xff] (!%p1049_p0)  ;;  %v519_v11 = vmul.f32 (!%p1049_p0), %v511_v7, %v511_v7  ;;  %v520_v12 = vmul.f32 (!%p1049_p0), %v512_v8, %v512_v8  ;;  %v518_v13 = vmul.f32 (!%p1049_p0), %v510_v3, %v510_v3  ;;  %v551_v29 = vshrl.u32 (!%p1049_p0), %v550_v25, 7  ;;  %v548_v34 = vld [vmem:[%s1652_s1] sm:$0xf] (!%p1049_p0) }
  0x51   : > { %v523_v14 = vadd.f32 (!%p1049_p0), %v516_v5, %v515_v4  ;;  %v521_v15 = vmul.f32 (!%p1049_p0), %v513_v9, %v513_v9  ;;  %v522_v18 = vmul.f32 (!%p1049_p0), %v514_v10, %v514_v10 }
  0x52   : > { %v528_v16 = vadd.f32 (!%p1049_p0), %v520_v12, %v519_v11  ;;  %v552_v30 = vsub.s32 (!%p1049_p0), 0, %v551_v29  ;;  %v556_v31 = vsub.s32 (!%p1049_p0), 1, %v551_v29  ;;  %v560_v32 = vsub.s32 (!%p1049_p0), 2, %v551_v29 }
  0x53   : > { %v524_v17 = vadd.f32 (!%p1049_p0), %v523_v14, %v517_v6  ;;  %v564_v33 = vsub.s32 (!%p1049_p0), 3, %v551_v29 }
  0x54   : > { %v529_v19 = vadd.f32 (!%p1049_p0), %v528_v16, %v521_v15  ;;  %v553_v36 = vrot.slane (!%p1049_p0), %v548_v34, %v552_v30  ;;  %v557_v37 = vrot.slane (!%p1049_p0), %v548_v34, %v556_v31  ;;  %v561_v38 = vrot.slane (!%p1049_p0), %v548_v34, %v560_v32 }
  0x55   : > { %v525_v20 = vadd.f32 %v524_v17, %v518_v13  ;;  %v565_v39 = vrot.slane %v548_v34, %v564_v33 }
  0x56   : > { %v530_v21 = vadd.f32 %v529_v19, %v522_v18 }
  0x57   : > { %526 = vadd.xlane.f32.xlu0 %v525_v20 }
  0x5b   : > { %531 = vadd.xlane.f32.xlu0 %v530_v21 }
  0xe4   : > { %v527_v22 = vpop.xlane.xlu0 %526 }
  0xe5   : > { %v534_v23 = vmul.f32 0.001953125, %v527_v22 }
  0xe7   : > { %v536_v24 = vadd.f32 1e-05, %v534_v23 }
  0xe8   : > { %v532_v26 = vpop.xlane.xlu0 %531 }
  0xe9   : > { %1188 = vrsqrt.f32 %v536_v24  ;;  %v535_v27 = vmul.f32 0.001953125, %v532_v26 }
  0xeb   : > { %v537_v28 = vadd.f32 1e-05, %v535_v27 }
  0xed   : > { %1190 = vrsqrt.f32 %v537_v28 }
  0xf3   : > { %v1189_v35 = vpop.eup %1188 }
  0xf4   : > { %v540_v40 = vmul.f32 %v1189_v35, %v507_v0  ;;  %v541_v41 = vmul.f32 %v1189_v35, %v508_v1  ;;  %v542_v42 = vmul.f32 %v1189_v35, %v509_v2  ;;  %v543_v43 = vmul.f32 %v1189_v35, %v510_v3 }
  0xf6   : > { %v570_v49 = vmul.f32 %v553_v36, %v540_v40  ;;  %v571_v50 = vmul.f32 %v557_v37, %v541_v41  ;;  %v572_v51 = vmul.f32 %v561_v38, %v542_v42  ;;  %v573_v52 = vmul.f32 %v565_v39, %v543_v43 }
  0xf7   : > { %v1191_v44 = vpop.eup %1190 }
  0xf8   : > { %v544_v45 = vmul.f32 %v1191_v44, %v511_v7  ;;  %v545_v46 = vmul.f32 %v1191_v44, %v512_v8  ;;  %v546_v47 = vmul.f32 %v1191_v44, %v513_v9  ;;  %v547_v48 = vmul.f32 %v1191_v44, %v514_v10 }
  0xfa   : > { %v574_v53 = vmul.f32 %v553_v36, %v544_v45  ;;  %v575_v54 = vmul.f32 %v557_v37, %v545_v46  ;;  %v576_v55 = vmul.f32 %v561_v38, %v546_v47  ;;  %v577_v56 = vmul.f32 %v565_v39, %v547_v48 }
  0xfc   : > { %v578_v57 = vpack.c.bf16 %v574_v53, %v570_v49  ;;  %v579_v58 = vpack.c.bf16 %v575_v54, %v571_v50  ;;  %v580_v59 = vpack.c.bf16 %v576_v55, %v572_v51  ;;  %v581_v60 = vpack.c.bf16 %v577_v56, %v573_v52 }
  0xfe   : > { %582 = vst [vmem:[#allocation2] sm:$0xff] %v578_v57  ;;  %583 = vst [vmem:[#allocation2 + $0x8] sm:$0xff] %v579_v58 }
  0xff   : > { %584 = vst [vmem:[#allocation2 + $0x10] sm:$0xff] %v580_v59  ;;  %585 = vst [vmem:[#allocation2 + $0x18] sm:$0xff] %v581_v60 }
 0x100 PF: > { %v1192_v61 = vld [vmem:[%s1529_s9 + $0x40] sm:$0xff]   ;;  %v1196_v1 = vld [vmem:[%s1529_s9 + $0x48] sm:$0xff]   ;;  %v1200_v5 = vld [vmem:[%s1529_s9 + $0x50] sm:$0xff]   ;;  %s946_s23 = sshll.u32 %s1531_s10, 4  ;;  %s1304_s30 = smov [#allocation4]   ;;  %s1600_s23 = int_to_ptr.vmem [resolvable:$true] %s946_s23 }
 0x101   : > { %v1193_v62 = vld [vmem:[%s1529_s9 + $0xc0] sm:$0xff]   ;;  %1086 = vmatprep.subr.bf16.mxu0 %v1192_v61  ;;  %v1197_v2 = vld [vmem:[%s1529_s9 + $0xc8] sm:$0xff]   ;;  %v1201_v6 = vld [vmem:[%s1529_s9 + $0xd0] sm:$0xff]   ;;  %s1224_s29 = scalar_lea.vmem %s1600_s23, 256  ;;  %s1228_s4 = sshll.u32 %s1304_s30, 4  ;;  %s1229_s4 = int_to_ptr.vmem [resolvable:$false] %s1228_s4 }
 0x102   : > { %v1194_v63 = vld [vmem:[%s1529_s9] sm:$0xff]   ;;  %1108 = vmatprep.subr.bf16.mxu1 %v1193_v62  ;;  %v1198_v3 = vld [vmem:[%s1529_s9 + $0x8] sm:$0xff]   ;;  %v1202_v7 = vld [vmem:[%s1529_s9 + $0x10] sm:$0xff]   ;;  %p1225_p1 = scmp.ne.s32.totalorder %s1600_s23, %s1224_s29  ;;  %s1230_s5 = scalar_lea.vmem %s1229_s4, 512 }
 0x103   : > { %v1195_v0 = vld [vmem:[%s1529_s9 + $0x80] sm:$0xff]   ;;  %1087 = vmatpush3.bf16.msra.mxu0 %v1194_v63  ;;  %v1199_v4 = vld [vmem:[%s1529_s9 + $0x88] sm:$0xff]   ;;  %v1203_v8 = vld [vmem:[%s1529_s9 + $0x90] sm:$0xff]   ;;  %p1231_p4 = scmp.lt.s32.totalorder %s1600_s23, %s1229_s4  ;;  %p1232_p6 = scmp.lt.s32.totalorder %s1230_s5, %s1224_s29 }
 0x104   : > { %1109 = vmatpush3.bf16.msra.mxu1 %v1195_v0  ;;  %1088 = vmatprep.subr.bf16.mxu0 %v1196_v1  ;;  %v1204_v9 = vld [vmem:[%s1529_s9 + $0x58] sm:$0xff]   ;;  %v1208_v13 = vld [vmem:[%s1529_s9 + $0x60] sm:$0xff]   ;;  %v1212_v17 = vld [vmem:[%s1529_s9 + $0x68] sm:$0xff]   ;;  %p1226_p2 = pnand %p1225_p1, %p1367_p5 }
 0x105   : > { %1110 = vmatprep.subr.bf16.mxu1 %v1197_v2  ;;  %v1205_v10 = vld [vmem:[%s1529_s9 + $0xd8] sm:$0xff]   ;;  %v1209_v14 = vld [vmem:[%s1529_s9 + $0xe0] sm:$0xff]   ;;  %v1213_v18 = vld [vmem:[%s1529_s9 + $0xe8] sm:$0xff]   ;;  %p1233_p7 = por %p1232_p6, %p1231_p4 }
 0x106   : > { %v1206_v11 = vld [vmem:[%s1529_s9 + $0x18] sm:$0xff]   ;;  %v1210_v15 = vld [vmem:[%s1529_s9 + $0x20] sm:$0xff]   ;;  %v1214_v19 = vld [vmem:[%s1529_s9 + $0x28] sm:$0xff]   ;;  %p1227_p3 = pneg %p1226_p2 }
 0x107   : > { %1089 = vmatpush3.bf16.msra.mxu0 %v1198_v3  ;;  %v1207_v12 = vld [vmem:[%s1529_s9 + $0x98] sm:$0xff]   ;;  %v1211_v16 = vld [vmem:[%s1529_s9 + $0xa0] sm:$0xff]   ;;  %v1215_v20 = vld [vmem:[%s1529_s9 + $0xa8] sm:$0xff]  }
 0x108   : > { %1111 = vmatpush3.bf16.msra.mxu1 %v1199_v4  ;;  %1090 = vmatprep.subr.bf16.mxu0 %v1200_v5  ;;  %v1216_v21 = vld [vmem:[%s1529_s9 + $0x70] sm:$0xff]   ;;  %v1220_v25 = vld [vmem:[%s1529_s9 + $0x78] sm:$0xff]   ;;  %v587_v29 = vld [vmem:[#allocation2 + $0x8] sm:$0xff]  ;;  %p1234_p8 = pnand %p1233_p7, %p1227_p3 }
 0x109   : > { %1112 = vmatprep.subr.bf16.mxu1 %v1201_v6  ;;  %v1217_v22 = vld [vmem:[%s1529_s9 + $0xf0] sm:$0xff]   ;;  %v1221_v26 = vld [vmem:[%s1529_s9 + $0xf8] sm:$0xff]   ;;  %v586_v31 = vld [vmem:[#allocation2] sm:$0xff]  ;;  %878 = vmatprep.mubr.bf16.mxu0 %v587_v29 }
 0x10a   : > { %v1218_v23 = vld [vmem:[%s1529_s9 + $0x30] sm:$0xff]   ;;  %v1222_v27 = vld [vmem:[%s1529_s9 + $0x38] sm:$0xff]  }
 0x10b   : > { %1091 = vmatpush3.bf16.msra.mxu0 %v1202_v7  ;;  %v1219_v24 = vld [vmem:[%s1529_s9 + $0xb0] sm:$0xff]   ;;  %v1223_v28 = vld [vmem:[%s1529_s9 + $0xb8] sm:$0xff]   ;;  %s1083_s9 = sshll.u32 %s1294_s15, 7  ;;  %s931_s15 = scalar_lea.sflag [#allocation5], %s1525_s6 }
 0x10c   : > { %1113 = vmatpush3.bf16.msra.mxu1 %v1203_v8  ;;  %1092 = vmatprep.subr.bf16.mxu0 %v1204_v9  ;;  %v589_v30 = vld [vmem:[#allocation2 + $0x18] sm:$0xff]  ;;  %v588_v32 = vld [vmem:[#allocation2 + $0x10] sm:$0xff]  ;;  %s1598_s28 = scalar_lea.hbm %s1654_s3, %s1083_s9 }
 0x10d   : > { %1114 = vmatprep.subr.bf16.mxu1 %v1205_v10  ;;  %919 = vmatprep.mubr.bf16.mxu1 %v589_v30 }
 0x10f   : > { %1093 = vmatpush3.bf16.msra.mxu0 %v1206_v11 }
 0x110   : > { %1115 = vmatpush3.bf16.msra.mxu1 %v1207_v12  ;;  %1094 = vmatprep.subr.bf16.mxu0 %v1208_v13 }
 0x111   : > { %1116 = vmatprep.subr.bf16.mxu1 %v1209_v14 }
 0x113   : > { %1095 = vmatpush3.bf16.msra.mxu0 %v1210_v15 }
 0x114   : > { %1117 = vmatpush3.bf16.msra.mxu1 %v1211_v16  ;;  %1096 = vmatprep.subr.bf16.mxu0 %v1212_v17 }
 0x115   : > { %1118 = vmatprep.subr.bf16.mxu1 %v1213_v18 }
 0x117   : > { %1097 = vmatpush3.bf16.msra.mxu0 %v1214_v19 }
 0x118   : > { %1119 = vmatpush3.bf16.msra.mxu1 %v1215_v20  ;;  %1098 = vmatprep.subr.bf16.mxu0 %v1216_v21 }
 0x119   : > { %1120 = vmatprep.subr.bf16.mxu1 %v1217_v22 }
 0x11b   : > { %1099 = vmatpush3.bf16.msra.mxu0 %v1218_v23 }
 0x11c   : > { %1121 = vmatpush3.bf16.msra.mxu1 %v1219_v24  ;;  %1100 = vmatprep.subr.bf16.mxu0 %v1220_v25 }
 0x11d   : > { %1122 = vmatprep.subr.bf16.mxu1 %v1221_v26 }
 0x11f   : > { %1101 = vmatpush3.bf16.msra.mxu0 %v1222_v27 }
 0x120   : > { %1123 = vmatpush3.bf16.msra.mxu1 %v1223_v28 }
 0x122   : > { %879 = vmatmul.mubr.bf16.vlgmr.msra.gmra.mrb[0].mxu0 %v586_v31 }
 0x123   : > { %920 = vmatmul.mubr.bf16.vlgmr.msra.gmra.mrb[0].mxu1 %v588_v32 }
 0x1f5   : > { %v1102_v33 = vpop.f32.mrb[0].mxu0 }
 0x1f6   : > { %v1124_v34 = vpop.f32.mrb[0].mxu1  ;;  %v1103_v35 = vpop.f32.mrb[1].mxu0 }
 0x1f7   : > { %v1104_v36 = vadd.f32 %v1103_v35, %v1102_v33  ;;  %v1125_v37 = vpop.f32.mrb[1].mxu1  ;;  %v1105_v38 = vpop.f32.mrb[2].mxu0 }
 0x1f8   : > { %v1126_v39 = vadd.f32 %v1125_v37, %v1124_v34  ;;  %v1127_v40 = vpop.f32.mrb[2].mxu1  ;;  %v1106_v41 = vpop.f32.mrb[3].mxu0 }
 0x1f9   : > { %v1107_v42 = vadd.f32 %v1106_v41, %v1105_v38  ;;  %v1128_v43 = vpop.f32.mrb[3].mxu1 }
 0x1fa   : > { %v922_v44 = vadd.f32 %v1126_v39, %v1104_v36  ;;  %v1129_v45 = vadd.f32 %v1128_v43, %v1127_v40 }
 0x1fc   : > { %928 = vst [vmem:[%s1531_s10] sm:$0xff] %v922_v44  ;;  %v925_v46 = vadd.f32 %v1129_v45, %v1107_v42 }
 0x1fe   : > { %929 = vst [vmem:[%s1531_s10 + $0x8] sm:$0xff] %v925_v46 }
 0x1ff   : > { %1237 = shalt.err (!%p1234_p8)
}
 0x200   : > { %s1238_s10 = scalar_lea.hbm %s1598_s28, 256  ;;  %s1242_s11 = scalar_lea.hbm %s1654_s3, 512 }
 0x201   : > { %p1239_p11 = scmp.ne.s32.totalorder %s1598_s28, %s1238_s10  ;;  %p1243_p0 = scmp.lt.u32.totalorder %s1598_s28, %s1654_s3 }
 0x202   : > { %p1244_p1 = scmp.lt.u32.totalorder %s1242_s11, %s1238_s10  ;;  %p1246_p3 = scmp.lt.u32.totalorder %s1238_s10, %s1598_s28 }
 0x203   : > { %p1240_p12 = pnand %p1239_p11, %p1367_p5 }
 0x204   : > { %p1245_p2 = por %p1244_p1, %p1243_p0 }
 0x205   : > { %p1241_p13 = pneg %p1240_p12 }
 0x206   : > { %p1247_p4 = por %p1246_p3, %p1245_p2 }
 0x208   : > { %p1248_p6 = pnand %p1247_p4, %p1241_p13 }
 0x20a   : > { %1251 = shalt.err (!%p1248_p6)
}
 0x20b   : > { %s1305_s21 = smov 128   ;;  %s1306_s9 = smov 256  }
 0x20c   : > { %s1307_s26 = smov 8  }
 0x20d   : > { %1130 = dma.vmem_to_hbm [thread:$0]  (%p1367_p5), %s1600_s23, 256, %s1598_s28, %s931_s15, %s1305_s21, %s1306_s9, %s1307_s26  }
 0x20e PF: > { %s961_s27 = sand.u32 1, %s1282_s12   ;;  %p1133_p7 = pnand %p1043_p10, %p1378_p9 }
 0x20f   : > { %s962_s29 = scalar_lea.sflag [#allocation5], %s961_s27 }
 0x210   : > { %1277 = dma.done.wait (!%p1133_p7), %s962_s29, 256  }
 0x211   : > { %1279 = vsyncadd (!%p1133_p7), %s962_s29, 4294967040  ;;  %s16_s17 = sadd.s32 1, %s1302_s17   ;;  %s1657_s12 = smov %s1286_s13 }
 0x212   : > { %p13_p8 = scmp.ge.s32.totalorder %s16_s17, 4   ;;  %s1658_s13 = smov %s1290_s14 }
 0x213   : > { %s1659_s14 = smov %s1376_s24  ;;  %s1660_s15 = smov %s1298_s16 }
 0x214   : > { %s1661_s16 = smov %s1663_s20  ;;  %15 = sbr.rel (!%p13_p8) target bundleno = 4 (0x4), region = 120 }
 0x21b   :  { %967 = vsyncpa [#allocation5], 1 }
 0x21c   :  { %969 = vsyncpa [#allocation5 + $0x1], 1 }

</bundles_post_ra>
